<compile_context>
chip_gen: v6e
topology: v6e:2x2x1
jax: 0.10.0
libtpu: 0.0.40
codegen_flags: <defaults>
</compile_context>

<pallas_src>
import functools
import numpy as np

import jax
import jax.numpy as jnp
from jax.experimental import pallas as pl
from jax.experimental.pallas import tpu as pltpu

EPS_GCC = 1e-3     # GCC 'phat' epsilon
BN_EPS = 1e-5      # nn.BatchNorm default eps

VMEM_SPEC = pl.BlockSpec(memory_space=pltpu.MemorySpace.VMEM)


# ----------------------------------------------------------------------------
# Kernel 1: GCC-PHAT (freq mode) -- cross spectrum, PHAT weighting, beta sweep,
#           irfft + shift-slice as two batched matmuls against a real basis.
# ----------------------------------------------------------------------------
def _gcc_phat_kernel(x1r_ref, x1i_ref, x2r_ref, x2i_ref, bcos_ref, bsin_ref,
                     out_ref, lhs_r_ref, lhs_i_ref, *, betas, bmp):
    # x*: (BMp, F) f32 ; bcos/bsin: (F, W) ; out: (nbeta*BMp, W)
    a_r, a_i = x1r_ref[...], x1i_ref[...]
    b_r, b_i = x2r_ref[...], x2i_ref[...]
    # Gxy = X1 * conj(X2)
    g_r = a_r * b_r + a_i * b_i
    g_i = a_i * b_r - a_r * b_i
    # phi = 1 / (|Gxy| + eps)  ('phat');  only log(phi) is needed
    log_phi = -jnp.log(jnp.sqrt(g_r * g_r + g_i * g_i) + EPS_GCC)

    # Stack the beta-weighted spectra into one tall matrix (nbeta*BMp, F).
    for i, beta in enumerate(betas):          # unrolled: betas are static
        if float(beta) == 0.0:
            wr, wi = g_r, g_i                 # phi**0 == 1
        else:
            w = jnp.exp(float(beta) * log_phi)
            wr, wi = g_r * w, g_i * w
        lhs_r_ref[i * bmp:(i + 1) * bmp, :] = wr
        lhs_i_ref[i * bmp:(i + 1) * bmp, :] = wi

    # irfft with the [-max_shift : max_shift+1] circular slice baked into the
    # basis:  cc = Re(G) @ Bcos + Im(G) @ Bsin   (one pair of big matmuls)
    out_ref[...] = (
        jnp.dot(lhs_r_ref[...], bcos_ref[...], preferred_element_type=jnp.float32)
        + jnp.dot(lhs_i_ref[...], bsin_ref[...], preferred_element_type=jnp.float32))


def _irfft_shift_basis(n_freq, max_shift):
    """Real basis so that (Re(G)@Bcos + Im(G)@Bsin)[t'] == the PGCC slice of
    torch.fft.irfft(G, n) at times [n-max_shift, ..., n-1, 0, ..., max_shift]."""
    n = (n_freq - 1) * 2
    times = np.concatenate([np.arange(n - max_shift, n),
                            np.arange(0, max_shift + 1)])
    k = np.arange(n_freq)[:, None].astype(np.float64)
    t = times[None, :].astype(np.float64)
    wgt = np.full((n_freq, 1), 2.0)
    wgt[0, 0] = 1.0            # DC counted once
    wgt[-1, 0] = 1.0           # Nyquist counted once (n even by construction)
    ang = 2.0 * np.pi * k * t / n
    bcos = (wgt * np.cos(ang)) / n
    bsin = (-wgt * np.sin(ang)) / n
    return (jnp.asarray(bcos, jnp.float32), jnp.asarray(bsin, jnp.float32))


def gcc_phat_freq(x1, x2, betas, max_tau):
    """x1, x2: complex64 (B, M, F).  Returns NHWC map (B, M, W, nbeta)."""
    B, M, F = x1.shape
    n = (F - 1) * 2
    max_shift = min(int(max_tau), n // 2)
    W = 2 * max_shift + 1
    nb = len(betas)
    bm = B * M
    bmp = ((bm + 7) // 8) * 8          # pad rows to a sublane multiple

    def prep(z):
        zr = jnp.real(z).astype(jnp.float32).reshape(bm, F)
        zi = jnp.imag(z).astype(jnp.float32).reshape(bm, F)
        pad = ((0, bmp - bm), (0, 0))
        return jnp.pad(zr, pad), jnp.pad(zi, pad)

    x1r, x1i = prep(x1)
    x2r, x2i = prep(x2)
    bcos, bsin = _irfft_shift_basis(F, max_shift)

    out = pl.pallas_call(
        functools.partial(_gcc_phat_kernel,
                          betas=tuple(float(b) for b in betas), bmp=bmp),
        out_shape=jax.ShapeDtypeStruct((nb * bmp, W), jnp.float32),
        in_specs=[VMEM_SPEC] * 6,
        out_specs=VMEM_SPEC,
        scratch_shapes=[pltpu.VMEM((nb * bmp, F), jnp.float32),
                        pltpu.VMEM((nb * bmp, F), jnp.float32)],
    )(x1r, x1i, x2r, x2i, bcos, bsin)

    # (nbeta*BMp, W) -> (nbeta, B, M, W) -> NHWC (B, M, W, nbeta)
    out = out.reshape(nb, bmp, W)[:, :bm, :].reshape(nb, B, M, W)
    return out.transpose(1, 2, 3, 0)


# ----------------------------------------------------------------------------
# Kernel 2: fused matmul + affine (BN eval / bias) + optional ReLU.
#           bf16 inputs, f32 accumulation, grid over the N (channel) axis.
# ----------------------------------------------------------------------------
def _mm_affine_kernel(x_ref, w_ref, scale_ref, shift_ref, o_ref, *, relu):
    acc = jnp.dot(x_ref[...], w_ref[...], preferred_element_type=jnp.float32)
    y = acc * scale_ref[...] + shift_ref[...]
    if relu:
        y = jnp.maximum(y, 0.0)
    o_ref[...] = y.astype(o_ref.dtype)


def mm_affine(x, w, scale, shift, relu, out_dtype=jnp.float32):
    M, K = x.shape
    _, N = w.shape
    tn = 128 if (N % 128 == 0) else N          # 128-granular tiles (v5e MXU)
    grid = (N // tn,)
    return pl.pallas_call(
        functools.partial(_mm_affine_kernel, relu=relu),
        out_shape=jax.ShapeDtypeStruct((M, N), out_dtype),
        grid=grid,
        in_specs=[pl.BlockSpec((M, K), lambda j: (0, 0)),
                  pl.BlockSpec((K, tn), lambda j: (0, j)),
                  pl.BlockSpec((1, tn), lambda j: (0, j)),
                  pl.BlockSpec((1, tn), lambda j: (0, j))],
        out_specs=pl.BlockSpec((M, tn), lambda j: (0, j)),
        compiler_params=pltpu.CompilerParams(
            dimension_semantics=("parallel",)),
    )(x.astype(jnp.bfloat16), w.astype(jnp.bfloat16),
      scale.reshape(1, N).astype(jnp.float32),
      shift.reshape(1, N).astype(jnp.float32))


# ----------------------------------------------------------------------------
# Conv2d(3x3, valid) + BatchNorm2d(eval) + ReLU  via im2col (NHWC) + matmul.
# ----------------------------------------------------------------------------
def _im2col3x3_nhwc(x):
    # x: (B, H, W, C) -> (B*Ho*Wo, 9*C), patch column order = (kh, kw, c)
    B, H, W, C = x.shape
    Ho, Wo = H - 2, W - 2
    cols = [x[:, kh:kh + Ho, kw:kw + Wo, :]
            for kh in range(3) for kw in range(3)]            # (B, Ho, Wo, C)
    p = jnp.stack(cols, axis=3)                               # (B, Ho, Wo, 9, C)
    return p.reshape(B * Ho * Wo, 9 * C), (B, Ho, Wo)


def conv_bn_relu(x, conv_w, conv_b, bn_gamma, bn_beta):
    # x: NHWC ; conv_w: (Cout, Cin, 3, 3) torch layout
    c_out = conv_w.shape[0]
    patches, (B, Ho, Wo) = _im2col3x3_nhwc(x)
    w_mat = conv_w.transpose(2, 3, 1, 0).reshape(-1, c_out)   # (9*Cin, Cout)
    # BN eval with running_mean=0, running_var=1: y = x*gamma/sqrt(1+eps)+beta
    scale = bn_gamma / jnp.sqrt(1.0 + BN_EPS)
    shift = conv_b * scale + bn_beta                          # fold conv bias
    y = mm_affine(patches, w_mat, scale, shift, relu=True,
                  out_dtype=jnp.bfloat16)                     # (B*Ho*Wo, Cout)
    return y.reshape(B, Ho, Wo, c_out)                        # stay NHWC


# ----------------------------------------------------------------------------
# Kernel 3: fused MLP  (fc1 -> BN -> ReLU -> fc2 -> BN -> ReLU -> fc3).
# ----------------------------------------------------------------------------
def _mlp_kernel(x_ref, w1_ref, s1_ref, b1_ref, w2_ref, s2_ref, b2_ref,
                w3_ref, b3_ref, o_ref):
    h = jnp.dot(x_ref[...], w1_ref[...], preferred_element_type=jnp.float32)
    h = jnp.maximum(h * s1_ref[...] + b1_ref[...], 0.0)
    h = jnp.dot(h.astype(jnp.bfloat16), w2_ref[...],
                preferred_element_type=jnp.float32)
    h = jnp.maximum(h * s2_ref[...] + b2_ref[...], 0.0)
    o = jnp.dot(h.astype(jnp.bfloat16), w3_ref[...],
                preferred_element_type=jnp.float32)
    o_ref[...] = o + b3_ref[...]


def mlp_fused(x, params):
    B = x.shape[0]
    n_out = params["fc3_w"].shape[1]
    s1 = params["bn6_g"] / jnp.sqrt(1.0 + BN_EPS)
    b1 = params["fc1_b"] * s1 + params["bn6_b"]
    s2 = params["bn7_g"] / jnp.sqrt(1.0 + BN_EPS)
    b2 = params["fc2_b"] * s2 + params["bn7_b"]
    return pl.pallas_call(
        _mlp_kernel,
        out_shape=jax.ShapeDtypeStruct((B, n_out), jnp.float32),
        in_specs=[VMEM_SPEC] * 9,
        out_specs=VMEM_SPEC,
    )(x.astype(jnp.bfloat16),
      params["fc1_w"].astype(jnp.bfloat16),
      s1.reshape(1, -1).astype(jnp.float32), b1.reshape(1, -1).astype(jnp.float32),
      params["fc2_w"].astype(jnp.bfloat16),
      s2.reshape(1, -1).astype(jnp.float32), b2.reshape(1, -1).astype(jnp.float32),
      params["fc3_w"].astype(jnp.bfloat16),
      params["fc3_b"].reshape(1, -1).astype(jnp.float32))


# ----------------------------------------------------------------------------
# Full PGCCPHAT forward (head='regression', input_shape='freq').
# ----------------------------------------------------------------------------
def pgccphat_forward(params, x1, x2, betas, max_tau):
    B = x1.shape[0]
    x = gcc_phat_freq(x1, x2, betas, max_tau)                 # NHWC (B, M, W, 11)
    for l in range(1, 6):
        x = conv_bn_relu(x, params[f"conv{l}_w"], params[f"conv{l}_b"],
                         params[f"bn{l}_g"], params[f"bn{l}_b"])
    # Tiny transpose back to NCHW flatten order (c, h, w) so the fc1 weight
    # row-ordering matches torch's x.reshape([batch, -1]).
    x = x.transpose(0, 3, 1, 2).reshape(B, -1)

    # MLP: Linear -> BN1d(eval) -> ReLU -> Dropout(eval=id) -> ... -> Linear(1)
    out = mlp_fused(x, params)                                # (B, 1)
    return jnp.squeeze(out)
    # TODO(synk): training-mode BatchNorm/Dropout (batch stats, random masks)
    # are not reproduced; this implements the deterministic eval-mode forward.


def init_params(key, num_class, hidden_flat, n_out=1):
    chans = [num_class, 32, 64, 128, 256, 512]
    params = {}
    keys = iter(jax.random.split(key, 64))

    def nrm(shape, scale=0.05):
        return (scale * jax.random.normal(next(keys), shape)).astype(jnp.float32)

    for l in range(1, 6):
        c_in, c_out = chans[l - 1], chans[l]
        params[f"conv{l}_w"] = nrm((c_out, c_in, 3, 3))
        params[f"conv{l}_b"] = nrm((c_out,))
        params[f"bn{l}_g"] = 1.0 + nrm((c_out,))
        params[f"bn{l}_b"] = nrm((c_out,))
    params["fc1_w"] = nrm((hidden_flat, 512), 0.02)   # stored (in, out)
    params["fc1_b"] = nrm((512,))
    params["bn6_g"] = 1.0 + nrm((512,))
    params["bn6_b"] = nrm((512,))
    params["fc2_w"] = nrm((512, 512), 0.02)
    params["fc2_b"] = nrm((512,))
    params["bn7_g"] = 1.0 + nrm((512,))
    params["bn7_b"] = nrm((512,))
    params["fc3_w"] = nrm((512, n_out), 0.02)
    params["fc3_b"] = nrm((n_out,))
    return params


if __name__ == "__main__":
    # Small shapes: batch=2, M=11 mic-pair rows, F=9 one-sided freq bins
    #  -> n = 16, max_shift = min(42, 8) = 8, GCC map (2, 11, 17, 11) NHWC
    #  -> after five valid 3x3 convs: (2, 1, 7, 512) -> flatten 3584 -> MLP -> (2,)
    B, M, F = 2, 11, 9
    max_tau = 42
    betas = np.arange(0, 1.1, 0.1)            # 11 betas -> num_class = 11

    key = jax.random.PRNGKey(0)
    k1, k2, k3, k4, kp = jax.random.split(key, 5)
    x1 = (jax.random.normal(k1, (B, M, F)) +
          1j * jax.random.normal(k2, (B, M, F))).astype(jnp.complex64)
    x2 = (jax.random.normal(k3, (B, M, F)) +
          1j * jax.random.normal(k4, (B, M, F))).astype(jnp.complex64)

    n = (F - 1) * 2
    max_shift = min(max_tau, n // 2)
    w_gcc = 2 * max_shift + 1
    h_out, w_out = M - 10, w_gcc - 10
    hidden_flat = 512 * h_out * w_out

    params = init_params(kp, num_class=len(betas), hidden_flat=hidden_flat)

    fwd = jax.jit(functools.partial(pgccphat_forward, betas=betas, max_tau=max_tau))
    out = fwd(params, x1, x2)
    out = jax.block_until_ready(out)

    assert out.shape == (B,), out.shape
    assert bool(jnp.all(jnp.isfinite(out)))
    print("KERNEL_OK")
</pallas_src>

<mosaic_0001>
module attributes {stable_mosaic.version = 11 : i64} {
  func.func @_gcc_phat_kernel(%arg0: memref<24x9xf32, #tpu.memory_space<vmem>>, %arg1: memref<24x9xf32, #tpu.memory_space<vmem>>, %arg2: memref<24x9xf32, #tpu.memory_space<vmem>>, %arg3: memref<24x9xf32, #tpu.memory_space<vmem>>, %arg4: memref<9x17xf32, #tpu.memory_space<vmem>>, %arg5: memref<9x17xf32, #tpu.memory_space<vmem>>, %arg6: memref<264x17xf32, #tpu.memory_space<vmem>>, %arg7: memref<264x9xf32, #tpu.memory_space<vmem>>, %arg8: memref<264x9xf32, #tpu.memory_space<vmem>>) attributes {dimension_semantics = [], scalar_prefetch = 0 : i64, scratch_operands = 2 : i64, tpu.core_type = #tpu.core_type<tc>} {
    %c0 = arith.constant 0 : index
    %c0_0 = arith.constant 0 : index
    %0 = vector.load %arg0[%c0, %c0_0] : memref<24x9xf32, #tpu.memory_space<vmem>>, vector<24x9xf32>
    %c0_1 = arith.constant 0 : index
    %c0_2 = arith.constant 0 : index
    %1 = vector.load %arg1[%c0_1, %c0_2] : memref<24x9xf32, #tpu.memory_space<vmem>>, vector<24x9xf32>
    %c0_3 = arith.constant 0 : index
    %c0_4 = arith.constant 0 : index
    %2 = vector.load %arg2[%c0_3, %c0_4] : memref<24x9xf32, #tpu.memory_space<vmem>>, vector<24x9xf32>
    %c0_5 = arith.constant 0 : index
    %c0_6 = arith.constant 0 : index
    %3 = vector.load %arg3[%c0_5, %c0_6] : memref<24x9xf32, #tpu.memory_space<vmem>>, vector<24x9xf32>
    %4 = arith.mulf %0, %2 : vector<24x9xf32>
    %5 = arith.mulf %1, %3 : vector<24x9xf32>
    %6 = arith.addf %4, %5 : vector<24x9xf32>
    %7 = arith.mulf %1, %2 : vector<24x9xf32>
    %8 = arith.mulf %0, %3 : vector<24x9xf32>
    %9 = arith.subf %7, %8 : vector<24x9xf32>
    %10 = arith.mulf %6, %6 : vector<24x9xf32>
    %11 = arith.mulf %9, %9 : vector<24x9xf32>
    %12 = arith.addf %10, %11 : vector<24x9xf32>
    %13 = math.sqrt %12 : vector<24x9xf32>
    %cst = arith.constant 1.000000e-03 : f32
    %14 = vector.broadcast %cst : f32 to vector<24x9xf32>
    %15 = arith.addf %13, %14 : vector<24x9xf32>
    %16 = math.log %15 : vector<24x9xf32>
    %cst_7 = arith.constant 0.000000e+00 : f32
    %17 = vector.broadcast %cst_7 : f32 to vector<24x9xf32>
    %18 = arith.subf %17, %16 : vector<24x9xf32>
    %c0_8 = arith.constant 0 : index
    %c0_9 = arith.constant 0 : index
    %19 = vector.load %arg7[%c0_8, %c0_9] : memref<264x9xf32, #tpu.memory_space<vmem>>, vector<24x9xf32>
    tpu.vector_store %arg7[%c0_8, %c0_9], %6 {strides = array<i32>} : memref<264x9xf32, #tpu.memory_space<vmem>>, vector<24x9xf32>,
    %c0_10 = arith.constant 0 : index
    %c0_11 = arith.constant 0 : index
    %20 = vector.load %arg8[%c0_10, %c0_11] : memref<264x9xf32, #tpu.memory_space<vmem>>, vector<24x9xf32>
    tpu.vector_store %arg8[%c0_10, %c0_11], %9 {strides = array<i32>} : memref<264x9xf32, #tpu.memory_space<vmem>>, vector<24x9xf32>,
    %cst_12 = arith.constant 1.000000e-01 : f32
    %21 = vector.broadcast %cst_12 : f32 to vector<24x9xf32>
    %22 = arith.mulf %21, %18 : vector<24x9xf32>
    %23 = math.exp %22 : vector<24x9xf32>
    %24 = arith.mulf %6, %23 : vector<24x9xf32>
    %25 = arith.mulf %9, %23 : vector<24x9xf32>
    %c24 = arith.constant 24 : index
    %c0_13 = arith.constant 0 : index
    %26 = vector.load %arg7[%c24, %c0_13] : memref<264x9xf32, #tpu.memory_space<vmem>>, vector<24x9xf32>
    tpu.vector_store %arg7[%c24, %c0_13], %24 {strides = array<i32>} : memref<264x9xf32, #tpu.memory_space<vmem>>, vector<24x9xf32>,
    %c24_14 = arith.constant 24 : index
    %c0_15 = arith.constant 0 : index
    %27 = vector.load %arg8[%c24_14, %c0_15] : memref<264x9xf32, #tpu.memory_space<vmem>>, vector<24x9xf32>
    tpu.vector_store %arg8[%c24_14, %c0_15], %25 {strides = array<i32>} : memref<264x9xf32, #tpu.memory_space<vmem>>, vector<24x9xf32>,
    %cst_16 = arith.constant 2.000000e-01 : f32
    %28 = vector.broadcast %cst_16 : f32 to vector<24x9xf32>
    %29 = arith.mulf %28, %18 : vector<24x9xf32>
    %30 = math.exp %29 : vector<24x9xf32>
    %31 = arith.mulf %6, %30 : vector<24x9xf32>
    %32 = arith.mulf %9, %30 : vector<24x9xf32>
    %c48 = arith.constant 48 : index
    %c0_17 = arith.constant 0 : index
    %33 = vector.load %arg7[%c48, %c0_17] : memref<264x9xf32, #tpu.memory_space<vmem>>, vector<24x9xf32>
    tpu.vector_store %arg7[%c48, %c0_17], %31 {strides = array<i32>} : memref<264x9xf32, #tpu.memory_space<vmem>>, vector<24x9xf32>,
    %c48_18 = arith.constant 48 : index
    %c0_19 = arith.constant 0 : index
    %34 = vector.load %arg8[%c48_18, %c0_19] : memref<264x9xf32, #tpu.memory_space<vmem>>, vector<24x9xf32>
    tpu.vector_store %arg8[%c48_18, %c0_19], %32 {strides = array<i32>} : memref<264x9xf32, #tpu.memory_space<vmem>>, vector<24x9xf32>,
    %cst_20 = arith.constant 3.000000e-01 : f32
    %35 = vector.broadcast %cst_20 : f32 to vector<24x9xf32>
    %36 = arith.mulf %35, %18 : vector<24x9xf32>
    %37 = math.exp %36 : vector<24x9xf32>
    %38 = arith.mulf %6, %37 : vector<24x9xf32>
    %39 = arith.mulf %9, %37 : vector<24x9xf32>
    %c72 = arith.constant 72 : index
    %c0_21 = arith.constant 0 : index
    %40 = vector.load %arg7[%c72, %c0_21] : memref<264x9xf32, #tpu.memory_space<vmem>>, vector<24x9xf32>
    tpu.vector_store %arg7[%c72, %c0_21], %38 {strides = array<i32>} : memref<264x9xf32, #tpu.memory_space<vmem>>, vector<24x9xf32>,
    %c72_22 = arith.constant 72 : index
    %c0_23 = arith.constant 0 : index
    %41 = vector.load %arg8[%c72_22, %c0_23] : memref<264x9xf32, #tpu.memory_space<vmem>>, vector<24x9xf32>
    tpu.vector_store %arg8[%c72_22, %c0_23], %39 {strides = array<i32>} : memref<264x9xf32, #tpu.memory_space<vmem>>, vector<24x9xf32>,
    %cst_24 = arith.constant 4.000000e-01 : f32
    %42 = vector.broadcast %cst_24 : f32 to vector<24x9xf32>
    %43 = arith.mulf %42, %18 : vector<24x9xf32>
    %44 = math.exp %43 : vector<24x9xf32>
    %45 = arith.mulf %6, %44 : vector<24x9xf32>
    %46 = arith.mulf %9, %44 : vector<24x9xf32>
    %c96 = arith.constant 96 : index
    %c0_25 = arith.constant 0 : index
    %47 = vector.load %arg7[%c96, %c0_25] : memref<264x9xf32, #tpu.memory_space<vmem>>, vector<24x9xf32>
    tpu.vector_store %arg7[%c96, %c0_25], %45 {strides = array<i32>} : memref<264x9xf32, #tpu.memory_space<vmem>>, vector<24x9xf32>,
    %c96_26 = arith.constant 96 : index
    %c0_27 = arith.constant 0 : index
    %48 = vector.load %arg8[%c96_26, %c0_27] : memref<264x9xf32, #tpu.memory_space<vmem>>, vector<24x9xf32>
    tpu.vector_store %arg8[%c96_26, %c0_27], %46 {strides = array<i32>} : memref<264x9xf32, #tpu.memory_space<vmem>>, vector<24x9xf32>,
    %cst_28 = arith.constant 5.000000e-01 : f32
    %49 = vector.broadcast %cst_28 : f32 to vector<24x9xf32>
    %50 = arith.mulf %49, %18 : vector<24x9xf32>
    %51 = math.exp %50 : vector<24x9xf32>
    %52 = arith.mulf %6, %51 : vector<24x9xf32>
    %53 = arith.mulf %9, %51 : vector<24x9xf32>
    %c120 = arith.constant 120 : index
    %c0_29 = arith.constant 0 : index
    %54 = vector.load %arg7[%c120, %c0_29] : memref<264x9xf32, #tpu.memory_space<vmem>>, vector<24x9xf32>
    tpu.vector_store %arg7[%c120, %c0_29], %52 {strides = array<i32>} : memref<264x9xf32, #tpu.memory_space<vmem>>, vector<24x9xf32>,
    %c120_30 = arith.constant 120 : index
    %c0_31 = arith.constant 0 : index
    %55 = vector.load %arg8[%c120_30, %c0_31] : memref<264x9xf32, #tpu.memory_space<vmem>>, vector<24x9xf32>
    tpu.vector_store %arg8[%c120_30, %c0_31], %53 {strides = array<i32>} : memref<264x9xf32, #tpu.memory_space<vmem>>, vector<24x9xf32>,
    %cst_32 = arith.constant 6.000000e-01 : f32
    %56 = vector.broadcast %cst_32 : f32 to vector<24x9xf32>
    %57 = arith.mulf %56, %18 : vector<24x9xf32>
    %58 = math.exp %57 : vector<24x9xf32>
    %59 = arith.mulf %6, %58 : vector<24x9xf32>
    %60 = arith.mulf %9, %58 : vector<24x9xf32>
    %c144 = arith.constant 144 : index
    %c0_33 = arith.constant 0 : index
    %61 = vector.load %arg7[%c144, %c0_33] : memref<264x9xf32, #tpu.memory_space<vmem>>, vector<24x9xf32>
    tpu.vector_store %arg7[%c144, %c0_33], %59 {strides = array<i32>} : memref<264x9xf32, #tpu.memory_space<vmem>>, vector<24x9xf32>,
    %c144_34 = arith.constant 144 : index
    %c0_35 = arith.constant 0 : index
    %62 = vector.load %arg8[%c144_34, %c0_35] : memref<264x9xf32, #tpu.memory_space<vmem>>, vector<24x9xf32>
    tpu.vector_store %arg8[%c144_34, %c0_35], %60 {strides = array<i32>} : memref<264x9xf32, #tpu.memory_space<vmem>>, vector<24x9xf32>,
    %cst_36 = arith.constant 0.699999988 : f32
    %63 = vector.broadcast %cst_36 : f32 to vector<24x9xf32>
    %64 = arith.mulf %63, %18 : vector<24x9xf32>
    %65 = math.exp %64 : vector<24x9xf32>
    %66 = arith.mulf %6, %65 : vector<24x9xf32>
    %67 = arith.mulf %9, %65 : vector<24x9xf32>
    %c168 = arith.constant 168 : index
    %c0_37 = arith.constant 0 : index
    %68 = vector.load %arg7[%c168, %c0_37] : memref<264x9xf32, #tpu.memory_space<vmem>>, vector<24x9xf32>
    tpu.vector_store %arg7[%c168, %c0_37], %66 {strides = array<i32>} : memref<264x9xf32, #tpu.memory_space<vmem>>, vector<24x9xf32>,
    %c168_38 = arith.constant 168 : index
    %c0_39 = arith.constant 0 : index
    %69 = vector.load %arg8[%c168_38, %c0_39] : memref<264x9xf32, #tpu.memory_space<vmem>>, vector<24x9xf32>
    tpu.vector_store %arg8[%c168_38, %c0_39], %67 {strides = array<i32>} : memref<264x9xf32, #tpu.memory_space<vmem>>, vector<24x9xf32>,
    %cst_40 = arith.constant 8.000000e-01 : f32
    %70 = vector.broadcast %cst_40 : f32 to vector<24x9xf32>
    %71 = arith.mulf %70, %18 : vector<24x9xf32>
    %72 = math.exp %71 : vector<24x9xf32>
    %73 = arith.mulf %6, %72 : vector<24x9xf32>
    %74 = arith.mulf %9, %72 : vector<24x9xf32>
    %c192 = arith.constant 192 : index
    %c0_41 = arith.constant 0 : index
    %75 = vector.load %arg7[%c192, %c0_41] : memref<264x9xf32, #tpu.memory_space<vmem>>, vector<24x9xf32>
    tpu.vector_store %arg7[%c192, %c0_41], %73 {strides = array<i32>} : memref<264x9xf32, #tpu.memory_space<vmem>>, vector<24x9xf32>,
    %c192_42 = arith.constant 192 : index
    %c0_43 = arith.constant 0 : index
    %76 = vector.load %arg8[%c192_42, %c0_43] : memref<264x9xf32, #tpu.memory_space<vmem>>, vector<24x9xf32>
    tpu.vector_store %arg8[%c192_42, %c0_43], %74 {strides = array<i32>} : memref<264x9xf32, #tpu.memory_space<vmem>>, vector<24x9xf32>,
    %cst_44 = arith.constant 0.899999976 : f32
    %77 = vector.broadcast %cst_44 : f32 to vector<24x9xf32>
    %78 = arith.mulf %77, %18 : vector<24x9xf32>
    %79 = math.exp %78 : vector<24x9xf32>
    %80 = arith.mulf %6, %79 : vector<24x9xf32>
    %81 = arith.mulf %9, %79 : vector<24x9xf32>
    %c216 = arith.constant 216 : index
    %c0_45 = arith.constant 0 : index
    %82 = vector.load %arg7[%c216, %c0_45] : memref<264x9xf32, #tpu.memory_space<vmem>>, vector<24x9xf32>
    tpu.vector_store %arg7[%c216, %c0_45], %80 {strides = array<i32>} : memref<264x9xf32, #tpu.memory_space<vmem>>, vector<24x9xf32>,
    %c216_46 = arith.constant 216 : index
    %c0_47 = arith.constant 0 : index
    %83 = vector.load %arg8[%c216_46, %c0_47] : memref<264x9xf32, #tpu.memory_space<vmem>>, vector<24x9xf32>
    tpu.vector_store %arg8[%c216_46, %c0_47], %81 {strides = array<i32>} : memref<264x9xf32, #tpu.memory_space<vmem>>, vector<24x9xf32>,
    %cst_48 = arith.constant 1.000000e+00 : f32
    %84 = vector.broadcast %cst_48 : f32 to vector<24x9xf32>
    %85 = arith.mulf %84, %18 : vector<24x9xf32>
    %86 = math.exp %85 : vector<24x9xf32>
    %87 = arith.mulf %6, %86 : vector<24x9xf32>
    %88 = arith.mulf %9, %86 : vector<24x9xf32>
    %c240 = arith.constant 240 : index
    %c0_49 = arith.constant 0 : index
    %89 = vector.load %arg7[%c240, %c0_49] : memref<264x9xf32, #tpu.memory_space<vmem>>, vector<24x9xf32>
    tpu.vector_store %arg7[%c240, %c0_49], %87 {strides = array<i32>} : memref<264x9xf32, #tpu.memory_space<vmem>>, vector<24x9xf32>,
    %c240_50 = arith.constant 240 : index
    %c0_51 = arith.constant 0 : index
    %90 = vector.load %arg8[%c240_50, %c0_51] : memref<264x9xf32, #tpu.memory_space<vmem>>, vector<24x9xf32>
    tpu.vector_store %arg8[%c240_50, %c0_51], %88 {strides = array<i32>} : memref<264x9xf32, #tpu.memory_space<vmem>>, vector<24x9xf32>,
    %c0_52 = arith.constant 0 : index
    %c0_53 = arith.constant 0 : index
    %91 = vector.load %arg7[%c0_52, %c0_53] : memref<264x9xf32, #tpu.memory_space<vmem>>, vector<264x9xf32>
    %c0_54 = arith.constant 0 : index
    %c0_55 = arith.constant 0 : index
    %92 = vector.load %arg4[%c0_54, %c0_55] : memref<9x17xf32, #tpu.memory_space<vmem>>, vector<9x17xf32>
    %cst_56 = arith.constant dense<0.000000e+00> : vector<264x17xf32>
    %93 = tpu.matmul %91, %92, %cst_56 {dimension_numbers = #tpu.dot_dimension_numbers<[1], [0], [0], [1], [0, 0, 1, 1], [], []>} : vector<264x9xf32>, vector<9x17xf32>, vector<264x17xf32> -> vector<264x17xf32>
    %c0_57 = arith.constant 0 : index
    %c0_58 = arith.constant 0 : index
    %94 = vector.load %arg8[%c0_57, %c0_58] : memref<264x9xf32, #tpu.memory_space<vmem>>, vector<264x9xf32>
    %c0_59 = arith.constant 0 : index
    %c0_60 = arith.constant 0 : index
    %95 = vector.load %arg5[%c0_59, %c0_60] : memref<9x17xf32, #tpu.memory_space<vmem>>, vector<9x17xf32>
    %cst_61 = arith.constant dense<0.000000e+00> : vector<264x17xf32>
    %96 = tpu.matmul %94, %95, %cst_61 {dimension_numbers = #tpu.dot_dimension_numbers<[1], [0], [0], [1], [0, 0, 1, 1], [], []>} : vector<264x9xf32>, vector<9x17xf32>, vector<264x17xf32> -> vector<264x17xf32>
    %97 = arith.addf %93, %96 : vector<264x17xf32>
    %c0_62 = arith.constant 0 : index
    %c0_63 = arith.constant 0 : index
    %98 = vector.load %arg6[%c0_62, %c0_63] : memref<264x17xf32, #tpu.memory_space<vmem>>, vector<264x17xf32>
    tpu.vector_store %arg6[%c0_62, %c0_63], %97 {strides = array<i32>} : memref<264x17xf32, #tpu.memory_space<vmem>>, vector<264x17xf32>,
    return
  }
}

module attributes {stable_mosaic.version = 11 : i64} {
  func.func @_mm_affine_kernel(%arg0: i32, %arg1: memref<270x99xbf16, #tpu.memory_space<vmem>>, %arg2: memref<99x32xbf16, #tpu.memory_space<vmem>>, %arg3: memref<1x32xf32, #tpu.memory_space<vmem>>, %arg4: memref<1x32xf32, #tpu.memory_space<vmem>>, %arg5: memref<270x32xbf16, #tpu.memory_space<vmem>>) attributes {dimension_semantics = [#tpu.dimension_semantics<parallel>], iteration_bounds = array<i64: 1>, scalar_prefetch = 0 : i64, scratch_operands = 0 : i64, tpu.core_type = #tpu.core_type<tc>, window_params = [{pipeline_mode = #tpu.pipeline_mode<synchronous>, transform_indices = @transform_0, window_bounds = array<i64: 270, 99>}, {transform_indices = @transform_1, window_bounds = array<i64: 99, 32>}, {transform_indices = @transform_2, window_bounds = array<i64: 1, 32>}, {transform_indices = @transform_3, window_bounds = array<i64: 1, 32>}, {transform_indices = @transform_4, window_bounds = array<i64: 270, 32>}]} {
    %c0 = arith.constant 0 : index
    %c0_0 = arith.constant 0 : index
    %0 = vector.load %arg1[%c0, %c0_0] : memref<270x99xbf16, #tpu.memory_space<vmem>>, vector<270x99xbf16>
    %c0_1 = arith.constant 0 : index
    %c0_2 = arith.constant 0 : index
    %1 = vector.load %arg2[%c0_1, %c0_2] : memref<99x32xbf16, #tpu.memory_space<vmem>>, vector<99x32xbf16>
    %cst = arith.constant dense<0.000000e+00> : vector<270x32xf32>
    %2 = tpu.matmul %0, %1, %cst {dimension_numbers = #tpu.dot_dimension_numbers<[1], [0], [0], [1], [0, 0, 1, 1], [], []>} : vector<270x99xbf16>, vector<99x32xbf16>, vector<270x32xf32> -> vector<270x32xf32>
    %c0_3 = arith.constant 0 : index
    %c0_4 = arith.constant 0 : index
    %3 = vector.load %arg3[%c0_3, %c0_4] : memref<1x32xf32, #tpu.memory_space<vmem>>, vector<1x32xf32>
    %4 = vector.broadcast %3 : vector<1x32xf32> to vector<270x32xf32>
    %5 = arith.mulf %2, %4 : vector<270x32xf32>
    %c0_5 = arith.constant 0 : index
    %c0_6 = arith.constant 0 : index
    %6 = vector.load %arg4[%c0_5, %c0_6] : memref<1x32xf32, #tpu.memory_space<vmem>>, vector<1x32xf32>
    %7 = vector.broadcast %6 : vector<1x32xf32> to vector<270x32xf32>
    %8 = arith.addf %5, %7 : vector<270x32xf32>
    %cst_7 = arith.constant 0.000000e+00 : f32
    %9 = vector.broadcast %cst_7 : f32 to vector<270x32xf32>
    %10 = arith.maximumf %8, %9 : vector<270x32xf32>
    %11 = arith.truncf %10 : vector<270x32xf32> to vector<270x32xbf16>
    %c0_8 = arith.constant 0 : index
    %c0_9 = arith.constant 0 : index
    %12 = vector.load %arg5[%c0_8, %c0_9] : memref<270x32xbf16, #tpu.memory_space<vmem>>, vector<270x32xbf16>
    tpu.vector_store %arg5[%c0_8, %c0_9], %11 {strides = array<i32>} : memref<270x32xbf16, #tpu.memory_space<vmem>>, vector<270x32xbf16>,
    return
  }
  func.func @transform_0(%arg0: i32) -> (i32, i32) {
    %c0_i32 = arith.constant 0 : i32
    %c0_i32_0 = arith.constant 0 : i32
    %c0_i32_1 = arith.constant 0 : i32
    return %c0_i32, %c0_i32_0 : i32, i32
  }
  func.func @transform_1(%arg0: i32) -> (i32, i32) {
    %c0_i32 = arith.constant 0 : i32
    %c0_i32_0 = arith.constant 0 : i32
    return %c0_i32, %arg0 : i32, i32
  }
  func.func @transform_2(%arg0: i32) -> (i32, i32) {
    %c0_i32 = arith.constant 0 : i32
    %c0_i32_0 = arith.constant 0 : i32
    return %c0_i32, %arg0 : i32, i32
  }
  func.func @transform_3(%arg0: i32) -> (i32, i32) {
    %c0_i32 = arith.constant 0 : i32
    %c0_i32_0 = arith.constant 0 : i32
    return %c0_i32, %arg0 : i32, i32
  }
  func.func @transform_4(%arg0: i32) -> (i32, i32) {
    %c0_i32 = arith.constant 0 : i32
    %c0_i32_0 = arith.constant 0 : i32
    return %c0_i32, %arg0 : i32, i32
  }
}

module attributes {stable_mosaic.version = 11 : i64} {
  func.func @_mm_affine_kernel(%arg0: i32, %arg1: memref<182x288xbf16, #tpu.memory_space<vmem>>, %arg2: memref<288x64xbf16, #tpu.memory_space<vmem>>, %arg3: memref<1x64xf32, #tpu.memory_space<vmem>>, %arg4: memref<1x64xf32, #tpu.memory_space<vmem>>, %arg5: memref<182x64xbf16, #tpu.memory_space<vmem>>) attributes {dimension_semantics = [#tpu.dimension_semantics<parallel>], iteration_bounds = array<i64: 1>, scalar_prefetch = 0 : i64, scratch_operands = 0 : i64, tpu.core_type = #tpu.core_type<tc>, window_params = [{pipeline_mode = #tpu.pipeline_mode<synchronous>, transform_indices = @transform_0, window_bounds = array<i64: 182, 288>}, {transform_indices = @transform_1, window_bounds = array<i64: 288, 64>}, {transform_indices = @transform_2, window_bounds = array<i64: 1, 64>}, {transform_indices = @transform_3, window_bounds = array<i64: 1, 64>}, {transform_indices = @transform_4, window_bounds = array<i64: 182, 64>}]} {
    %c0 = arith.constant 0 : index
    %c0_0 = arith.constant 0 : index
    %0 = vector.load %arg1[%c0, %c0_0] : memref<182x288xbf16, #tpu.memory_space<vmem>>, vector<182x288xbf16>
    %c0_1 = arith.constant 0 : index
    %c0_2 = arith.constant 0 : index
    %1 = vector.load %arg2[%c0_1, %c0_2] : memref<288x64xbf16, #tpu.memory_space<vmem>>, vector<288x64xbf16>
    %cst = arith.constant dense<0.000000e+00> : vector<182x64xf32>
    %2 = tpu.matmul %0, %1, %cst {dimension_numbers = #tpu.dot_dimension_numbers<[1], [0], [0], [1], [0, 0, 1, 1], [], []>} : vector<182x288xbf16>, vector<288x64xbf16>, vector<182x64xf32> -> vector<182x64xf32>
    %c0_3 = arith.constant 0 : index
    %c0_4 = arith.constant 0 : index
    %3 = vector.load %arg3[%c0_3, %c0_4] : memref<1x64xf32, #tpu.memory_space<vmem>>, vector<1x64xf32>
    %4 = vector.broadcast %3 : vector<1x64xf32> to vector<182x64xf32>
    %5 = arith.mulf %2, %4 : vector<182x64xf32>
    %c0_5 = arith.constant 0 : index
    %c0_6 = arith.constant 0 : index
    %6 = vector.load %arg4[%c0_5, %c0_6] : memref<1x64xf32, #tpu.memory_space<vmem>>, vector<1x64xf32>
    %7 = vector.broadcast %6 : vector<1x64xf32> to vector<182x64xf32>
    %8 = arith.addf %5, %7 : vector<182x64xf32>
    %cst_7 = arith.constant 0.000000e+00 : f32
    %9 = vector.broadcast %cst_7 : f32 to vector<182x64xf32>
    %10 = arith.maximumf %8, %9 : vector<182x64xf32>
    %11 = arith.truncf %10 : vector<182x64xf32> to vector<182x64xbf16>
    %c0_8 = arith.constant 0 : index
    %c0_9 = arith.constant 0 : index
    %12 = vector.load %arg5[%c0_8, %c0_9] : memref<182x64xbf16, #tpu.memory_space<vmem>>, vector<182x64xbf16>
    tpu.vector_store %arg5[%c0_8, %c0_9], %11 {strides = array<i32>} : memref<182x64xbf16, #tpu.memory_space<vmem>>, vector<182x64xbf16>,
    return
  }
  func.func @transform_0(%arg0: i32) -> (i32, i32) {
    %c0_i32 = arith.constant 0 : i32
    %c0_i32_0 = arith.constant 0 : i32
    %c0_i32_1 = arith.constant 0 : i32
    return %c0_i32, %c0_i32_0 : i32, i32
  }
  func.func @transform_1(%arg0: i32) -> (i32, i32) {
    %c0_i32 = arith.constant 0 : i32
    %c0_i32_0 = arith.constant 0 : i32
    return %c0_i32, %arg0 : i32, i32
  }
  func.func @transform_2(%arg0: i32) -> (i32, i32) {
    %c0_i32 = arith.constant 0 : i32
    %c0_i32_0 = arith.constant 0 : i32
    return %c0_i32, %arg0 : i32, i32
  }
  func.func @transform_3(%arg0: i32) -> (i32, i32) {
    %c0_i32 = arith.constant 0 : i32
    %c0_i32_0 = arith.constant 0 : i32
    return %c0_i32, %arg0 : i32, i32
  }
  func.func @transform_4(%arg0: i32) -> (i32, i32) {
    %c0_i32 = arith.constant 0 : i32
    %c0_i32_0 = arith.constant 0 : i32
    return %c0_i32, %arg0 : i32, i32
  }
}

module attributes {stable_mosaic.version = 11 : i64} {
  func.func @_mm_affine_kernel(%arg0: i32, %arg1: memref<110x576xbf16, #tpu.memory_space<vmem>>, %arg2: memref<576x128xbf16, #tpu.memory_space<vmem>>, %arg3: memref<1x128xf32, #tpu.memory_space<vmem>>, %arg4: memref<1x128xf32, #tpu.memory_space<vmem>>, %arg5: memref<110x128xbf16, #tpu.memory_space<vmem>>) attributes {dimension_semantics = [#tpu.dimension_semantics<parallel>], iteration_bounds = array<i64: 1>, scalar_prefetch = 0 : i64, scratch_operands = 0 : i64, tpu.core_type = #tpu.core_type<tc>, window_params = [{pipeline_mode = #tpu.pipeline_mode<synchronous>, transform_indices = @transform_0, window_bounds = array<i64: 110, 576>}, {transform_indices = @transform_1, window_bounds = array<i64: 576, 128>}, {transform_indices = @transform_2, window_bounds = array<i64: 1, 128>}, {transform_indices = @transform_3, window_bounds = array<i64: 1, 128>}, {transform_indices = @transform_4, window_bounds = array<i64: 110, 128>}]} {
    %c0 = arith.constant 0 : index
    %c0_0 = arith.constant 0 : index
    %0 = vector.load %arg1[%c0, %c0_0] : memref<110x576xbf16, #tpu.memory_space<vmem>>, vector<110x576xbf16>
    %c0_1 = arith.constant 0 : index
    %c0_2 = arith.constant 0 : index
    %1 = vector.load %arg2[%c0_1, %c0_2] : memref<576x128xbf16, #tpu.memory_space<vmem>>, vector<576x128xbf16>
    %cst = arith.constant dense<0.000000e+00> : vector<110x128xf32>
    %2 = tpu.matmul %0, %1, %cst {dimension_numbers = #tpu.dot_dimension_numbers<[1], [0], [0], [1], [0, 0, 1, 1], [], []>} : vector<110x576xbf16>, vector<576x128xbf16>, vector<110x128xf32> -> vector<110x128xf32>
    %c0_3 = arith.constant 0 : index
    %c0_4 = arith.constant 0 : index
    %3 = vector.load %arg3[%c0_3, %c0_4] : memref<1x128xf32, #tpu.memory_space<vmem>>, vector<1x128xf32>
    %4 = vector.broadcast %3 : vector<1x128xf32> to vector<110x128xf32>
    %5 = arith.mulf %2, %4 : vector<110x128xf32>
    %c0_5 = arith.constant 0 : index
    %c0_6 = arith.constant 0 : index
    %6 = vector.load %arg4[%c0_5, %c0_6] : memref<1x128xf32, #tpu.memory_space<vmem>>, vector<1x128xf32>
    %7 = vector.broadcast %6 : vector<1x128xf32> to vector<110x128xf32>
    %8 = arith.addf %5, %7 : vector<110x128xf32>
    %cst_7 = arith.constant 0.000000e+00 : f32
    %9 = vector.broadcast %cst_7 : f32 to vector<110x128xf32>
    %10 = arith.maximumf %8, %9 : vector<110x128xf32>
    %11 = arith.truncf %10 : vector<110x128xf32> to vector<110x128xbf16>
    %c0_8 = arith.constant 0 : index
    %c0_9 = arith.constant 0 : index
    %12 = vector.load %arg5[%c0_8, %c0_9] : memref<110x128xbf16, #tpu.memory_space<vmem>>, vector<110x128xbf16>
    tpu.vector_store %arg5[%c0_8, %c0_9], %11 {strides = array<i32>} : memref<110x128xbf16, #tpu.memory_space<vmem>>, vector<110x128xbf16>,
    return
  }
  func.func @transform_0(%arg0: i32) -> (i32, i32) {
    %c0_i32 = arith.constant 0 : i32
    %c0_i32_0 = arith.constant 0 : i32
    %c0_i32_1 = arith.constant 0 : i32
    return %c0_i32, %c0_i32_0 : i32, i32
  }
  func.func @transform_1(%arg0: i32) -> (i32, i32) {
    %c0_i32 = arith.constant 0 : i32
    %c0_i32_0 = arith.constant 0 : i32
    return %c0_i32, %arg0 : i32, i32
  }
  func.func @transform_2(%arg0: i32) -> (i32, i32) {
    %c0_i32 = arith.constant 0 : i32
    %c0_i32_0 = arith.constant 0 : i32
    return %c0_i32, %arg0 : i32, i32
  }
  func.func @transform_3(%arg0: i32) -> (i32, i32) {
    %c0_i32 = arith.constant 0 : i32
    %c0_i32_0 = arith.constant 0 : i32
    return %c0_i32, %arg0 : i32, i32
  }
  func.func @transform_4(%arg0: i32) -> (i32, i32) {
    %c0_i32 = arith.constant 0 : i32
    %c0_i32_0 = arith.constant 0 : i32
    return %c0_i32, %arg0 : i32, i32
  }
}

module attributes {stable_mosaic.version = 11 : i64} {
  func.func @_mm_affine_kernel(%arg0: i32, %arg1: memref<54x1152xbf16, #tpu.memory_space<vmem>>, %arg2: memref<1152x128xbf16, #tpu.memory_space<vmem>>, %arg3: memref<1x128xf32, #tpu.memory_space<vmem>>, %arg4: memref<1x128xf32, #tpu.memory_space<vmem>>, %arg5: memref<54x128xbf16, #tpu.memory_space<vmem>>) attributes {dimension_semantics = [#tpu.dimension_semantics<parallel>], iteration_bounds = array<i64: 2>, scalar_prefetch = 0 : i64, scratch_operands = 0 : i64, tpu.core_type = #tpu.core_type<tc>, window_params = [{pipeline_mode = #tpu.pipeline_mode<synchronous>, transform_indices = @transform_0, window_bounds = array<i64: 54, 1152>}, {transform_indices = @transform_1, window_bounds = array<i64: 1152, 128>}, {transform_indices = @transform_2, window_bounds = array<i64: 1, 128>}, {transform_indices = @transform_3, window_bounds = array<i64: 1, 128>}, {transform_indices = @transform_4, window_bounds = array<i64: 54, 128>}]} {
    %c0 = arith.constant 0 : index
    %c0_0 = arith.constant 0 : index
    %0 = vector.load %arg1[%c0, %c0_0] : memref<54x1152xbf16, #tpu.memory_space<vmem>>, vector<54x1152xbf16>
    %c0_1 = arith.constant 0 : index
    %c0_2 = arith.constant 0 : index
    %1 = vector.load %arg2[%c0_1, %c0_2] : memref<1152x128xbf16, #tpu.memory_space<vmem>>, vector<1152x128xbf16>
    %cst = arith.constant dense<0.000000e+00> : vector<54x128xf32>
    %2 = tpu.matmul %0, %1, %cst {dimension_numbers = #tpu.dot_dimension_numbers<[1], [0], [0], [1], [0, 0, 1, 1], [], []>} : vector<54x1152xbf16>, vector<1152x128xbf16>, vector<54x128xf32> -> vector<54x128xf32>
    %c0_3 = arith.constant 0 : index
    %c0_4 = arith.constant 0 : index
    %3 = vector.load %arg3[%c0_3, %c0_4] : memref<1x128xf32, #tpu.memory_space<vmem>>, vector<1x128xf32>
    %4 = vector.broadcast %3 : vector<1x128xf32> to vector<54x128xf32>
    %5 = arith.mulf %2, %4 : vector<54x128xf32>
    %c0_5 = arith.constant 0 : index
    %c0_6 = arith.constant 0 : index
    %6 = vector.load %arg4[%c0_5, %c0_6] : memref<1x128xf32, #tpu.memory_space<vmem>>, vector<1x128xf32>
    %7 = vector.broadcast %6 : vector<1x128xf32> to vector<54x128xf32>
    %8 = arith.addf %5, %7 : vector<54x128xf32>
    %cst_7 = arith.constant 0.000000e+00 : f32
    %9 = vector.broadcast %cst_7 : f32 to vector<54x128xf32>
    %10 = arith.maximumf %8, %9 : vector<54x128xf32>
    %11 = arith.truncf %10 : vector<54x128xf32> to vector<54x128xbf16>
    %c0_8 = arith.constant 0 : index
    %c0_9 = arith.constant 0 : index
    %12 = vector.load %arg5[%c0_8, %c0_9] : memref<54x128xbf16, #tpu.memory_space<vmem>>, vector<54x128xbf16>
    tpu.vector_store %arg5[%c0_8, %c0_9], %11 {strides = array<i32>} : memref<54x128xbf16, #tpu.memory_space<vmem>>, vector<54x128xbf16>,
    return
  }
  func.func @transform_0(%arg0: i32) -> (i32, i32) {
    %c0_i32 = arith.constant 0 : i32
    %c0_i32_0 = arith.constant 0 : i32
    %c0_i32_1 = arith.constant 0 : i32
    return %c0_i32, %c0_i32_0 : i32, i32
  }
  func.func @transform_1(%arg0: i32) -> (i32, i32) {
    %c0_i32 = arith.constant 0 : i32
    %c0_i32_0 = arith.constant 0 : i32
    return %c0_i32, %arg0 : i32, i32
  }
  func.func @transform_2(%arg0: i32) -> (i32, i32) {
    %c0_i32 = arith.constant 0 : i32
    %c0_i32_0 = arith.constant 0 : i32
    return %c0_i32, %arg0 : i32, i32
  }
  func.func @transform_3(%arg0: i32) -> (i32, i32) {
    %c0_i32 = arith.constant 0 : i32
    %c0_i32_0 = arith.constant 0 : i32
    return %c0_i32, %arg0 : i32, i32
  }
  func.func @transform_4(%arg0: i32) -> (i32, i32) {
    %c0_i32 = arith.constant 0 : i32
    %c0_i32_0 = arith.constant 0 : i32
    return %c0_i32, %arg0 : i32, i32
  }
}

module attributes {stable_mosaic.version = 11 : i64} {
  func.func @_mm_affine_kernel(%arg0: i32, %arg1: memref<14x2304xbf16, #tpu.memory_space<vmem>>, %arg2: memref<2304x128xbf16, #tpu.memory_space<vmem>>, %arg3: memref<1x128xf32, #tpu.memory_space<vmem>>, %arg4: memref<1x128xf32, #tpu.memory_space<vmem>>, %arg5: memref<14x128xbf16, #tpu.memory_space<vmem>>) attributes {dimension_semantics = [#tpu.dimension_semantics<parallel>], iteration_bounds = array<i64: 4>, scalar_prefetch = 0 : i64, scratch_operands = 0 : i64, tpu.core_type = #tpu.core_type<tc>, window_params = [{pipeline_mode = #tpu.pipeline_mode<synchronous>, transform_indices = @transform_0, window_bounds = array<i64: 14, 2304>}, {transform_indices = @transform_1, window_bounds = array<i64: 2304, 128>}, {transform_indices = @transform_2, window_bounds = array<i64: 1, 128>}, {transform_indices = @transform_3, window_bounds = array<i64: 1, 128>}, {transform_indices = @transform_4, window_bounds = array<i64: 14, 128>}]} {
    %c0 = arith.constant 0 : index
    %c0_0 = arith.constant 0 : index
    %0 = vector.load %arg1[%c0, %c0_0] : memref<14x2304xbf16, #tpu.memory_space<vmem>>, vector<14x2304xbf16>
    %c0_1 = arith.constant 0 : index
    %c0_2 = arith.constant 0 : index
    %1 = vector.load %arg2[%c0_1, %c0_2] : memref<2304x128xbf16, #tpu.memory_space<vmem>>, vector<2304x128xbf16>
    %cst = arith.constant dense<0.000000e+00> : vector<14x128xf32>
    %2 = tpu.matmul %0, %1, %cst {dimension_numbers = #tpu.dot_dimension_numbers<[1], [0], [0], [1], [0, 0, 1, 1], [], []>} : vector<14x2304xbf16>, vector<2304x128xbf16>, vector<14x128xf32> -> vector<14x128xf32>
    %c0_3 = arith.constant 0 : index
    %c0_4 = arith.constant 0 : index
    %3 = vector.load %arg3[%c0_3, %c0_4] : memref<1x128xf32, #tpu.memory_space<vmem>>, vector<1x128xf32>
    %4 = vector.broadcast %3 : vector<1x128xf32> to vector<14x128xf32>
    %5 = arith.mulf %2, %4 : vector<14x128xf32>
    %c0_5 = arith.constant 0 : index
    %c0_6 = arith.constant 0 : index
    %6 = vector.load %arg4[%c0_5, %c0_6] : memref<1x128xf32, #tpu.memory_space<vmem>>, vector<1x128xf32>
    %7 = vector.broadcast %6 : vector<1x128xf32> to vector<14x128xf32>
    %8 = arith.addf %5, %7 : vector<14x128xf32>
    %cst_7 = arith.constant 0.000000e+00 : f32
    %9 = vector.broadcast %cst_7 : f32 to vector<14x128xf32>
    %10 = arith.maximumf %8, %9 : vector<14x128xf32>
    %11 = arith.truncf %10 : vector<14x128xf32> to vector<14x128xbf16>
    %c0_8 = arith.constant 0 : index
    %c0_9 = arith.constant 0 : index
    %12 = vector.load %arg5[%c0_8, %c0_9] : memref<14x128xbf16, #tpu.memory_space<vmem>>, vector<14x128xbf16>
    tpu.vector_store %arg5[%c0_8, %c0_9], %11 {strides = array<i32>} : memref<14x128xbf16, #tpu.memory_space<vmem>>, vector<14x128xbf16>,
    return
  }
  func.func @transform_0(%arg0: i32) -> (i32, i32) {
    %c0_i32 = arith.constant 0 : i32
    %c0_i32_0 = arith.constant 0 : i32
    %c0_i32_1 = arith.constant 0 : i32
    return %c0_i32, %c0_i32_0 : i32, i32
  }
  func.func @transform_1(%arg0: i32) -> (i32, i32) {
    %c0_i32 = arith.constant 0 : i32
    %c0_i32_0 = arith.constant 0 : i32
    return %c0_i32, %arg0 : i32, i32
  }
  func.func @transform_2(%arg0: i32) -> (i32, i32) {
    %c0_i32 = arith.constant 0 : i32
    %c0_i32_0 = arith.constant 0 : i32
    return %c0_i32, %arg0 : i32, i32
  }
  func.func @transform_3(%arg0: i32) -> (i32, i32) {
    %c0_i32 = arith.constant 0 : i32
    %c0_i32_0 = arith.constant 0 : i32
    return %c0_i32, %arg0 : i32, i32
  }
  func.func @transform_4(%arg0: i32) -> (i32, i32) {
    %c0_i32 = arith.constant 0 : i32
    %c0_i32_0 = arith.constant 0 : i32
    return %c0_i32, %arg0 : i32, i32
  }
}

module attributes {stable_mosaic.version = 11 : i64} {
  func.func @_mlp_kernel(%arg0: memref<2x3584xbf16, #tpu.memory_space<vmem>>, %arg1: memref<3584x512xbf16, #tpu.memory_space<vmem>>, %arg2: memref<1x512xf32, #tpu.memory_space<vmem>>, %arg3: memref<1x512xf32, #tpu.memory_space<vmem>>, %arg4: memref<512x512xbf16, #tpu.memory_space<vmem>>, %arg5: memref<1x512xf32, #tpu.memory_space<vmem>>, %arg6: memref<1x512xf32, #tpu.memory_space<vmem>>, %arg7: memref<512x1xbf16, #tpu.memory_space<vmem>>, %arg8: memref<1x1xf32, #tpu.memory_space<vmem>>, %arg9: memref<2x1xf32, #tpu.memory_space<vmem>>) attributes {dimension_semantics = [], scalar_prefetch = 0 : i64, scratch_operands = 0 : i64, tpu.core_type = #tpu.core_type<tc>} {
    %c0 = arith.constant 0 : index
    %c0_0 = arith.constant 0 : index
    %0 = vector.load %arg0[%c0, %c0_0] : memref<2x3584xbf16, #tpu.memory_space<vmem>>, vector<2x3584xbf16>
    %c0_1 = arith.constant 0 : index
    %c0_2 = arith.constant 0 : index
    %1 = vector.load %arg1[%c0_1, %c0_2] : memref<3584x512xbf16, #tpu.memory_space<vmem>>, vector<3584x512xbf16>
    %cst = arith.constant dense<0.000000e+00> : vector<2x512xf32>
    %2 = tpu.matmul %0, %1, %cst {dimension_numbers = #tpu.dot_dimension_numbers<[1], [0], [0], [1], [0, 0, 1, 1], [], []>} : vector<2x3584xbf16>, vector<3584x512xbf16>, vector<2x512xf32> -> vector<2x512xf32>
    %c0_3 = arith.constant 0 : index
    %c0_4 = arith.constant 0 : index
    %3 = vector.load %arg2[%c0_3, %c0_4] : memref<1x512xf32, #tpu.memory_space<vmem>>, vector<1x512xf32>
    %4 = vector.broadcast %3 : vector<1x512xf32> to vector<2x512xf32>
    %5 = arith.mulf %2, %4 : vector<2x512xf32>
    %c0_5 = arith.constant 0 : index
    %c0_6 = arith.constant 0 : index
    %6 = vector.load %arg3[%c0_5, %c0_6] : memref<1x512xf32, #tpu.memory_space<vmem>>, vector<1x512xf32>
    %7 = vector.broadcast %6 : vector<1x512xf32> to vector<2x512xf32>
    %8 = arith.addf %5, %7 : vector<2x512xf32>
    %cst_7 = arith.constant 0.000000e+00 : f32
    %9 = vector.broadcast %cst_7 : f32 to vector<2x512xf32>
    %10 = arith.maximumf %8, %9 : vector<2x512xf32>
    %11 = arith.truncf %10 : vector<2x512xf32> to vector<2x512xbf16>
    %c0_8 = arith.constant 0 : index
    %c0_9 = arith.constant 0 : index
    %12 = vector.load %arg4[%c0_8, %c0_9] : memref<512x512xbf16, #tpu.memory_space<vmem>>, vector<512x512xbf16>
    %cst_10 = arith.constant dense<0.000000e+00> : vector<2x512xf32>
    %13 = tpu.matmul %11, %12, %cst_10 {dimension_numbers = #tpu.dot_dimension_numbers<[1], [0], [0], [1], [0, 0, 1, 1], [], []>} : vector<2x512xbf16>, vector<512x512xbf16>, vector<2x512xf32> -> vector<2x512xf32>
    %c0_11 = arith.constant 0 : index
    %c0_12 = arith.constant 0 : index
    %14 = vector.load %arg5[%c0_11, %c0_12] : memref<1x512xf32, #tpu.memory_space<vmem>>, vector<1x512xf32>
    %15 = vector.broadcast %14 : vector<1x512xf32> to vector<2x512xf32>
    %16 = arith.mulf %13, %15 : vector<2x512xf32>
    %c0_13 = arith.constant 0 : index
    %c0_14 = arith.constant 0 : index
    %17 = vector.load %arg6[%c0_13, %c0_14] : memref<1x512xf32, #tpu.memory_space<vmem>>, vector<1x512xf32>
    %18 = vector.broadcast %17 : vector<1x512xf32> to vector<2x512xf32>
    %19 = arith.addf %16, %18 : vector<2x512xf32>
    %cst_15 = arith.constant 0.000000e+00 : f32
    %20 = vector.broadcast %cst_15 : f32 to vector<2x512xf32>
    %21 = arith.maximumf %19, %20 : vector<2x512xf32>
    %22 = arith.truncf %21 : vector<2x512xf32> to vector<2x512xbf16>
    %c0_16 = arith.constant 0 : index
    %c0_17 = arith.constant 0 : index
    %23 = vector.load %arg7[%c0_16, %c0_17] : memref<512x1xbf16, #tpu.memory_space<vmem>>, vector<512x1xbf16>
    %cst_18 = arith.constant dense<0.000000e+00> : vector<2x1xf32>
    %24 = tpu.matmul %22, %23, %cst_18 {dimension_numbers = #tpu.dot_dimension_numbers<[1], [0], [0], [1], [0, 0, 1, 1], [], []>} : vector<2x512xbf16>, vector<512x1xbf16>, vector<2x1xf32> -> vector<2x1xf32>
    %c0_19 = arith.constant 0 : index
    %c0_20 = arith.constant 0 : index
    %25 = vector.load %arg8[%c0_19, %c0_20] : memref<1x1xf32, #tpu.memory_space<vmem>>, vector<1x1xf32>
    %26 = vector.broadcast %25 : vector<1x1xf32> to vector<2x1xf32>
    %27 = arith.addf %24, %26 : vector<2x1xf32>
    %c0_21 = arith.constant 0 : index
    %c0_22 = arith.constant 0 : index
    %28 = vector.load %arg9[%c0_21, %c0_22] : memref<2x1xf32, #tpu.memory_space<vmem>>, vector<2x1xf32>
    tpu.vector_store %arg9[%c0_21, %c0_22], %27 {strides = array<i32>} : memref<2x1xf32, #tpu.memory_space<vmem>>, vector<2x1xf32>,
    return
  }
}

</mosaic_0001>

<bundles_post_ra>
// kernel: custom-call
= control target key start
LH: loop header
LB: loop body
LE: loop exit
PB: predicated region body
PF: predicated region fallthrough
CT: control target
= control target key end

     0   :  { %2 = vsyncpa [#allocation0], 0  ;;  %s47_s0 = inlined_call_operand.hbm [shape: c64[2,11,9], index: 0, kind: input, shape index: {}]   ;;  %s48_s1 = inlined_call_operand.vmem [shape: f32[2,11,9], index: 1, kind: output, shape index: {}]  }
   0x1   :  { %s3_s8 = sshll.u32 %s48_s1, 4  ;;  %s4_s8 = int_to_ptr.vmem [resolvable:$true] %s3_s8 }
   0x2   :  { %s17_s9 = scalar_lea.vmem %s4_s8, 288  ;;  %p22_p1 = scmp.lt.s32.totalorder %s4_s8, %s4_s8 }
   0x3   :  { %p18_p0 = scmp.ne.s32.totalorder %s4_s8, %s17_s9  ;;  %p23_p2 = scmp.lt.s32.totalorder %s17_s9, %s17_s9 }
   0x5   :  { %p24_p3 = por %p23_p2, %p22_p1 }
   0x7   :  { %p25_p4 = pnand %p24_p3, %p18_p0 }
   0x9   :  { %28 = shalt.err (!%p25_p4)  }
   0xa   :  { %6 = dma.hbm_to_vmem [thread:$0]  %s47_s0, 288, %s4_s8, [#allocation0] }
   0xb   :  { %29 = dma.done.wait [#allocation0], 288  }
   0xc   :  { %30 = vsyncadd [#allocation0], 4294967008 }
   0xd   :  { %8 = vsyncpa [#allocation0], 1 }

// kernel: custom-call.1
= control target key start
LH: loop header
LB: loop body
LE: loop exit
PB: predicated region body
PF: predicated region fallthrough
CT: control target
= control target key end

     0   :  { %s51_s0 = inlined_call_operand.hbm [shape: c64[2,11,9], index: 0, kind: input, shape index: {}]   ;;  %s52_s1 = inlined_call_operand.vmem [shape: f32[2,11,9], index: 1, kind: output, shape index: {}]  }
   0x1   :  { %s2_s8 = scalar_lea.hbm %s51_s0, 288 }
   0x2   :  { %3 = vsyncpa [#allocation0], 0  ;;  %s4_s11 = sshll.u32 %s52_s1, 4  ;;  %s5_s11 = int_to_ptr.vmem [resolvable:$true] %s4_s11 }
   0x3   :  { %s20_s12 = scalar_lea.vmem %s5_s11, 288  ;;  %p25_p1 = scmp.lt.s32.totalorder %s5_s11, %s5_s11 }
   0x4   :  { %p21_p0 = scmp.ne.s32.totalorder %s5_s11, %s20_s12  ;;  %p26_p2 = scmp.lt.s32.totalorder %s20_s12, %s20_s12 }
   0x6   :  { %p27_p3 = por %p26_p2, %p25_p1 }
   0x8   :  { %p28_p4 = pnand %p27_p3, %p21_p0 }
   0xa   :  { %31 = shalt.err (!%p28_p4)  }
   0xb   :  { %7 = dma.hbm_to_vmem [thread:$0]  %s2_s8, 288, %s5_s11, [#allocation0] }
   0xc   :  { %33 = dma.done.wait [#allocation0], 288  }
   0xd   :  { %34 = vsyncadd [#allocation0], 4294967008 }
   0xe   :  { %9 = vsyncpa [#allocation0], 1 }

// kernel: pgccphat_forward.7
= control target key start
LH: loop header
LB: loop body
LE: loop exit
PB: predicated region body
PF: predicated region fallthrough
CT: control target
= control target key end

     0   :  { %11 = vsyncpa [#allocation5], 0  ;;  %s2187_s0 = inlined_call_operand.vmem [shape: f32[24,9], index: 0, kind: input, shape index: {}]   ;;  %s2188_s1 = inlined_call_operand.vmem [shape: f32[24,9], index: 1, kind: input, shape index: {}]   ;;  %s2189_s2 = inlined_call_operand.vmem [shape: f32[24,9], index: 2, kind: input, shape index: {}]   ;;  %s2190_s3 = inlined_call_operand.vmem [shape: f32[24,9], index: 3, kind: input, shape index: {}]   ;;  %s2191_s4 = inlined_call_operand.hbm [shape: f32[9,17], index: 4, kind: input, shape index: {}]   ;;  %s2192_s5 = inlined_call_operand.hbm [shape: f32[9,17], index: 5, kind: input, shape index: {}]   ;;  %s2193_s6 = inlined_call_operand.vmem [shape: f32[264,17], index: 6, kind: output, shape index: {}]  }
   0x1   :  { %12 = vsyncpa [#allocation7], 0  ;;  %s1578_s21 = smov [#allocation4]  }
   0x2   :  { %s26_s22 = sshll.u32 %s1578_s21, 4  ;;  %s27_s22 = int_to_ptr.vmem [resolvable:$true] %s26_s22 }
   0x3   :  { %s1542_s23 = scalar_lea.vmem %s27_s22, 256  ;;  %p1547_p1 = scmp.lt.s32.totalorder %s27_s22, %s27_s22 }
   0x4   :  { %p1543_p0 = scmp.ne.s32.totalorder %s27_s22, %s1542_s23  ;;  %p1548_p2 = scmp.lt.s32.totalorder %s1542_s23, %s1542_s23 }
   0x6   :  { %p1549_p3 = por %p1548_p2, %p1547_p1 }
   0x8   :  { %p1550_p4 = pnand %p1549_p3, %p1543_p0 }
   0xa   :  { %1553 = shalt.err (!%p1550_p4)
}
   0xb   :  { %s1579_s24 = smov 128   ;;  %s1580_s25 = smov 8  }
   0xc   :  { %32 = dma.hbm_to_vmem [thread:$0]  %s2191_s4, 256, %s27_s22, [#allocation5], %s1579_s24, %s1579_s24, %s1580_s25  }
   0xd   :  { %s1581_s28 = smov [#allocation6]  }
   0xe   :  { %s38_s29 = sshll.u32 %s1581_s28, 4  ;;  %s39_s29 = int_to_ptr.vmem [resolvable:$true] %s38_s29 }
   0xf   :  { %s1562_s30 = scalar_lea.vmem %s39_s29, 256  ;;  %p1567_p6 = scmp.lt.s32.totalorder %s39_s29, %s39_s29 }
  0x10   :  { %p1563_p5 = scmp.ne.s32.totalorder %s39_s29, %s1562_s30  ;;  %p1568_p7 = scmp.lt.s32.totalorder %s1562_s30, %s1562_s30 }
  0x12   :  { %p1569_p8 = por %p1568_p7, %p1567_p6 }
  0x14   :  { %p1570_p9 = pnand %p1569_p8, %p1563_p5 }
  0x16   :  { %1573 = shalt.err (!%p1570_p9)
}
  0x17   :  { %44 = dma.hbm_to_vmem [thread:$0]  %s2192_s5, 256, %s39_s29, [#allocation7], %s1579_s24, %s1579_s24, %s1580_s25  }
  0x18   :  { %1574 = dma.done.wait [#allocation5], 256  }
  0x19   :  { %1575 = vsyncadd [#allocation5], 4294967040 }
  0x1a   :  { %1576 = dma.done.wait [#allocation7], 256  }
  0x1b   :  { %1577 = vsyncadd [#allocation7], 4294967040  ;;  %v1582_v0 = vmov 0.0   ;;  %vm1583_vm0 = vmmov 0   ;;  %vm506_vm1 = vcmask 1040384   ;;  %v405_v3 = vld [vmem:[#allocation6] sm:$0xff] }
  0x1c   :  { %1250 = vmatprep.subr.mxu0 %v1582_v0  ;;  %1353 = vmatprep.subr.mxu1 %v1582_v0  ;;  %v406_v1 = vld [vmem:[#allocation6 + $0x8] sm:$0x1]  ;;  %v371_v2 = vld [vmem:[#allocation4 + $0x8] sm:$0x1]  ;;  %v370_v4 = vld [vmem:[#allocation4] sm:$0xff]  ;;  %vm123_vm2 = vcmask 72704  }
  0x1d   :  { %1254 = vmatprep.mubr.msk.f32.mxu0 %vm1583_vm0, %v1582_v0  ;;  %1357 = vmatprep.mubr.msk.f32.mxu1 %vm1583_vm0, %v1582_v0  ;;  %v51_v5 = vld [vmem:[%s2187_s0] sm:$0xff]  ;;  %v52_v9 = vld [vmem:[%s2187_s0 + $0x8] sm:$0xff]  ;;  %v53_v20 = vld [vmem:[%s2187_s0 + $0x10] sm:$0xff]  ;;  %vm1072_vm9 = vcmask 138240  }
  0x1e   :  { %1251 = vmatpush3.msk.msra.mxu0 %vm506_vm1, %v406_v1  ;;  %1354 = vmatpush3.msk.msra.mxu1 %vm506_vm1, %v371_v2  ;;  %v54_v6 = vld [vmem:[%s2188_s1] sm:$0xff]  ;;  %v55_v13 = vld [vmem:[%s2188_s1 + $0x8] sm:$0xff]  ;;  %v56_v21 = vld [vmem:[%s2188_s1 + $0x10] sm:$0xff] }
  0x1f   :  { %1252 = vmatprep.subr.mxu0 %v1582_v0  ;;  %1355 = vmatprep.subr.mxu1 %v1582_v0  ;;  %v57_v7 = vld [vmem:[%s2189_s2] sm:$0xff]  ;;  %v58_v14 = vld [vmem:[%s2189_s2 + $0x8] sm:$0xff]  ;;  %v59_v22 = vld [vmem:[%s2189_s2 + $0x10] sm:$0xff] }
  0x20   :  { %v60_v8 = vld [vmem:[%s2190_s3] sm:$0xff]  ;;  %1253 = vmatpush3.msra.mxu0 %v405_v3  ;;  %1356 = vmatpush3.msra.mxu1 %v370_v4  ;;  %v72_v10 = vmul.f32 %v57_v7, %v54_v6  ;;  %v63_v12 = vmul.f32 %v57_v7, %v51_v5  ;;  %v61_v15 = vld [vmem:[%s2190_s3 + $0x8] sm:$0xff]  ;;  %v73_v17 = vmul.f32 %v58_v14, %v55_v13  ;;  %v62_v25 = vld [vmem:[%s2190_s3 + $0x10] sm:$0xff] }
  0x21   :  { %v75_v11 = vmul.f32 %v60_v8, %v51_v5  ;;  %v66_v16 = vmul.f32 %v60_v8, %v54_v6  ;;  %v76_v18 = vmul.f32 %v61_v15, %v52_v9  ;;  %v64_v19 = vmul.f32 %v58_v14, %v52_v9 }
  0x22   :  { %v67_v24 = vmul.f32 %v61_v15, %v55_v13  ;;  %v74_v26 = vmul.f32 %v59_v22, %v56_v21  ;;  %v65_v27 = vmul.f32 %v59_v22, %v53_v20  ;;  %v77_v30 = vmul.f32 %v62_v25, %v53_v20 }
  0x23   :  { %v1666_v23 = vsub.f32 %v72_v10, %v75_v11  ;;  %v1671_v28 = vadd.f32 %v66_v16, %v63_v12  ;;  %v1673_v29 = vsub.f32 %v73_v17, %v76_v18  ;;  %v68_v31 = vmul.f32 %v62_v25, %v56_v21 }
  0x24   :  { %v1677_v32 = vadd.f32 %v67_v24, %v64_v19  ;;  %v1685_v34 = vsub.f32 %v74_v26, %v77_v30 }
  0x25   :  { %127 = vst.msk [vmem:[#allocation3] sm:$0xff] %vm123_vm2, %v1666_v23  ;;  %v84_v33 = vmul.f32 %v1666_v23, %v1666_v23  ;;  %124 = vst.msk [vmem:[#allocation2] sm:$0xff] %vm123_vm2, %v1671_v28  ;;  %v1687_v35 = vadd.f32 %v68_v31, %v65_v27  ;;  %v81_v36 = vmul.f32 %v1671_v28, %v1671_v28 }
  0x26   :  { %128 = vst.msk [vmem:[#allocation3 + $0x8] sm:$0xff] %vm123_vm2, %v1673_v29  ;;  %v85_v37 = vmul.f32 %v1673_v29, %v1673_v29  ;;  %125 = vst.msk [vmem:[#allocation2 + $0x8] sm:$0xff] %vm123_vm2, %v1677_v32  ;;  %v82_v38 = vmul.f32 %v1677_v32, %v1677_v32  ;;  %v86_v41 = vmul.f32 %v1685_v34, %v1685_v34 }
  0x27   :  { %129 = vst.msk [vmem:[#allocation3 + $0x10] sm:$0xff] %vm123_vm2, %v1685_v34  ;;  %126 = vst.msk [vmem:[#allocation2 + $0x10] sm:$0xff] %vm123_vm2, %v1687_v35  ;;  %v87_v39 = vadd.f32 %v84_v33, %v81_v36  ;;  %v83_v40 = vmul.f32 %v1687_v35, %v1687_v35 }
  0x28   :  { %v88_v42 = vadd.f32 %v85_v37, %v82_v38 }
  0x29   :  { %1462 = vrsqrt.f32 %v87_v39  ;;  %v89_v44 = vadd.f32 %v86_v41, %v83_v40  ;;  %vm92_vm3 = vcmp.eq.f32.partialorder %v87_v39, inf  ;;  %v95_v51 = vand.u32 2147483648, %v87_v39 }
  0x2a   :  { %1464 = vrsqrt.f32 %v88_v42  ;;  %vm94_vm4 = vcmp.eq.f32.partialorder %v87_v39, 0.0  ;;  %vm99_vm5 = vcmp.eq.f32.partialorder %v88_v42, inf  ;;  %v102_v54 = vand.u32 2147483648, %v88_v42 }
  0x2b   :  { %1466 = vrsqrt.f32 %v89_v44  ;;  %vm101_vm6 = vcmp.eq.f32.partialorder %v88_v42, 0.0  ;;  %vm106_vm7 = vcmp.eq.f32.partialorder %v89_v44, inf  ;;  %v109_v60 = vand.u32 2147483648, %v89_v44 }
  0x2c   :  { %v372_v43 = vld [vmem:[#allocation3] sm:$0xff]  ;;  %v337_v45 = vld [vmem:[#allocation2] sm:$0xff]  ;;  %vm108_vm8 = vcmp.eq.f32.partialorder %v89_v44, 0.0 }
  0x2d   :  { %1255 = vmatmul.mubr.msk.f32.vlgmr.msra.gmra.mxu0 %vm123_vm2, %v372_v43  ;;  %1358 = vmatmul.mubr.msk.f32.vlgmr.msra.gmra.mxu1 %vm123_vm2, %v337_v45  ;;  %v373_v46 = vld [vmem:[#allocation3 + $0x8] sm:$0xff]  ;;  %v338_v47 = vld [vmem:[#allocation2 + $0x8] sm:$0xff] }
  0x2e   :  { %1257 = vmatprep.mubr.msk.f32.mxu0 %vm1583_vm0, %v1582_v0  ;;  %1360 = vmatprep.mubr.msk.f32.mxu1 %vm1583_vm0, %v1582_v0  ;;  %v374_v48 = vld [vmem:[#allocation3 + $0x10] sm:$0xff]  ;;  %v339_v49 = vld [vmem:[#allocation2 + $0x10] sm:$0xff] }
  0x31   :  { %1258 = vmatmul.mubr.msk.f32.gmra.mxu0 %vm123_vm2, %v373_v46  ;;  %1361 = vmatmul.mubr.msk.f32.gmra.mxu1 %vm123_vm2, %v338_v47 }
  0x32   :  { %1260 = vmatprep.mubr.msk.f32.mxu0 %vm1583_vm0, %v1582_v0  ;;  %1363 = vmatprep.mubr.msk.f32.mxu1 %vm1583_vm0, %v1582_v0 }
  0x35   :  { %1261 = vmatmul.mubr.msk.f32.gmra.mxu0 %vm123_vm2, %v374_v48  ;;  %1364 = vmatmul.mubr.msk.f32.gmra.mxu1 %vm123_vm2, %v339_v49 }
  0x36   :  { %1263 = vmatprep.mubr.msk.f32.mxu0 %vm1583_vm0, %v1582_v0  ;;  %v1463_v50 = vpop.eup %1462  ;;  %1366 = vmatprep.mubr.msk.f32.mxu1 %vm1583_vm0, %v1582_v0 }
  0x37   :  { %v1465_v52 = vpop.eup %1464  ;;  %v91_v53 = vmul.f32 %v1463_v50, %v87_v39 }
  0x38   :  { %v98_v55 = vmul.f32 %v1465_v52, %v88_v42  ;;  %v1467_v57 = vpop.eup %1466 }
  0x39   :  { %v93_v56 = vsel %vm92_vm3, %v87_v39, %v91_v53  ;;  %v105_v63 = vmul.f32 %v1467_v57, %v89_v44 }
  0x3a   :  { %v96_v58 = vsel %vm94_vm4, %v95_v51, %v93_v56  ;;  %v100_v59 = vsel %vm99_vm5, %v88_v42, %v98_v55 }
  0x3b   :  { %v111_v61 = vadd.f32 0.001, %v96_v58  ;;  %v103_v62 = vsel %vm101_vm6, %v102_v54, %v100_v59  ;;  %v107_v2 = vsel %vm106_vm7, %v89_v44, %v105_v63 }
  0x3c   :  { %v112_v1 = vadd.f32 0.001, %v103_v62  ;;  %v110_v3 = vsel %vm108_vm8, %v109_v60, %v107_v2 }
  0x3d   :  { %1468 = vlog2.f32 %v111_v61  ;;  %v113_v4 = vadd.f32 0.001, %v110_v3 }
  0x3e   :  { %1470 = vlog2.f32 %v112_v1 }
  0x3f   :  { %1472 = vlog2.f32 %v113_v4 }
  0x4a   :  { %v1469_v5 = vpop.eup %1468 }
  0x4b   :  { %v1471_v6 = vpop.eup %1470  ;;  %v115_v7 = vmul.f32 0.6931472, %v1469_v5 }
  0x4c   :  { %v117_v8 = vmul.f32 0.6931472, %v1471_v6  ;;  %v1473_v10 = vpop.eup %1472 }
  0x4d   :  { %v1723_v9 = vsub.f32 0.0, %v115_v7  ;;  %v119_v13 = vmul.f32 0.6931472, %v1473_v10 }
  0x4e   :  { %v1725_v11 = vsub.f32 0.0, %v117_v8 }
  0x4f   :  { %v130_v12 = vmul.f32 0.1, %v1723_v9  ;;  %v151_v14 = vmul.f32 0.2, %v1723_v9  ;;  %v172_v17 = vmul.f32 0.3, %v1723_v9 }
  0x50   :  { %v131_v15 = vmul.f32 0.1, %v1725_v11  ;;  %v152_v16 = vmul.f32 0.2, %v1725_v11  ;;  %v1732_v19 = vsub.f32 0.0, %v119_v13  ;;  %v214_v39 = vmul.f32 0.5, %v1723_v9 }
  0x51   :  { %v133_v18 = vmul.f32 1.442695, %v130_v12  ;;  %v154_v20 = vmul.f32 1.442695, %v151_v14  ;;  %v173_v26 = vmul.f32 0.3, %v1725_v11 }
  0x52   :  { %v135_v21 = vmul.f32 1.442695, %v131_v15  ;;  %v156_v22 = vmul.f32 1.442695, %v152_v16  ;;  %v132_v24 = vmul.f32 0.1, %v1732_v19 }
  0x53   :  { %1474 = vpow2.f32 %v133_v18  ;;  %v153_v25 = vmul.f32 0.2, %v1732_v19  ;;  %v175_v27 = vmul.f32 1.442695, %v172_v17  ;;  %v174_v30 = vmul.f32 0.3, %v1732_v19 }
  0x54   :  { %1476 = vpow2.f32 %v135_v21  ;;  %v193_v31 = vmul.f32 0.4, %v1723_v9  ;;  %v137_v33 = vmul.f32 1.442695, %v132_v24  ;;  %v194_v37 = vmul.f32 0.4, %v1725_v11 }
  0x55   :  { %1478 = vpow2.f32 %v154_v20  ;;  %v158_v36 = vmul.f32 1.442695, %v153_v25  ;;  %v177_v38 = vmul.f32 1.442695, %v173_v26  ;;  %v179_v40 = vmul.f32 1.442695, %v174_v30 }
  0x56   :  { %1480 = vpow2.f32 %v156_v22  ;;  %v195_v41 = vmul.f32 0.4, %v1732_v19  ;;  %v196_v42 = vmul.f32 1.442695, %v193_v31  ;;  %v215_v43 = vmul.f32 0.5, %v1725_v11 }
  0x57   :  { %1482 = vpow2.f32 %v137_v33  ;;  %v198_v44 = vmul.f32 1.442695, %v194_v37  ;;  %v216_v45 = vmul.f32 0.5, %v1732_v19  ;;  %v217_v47 = vmul.f32 1.442695, %v214_v39 }
  0x58   :  { %1484 = vpow2.f32 %v158_v36  ;;  %v200_v46 = vmul.f32 1.442695, %v195_v41  ;;  %v235_v48 = vmul.f32 0.6, %v1723_v9  ;;  %v236_v49 = vmul.f32 0.6, %v1725_v11 }
  0x59   :  { %1486 = vpow2.f32 %v175_v27  ;;  %v237_v50 = vmul.f32 0.6, %v1732_v19  ;;  %v256_v51 = vmul.f32 0.7, %v1723_v9  ;;  %v219_v52 = vmul.f32 1.442695, %v215_v43 }
  0x5a   :  { %1488 = vpow2.f32 %v177_v38  ;;  %v257_v53 = vmul.f32 0.7, %v1725_v11  ;;  %v258_v54 = vmul.f32 0.7, %v1732_v19  ;;  %v221_v55 = vmul.f32 1.442695, %v216_v45 }
  0x5b   :  { %1490 = vpow2.f32 %v179_v40  ;;  %v277_v56 = vmul.f32 0.8, %v1723_v9  ;;  %v238_v57 = vmul.f32 1.442695, %v235_v48  ;;  %v278_v58 = vmul.f32 0.8, %v1725_v11 }
  0x5c   :  { %1492 = vpow2.f32 %v196_v42  ;;  %v240_v59 = vmul.f32 1.442695, %v236_v49  ;;  %v242_v60 = vmul.f32 1.442695, %v237_v50  ;;  %v259_v61 = vmul.f32 1.442695, %v256_v51 }
  0x5d   :  { %1494 = vpow2.f32 %v198_v44  ;;  %v261_v63 = vmul.f32 1.442695, %v257_v53  ;;  %v263_v1 = vmul.f32 1.442695, %v258_v54  ;;  %v279_v2 = vmul.f32 0.8, %v1732_v19 }
  0x5e   :  { %1496 = vpow2.f32 %v200_v46  ;;  %v280_v6 = vmul.f32 1.442695, %v277_v56  ;;  %v282_v12 = vmul.f32 1.442695, %v278_v58  ;;  %v298_v16 = vmul.f32 0.9, %v1723_v9 }
  0x5f   :  { %1498 = vpow2.f32 %v217_v47  ;;  %v299_v21 = vmul.f32 0.9, %v1725_v11  ;;  %v300_v26 = vmul.f32 0.9, %v1732_v19  ;;  %v284_v33 = vmul.f32 1.442695, %v279_v2 }
  0x60   :  { %v1475_v62 = vpop.eup %1474  ;;  %1500 = vpow2.f32 %v219_v52  ;;  %v301_v39 = vmul.f32 1.442695, %v298_v16  ;;  %v319_v53 = vmul.f32 1.442695, %v1723_v9 }
  0x61   :  { %v1477_v3 = vpop.eup %1476  ;;  %v142_v4 = vmul.f32 %v1475_v62, %v1666_v23  ;;  %v139_v5 = vmul.f32 %v1475_v62, %v1671_v28  ;;  %1502 = vpow2.f32 %v221_v55  ;;  %v303_v43 = vmul.f32 1.442695, %v299_v21 }
  0x62   :  { %v1479_v7 = vpop.eup %1478  ;;  %v143_v8 = vmul.f32 %v1477_v3, %v1673_v29  ;;  %v140_v10 = vmul.f32 %v1477_v3, %v1677_v32  ;;  %1504 = vpow2.f32 %v238_v57  ;;  %v305_v47 = vmul.f32 1.442695, %v300_v26 }
  0x63   :  { %v1481_v13 = vpop.eup %1480  ;;  %148 = vst.msk [vmem:[#allocation3 + $0x18] sm:$0xff] %vm123_vm2, %v142_v4  ;;  %145 = vst.msk [vmem:[#allocation2 + $0x18] sm:$0xff] %vm123_vm2, %v139_v5  ;;  %v163_v14 = vmul.f32 %v1479_v7, %v1666_v23  ;;  %v160_v15 = vmul.f32 %v1479_v7, %v1671_v28  ;;  %1506 = vpow2.f32 %v240_v59  ;;  %v321_v57 = vmul.f32 1.442695, %v1725_v11 }
  0x64   :  { %v1483_v17 = vpop.eup %1482  ;;  %149 = vst.msk [vmem:[#allocation3 + $0x20] sm:$0xff] %vm123_vm2, %v143_v8  ;;  %146 = vst.msk [vmem:[#allocation2 + $0x20] sm:$0xff] %vm123_vm2, %v140_v10  ;;  %v164_v18 = vmul.f32 %v1481_v13, %v1673_v29  ;;  %v161_v20 = vmul.f32 %v1481_v13, %v1677_v32  ;;  %1508 = vpow2.f32 %v242_v60  ;;  %v323_v11 = vmul.f32 1.442695, %v1732_v19 }
  0x65   :  { %v1485_v22 = vpop.eup %1484  ;;  %v144_v24 = vmul.f32 %v1483_v17, %v1685_v34  ;;  %v141_v25 = vmul.f32 %v1483_v17, %v1687_v35  ;;  %169 = vst.msk [vmem:[#allocation3 + $0x30] sm:$0xff] %vm123_vm2, %v163_v14  ;;  %166 = vst.msk [vmem:[#allocation2 + $0x30] sm:$0xff] %vm123_vm2, %v160_v15  ;;  %1510 = vpow2.f32 %v259_v61 }
  0x66   :  { %v1487_v27 = vpop.eup %1486  ;;  %170 = vst.msk [vmem:[#allocation3 + $0x38] sm:$0xff] %vm123_vm2, %v164_v18  ;;  %167 = vst.msk [vmem:[#allocation2 + $0x38] sm:$0xff] %vm123_vm2, %v161_v20  ;;  %v165_v30 = vmul.f32 %v1485_v22, %v1685_v34  ;;  %v162_v31 = vmul.f32 %v1485_v22, %v1687_v35  ;;  %1512 = vpow2.f32 %v261_v63 }
  0x67   :  { %v1489_v36 = vpop.eup %1488  ;;  %150 = vst.msk [vmem:[#allocation3 + $0x28] sm:$0xff] %vm123_vm2, %v144_v24  ;;  %147 = vst.msk [vmem:[#allocation2 + $0x28] sm:$0xff] %vm123_vm2, %v141_v25  ;;  %v184_v37 = vmul.f32 %v1487_v27, %v1666_v23  ;;  %v181_v38 = vmul.f32 %v1487_v27, %v1671_v28  ;;  %1514 = vpow2.f32 %v263_v1 }
  0x68   :  { %v1491_v40 = vpop.eup %1490  ;;  %171 = vst.msk [vmem:[#allocation3 + $0x40] sm:$0xff] %vm123_vm2, %v165_v30  ;;  %168 = vst.msk [vmem:[#allocation2 + $0x40] sm:$0xff] %vm123_vm2, %v162_v31  ;;  %v185_v41 = vmul.f32 %v1489_v36, %v1673_v29  ;;  %v182_v42 = vmul.f32 %v1489_v36, %v1677_v32  ;;  %1516 = vpow2.f32 %v280_v6 }
  0x69   :  { %v1493_v44 = vpop.eup %1492  ;;  %190 = vst.msk [vmem:[#allocation3 + $0x48] sm:$0xff] %vm123_vm2, %v184_v37  ;;  %187 = vst.msk [vmem:[#allocation2 + $0x48] sm:$0xff] %vm123_vm2, %v181_v38  ;;  %v186_v45 = vmul.f32 %v1491_v40, %v1685_v34  ;;  %v183_v46 = vmul.f32 %v1491_v40, %v1687_v35  ;;  %1518 = vpow2.f32 %v282_v12 }
  0x6a   :  { %v1495_v48 = vpop.eup %1494  ;;  %v375_v49 = vld [vmem:[#allocation3 + $0x18] sm:$0xff]  ;;  %v340_v50 = vld [vmem:[#allocation2 + $0x18] sm:$0xff]  ;;  %191 = vst.msk [vmem:[#allocation3 + $0x50] sm:$0xff] %vm123_vm2, %v185_v41  ;;  %188 = vst.msk [vmem:[#allocation2 + $0x50] sm:$0xff] %vm123_vm2, %v182_v42  ;;  %v205_v51 = vmul.f32 %v1493_v44, %v1666_v23  ;;  %v202_v52 = vmul.f32 %v1493_v44, %v1671_v28  ;;  %1520 = vpow2.f32 %v284_v33 }
  0x6b   :  { %v1497_v54 = vpop.eup %1496  ;;  %1264 = vmatmul.mubr.msk.f32.gmra.mxu0 %vm123_vm2, %v375_v49  ;;  %1367 = vmatmul.mubr.msk.f32.gmra.mxu1 %vm123_vm2, %v340_v50  ;;  %192 = vst.msk [vmem:[#allocation3 + $0x58] sm:$0xff] %vm123_vm2, %v186_v45  ;;  %189 = vst.msk [vmem:[#allocation2 + $0x58] sm:$0xff] %vm123_vm2, %v183_v46  ;;  %v206_v55 = vmul.f32 %v1495_v48, %v1673_v29  ;;  %v203_v56 = vmul.f32 %v1495_v48, %v1677_v32  ;;  %1522 = vpow2.f32 %v301_v39  ;;  %v376_v9 = vld [vmem:[#allocation3 + $0x20] sm:$0xff]  ;;  %v341_v59 = vld [vmem:[#allocation2 + $0x20] sm:$0xff] }
  0x6c   :  { %v1499_v58 = vpop.eup %1498  ;;  %1266 = vmatprep.mubr.msk.f32.mxu0 %vm1583_vm0, %v1582_v0  ;;  %1369 = vmatprep.mubr.msk.f32.mxu1 %vm1583_vm0, %v1582_v0  ;;  %211 = vst.msk [vmem:[#allocation3 + $0x60] sm:$0xff] %vm123_vm2, %v205_v51  ;;  %208 = vst.msk [vmem:[#allocation2 + $0x60] sm:$0xff] %vm123_vm2, %v202_v52  ;;  %v207_v60 = vmul.f32 %v1497_v54, %v1685_v34  ;;  %v204_v61 = vmul.f32 %v1497_v54, %v1687_v35  ;;  %1524 = vpow2.f32 %v303_v43  ;;  %v378_v26 = vld [vmem:[#allocation3 + $0x30] sm:$0xff]  ;;  %v343_v27 = vld [vmem:[#allocation2 + $0x30] sm:$0xff] }
  0x6d   :  { %v1501_v62 = vpop.eup %1500  ;;  %212 = vst.msk [vmem:[#allocation3 + $0x68] sm:$0xff] %vm123_vm2, %v206_v55  ;;  %209 = vst.msk [vmem:[#allocation2 + $0x68] sm:$0xff] %vm123_vm2, %v203_v56  ;;  %v226_v63 = vmul.f32 %v1499_v58, %v1666_v23  ;;  %v223_v1 = vmul.f32 %v1499_v58, %v1671_v28  ;;  %1526 = vpow2.f32 %v305_v47  ;;  %v379_v45 = vld [vmem:[#allocation3 + $0x38] sm:$0xff]  ;;  %v344_v46 = vld [vmem:[#allocation2 + $0x38] sm:$0xff] }
  0x6e   :  { %v1503_v2 = vpop.eup %1502  ;;  %213 = vst.msk [vmem:[#allocation3 + $0x70] sm:$0xff] %vm123_vm2, %v207_v60  ;;  %210 = vst.msk [vmem:[#allocation2 + $0x70] sm:$0xff] %vm123_vm2, %v204_v61  ;;  %v227_v3 = vmul.f32 %v1501_v62, %v1673_v29  ;;  %v224_v4 = vmul.f32 %v1501_v62, %v1677_v32  ;;  %1528 = vpow2.f32 %v319_v53  ;;  %v377_v8 = vld [vmem:[#allocation3 + $0x28] sm:$0xff]  ;;  %v342_v10 = vld [vmem:[#allocation2 + $0x28] sm:$0xff] }
  0x6f   :  { %v1505_v19 = vpop.eup %1504  ;;  %1267 = vmatmul.mubr.msk.f32.gmra.mxu0 %vm123_vm2, %v376_v9  ;;  %1370 = vmatmul.mubr.msk.f32.gmra.mxu1 %vm123_vm2, %v341_v59  ;;  %232 = vst.msk [vmem:[#allocation3 + $0x78] sm:$0xff] %vm123_vm2, %v226_v63  ;;  %229 = vst.msk [vmem:[#allocation2 + $0x78] sm:$0xff] %vm123_vm2, %v223_v1  ;;  %v228_v5 = vmul.f32 %v1503_v2, %v1685_v34  ;;  %v225_v6 = vmul.f32 %v1503_v2, %v1687_v35  ;;  %1530 = vpow2.f32 %v321_v57  ;;  %v380_v9 = vld [vmem:[#allocation3 + $0x40] sm:$0xff]  ;;  %v345_v59 = vld [vmem:[#allocation2 + $0x40] sm:$0xff] }
  0x70   :  { %v1507_v7 = vpop.eup %1506  ;;  %1269 = vmatprep.mubr.msk.f32.mxu0 %vm1583_vm0, %v1582_v0  ;;  %1372 = vmatprep.mubr.msk.f32.mxu1 %vm1583_vm0, %v1582_v0  ;;  %233 = vst.msk [vmem:[#allocation3 + $0x80] sm:$0xff] %vm123_vm2, %v227_v3  ;;  %230 = vst.msk [vmem:[#allocation2 + $0x80] sm:$0xff] %vm123_vm2, %v224_v4  ;;  %v247_v12 = vmul.f32 %v1505_v19, %v1666_v23  ;;  %v244_v13 = vmul.f32 %v1505_v19, %v1671_v28  ;;  %1532 = vpow2.f32 %v323_v11 }
  0x71   :  { %v1509_v14 = vpop.eup %1508  ;;  %234 = vst.msk [vmem:[#allocation3 + $0x88] sm:$0xff] %vm123_vm2, %v228_v5  ;;  %231 = vst.msk [vmem:[#allocation2 + $0x88] sm:$0xff] %vm123_vm2, %v225_v6  ;;  %v248_v15 = vmul.f32 %v1507_v7, %v1673_v29  ;;  %v245_v16 = vmul.f32 %v1507_v7, %v1677_v32 }
  0x72   :  { %v1511_v17 = vpop.eup %1510  ;;  %253 = vst.msk [vmem:[#allocation3 + $0x90] sm:$0xff] %vm123_vm2, %v247_v12  ;;  %250 = vst.msk [vmem:[#allocation2 + $0x90] sm:$0xff] %vm123_vm2, %v244_v13  ;;  %v249_v18 = vmul.f32 %v1509_v14, %v1685_v34  ;;  %v246_v20 = vmul.f32 %v1509_v14, %v1687_v35 }
  0x73   :  { %v1513_v21 = vpop.eup %1512  ;;  %1270 = vmatmul.mubr.msk.f32.gmra.mxu0 %vm123_vm2, %v377_v8  ;;  %1373 = vmatmul.mubr.msk.f32.gmra.mxu1 %vm123_vm2, %v342_v10  ;;  %254 = vst.msk [vmem:[#allocation3 + $0x98] sm:$0xff] %vm123_vm2, %v248_v15  ;;  %251 = vst.msk [vmem:[#allocation2 + $0x98] sm:$0xff] %vm123_vm2, %v245_v16  ;;  %v268_v22 = vmul.f32 %v1511_v17, %v1666_v23  ;;  %v265_v24 = vmul.f32 %v1511_v17, %v1671_v28  ;;  %v384_v3 = vld [vmem:[#allocation3 + $0x60] sm:$0xff]  ;;  %v349_v4 = vld [vmem:[#allocation2 + $0x60] sm:$0xff] }
  0x74   :  { %v1515_v25 = vpop.eup %1514  ;;  %1272 = vmatprep.mubr.msk.f32.mxu0 %vm1583_vm0, %v1582_v0  ;;  %1375 = vmatprep.mubr.msk.f32.mxu1 %vm1583_vm0, %v1582_v0  ;;  %255 = vst.msk [vmem:[#allocation3 + $0xa0] sm:$0xff] %vm123_vm2, %v249_v18  ;;  %252 = vst.msk [vmem:[#allocation2 + $0xa0] sm:$0xff] %vm123_vm2, %v246_v20  ;;  %v269_v30 = vmul.f32 %v1513_v21, %v1673_v29  ;;  %v266_v31 = vmul.f32 %v1513_v21, %v1677_v32  ;;  %v385_v19 = vld [vmem:[#allocation3 + $0x68] sm:$0xff]  ;;  %v350_v5 = vld [vmem:[#allocation2 + $0x68] sm:$0xff] }
  0x75   :  { %v1517_v33 = vpop.eup %1516  ;;  %274 = vst.msk [vmem:[#allocation3 + $0xa8] sm:$0xff] %vm123_vm2, %v268_v22  ;;  %271 = vst.msk [vmem:[#allocation2 + $0xa8] sm:$0xff] %vm123_vm2, %v265_v24  ;;  %v270_v36 = vmul.f32 %v1515_v25, %v1685_v34  ;;  %v267_v37 = vmul.f32 %v1515_v25, %v1687_v35  ;;  %v386_v6 = vld [vmem:[#allocation3 + $0x70] sm:$0xff]  ;;  %v351_v7 = vld [vmem:[#allocation2 + $0x70] sm:$0xff] }
  0x76   :  { %v1519_v38 = vpop.eup %1518  ;;  %275 = vst.msk [vmem:[#allocation3 + $0xb0] sm:$0xff] %vm123_vm2, %v269_v30  ;;  %272 = vst.msk [vmem:[#allocation2 + $0xb0] sm:$0xff] %vm123_vm2, %v266_v31  ;;  %v289_v39 = vmul.f32 %v1517_v33, %v1666_v23  ;;  %v286_v40 = vmul.f32 %v1517_v33, %v1671_v28  ;;  %v387_v8 = vld [vmem:[#allocation3 + $0x78] sm:$0xff]  ;;  %v352_v10 = vld [vmem:[#allocation2 + $0x78] sm:$0xff] }
  0x77   :  { %v1521_v41 = vpop.eup %1520  ;;  %1273 = vmatmul.mubr.msk.f32.gmra.mxu0 %vm123_vm2, %v378_v26  ;;  %1376 = vmatmul.mubr.msk.f32.gmra.mxu1 %vm123_vm2, %v343_v27  ;;  %276 = vst.msk [vmem:[#allocation3 + $0xb8] sm:$0xff] %vm123_vm2, %v270_v36  ;;  %273 = vst.msk [vmem:[#allocation2 + $0xb8] sm:$0xff] %vm123_vm2, %v267_v37  ;;  %v290_v42 = vmul.f32 %v1519_v38, %v1673_v29  ;;  %v287_v43 = vmul.f32 %v1519_v38, %v1677_v32  ;;  %v388_v12 = vld [vmem:[#allocation3 + $0x80] sm:$0xff]  ;;  %v353_v13 = vld [vmem:[#allocation2 + $0x80] sm:$0xff] }
  0x78   :  { %v1523_v44 = vpop.eup %1522  ;;  %1275 = vmatprep.mubr.msk.f32.mxu0 %vm1583_vm0, %v1582_v0  ;;  %1378 = vmatprep.mubr.msk.f32.mxu1 %vm1583_vm0, %v1582_v0  ;;  %295 = vst.msk [vmem:[#allocation3 + $0xc0] sm:$0xff] %vm123_vm2, %v289_v39  ;;  %292 = vst.msk [vmem:[#allocation2 + $0xc0] sm:$0xff] %vm123_vm2, %v286_v40  ;;  %v291_v47 = vmul.f32 %v1521_v41, %v1685_v34  ;;  %v288_v48 = vmul.f32 %v1521_v41, %v1687_v35  ;;  %v389_v14 = vld [vmem:[#allocation3 + $0x88] sm:$0xff]  ;;  %v354_v15 = vld [vmem:[#allocation2 + $0x88] sm:$0xff] }
  0x79   :  { %v1525_v49 = vpop.eup %1524  ;;  %296 = vst.msk [vmem:[#allocation3 + $0xc8] sm:$0xff] %vm123_vm2, %v290_v42  ;;  %293 = vst.msk [vmem:[#allocation2 + $0xc8] sm:$0xff] %vm123_vm2, %v287_v43  ;;  %v310_v50 = vmul.f32 %v1523_v44, %v1666_v23  ;;  %v307_v51 = vmul.f32 %v1523_v44, %v1671_v28  ;;  %v390_v16 = vld [vmem:[#allocation3 + $0x90] sm:$0xff]  ;;  %v355_v17 = vld [vmem:[#allocation2 + $0x90] sm:$0xff] }
  0x7a   :  { %v1527_v52 = vpop.eup %1526  ;;  %297 = vst.msk [vmem:[#allocation3 + $0xd0] sm:$0xff] %vm123_vm2, %v291_v47  ;;  %294 = vst.msk [vmem:[#allocation2 + $0xd0] sm:$0xff] %vm123_vm2, %v288_v48  ;;  %v311_v53 = vmul.f32 %v1525_v49, %v1673_v29  ;;  %v308_v54 = vmul.f32 %v1525_v49, %v1677_v32  ;;  %v391_v18 = vld [vmem:[#allocation3 + $0x98] sm:$0xff]  ;;  %v356_v20 = vld [vmem:[#allocation2 + $0x98] sm:$0xff] }
  0x7b   :  { %v1529_v55 = vpop.eup %1528  ;;  %1276 = vmatmul.mubr.msk.f32.gmra.mxu0 %vm123_vm2, %v379_v45  ;;  %1379 = vmatmul.mubr.msk.f32.gmra.mxu1 %vm123_vm2, %v344_v46  ;;  %316 = vst.msk [vmem:[#allocation3 + $0xd8] sm:$0xff] %vm123_vm2, %v310_v50  ;;  %313 = vst.msk [vmem:[#allocation2 + $0xd8] sm:$0xff] %vm123_vm2, %v307_v51  ;;  %v312_v56 = vmul.f32 %v1527_v52, %v1685_v34  ;;  %v309_v57 = vmul.f32 %v1527_v52, %v1687_v35  ;;  %v392_v21 = vld [vmem:[#allocation3 + $0xa0] sm:$0xff]  ;;  %v357_v22 = vld [vmem:[#allocation2 + $0xa0] sm:$0xff] }
  0x7c   :  { %v1531_v58 = vpop.eup %1530  ;;  %1278 = vmatprep.mubr.msk.f32.mxu0 %vm1583_vm0, %v1582_v0  ;;  %1381 = vmatprep.mubr.msk.f32.mxu1 %vm1583_vm0, %v1582_v0  ;;  %317 = vst.msk [vmem:[#allocation3 + $0xe0] sm:$0xff] %vm123_vm2, %v311_v53  ;;  %314 = vst.msk [vmem:[#allocation2 + $0xe0] sm:$0xff] %vm123_vm2, %v308_v54  ;;  %v328_v60 = vmul.f32 %v1529_v55, %v1666_v23  ;;  %v325_v61 = vmul.f32 %v1529_v55, %v1671_v28  ;;  %v381_v23 = vld [vmem:[#allocation3 + $0x48] sm:$0xff]  ;;  %v346_v28 = vld [vmem:[#allocation2 + $0x48] sm:$0xff] }
  0x7d   :  { %v1533_v11 = vpop.eup %1532  ;;  %318 = vst.msk [vmem:[#allocation3 + $0xe8] sm:$0xff] %vm123_vm2, %v312_v56  ;;  %315 = vst.msk [vmem:[#allocation2 + $0xe8] sm:$0xff] %vm123_vm2, %v309_v57  ;;  %v329_v62 = vmul.f32 %v1531_v58, %v1673_v29  ;;  %v326_v63 = vmul.f32 %v1531_v58, %v1677_v32  ;;  %v382_v29 = vld [vmem:[#allocation3 + $0x50] sm:$0xff]  ;;  %v347_v32 = vld [vmem:[#allocation2 + $0x50] sm:$0xff] }
  0x7e   :  { %334 = vst.msk [vmem:[#allocation3 + $0xf0] sm:$0xff] %vm123_vm2, %v328_v60  ;;  %331 = vst.msk [vmem:[#allocation2 + $0xf0] sm:$0xff] %vm123_vm2, %v325_v61  ;;  %v330_v1 = vmul.f32 %v1533_v11, %v1685_v34  ;;  %v327_v2 = vmul.f32 %v1533_v11, %v1687_v35  ;;  %v383_v34 = vld [vmem:[#allocation3 + $0x58] sm:$0xff]  ;;  %v348_v35 = vld [vmem:[#allocation2 + $0x58] sm:$0xff] }
  0x7f   :  { %1279 = vmatmul.mubr.msk.f32.gmra.mxu0 %vm123_vm2, %v380_v9  ;;  %1382 = vmatmul.mubr.msk.f32.gmra.mxu1 %vm123_vm2, %v345_v59  ;;  %335 = vst.msk [vmem:[#allocation3 + $0xf8] sm:$0xff] %vm123_vm2, %v329_v62  ;;  %332 = vst.msk [vmem:[#allocation2 + $0xf8] sm:$0xff] %vm123_vm2, %v326_v63  ;;  %v393_v24 = vld [vmem:[#allocation3 + $0xa8] sm:$0xff]  ;;  %v358_v25 = vld [vmem:[#allocation2 + $0xa8] sm:$0xff] }
  0x80   :  { %1281 = vmatprep.mubr.msk.f32.mxu0 %vm1583_vm0, %v1582_v0  ;;  %1384 = vmatprep.mubr.msk.f32.mxu1 %vm1583_vm0, %v1582_v0  ;;  %336 = vst.msk [vmem:[#allocation3 + $0x100] sm:$0xff] %vm123_vm2, %v330_v1  ;;  %333 = vst.msk [vmem:[#allocation2 + $0x100] sm:$0xff] %vm123_vm2, %v327_v2  ;;  %v394_v26 = vld [vmem:[#allocation3 + $0xb0] sm:$0xff]  ;;  %v359_v27 = vld [vmem:[#allocation2 + $0xb0] sm:$0xff] }
  0x81   :  { %v395_v30 = vld [vmem:[#allocation3 + $0xb8] sm:$0xff]  ;;  %v360_v31 = vld [vmem:[#allocation2 + $0xb8] sm:$0xff]  ;;  %v396_v33 = vld [vmem:[#allocation3 + $0xc0] sm:$0xff] }
  0x82   :  { %v361_v36 = vld [vmem:[#allocation2 + $0xc0] sm:$0xff]  ;;  %v397_v37 = vld [vmem:[#allocation3 + $0xc8] sm:$0xff]  ;;  %v362_v38 = vld [vmem:[#allocation2 + $0xc8] sm:$0xff] }
  0x83   :  { %1282 = vmatmul.mubr.msk.f32.gmra.mxu0 %vm123_vm2, %v381_v23  ;;  %1385 = vmatmul.mubr.msk.f32.gmra.mxu1 %vm123_vm2, %v346_v28  ;;  %v398_v39 = vld [vmem:[#allocation3 + $0xd0] sm:$0xff]  ;;  %v363_v40 = vld [vmem:[#allocation2 + $0xd0] sm:$0xff]  ;;  %v399_v41 = vld [vmem:[#allocation3 + $0xd8] sm:$0xff] }
  0x84   :  { %1284 = vmatprep.mubr.msk.f32.mxu0 %vm1583_vm0, %v1582_v0  ;;  %1387 = vmatprep.mubr.msk.f32.mxu1 %vm1583_vm0, %v1582_v0  ;;  %v364_v42 = vld [vmem:[#allocation2 + $0xd8] sm:$0xff]  ;;  %v400_v43 = vld [vmem:[#allocation3 + $0xe0] sm:$0xff]  ;;  %v365_v44 = vld [vmem:[#allocation2 + $0xe0] sm:$0xff] }
  0x85   :  { %v401_v45 = vld [vmem:[#allocation3 + $0xe8] sm:$0xff]  ;;  %v366_v46 = vld [vmem:[#allocation2 + $0xe8] sm:$0xff]  ;;  %v402_v47 = vld [vmem:[#allocation3 + $0xf0] sm:$0xff] }
  0x86   :  { %v367_v48 = vld [vmem:[#allocation2 + $0xf0] sm:$0xff]  ;;  %v403_v49 = vld [vmem:[#allocation3 + $0xf8] sm:$0xff]  ;;  %v368_v50 = vld [vmem:[#allocation2 + $0xf8] sm:$0xff] }
  0x87   :  { %1285 = vmatmul.mubr.msk.f32.gmra.mxu0 %vm123_vm2, %v382_v29  ;;  %1388 = vmatmul.mubr.msk.f32.gmra.mxu1 %vm123_vm2, %v347_v32  ;;  %v404_v51 = vld [vmem:[#allocation3 + $0x100] sm:$0xff]  ;;  %v369_v52 = vld [vmem:[#allocation2 + $0x100] sm:$0xff] }
  0x88   :  { %1287 = vmatprep.mubr.msk.f32.mxu0 %vm1583_vm0, %v1582_v0  ;;  %1390 = vmatprep.mubr.msk.f32.mxu1 %vm1583_vm0, %v1582_v0 }
  0x8b   :  { %1288 = vmatmul.mubr.msk.f32.gmra.mxu0 %vm123_vm2, %v383_v34  ;;  %1391 = vmatmul.mubr.msk.f32.gmra.mxu1 %vm123_vm2, %v348_v35 }
  0x8c   :  { %1290 = vmatprep.mubr.msk.f32.mxu0 %vm1583_vm0, %v1582_v0  ;;  %1393 = vmatprep.mubr.msk.f32.mxu1 %vm1583_vm0, %v1582_v0 }
  0x8f   :  { %1291 = vmatmul.mubr.msk.f32.gmra.mxu0 %vm123_vm2, %v384_v3  ;;  %1394 = vmatmul.mubr.msk.f32.gmra.mxu1 %vm123_vm2, %v349_v4 }
  0x90   :  { %1293 = vmatprep.mubr.msk.f32.mxu0 %vm1583_vm0, %v1582_v0  ;;  %1396 = vmatprep.mubr.msk.f32.mxu1 %vm1583_vm0, %v1582_v0 }
  0x93   :  { %1294 = vmatmul.mubr.msk.f32.gmra.mxu0 %vm123_vm2, %v385_v19  ;;  %1397 = vmatmul.mubr.msk.f32.gmra.mxu1 %vm123_vm2, %v350_v5 }
  0x94   :  { %1296 = vmatprep.mubr.msk.f32.mxu0 %vm1583_vm0, %v1582_v0  ;;  %1399 = vmatprep.mubr.msk.f32.mxu1 %vm1583_vm0, %v1582_v0 }
  0x97   :  { %1297 = vmatmul.mubr.msk.f32.gmra.mxu0 %vm123_vm2, %v386_v6  ;;  %1400 = vmatmul.mubr.msk.f32.gmra.mxu1 %vm123_vm2, %v351_v7 }
  0x98   :  { %1299 = vmatprep.mubr.msk.f32.mxu0 %vm1583_vm0, %v1582_v0  ;;  %1402 = vmatprep.mubr.msk.f32.mxu1 %vm1583_vm0, %v1582_v0 }
  0x9b   :  { %1300 = vmatmul.mubr.msk.f32.gmra.mxu0 %vm123_vm2, %v387_v8  ;;  %1403 = vmatmul.mubr.msk.f32.gmra.mxu1 %vm123_vm2, %v352_v10 }
  0x9c   :  { %1302 = vmatprep.mubr.msk.f32.mxu0 %vm1583_vm0, %v1582_v0  ;;  %1405 = vmatprep.mubr.msk.f32.mxu1 %vm1583_vm0, %v1582_v0 }
  0x9f   :  { %1303 = vmatmul.mubr.msk.f32.gmra.mxu0 %vm123_vm2, %v388_v12  ;;  %1406 = vmatmul.mubr.msk.f32.gmra.mxu1 %vm123_vm2, %v353_v13 }
  0xa0   :  { %1305 = vmatprep.mubr.msk.f32.mxu0 %vm1583_vm0, %v1582_v0  ;;  %1408 = vmatprep.mubr.msk.f32.mxu1 %vm1583_vm0, %v1582_v0 }
  0xa3   :  { %1306 = vmatmul.mubr.msk.f32.gmra.mxu0 %vm123_vm2, %v389_v14  ;;  %1409 = vmatmul.mubr.msk.f32.gmra.mxu1 %vm123_vm2, %v354_v15 }
  0xa4   :  { %1308 = vmatprep.mubr.msk.f32.mxu0 %vm1583_vm0, %v1582_v0  ;;  %1411 = vmatprep.mubr.msk.f32.mxu1 %vm1583_vm0, %v1582_v0 }
  0xa7   :  { %1309 = vmatmul.mubr.msk.f32.gmra.mxu0 %vm123_vm2, %v390_v16  ;;  %1412 = vmatmul.mubr.msk.f32.gmra.mxu1 %vm123_vm2, %v355_v17 }
  0xa8   :  { %1311 = vmatprep.mubr.msk.f32.mxu0 %vm1583_vm0, %v1582_v0  ;;  %1414 = vmatprep.mubr.msk.f32.mxu1 %vm1583_vm0, %v1582_v0 }
  0xab   :  { %1312 = vmatmul.mubr.msk.f32.gmra.mxu0 %vm123_vm2, %v391_v18  ;;  %1415 = vmatmul.mubr.msk.f32.gmra.mxu1 %vm123_vm2, %v356_v20 }
  0xac   :  { %1314 = vmatprep.mubr.msk.f32.mxu0 %vm1583_vm0, %v1582_v0  ;;  %1417 = vmatprep.mubr.msk.f32.mxu1 %vm1583_vm0, %v1582_v0 }
  0xaf   :  { %1315 = vmatmul.mubr.msk.f32.gmra.mxu0 %vm123_vm2, %v392_v21  ;;  %1418 = vmatmul.mubr.msk.f32.gmra.mxu1 %vm123_vm2, %v357_v22 }
  0xb0   :  { %1317 = vmatprep.mubr.msk.f32.mxu0 %vm1583_vm0, %v1582_v0  ;;  %1420 = vmatprep.mubr.msk.f32.mxu1 %vm1583_vm0, %v1582_v0 }
  0xb3   :  { %1318 = vmatmul.mubr.msk.f32.gmra.mxu0 %vm123_vm2, %v393_v24  ;;  %1421 = vmatmul.mubr.msk.f32.gmra.mxu1 %vm123_vm2, %v358_v25 }
  0xb4   :  { %1320 = vmatprep.mubr.msk.f32.mxu0 %vm1583_vm0, %v1582_v0  ;;  %1423 = vmatprep.mubr.msk.f32.mxu1 %vm1583_vm0, %v1582_v0 }
  0xb7   :  { %1321 = vmatmul.mubr.msk.f32.gmra.mxu0 %vm123_vm2, %v394_v26  ;;  %1424 = vmatmul.mubr.msk.f32.gmra.mxu1 %vm123_vm2, %v359_v27 }
  0xb8   :  { %1323 = vmatprep.mubr.msk.f32.mxu0 %vm1583_vm0, %v1582_v0  ;;  %1426 = vmatprep.mubr.msk.f32.mxu1 %vm1583_vm0, %v1582_v0 }
  0xbb   :  { %1324 = vmatmul.mubr.msk.f32.gmra.mxu0 %vm123_vm2, %v395_v30  ;;  %1427 = vmatmul.mubr.msk.f32.gmra.mxu1 %vm123_vm2, %v360_v31 }
  0xbc   :  { %1326 = vmatprep.mubr.msk.f32.mxu0 %vm1583_vm0, %v1582_v0  ;;  %1429 = vmatprep.mubr.msk.f32.mxu1 %vm1583_vm0, %v1582_v0 }
  0xbf   :  { %1327 = vmatmul.mubr.msk.f32.gmra.mxu0 %vm123_vm2, %v396_v33  ;;  %1430 = vmatmul.mubr.msk.f32.gmra.mxu1 %vm123_vm2, %v361_v36 }
  0xc0   :  { %1329 = vmatprep.mubr.msk.f32.mxu0 %vm1583_vm0, %v1582_v0  ;;  %1432 = vmatprep.mubr.msk.f32.mxu1 %vm1583_vm0, %v1582_v0 }
  0xc3   :  { %1330 = vmatmul.mubr.msk.f32.gmra.mxu0 %vm123_vm2, %v397_v37  ;;  %1433 = vmatmul.mubr.msk.f32.gmra.mxu1 %vm123_vm2, %v362_v38 }
  0xc4   :  { %1332 = vmatprep.mubr.msk.f32.mxu0 %vm1583_vm0, %v1582_v0  ;;  %1435 = vmatprep.mubr.msk.f32.mxu1 %vm1583_vm0, %v1582_v0 }
  0xc7   :  { %1333 = vmatmul.mubr.msk.f32.gmra.mxu0 %vm123_vm2, %v398_v39  ;;  %1436 = vmatmul.mubr.msk.f32.gmra.mxu1 %vm123_vm2, %v363_v40 }
  0xc8   :  { %1335 = vmatprep.mubr.msk.f32.mxu0 %vm1583_vm0, %v1582_v0  ;;  %1438 = vmatprep.mubr.msk.f32.mxu1 %vm1583_vm0, %v1582_v0 }
  0xcb   :  { %1336 = vmatmul.mubr.msk.f32.gmra.mxu0 %vm123_vm2, %v399_v41  ;;  %1439 = vmatmul.mubr.msk.f32.gmra.mxu1 %vm123_vm2, %v364_v42 }
  0xcc   :  { %1338 = vmatprep.mubr.msk.f32.mxu0 %vm1583_vm0, %v1582_v0  ;;  %1441 = vmatprep.mubr.msk.f32.mxu1 %vm1583_vm0, %v1582_v0 }
  0xcf   :  { %1339 = vmatmul.mubr.msk.f32.gmra.mxu0 %vm123_vm2, %v400_v43  ;;  %1442 = vmatmul.mubr.msk.f32.gmra.mxu1 %vm123_vm2, %v365_v44 }
  0xd0   :  { %1341 = vmatprep.mubr.msk.f32.mxu0 %vm1583_vm0, %v1582_v0  ;;  %1444 = vmatprep.mubr.msk.f32.mxu1 %vm1583_vm0, %v1582_v0 }
  0xd3   :  { %1342 = vmatmul.mubr.msk.f32.gmra.mxu0 %vm123_vm2, %v401_v45  ;;  %1445 = vmatmul.mubr.msk.f32.gmra.mxu1 %vm123_vm2, %v366_v46 }
  0xd4   :  { %1344 = vmatprep.mubr.msk.f32.mxu0 %vm1583_vm0, %v1582_v0  ;;  %1447 = vmatprep.mubr.msk.f32.mxu1 %vm1583_vm0, %v1582_v0 }
  0xd7   :  { %1345 = vmatmul.mubr.msk.f32.gmra.mxu0 %vm123_vm2, %v402_v47  ;;  %1448 = vmatmul.mubr.msk.f32.gmra.mxu1 %vm123_vm2, %v367_v48 }
  0xd8   :  { %1347 = vmatprep.mubr.msk.f32.mxu0 %vm1583_vm0, %v1582_v0  ;;  %1450 = vmatprep.mubr.msk.f32.mxu1 %vm1583_vm0, %v1582_v0 }
  0xdb   :  { %1348 = vmatmul.mubr.msk.f32.gmra.mxu0 %vm123_vm2, %v403_v49  ;;  %1451 = vmatmul.mubr.msk.f32.gmra.mxu1 %vm123_vm2, %v368_v50 }
  0xdc   :  { %1350 = vmatprep.mubr.msk.f32.mxu0 %vm1583_vm0, %v1582_v0  ;;  %1453 = vmatprep.mubr.msk.f32.mxu1 %vm1583_vm0, %v1582_v0 }
  0xdf   :  { %1351 = vmatmul.mubr.msk.f32.gmra.mxu0 %vm123_vm2, %v404_v51  ;;  %1454 = vmatmul.mubr.msk.f32.gmra.mxu1 %vm123_vm2, %v369_v52 }
  0xed   :  { %v576_v53 = vpop.f32.mrf.mxu0  ;;  %v908_v54 = vpop.f32.mrf.mxu1 }
  0xee   :  { %v909_v55 = vadd.f32 %v908_v54, %v576_v53 }
  0xef   :  { %v1256_v56 = vpop.f32.mrf.mxu0  ;;  %v1359_v57 = vpop.f32.mrf.mxu1 }
  0xf0   :  { %1073 = vst.msk [vmem:[%s2193_s6] sm:$0xff] %vm1072_vm9, %v909_v55 }
  0xf1   :  { %v581_v58 = vpop.f32.mrf.mxu0  ;;  %v913_v9 = vpop.f32.mrf.mxu1 }
  0xf2   :  { %v914_v0 = vadd.f32 %v913_v9, %v581_v58 }
  0xf3   :  { %v1259_v59 = vpop.f32.mrf.mxu0  ;;  %v1362_v60 = vpop.f32.mrf.mxu1 }
  0xf4   :  { %1074 = vst.msk [vmem:[%s2193_s6 + $0x8] sm:$0xff] %vm1072_vm9, %v914_v0 }
  0xf5   :  { %v586_v61 = vpop.f32.mrf.mxu0  ;;  %v918_v11 = vpop.f32.mrf.mxu1 }
  0xf6   :  { %v919_v62 = vadd.f32 %v918_v11, %v586_v61 }
  0xf7   :  { %v1262_v63 = vpop.f32.mrf.mxu0  ;;  %v1365_v1 = vpop.f32.mrf.mxu1 }
  0xf8   :  { %1075 = vst.msk [vmem:[%s2193_s6 + $0x10] sm:$0xff] %vm1072_vm9, %v919_v62 }
 0x12b   :  { %v591_v2 = vpop.f32.mrf.mxu0  ;;  %v923_v23 = vpop.f32.mrf.mxu1 }
 0x12c   :  { %v924_v28 = vadd.f32 %v923_v23, %v591_v2 }
 0x12d   :  { %v1265_v29 = vpop.f32.mrf.mxu0  ;;  %v1368_v32 = vpop.f32.mrf.mxu1 }
 0x12e   :  { %1076 = vst.msk [vmem:[%s2193_s6 + $0x18] sm:$0xff] %vm1072_vm9, %v924_v28 }
 0x12f   :  { %v596_v34 = vpop.f32.mrf.mxu0  ;;  %v928_v35 = vpop.f32.mrf.mxu1 }
 0x130   :  { %v929_v3 = vadd.f32 %v928_v35, %v596_v34 }
 0x131   :  { %v1268_v4 = vpop.f32.mrf.mxu0  ;;  %v1371_v19 = vpop.f32.mrf.mxu1 }
 0x132   :  { %1077 = vst.msk [vmem:[%s2193_s6 + $0x20] sm:$0xff] %vm1072_vm9, %v929_v3 }
 0x133   :  { %v601_v5 = vpop.f32.mrf.mxu0  ;;  %v933_v6 = vpop.f32.mrf.mxu1 }
 0x134   :  { %v934_v7 = vadd.f32 %v933_v6, %v601_v5 }
 0x135   :  { %v1271_v8 = vpop.f32.mrf.mxu0  ;;  %v1374_v10 = vpop.f32.mrf.mxu1 }
 0x136   :  { %1078 = vst.msk [vmem:[%s2193_s6 + $0x28] sm:$0xff] %vm1072_vm9, %v934_v7 }
 0x137   :  { %v606_v12 = vpop.f32.mrf.mxu0  ;;  %v938_v13 = vpop.f32.mrf.mxu1 }
 0x138   :  { %v939_v14 = vadd.f32 %v938_v13, %v606_v12 }
 0x139   :  { %v1274_v15 = vpop.f32.mrf.mxu0  ;;  %v1377_v16 = vpop.f32.mrf.mxu1 }
 0x13a   :  { %1079 = vst.msk [vmem:[%s2193_s6 + $0x30] sm:$0xff] %vm1072_vm9, %v939_v14 }
 0x13b   :  { %v611_v17 = vpop.f32.mrf.mxu0  ;;  %v943_v18 = vpop.f32.mrf.mxu1 }
 0x13c   :  { %v944_v20 = vadd.f32 %v943_v18, %v611_v17 }
 0x13d   :  { %v1277_v21 = vpop.f32.mrf.mxu0  ;;  %v1380_v22 = vpop.f32.mrf.mxu1 }
 0x13e   :  { %1080 = vst.msk [vmem:[%s2193_s6 + $0x38] sm:$0xff] %vm1072_vm9, %v944_v20 }
 0x13f   :  { %v616_v24 = vpop.f32.mrf.mxu0  ;;  %v948_v25 = vpop.f32.mrf.mxu1 }
 0x140   :  { %v949_v26 = vadd.f32 %v948_v25, %v616_v24 }
 0x141   :  { %v1280_v27 = vpop.f32.mrf.mxu0  ;;  %v1383_v30 = vpop.f32.mrf.mxu1 }
 0x142   :  { %1081 = vst.msk [vmem:[%s2193_s6 + $0x40] sm:$0xff] %vm1072_vm9, %v949_v26 }
 0x143   :  { %v621_v31 = vpop.f32.mrf.mxu0  ;;  %v953_v33 = vpop.f32.mrf.mxu1 }
 0x144   :  { %v954_v36 = vadd.f32 %v953_v33, %v621_v31 }
 0x145   :  { %v1283_v37 = vpop.f32.mrf.mxu0  ;;  %v1386_v38 = vpop.f32.mrf.mxu1 }
 0x146   :  { %1082 = vst.msk [vmem:[%s2193_s6 + $0x48] sm:$0xff] %vm1072_vm9, %v954_v36 }
 0x147   :  { %v626_v39 = vpop.f32.mrf.mxu0  ;;  %v958_v40 = vpop.f32.mrf.mxu1 }
 0x148   :  { %v959_v41 = vadd.f32 %v958_v40, %v626_v39 }
 0x149   :  { %v1286_v42 = vpop.f32.mrf.mxu0  ;;  %v1389_v43 = vpop.f32.mrf.mxu1 }
 0x14a   :  { %1083 = vst.msk [vmem:[%s2193_s6 + $0x50] sm:$0xff] %vm1072_vm9, %v959_v41 }
 0x14b   :  { %v631_v44 = vpop.f32.mrf.mxu0  ;;  %v963_v45 = vpop.f32.mrf.mxu1 }
 0x14c   :  { %v964_v46 = vadd.f32 %v963_v45, %v631_v44 }
 0x14d   :  { %v1289_v47 = vpop.f32.mrf.mxu0  ;;  %v1392_v48 = vpop.f32.mrf.mxu1 }
 0x14e   :  { %1084 = vst.msk [vmem:[%s2193_s6 + $0x58] sm:$0xff] %vm1072_vm9, %v964_v46 }
 0x14f   :  { %v636_v49 = vpop.f32.mrf.mxu0  ;;  %v968_v50 = vpop.f32.mrf.mxu1 }
 0x150   :  { %v969_v51 = vadd.f32 %v968_v50, %v636_v49 }
 0x151   :  { %v1292_v52 = vpop.f32.mrf.mxu0  ;;  %v1395_v53 = vpop.f32.mrf.mxu1 }
 0x152   :  { %1085 = vst.msk [vmem:[%s2193_s6 + $0x60] sm:$0xff] %vm1072_vm9, %v969_v51 }
 0x153   :  { %v641_v54 = vpop.f32.mrf.mxu0  ;;  %v973_v55 = vpop.f32.mrf.mxu1 }
 0x154   :  { %v974_v56 = vadd.f32 %v973_v55, %v641_v54 }
 0x155   :  { %v1295_v57 = vpop.f32.mrf.mxu0  ;;  %v1398_v58 = vpop.f32.mrf.mxu1 }
 0x156   :  { %1086 = vst.msk [vmem:[%s2193_s6 + $0x68] sm:$0xff] %vm1072_vm9, %v974_v56 }
 0x157   :  { %v646_v9 = vpop.f32.mrf.mxu0  ;;  %v978_v0 = vpop.f32.mrf.mxu1 }
 0x158   :  { %v979_v59 = vadd.f32 %v978_v0, %v646_v9 }
 0x159   :  { %v1298_v60 = vpop.f32.mrf.mxu0  ;;  %v1401_v61 = vpop.f32.mrf.mxu1 }
 0x15a   :  { %1087 = vst.msk [vmem:[%s2193_s6 + $0x70] sm:$0xff] %vm1072_vm9, %v979_v59 }
 0x15b   :  { %v651_v11 = vpop.f32.mrf.mxu0  ;;  %v983_v62 = vpop.f32.mrf.mxu1 }
 0x15c   :  { %v984_v63 = vadd.f32 %v983_v62, %v651_v11 }
 0x15d   :  { %v1301_v1 = vpop.f32.mrf.mxu0  ;;  %v1404_v2 = vpop.f32.mrf.mxu1 }
 0x15e   :  { %1088 = vst.msk [vmem:[%s2193_s6 + $0x78] sm:$0xff] %vm1072_vm9, %v984_v63 }
 0x15f   :  { %v656_v23 = vpop.f32.mrf.mxu0  ;;  %v988_v28 = vpop.f32.mrf.mxu1 }
 0x160   :  { %v989_v29 = vadd.f32 %v988_v28, %v656_v23 }
 0x161   :  { %v1304_v32 = vpop.f32.mrf.mxu0  ;;  %v1407_v34 = vpop.f32.mrf.mxu1 }
 0x162   :  { %1089 = vst.msk [vmem:[%s2193_s6 + $0x80] sm:$0xff] %vm1072_vm9, %v989_v29 }
 0x163   :  { %v661_v35 = vpop.f32.mrf.mxu0  ;;  %v993_v3 = vpop.f32.mrf.mxu1 }
 0x164   :  { %v994_v4 = vadd.f32 %v993_v3, %v661_v35 }
 0x165   :  { %v1307_v19 = vpop.f32.mrf.mxu0  ;;  %v1410_v5 = vpop.f32.mrf.mxu1 }
 0x166   :  { %1090 = vst.msk [vmem:[%s2193_s6 + $0x88] sm:$0xff] %vm1072_vm9, %v994_v4 }
 0x167   :  { %v666_v6 = vpop.f32.mrf.mxu0  ;;  %v998_v7 = vpop.f32.mrf.mxu1 }
 0x168   :  { %v999_v8 = vadd.f32 %v998_v7, %v666_v6 }
 0x169   :  { %v1310_v10 = vpop.f32.mrf.mxu0  ;;  %v1413_v12 = vpop.f32.mrf.mxu1 }
 0x16a   :  { %1091 = vst.msk [vmem:[%s2193_s6 + $0x90] sm:$0xff] %vm1072_vm9, %v999_v8 }
 0x16b   :  { %v671_v13 = vpop.f32.mrf.mxu0  ;;  %v1003_v14 = vpop.f32.mrf.mxu1 }
 0x16c   :  { %v1004_v15 = vadd.f32 %v1003_v14, %v671_v13 }
 0x16d   :  { %v1313_v16 = vpop.f32.mrf.mxu0  ;;  %v1416_v17 = vpop.f32.mrf.mxu1 }
 0x16e   :  { %1092 = vst.msk [vmem:[%s2193_s6 + $0x98] sm:$0xff] %vm1072_vm9, %v1004_v15 }
 0x16f   :  { %v676_v18 = vpop.f32.mrf.mxu0  ;;  %v1008_v20 = vpop.f32.mrf.mxu1 }
 0x170   :  { %v1009_v21 = vadd.f32 %v1008_v20, %v676_v18 }
 0x171   :  { %v1316_v22 = vpop.f32.mrf.mxu0  ;;  %v1419_v24 = vpop.f32.mrf.mxu1 }
 0x172   :  { %1093 = vst.msk [vmem:[%s2193_s6 + $0xa0] sm:$0xff] %vm1072_vm9, %v1009_v21 }
 0x173   :  { %v681_v25 = vpop.f32.mrf.mxu0  ;;  %v1013_v26 = vpop.f32.mrf.mxu1 }
 0x174   :  { %v1014_v27 = vadd.f32 %v1013_v26, %v681_v25 }
 0x175   :  { %v1319_v30 = vpop.f32.mrf.mxu0  ;;  %v1422_v31 = vpop.f32.mrf.mxu1 }
 0x176   :  { %1094 = vst.msk [vmem:[%s2193_s6 + $0xa8] sm:$0xff] %vm1072_vm9, %v1014_v27 }
 0x177   :  { %v686_v33 = vpop.f32.mrf.mxu0  ;;  %v1018_v36 = vpop.f32.mrf.mxu1 }
 0x178   :  { %v1019_v37 = vadd.f32 %v1018_v36, %v686_v33 }
 0x179   :  { %v1322_v38 = vpop.f32.mrf.mxu0  ;;  %v1425_v39 = vpop.f32.mrf.mxu1 }
 0x17a   :  { %1095 = vst.msk [vmem:[%s2193_s6 + $0xb0] sm:$0xff] %vm1072_vm9, %v1019_v37 }
 0x17b   :  { %v691_v40 = vpop.f32.mrf.mxu0  ;;  %v1023_v41 = vpop.f32.mrf.mxu1 }
 0x17c   :  { %v1024_v42 = vadd.f32 %v1023_v41, %v691_v40 }
 0x17d   :  { %v1325_v43 = vpop.f32.mrf.mxu0  ;;  %v1428_v44 = vpop.f32.mrf.mxu1 }
 0x17e   :  { %1096 = vst.msk [vmem:[%s2193_s6 + $0xb8] sm:$0xff] %vm1072_vm9, %v1024_v42 }
 0x17f   :  { %v696_v45 = vpop.f32.mrf.mxu0  ;;  %v1028_v46 = vpop.f32.mrf.mxu1 }
 0x180   :  { %v1029_v47 = vadd.f32 %v1028_v46, %v696_v45 }
 0x181   :  { %v1328_v48 = vpop.f32.mrf.mxu0  ;;  %v1431_v49 = vpop.f32.mrf.mxu1 }
 0x182   :  { %1097 = vst.msk [vmem:[%s2193_s6 + $0xc0] sm:$0xff] %vm1072_vm9, %v1029_v47 }
 0x183   :  { %v701_v50 = vpop.f32.mrf.mxu0  ;;  %v1033_v51 = vpop.f32.mrf.mxu1 }
 0x184   :  { %v1034_v52 = vadd.f32 %v1033_v51, %v701_v50 }
 0x185   :  { %v1331_v53 = vpop.f32.mrf.mxu0  ;;  %v1434_v54 = vpop.f32.mrf.mxu1 }
 0x186   :  { %1098 = vst.msk [vmem:[%s2193_s6 + $0xc8] sm:$0xff] %vm1072_vm9, %v1034_v52 }
 0x187   :  { %v706_v55 = vpop.f32.mrf.mxu0  ;;  %v1038_v56 = vpop.f32.mrf.mxu1 }
 0x188   :  { %v1039_v57 = vadd.f32 %v1038_v56, %v706_v55 }
 0x189   :  { %v1334_v58 = vpop.f32.mrf.mxu0  ;;  %v1437_v9 = vpop.f32.mrf.mxu1 }
 0x18a   :  { %1099 = vst.msk [vmem:[%s2193_s6 + $0xd0] sm:$0xff] %vm1072_vm9, %v1039_v57 }
 0x18b   :  { %v711_v0 = vpop.f32.mrf.mxu0  ;;  %v1043_v59 = vpop.f32.mrf.mxu1 }
 0x18c   :  { %v1044_v60 = vadd.f32 %v1043_v59, %v711_v0 }
 0x18d   :  { %v1337_v61 = vpop.f32.mrf.mxu0  ;;  %v1440_v11 = vpop.f32.mrf.mxu1 }
 0x18e   :  { %1100 = vst.msk [vmem:[%s2193_s6 + $0xd8] sm:$0xff] %vm1072_vm9, %v1044_v60 }
 0x18f   :  { %v716_v62 = vpop.f32.mrf.mxu0  ;;  %v1048_v63 = vpop.f32.mrf.mxu1 }
 0x190   :  { %v1049_v1 = vadd.f32 %v1048_v63, %v716_v62 }
 0x191   :  { %v1340_v2 = vpop.f32.mrf.mxu0  ;;  %v1443_v23 = vpop.f32.mrf.mxu1 }
 0x192   :  { %1101 = vst.msk [vmem:[%s2193_s6 + $0xe0] sm:$0xff] %vm1072_vm9, %v1049_v1 }
 0x193   :  { %v721_v28 = vpop.f32.mrf.mxu0  ;;  %v1053_v29 = vpop.f32.mrf.mxu1 }
 0x194   :  { %v1054_v32 = vadd.f32 %v1053_v29, %v721_v28 }
 0x195   :  { %v1343_v34 = vpop.f32.mrf.mxu0  ;;  %v1446_v35 = vpop.f32.mrf.mxu1 }
 0x196   :  { %1102 = vst.msk [vmem:[%s2193_s6 + $0xe8] sm:$0xff] %vm1072_vm9, %v1054_v32 }
 0x197   :  { %v726_v3 = vpop.f32.mrf.mxu0  ;;  %v1058_v4 = vpop.f32.mrf.mxu1 }
 0x198   :  { %v1059_v19 = vadd.f32 %v1058_v4, %v726_v3 }
 0x199   :  { %v1346_v5 = vpop.f32.mrf.mxu0  ;;  %v1449_v6 = vpop.f32.mrf.mxu1 }
 0x19a   :  { %1103 = vst.msk [vmem:[%s2193_s6 + $0xf0] sm:$0xff] %vm1072_vm9, %v1059_v19 }
 0x19b   :  { %v731_v7 = vpop.f32.mrf.mxu0  ;;  %v1063_v8 = vpop.f32.mrf.mxu1 }
 0x19c   :  { %v1064_v10 = vadd.f32 %v1063_v8, %v731_v7 }
 0x19d   :  { %v1349_v12 = vpop.f32.mrf.mxu0  ;;  %v1452_v13 = vpop.f32.mrf.mxu1 }
 0x19e   :  { %1104 = vst.msk [vmem:[%s2193_s6 + $0xf8] sm:$0xff] %vm1072_vm9, %v1064_v10 }
 0x19f   :  { %v736_v14 = vpop.f32.mrf.mxu0  ;;  %v1068_v15 = vpop.f32.mrf.mxu1 }
 0x1a0   :  { %v1069_v16 = vadd.f32 %v1068_v15, %v736_v14 }
 0x1a1   :  { %v1352_v17 = vpop.f32.mrf.mxu0  ;;  %v1455_v18 = vpop.f32.mrf.mxu1 }
 0x1a2   :  { %1105 = vst.msk [vmem:[%s2193_s6 + $0x100] sm:$0xff] %vm1072_vm9, %v1069_v16 }
 0x1a3   :  { %1110 = vsyncpa [#allocation5], 1 }
 0x1a4   :  { %1111 = vsyncpa [#allocation7], 1 }

// kernel: pgccphat_forward.8
= control target key start
LH: loop header
LB: loop body
LE: loop exit
PB: predicated region body
PF: predicated region fallthrough
CT: control target
= control target key end

     0   :  { %vm241_vm0 = vcmask 1040384   ;;  %vm242_vm1 = vcmask 1041408   ;;  %v967_v0 = vmov 0.0   ;;  %v968_v2 = vmov 65535   ;;  %s1345_s1 = inlined_call_operand.vmem [shape: bf16[99,32], index: 1, kind: input, shape index: {}]   ;;  %s1346_s0 = inlined_call_operand.vmem [shape: bf16[270,99], index: 0, kind: input, shape index: {}]   ;;  %s1347_s2 = inlined_call_operand.vmem [shape: f32[1,32], index: 2, kind: input, shape index: {}]   ;;  %s1348_s3 = inlined_call_operand.vmem [shape: f32[1,32], index: 3, kind: input, shape index: {}]   ;;  %s1349_s4 = inlined_call_operand.vmem [shape: bf16[270,32], index: 4, kind: output, shape index: {}]  }
   0x1   :  { %844 = vmatprep.subr.bf16.mxu0 %v967_v0  ;;  %v943_v1 = vld [vmem:[%s1345_s1 + $0x30] ss:$0 sps:$4 sm:$0x33]   ;;  %v243_v3 = vsel %vm241_vm0, 4294967295, %v968_v2  ;;  %926 = vmatprep.subr.bf16.mxu1 %v967_v0  ;;  %vm969_vm2 = vmmov 0   ;;  %v944_v6 = vld [vmem:[%s1345_s1 + $0x28] sm:$0xff]  }
   0x2   :  { %v244_v4 = vsel %vm242_vm1, %v243_v3, 0  ;;  %858 = vmatprep.mubr.msk.bf16.mxu0 %vm969_vm2, %v967_v0  ;;  %894 = vmatprep.mubr.msk.bf16.mxu1 %vm969_vm2, %v967_v0  ;;  %v945_v7 = vld [vmem:[%s1345_s1 + $0x20] sm:$0xff]   ;;  %v946_v8 = vld [vmem:[%s1345_s1 + $0x18] sm:$0xff]   ;;  %v947_v9 = vld [vmem:[%s1345_s1 + $0x10] sm:$0xff]   ;;  %vm189_vm3 = vcmask 809984   ;;  %vm669_vm4 = vcmask 257024  }
   0x3   :  { %v246_v5 = vand.u32 %v943_v1, %v244_v4  ;;  %v948_v10 = vld [vmem:[%s1345_s1 + $0x8] sm:$0xff]   ;;  %v949_v11 = vld [vmem:[%s1345_s1] sm:$0xff]   ;;  %v953_v15 = vld [vmem:[%s1346_s0 + $0x50] sm:$0xff]   ;;  %vm703_vm5 = vcmask 256000  }
   0x4   :  { %v950_v12 = vld [vmem:[%s1346_s0] sm:$0xff]   ;;  %v951_v13 = vld [vmem:[%s1346_s0 + $0x48] sm:$0xff]   ;;  %v954_v16 = vld [vmem:[%s1346_s0 + $0x10] sm:$0xff]  }
   0x5   :  { %845 = vmatpush3.bf16.msra.mxu0 %v246_v5  ;;  %933 = vmatpush3.bf16.msra.mxu1 %v246_v5  ;;  %v952_v14 = vld [vmem:[%s1346_s0 + $0x8] sm:$0xff]   ;;  %v955_v17 = vld [vmem:[%s1346_s0 + $0x58] sm:$0xff]   ;;  %v957_v19 = vld [vmem:[%s1346_s0 + $0x60] sm:$0xff]  }
   0x6   :  { %846 = vmatprep.subr.bf16.mxu0 %v967_v0  ;;  %927 = vmatprep.subr.bf16.mxu1 %v967_v0  ;;  %v956_v18 = vld [vmem:[%s1346_s0 + $0x18] sm:$0xff]   ;;  %v958_v20 = vld [vmem:[%s1346_s0 + $0x20] sm:$0xff]   ;;  %v959_v21 = vld [vmem:[%s1346_s0 + $0x68] sm:$0xff]  }
   0x7   :  { %v960_v22 = vld [vmem:[%s1346_s0 + $0x28] sm:$0xff]   ;;  %v961_v23 = vld [vmem:[%s1346_s0 + $0x70] sm:$0xff]   ;;  %v963_v25 = vld [vmem:[%s1346_s0 + $0x78] sm:$0xff]  }
   0x8   :  { %v962_v24 = vld [vmem:[%s1346_s0 + $0x30] sm:$0xff]   ;;  %v964_v26 = vld [vmem:[%s1346_s0 + $0x38] sm:$0xff]   ;;  %v965_v27 = vld [vmem:[%s1346_s0 + $0x80] sm:$0x7f]  }
   0x9   :  { %847 = vmatpush3.bf16.msra.mxu0 %v944_v6  ;;  %934 = vmatpush3.bf16.msra.mxu1 %v944_v6  ;;  %v966_v28 = vld [vmem:[%s1346_s0 + $0x40] sm:$0xff]  }
   0xa   :  { %848 = vmatprep.subr.bf16.mxu0 %v967_v0  ;;  %928 = vmatprep.subr.bf16.mxu1 %v967_v0  ;;  %v1135_v29 = vld [vmem:[%s1347_s2] ss:$0 sm:$0xff] }
   0xb   :  { %v1140_v31 = vld [vmem:[%s1348_s3] ss:$0 sm:$0xff] }
   0xd   :  { %849 = vmatpush3.bf16.msra.mxu0 %v945_v7  ;;  %935 = vmatpush3.bf16.msra.mxu1 %v945_v7 }
   0xe   :  { %850 = vmatprep.subr.bf16.mxu0 %v967_v0  ;;  %929 = vmatprep.subr.bf16.mxu1 %v967_v0 }
  0x11   :  { %851 = vmatpush3.bf16.msra.mxu0 %v946_v8  ;;  %936 = vmatpush3.bf16.msra.mxu1 %v946_v8 }
  0x12   :  { %852 = vmatprep.subr.bf16.mxu0 %v967_v0  ;;  %930 = vmatprep.subr.bf16.mxu1 %v967_v0 }
  0x15   :  { %853 = vmatpush3.bf16.msra.mxu0 %v947_v9  ;;  %937 = vmatpush3.bf16.msra.mxu1 %v947_v9 }
  0x16   :  { %854 = vmatprep.subr.bf16.mxu0 %v967_v0  ;;  %931 = vmatprep.subr.bf16.mxu1 %v967_v0 }
  0x19   :  { %855 = vmatpush3.bf16.msra.mxu0 %v948_v10  ;;  %938 = vmatpush3.bf16.msra.mxu1 %v948_v10 }
  0x1a   :  { %856 = vmatprep.subr.bf16.mxu0 %v967_v0  ;;  %932 = vmatprep.subr.bf16.mxu1 %v967_v0 }
  0x1d   :  { %857 = vmatpush3.bf16.msra.mxu0 %v949_v11  ;;  %939 = vmatpush3.bf16.msra.mxu1 %v949_v11 }
  0x20   :  { %859 = vmatmul.mubr.msk.bf16.vlgmr.msra.gmra.mxu0 %vm189_vm3, %v950_v12  ;;  %895 = vmatmul.mubr.msk.bf16.vlgmr.msra.gmra.mxu1 %vm189_vm3, %v951_v13 }
  0x21   :  { %862 = vmatprep.mubr.msk.bf16.mxu0 %vm969_vm2, %v967_v0  ;;  %898 = vmatprep.mubr.msk.bf16.mxu1 %vm969_vm2, %v967_v0 }
  0x28   :  { %863 = vmatmul.mubr.msk.bf16.gmra.mxu0 %vm189_vm3, %v952_v14  ;;  %899 = vmatmul.mubr.msk.bf16.gmra.mxu1 %vm189_vm3, %v953_v15 }
  0x29   :  { %866 = vmatprep.mubr.msk.bf16.mxu0 %vm969_vm2, %v967_v0  ;;  %902 = vmatprep.mubr.msk.bf16.mxu1 %vm969_vm2, %v967_v0 }
  0x30   :  { %867 = vmatmul.mubr.msk.bf16.gmra.mxu0 %vm189_vm3, %v954_v16  ;;  %903 = vmatmul.mubr.msk.bf16.gmra.mxu1 %vm189_vm3, %v955_v17 }
  0x31   :  { %870 = vmatprep.mubr.msk.bf16.mxu0 %vm969_vm2, %v967_v0  ;;  %906 = vmatprep.mubr.msk.bf16.mxu1 %vm969_vm2, %v967_v0 }
  0x38   :  { %871 = vmatmul.mubr.msk.bf16.gmra.mxu0 %vm189_vm3, %v956_v18  ;;  %907 = vmatmul.mubr.msk.bf16.gmra.mxu1 %vm189_vm3, %v957_v19 }
  0x39   :  { %874 = vmatprep.mubr.msk.bf16.mxu0 %vm969_vm2, %v967_v0  ;;  %910 = vmatprep.mubr.msk.bf16.mxu1 %vm969_vm2, %v967_v0 }
  0x40   :  { %875 = vmatmul.mubr.msk.bf16.gmra.mxu0 %vm189_vm3, %v958_v20  ;;  %911 = vmatmul.mubr.msk.bf16.gmra.mxu1 %vm189_vm3, %v959_v21 }
  0x41   :  { %878 = vmatprep.mubr.msk.bf16.mxu0 %vm969_vm2, %v967_v0  ;;  %914 = vmatprep.mubr.msk.bf16.mxu1 %vm969_vm2, %v967_v0 }
  0x48   :  { %879 = vmatmul.mubr.msk.bf16.gmra.mxu0 %vm189_vm3, %v960_v22  ;;  %915 = vmatmul.mubr.msk.bf16.gmra.mxu1 %vm189_vm3, %v961_v23 }
  0x49   :  { %882 = vmatprep.mubr.msk.bf16.mxu0 %vm969_vm2, %v967_v0  ;;  %918 = vmatprep.mubr.msk.bf16.mxu1 %vm969_vm2, %v967_v0 }
  0x50   :  { %883 = vmatmul.mubr.msk.bf16.gmra.mxu0 %vm189_vm3, %v962_v24  ;;  %919 = vmatmul.mubr.msk.bf16.gmra.mxu1 %vm189_vm3, %v963_v25 }
  0x51   :  { %886 = vmatprep.mubr.msk.bf16.mxu0 %vm969_vm2, %v967_v0  ;;  %922 = vmatprep.mubr.msk.bf16.mxu1 %vm969_vm2, %v967_v0 }
  0x58   :  { %887 = vmatmul.mubr.msk.bf16.gmra.mxu0 %vm189_vm3, %v964_v26  ;;  %923 = vmatmul.mubr.msk.bf16.gmra.mxu1 %vm189_vm3, %v965_v27 }
  0x59   :  { %890 = vmatprep.mubr.msk.bf16.mxu0 %vm969_vm2, %v967_v0 }
  0x60   :  { %891 = vmatmul.mubr.msk.bf16.gmra.mxu0 %vm189_vm3, %v966_v28 }
  0xe0   :  { %v282_v30 = vpop.f32.mrf.mxu0  ;;  %v354_v32 = vpop.f32.mrf.mxu1 }
  0xe1   :  { %v424_v33 = vmul.f32 %v1135_v29, %v282_v30  ;;  %v442_v34 = vmul.f32 %v1135_v29, %v354_v32 }
  0xe2   :  { %v860_v35 = vpop.f32.mrf.mxu0  ;;  %v896_v36 = vpop.f32.mrf.mxu1 }
  0xe3   :  { %v465_v37 = vadd.f32 %v1140_v31, %v424_v33  ;;  %v483_v38 = vadd.f32 %v1140_v31, %v442_v34 }
  0xe4   :  { %v285_v39 = vpop.f32.mrf.mxu0  ;;  %v357_v40 = vpop.f32.mrf.mxu1 }
  0xe5   :  { %v499_v41 = vmax.f32 %v465_v37, 0.0  ;;  %v517_v42 = vmax.f32 %v483_v38, 0.0  ;;  %v425_v43 = vmul.f32 %v1135_v29, %v285_v39  ;;  %v443_v44 = vmul.f32 %v1135_v29, %v357_v40 }
  0xe6   :  { %v861_v45 = vpop.f32.mrf.mxu0  ;;  %v897_v46 = vpop.f32.mrf.mxu1 }
  0xe7   :  { %v786_v47 = vpack.c.bf16 %v499_v41, %v499_v41  ;;  %v804_v48 = vpack.c.bf16 %v517_v42, %v517_v42  ;;  %v466_v49 = vadd.f32 %v1140_v31, %v425_v43  ;;  %v484_v50 = vadd.f32 %v1140_v31, %v443_v44 }
  0xe8   :  { %v290_v51 = vpop.f32.mrf.mxu0  ;;  %v362_v52 = vpop.f32.mrf.mxu1 }
  0xe9   :  { %670 = vst.msk [vmem:[%s1349_s4] sm:$0xf] %vm669_vm4, %v786_v47  ;;  %688 = vst.msk [vmem:[%s1349_s4 + $0x48] sm:$0xf] %vm669_vm4, %v804_v48  ;;  %v500_v53 = vmax.f32 %v466_v49, 0.0  ;;  %v518_v54 = vmax.f32 %v484_v50, 0.0  ;;  %v426_v55 = vmul.f32 %v1135_v29, %v290_v51  ;;  %v444_v56 = vmul.f32 %v1135_v29, %v362_v52 }
  0xea   :  { %v864_v57 = vpop.f32.mrf.mxu0  ;;  %v900_v58 = vpop.f32.mrf.mxu1 }
  0xeb   :  { %v787_v59 = vpack.c.bf16 %v500_v53, %v500_v53  ;;  %v805_v60 = vpack.c.bf16 %v518_v54, %v518_v54  ;;  %v467_v61 = vadd.f32 %v1140_v31, %v426_v55  ;;  %v485_v62 = vadd.f32 %v1140_v31, %v444_v56 }
  0xec   :  { %v293_v63 = vpop.f32.mrf.mxu0  ;;  %v365_v0 = vpop.f32.mrf.mxu1 }
  0xed   :  { %671 = vst.msk [vmem:[%s1349_s4 + $0x4] sm:$0xf] %vm669_vm4, %v787_v59  ;;  %689 = vst.msk [vmem:[%s1349_s4 + $0x4c] sm:$0xf] %vm669_vm4, %v805_v60  ;;  %v501_v1 = vmax.f32 %v467_v61, 0.0  ;;  %v519_v2 = vmax.f32 %v485_v62, 0.0  ;;  %v427_v3 = vmul.f32 %v1135_v29, %v293_v63  ;;  %v445_v4 = vmul.f32 %v1135_v29, %v365_v0 }
  0xee   :  { %v865_v5 = vpop.f32.mrf.mxu0  ;;  %v901_v6 = vpop.f32.mrf.mxu1 }
  0xef   :  { %v788_v7 = vpack.c.bf16 %v501_v1, %v501_v1  ;;  %v806_v8 = vpack.c.bf16 %v519_v2, %v519_v2  ;;  %v468_v9 = vadd.f32 %v1140_v31, %v427_v3  ;;  %v486_v10 = vadd.f32 %v1140_v31, %v445_v4 }
  0xf0   :  { %v298_v11 = vpop.f32.mrf.mxu0  ;;  %v370_v12 = vpop.f32.mrf.mxu1 }
  0xf1   :  { %672 = vst.msk [vmem:[%s1349_s4 + $0x8] sm:$0xf] %vm669_vm4, %v788_v7  ;;  %690 = vst.msk [vmem:[%s1349_s4 + $0x50] sm:$0xf] %vm669_vm4, %v806_v8  ;;  %v502_v13 = vmax.f32 %v468_v9, 0.0  ;;  %v520_v14 = vmax.f32 %v486_v10, 0.0  ;;  %v428_v15 = vmul.f32 %v1135_v29, %v298_v11  ;;  %v446_v16 = vmul.f32 %v1135_v29, %v370_v12 }
  0xf2   :  { %v868_v17 = vpop.f32.mrf.mxu0  ;;  %v904_v18 = vpop.f32.mrf.mxu1 }
  0xf3   :  { %v789_v19 = vpack.c.bf16 %v502_v13, %v502_v13  ;;  %v807_v20 = vpack.c.bf16 %v520_v14, %v520_v14  ;;  %v469_v21 = vadd.f32 %v1140_v31, %v428_v15  ;;  %v487_v22 = vadd.f32 %v1140_v31, %v446_v16 }
  0xf4   :  { %v301_v23 = vpop.f32.mrf.mxu0  ;;  %v373_v24 = vpop.f32.mrf.mxu1 }
  0xf5   :  { %673 = vst.msk [vmem:[%s1349_s4 + $0xc] sm:$0xf] %vm669_vm4, %v789_v19  ;;  %691 = vst.msk [vmem:[%s1349_s4 + $0x54] sm:$0xf] %vm669_vm4, %v807_v20  ;;  %v503_v25 = vmax.f32 %v469_v21, 0.0  ;;  %v521_v26 = vmax.f32 %v487_v22, 0.0  ;;  %v429_v27 = vmul.f32 %v1135_v29, %v301_v23  ;;  %v447_v28 = vmul.f32 %v1135_v29, %v373_v24 }
  0xf6   :  { %v869_v30 = vpop.f32.mrf.mxu0  ;;  %v905_v32 = vpop.f32.mrf.mxu1 }
  0xf7   :  { %v790_v33 = vpack.c.bf16 %v503_v25, %v503_v25  ;;  %v808_v34 = vpack.c.bf16 %v521_v26, %v521_v26  ;;  %v470_v35 = vadd.f32 %v1140_v31, %v429_v27  ;;  %v488_v36 = vadd.f32 %v1140_v31, %v447_v28 }
  0xf8   :  { %v306_v37 = vpop.f32.mrf.mxu0  ;;  %v378_v38 = vpop.f32.mrf.mxu1 }
  0xf9   :  { %674 = vst.msk [vmem:[%s1349_s4 + $0x10] sm:$0xf] %vm669_vm4, %v790_v33  ;;  %692 = vst.msk [vmem:[%s1349_s4 + $0x58] sm:$0xf] %vm669_vm4, %v808_v34  ;;  %v504_v39 = vmax.f32 %v470_v35, 0.0  ;;  %v522_v40 = vmax.f32 %v488_v36, 0.0  ;;  %v430_v41 = vmul.f32 %v1135_v29, %v306_v37  ;;  %v448_v42 = vmul.f32 %v1135_v29, %v378_v38 }
  0xfa   :  { %v872_v43 = vpop.f32.mrf.mxu0  ;;  %v908_v44 = vpop.f32.mrf.mxu1 }
  0xfb   :  { %v791_v45 = vpack.c.bf16 %v504_v39, %v504_v39  ;;  %v809_v46 = vpack.c.bf16 %v522_v40, %v522_v40  ;;  %v471_v47 = vadd.f32 %v1140_v31, %v430_v41  ;;  %v489_v48 = vadd.f32 %v1140_v31, %v448_v42 }
  0xfc   :  { %v309_v49 = vpop.f32.mrf.mxu0  ;;  %v381_v50 = vpop.f32.mrf.mxu1 }
  0xfd   :  { %675 = vst.msk [vmem:[%s1349_s4 + $0x14] sm:$0xf] %vm669_vm4, %v791_v45  ;;  %693 = vst.msk [vmem:[%s1349_s4 + $0x5c] sm:$0xf] %vm669_vm4, %v809_v46  ;;  %v505_v51 = vmax.f32 %v471_v47, 0.0  ;;  %v523_v52 = vmax.f32 %v489_v48, 0.0  ;;  %v431_v53 = vmul.f32 %v1135_v29, %v309_v49  ;;  %v449_v54 = vmul.f32 %v1135_v29, %v381_v50 }
  0xfe   :  { %v873_v55 = vpop.f32.mrf.mxu0  ;;  %v909_v56 = vpop.f32.mrf.mxu1 }
  0xff   :  { %v792_v57 = vpack.c.bf16 %v505_v51, %v505_v51  ;;  %v810_v58 = vpack.c.bf16 %v523_v52, %v523_v52  ;;  %v472_v59 = vadd.f32 %v1140_v31, %v431_v53  ;;  %v490_v60 = vadd.f32 %v1140_v31, %v449_v54 }
 0x100   :  { %v314_v61 = vpop.f32.mrf.mxu0  ;;  %v386_v62 = vpop.f32.mrf.mxu1 }
 0x101   :  { %676 = vst.msk [vmem:[%s1349_s4 + $0x18] sm:$0xf] %vm669_vm4, %v792_v57  ;;  %694 = vst.msk [vmem:[%s1349_s4 + $0x60] sm:$0xf] %vm669_vm4, %v810_v58  ;;  %v506_v63 = vmax.f32 %v472_v59, 0.0  ;;  %v524_v0 = vmax.f32 %v490_v60, 0.0  ;;  %v432_v1 = vmul.f32 %v1135_v29, %v314_v61  ;;  %v450_v2 = vmul.f32 %v1135_v29, %v386_v62 }
 0x102   :  { %v876_v3 = vpop.f32.mrf.mxu0  ;;  %v912_v4 = vpop.f32.mrf.mxu1 }
 0x103   :  { %v793_v5 = vpack.c.bf16 %v506_v63, %v506_v63  ;;  %v811_v6 = vpack.c.bf16 %v524_v0, %v524_v0  ;;  %v473_v7 = vadd.f32 %v1140_v31, %v432_v1  ;;  %v491_v8 = vadd.f32 %v1140_v31, %v450_v2 }
 0x104   :  { %v317_v9 = vpop.f32.mrf.mxu0  ;;  %v389_v10 = vpop.f32.mrf.mxu1 }
 0x105   :  { %677 = vst.msk [vmem:[%s1349_s4 + $0x1c] sm:$0xf] %vm669_vm4, %v793_v5  ;;  %695 = vst.msk [vmem:[%s1349_s4 + $0x64] sm:$0xf] %vm669_vm4, %v811_v6  ;;  %v507_v11 = vmax.f32 %v473_v7, 0.0  ;;  %v525_v12 = vmax.f32 %v491_v8, 0.0  ;;  %v433_v13 = vmul.f32 %v1135_v29, %v317_v9  ;;  %v451_v14 = vmul.f32 %v1135_v29, %v389_v10 }
 0x106   :  { %v877_v15 = vpop.f32.mrf.mxu0  ;;  %v913_v16 = vpop.f32.mrf.mxu1 }
 0x107   :  { %v794_v17 = vpack.c.bf16 %v507_v11, %v507_v11  ;;  %v812_v18 = vpack.c.bf16 %v525_v12, %v525_v12  ;;  %v474_v19 = vadd.f32 %v1140_v31, %v433_v13  ;;  %v492_v20 = vadd.f32 %v1140_v31, %v451_v14 }
 0x108   :  { %v322_v21 = vpop.f32.mrf.mxu0  ;;  %v394_v22 = vpop.f32.mrf.mxu1 }
 0x109   :  { %678 = vst.msk [vmem:[%s1349_s4 + $0x20] sm:$0xf] %vm669_vm4, %v794_v17  ;;  %696 = vst.msk [vmem:[%s1349_s4 + $0x68] sm:$0xf] %vm669_vm4, %v812_v18  ;;  %v508_v23 = vmax.f32 %v474_v19, 0.0  ;;  %v526_v24 = vmax.f32 %v492_v20, 0.0  ;;  %v434_v25 = vmul.f32 %v1135_v29, %v322_v21  ;;  %v452_v26 = vmul.f32 %v1135_v29, %v394_v22 }
 0x10a   :  { %v880_v27 = vpop.f32.mrf.mxu0  ;;  %v916_v28 = vpop.f32.mrf.mxu1 }
 0x10b   :  { %v795_v30 = vpack.c.bf16 %v508_v23, %v508_v23  ;;  %v813_v32 = vpack.c.bf16 %v526_v24, %v526_v24  ;;  %v475_v33 = vadd.f32 %v1140_v31, %v434_v25  ;;  %v493_v34 = vadd.f32 %v1140_v31, %v452_v26 }
 0x10c   :  { %v325_v35 = vpop.f32.mrf.mxu0  ;;  %v397_v36 = vpop.f32.mrf.mxu1 }
 0x10d   :  { %679 = vst.msk [vmem:[%s1349_s4 + $0x24] sm:$0xf] %vm669_vm4, %v795_v30  ;;  %697 = vst.msk [vmem:[%s1349_s4 + $0x6c] sm:$0xf] %vm669_vm4, %v813_v32  ;;  %v509_v37 = vmax.f32 %v475_v33, 0.0  ;;  %v527_v38 = vmax.f32 %v493_v34, 0.0  ;;  %v435_v39 = vmul.f32 %v1135_v29, %v325_v35  ;;  %v453_v40 = vmul.f32 %v1135_v29, %v397_v36 }
 0x10e   :  { %v881_v41 = vpop.f32.mrf.mxu0  ;;  %v917_v42 = vpop.f32.mrf.mxu1 }
 0x10f   :  { %v796_v43 = vpack.c.bf16 %v509_v37, %v509_v37  ;;  %v814_v44 = vpack.c.bf16 %v527_v38, %v527_v38  ;;  %v476_v45 = vadd.f32 %v1140_v31, %v435_v39  ;;  %v494_v46 = vadd.f32 %v1140_v31, %v453_v40 }
 0x110   :  { %v330_v47 = vpop.f32.mrf.mxu0  ;;  %v402_v48 = vpop.f32.mrf.mxu1 }
 0x111   :  { %680 = vst.msk [vmem:[%s1349_s4 + $0x28] sm:$0xf] %vm669_vm4, %v796_v43  ;;  %698 = vst.msk [vmem:[%s1349_s4 + $0x70] sm:$0xf] %vm669_vm4, %v814_v44  ;;  %v510_v49 = vmax.f32 %v476_v45, 0.0  ;;  %v528_v50 = vmax.f32 %v494_v46, 0.0  ;;  %v436_v51 = vmul.f32 %v1135_v29, %v330_v47  ;;  %v454_v52 = vmul.f32 %v1135_v29, %v402_v48 }
 0x112   :  { %v884_v53 = vpop.f32.mrf.mxu0  ;;  %v920_v54 = vpop.f32.mrf.mxu1 }
 0x113   :  { %v797_v55 = vpack.c.bf16 %v510_v49, %v510_v49  ;;  %v815_v56 = vpack.c.bf16 %v528_v50, %v528_v50  ;;  %v477_v57 = vadd.f32 %v1140_v31, %v436_v51  ;;  %v495_v58 = vadd.f32 %v1140_v31, %v454_v52 }
 0x114   :  { %v333_v59 = vpop.f32.mrf.mxu0  ;;  %v405_v60 = vpop.f32.mrf.mxu1 }
 0x115   :  { %681 = vst.msk [vmem:[%s1349_s4 + $0x2c] sm:$0xf] %vm669_vm4, %v797_v55  ;;  %699 = vst.msk [vmem:[%s1349_s4 + $0x74] sm:$0xf] %vm669_vm4, %v815_v56  ;;  %v511_v61 = vmax.f32 %v477_v57, 0.0  ;;  %v529_v62 = vmax.f32 %v495_v58, 0.0  ;;  %v437_v63 = vmul.f32 %v1135_v29, %v333_v59  ;;  %v455_v0 = vmul.f32 %v1135_v29, %v405_v60 }
 0x116   :  { %v885_v1 = vpop.f32.mrf.mxu0  ;;  %v921_v2 = vpop.f32.mrf.mxu1 }
 0x117   :  { %v798_v3 = vpack.c.bf16 %v511_v61, %v511_v61  ;;  %v816_v4 = vpack.c.bf16 %v529_v62, %v529_v62  ;;  %v478_v5 = vadd.f32 %v1140_v31, %v437_v63  ;;  %v496_v6 = vadd.f32 %v1140_v31, %v455_v0 }
 0x118   :  { %v338_v7 = vpop.f32.mrf.mxu0  ;;  %v410_v8 = vpop.f32.mrf.mxu1 }
 0x119   :  { %682 = vst.msk [vmem:[%s1349_s4 + $0x30] sm:$0xf] %vm669_vm4, %v798_v3  ;;  %700 = vst.msk [vmem:[%s1349_s4 + $0x78] sm:$0xf] %vm669_vm4, %v816_v4  ;;  %v512_v9 = vmax.f32 %v478_v5, 0.0  ;;  %v530_v10 = vmax.f32 %v496_v6, 0.0  ;;  %v438_v11 = vmul.f32 %v1135_v29, %v338_v7  ;;  %v456_v12 = vmul.f32 %v1135_v29, %v410_v8 }
 0x11a   :  { %v888_v13 = vpop.f32.mrf.mxu0  ;;  %v924_v14 = vpop.f32.mrf.mxu1 }
 0x11b   :  { %v799_v15 = vpack.c.bf16 %v512_v9, %v512_v9  ;;  %v817_v16 = vpack.c.bf16 %v530_v10, %v530_v10  ;;  %v479_v17 = vadd.f32 %v1140_v31, %v438_v11  ;;  %v497_v18 = vadd.f32 %v1140_v31, %v456_v12 }
 0x11c   :  { %v341_v19 = vpop.f32.mrf.mxu0  ;;  %v413_v20 = vpop.f32.mrf.mxu1 }
 0x11d   :  { %683 = vst.msk [vmem:[%s1349_s4 + $0x34] sm:$0xf] %vm669_vm4, %v799_v15  ;;  %701 = vst.msk [vmem:[%s1349_s4 + $0x7c] sm:$0xf] %vm669_vm4, %v817_v16  ;;  %v513_v21 = vmax.f32 %v479_v17, 0.0  ;;  %v531_v22 = vmax.f32 %v497_v18, 0.0  ;;  %v439_v23 = vmul.f32 %v1135_v29, %v341_v19  ;;  %v457_v24 = vmul.f32 %v1135_v29, %v413_v20 }
 0x11e   :  { %v889_v25 = vpop.f32.mrf.mxu0  ;;  %v925_v26 = vpop.f32.mrf.mxu1 }
 0x11f   :  { %v800_v27 = vpack.c.bf16 %v513_v21, %v513_v21  ;;  %v818_v28 = vpack.c.bf16 %v531_v22, %v531_v22  ;;  %v480_v30 = vadd.f32 %v1140_v31, %v439_v23  ;;  %v498_v32 = vadd.f32 %v1140_v31, %v457_v24 }
 0x120   :  { %v346_v33 = vpop.f32.mrf.mxu0 }
 0x121   :  { %684 = vst.msk [vmem:[%s1349_s4 + $0x38] sm:$0xf] %vm669_vm4, %v800_v27  ;;  %702 = vst.msk [vmem:[%s1349_s4 + $0x80] sm:$0xf] %vm669_vm4, %v818_v28  ;;  %v514_v34 = vmax.f32 %v480_v30, 0.0  ;;  %v532_v35 = vmax.f32 %v498_v32, 0.0  ;;  %v440_v36 = vmul.f32 %v1135_v29, %v346_v33 }
 0x122   :  { %v892_v37 = vpop.f32.mrf.mxu0 }
 0x123   :  { %v801_v38 = vpack.c.bf16 %v514_v34, %v514_v34  ;;  %v819_v39 = vpack.c.bf16 %v532_v35, %v532_v35  ;;  %v481_v40 = vadd.f32 %v1140_v31, %v440_v36 }
 0x124   :  { %v349_v41 = vpop.f32.mrf.mxu0 }
 0x125   :  { %685 = vst.msk [vmem:[%s1349_s4 + $0x3c] sm:$0xf] %vm669_vm4, %v801_v38  ;;  %v515_v42 = vmax.f32 %v481_v40, 0.0  ;;  %v441_v43 = vmul.f32 %v1135_v29, %v349_v41 }
 0x126   :  { %704 = vst.msk [vmem:[%s1349_s4 + $0x84] sm:$0x7] %vm703_vm5, %v819_v39  ;;  %v893_v44 = vpop.f32.mrf.mxu0 }
 0x127   :  { %v802_v45 = vpack.c.bf16 %v515_v42, %v515_v42  ;;  %v482_v46 = vadd.f32 %v1140_v31, %v441_v43 }
 0x129   :  { %686 = vst.msk [vmem:[%s1349_s4 + $0x40] sm:$0xf] %vm669_vm4, %v802_v45  ;;  %v516_v47 = vmax.f32 %v482_v46, 0.0 }
 0x12b   :  { %v803_v48 = vpack.c.bf16 %v516_v47, %v516_v47 }
 0x12d   :  { %687 = vst.msk [vmem:[%s1349_s4 + $0x44] sm:$0xf] %vm669_vm4, %v803_v48 }

// kernel: pgccphat_forward.9
= control target key start
LH: loop header
LB: loop body
LE: loop exit
PB: predicated region body
PF: predicated region fallthrough
CT: control target
= control target key end

     0   :  { %vm383_vm0 = vcmask 261120   ;;  %vm852_vm1 = vcmask 519168   ;;  %vm875_vm2 = vcmask 518144   ;;  %s1579_s1 = inlined_call_operand.vmem [shape: bf16[288,64], index: 1, kind: input, shape index: {}]   ;;  %s1580_s0 = inlined_call_operand.vmem [shape: bf16[182,288], index: 0, kind: input, shape index: {}]   ;;  %s1581_s2 = inlined_call_operand.vmem [shape: f32[1,64], index: 2, kind: input, shape index: {}]   ;;  %s1582_s3 = inlined_call_operand.vmem [shape: f32[1,64], index: 3, kind: input, shape index: {}]   ;;  %s1583_s4 = inlined_call_operand.vmem [shape: bf16[182,64], index: 4, kind: output, shape index: {}]  }
   0x1   :  { %v1141_v0 = vld [vmem:[%s1579_s1 + $0x78] sm:$0xff]   ;;  %v1143_v2 = vld [vmem:[%s1579_s1 + $0x70] sm:$0xff]   ;;  %v1145_v4 = vld [vmem:[%s1579_s1 + $0x68] sm:$0xff]  }
   0x2   :  { %v1142_v1 = vld [vmem:[%s1579_s1 + $0x38] sm:$0xff]   ;;  %995 = vmatprep.subr.bf16.mxu0 %v1141_v0  ;;  %1125 = vmatprep.subr.bf16.mxu1 %v1141_v0  ;;  %v1144_v3 = vld [vmem:[%s1579_s1 + $0x30] sm:$0xff]   ;;  %v1146_v5 = vld [vmem:[%s1579_s1 + $0x28] sm:$0xff]  }
   0x3   :  { %996 = vmatpush3.bf16.msra.mxu0 %v1142_v1  ;;  %1133 = vmatpush3.bf16.msra.mxu1 %v1142_v1  ;;  %v1147_v6 = vld [vmem:[%s1579_s1 + $0x60] sm:$0xff]   ;;  %v1149_v8 = vld [vmem:[%s1579_s1 + $0x58] sm:$0xff]   ;;  %v1151_v10 = vld [vmem:[%s1579_s1 + $0x50] sm:$0xff]  }
   0x4   :  { %997 = vmatprep.subr.bf16.mxu0 %v1143_v2  ;;  %1126 = vmatprep.subr.bf16.mxu1 %v1143_v2  ;;  %v1148_v7 = vld [vmem:[%s1579_s1 + $0x20] sm:$0xff]   ;;  %v1150_v9 = vld [vmem:[%s1579_s1 + $0x18] sm:$0xff]   ;;  %v1152_v13 = vld [vmem:[%s1579_s1 + $0x10] sm:$0xff]  }
   0x5   :  { %v1159_v11 = vld [vmem:[%s1580_s0 + $0x4] ss:$12 sps:$4 sm:$0xff]   ;;  %v1162_v12 = vld [vmem:[%s1580_s0 + $0xdc] ss:$12 sps:$4 sm:$0xff]   ;;  %v1157_v19 = vld [vmem:[%s1580_s0] ss:$12 sps:$4 sm:$0xff]  }
   0x6   :  { %v1153_v14 = vld [vmem:[%s1579_s1 + $0x48] sm:$0xff]   ;;  %452 = vmatprep.mubr.bf16.mxu0 %v1159_v11  ;;  %524 = vmatprep.mubr.bf16.mxu1 %v1162_v12  ;;  %v1155_v16 = vld [vmem:[%s1579_s1 + $0x40] sm:$0xff]   ;;  %v1169_v26 = vld [vmem:[%s1580_s0 + $0xf0] ss:$12 sps:$4 sm:$0xff]  }
   0x7   :  { %998 = vmatpush3.bf16.msra.mxu0 %v1144_v3  ;;  %1134 = vmatpush3.bf16.msra.mxu1 %v1144_v3  ;;  %v1154_v15 = vld [vmem:[%s1579_s1 + $0x8] sm:$0xff]   ;;  %v1156_v17 = vld [vmem:[%s1579_s1] sm:$0xff]   ;;  %v1174_v29 = vld [vmem:[%s1580_s0 + $0x30] ss:$12 sps:$4 sm:$0xff]  }
   0x8   :  { %999 = vmatprep.subr.bf16.mxu0 %v1145_v4  ;;  %1127 = vmatprep.subr.bf16.mxu1 %v1145_v4  ;;  %v1163_v18 = vld [vmem:[%s1579_s1 + $0x88] sm:$0xff]   ;;  %v1160_v20 = vld [vmem:[%s1580_s0 + $0xd8] ss:$12 sps:$4 sm:$0xff]   ;;  %v1166_v22 = vld [vmem:[%s1580_s0 + $0xf4] ss:$12 sps:$4 sm:$0xff]  }
   0x9   :  { %v1164_v21 = vld [vmem:[%s1580_s0 + $0x1c] ss:$12 sps:$4 sm:$0xff]   ;;  %v1170_v23 = vld [vmem:[%s1579_s1 + $0x80] sm:$0xff]   ;;  %v1176_v31 = vld [vmem:[%s1580_s0 + $0x4c] ss:$12 sps:$4 sm:$0xff]  }
   0xa   :  { %v62_v24 = vld [vmem:[%s1580_s0 + $0x108] sm:$0x77]  ;;  %v1168_v25 = vld [vmem:[%s1580_s0 + $0x18] ss:$12 sps:$4 sm:$0xff]   ;;  %v1171_v27 = vld [vmem:[%s1580_s0 + $0x34] ss:$12 sps:$4 sm:$0xff]  }
   0xb   :  { %1000 = vmatpush3.bf16.msra.mxu0 %v1146_v5  ;;  %1135 = vmatpush3.bf16.msra.mxu1 %v1146_v5  ;;  %v915_v28 = vcombine.high %v62_v24, %v62_v24  ;;  %v914_v30 = vcombine.low %v62_v24, %v62_v24  ;;  %v1178_v32 = vld [vmem:[%s1580_s0 + $0x8] ss:$12 sps:$4 sm:$0xff]   ;;  %v1180_v34 = vld [vmem:[%s1580_s0 + $0x20] ss:$12 sps:$4 sm:$0xff]   ;;  %v1181_v35 = vld [vmem:[%s1580_s0 + $0x64] ss:$12 sps:$4 sm:$0xff]  }
   0xc   :  { %1001 = vmatprep.subr.bf16.mxu0 %v1147_v6  ;;  %1128 = vmatprep.subr.bf16.mxu1 %v1147_v6  ;;  %v1179_v33 = vld [vmem:[%s1580_s0 + $0x48] ss:$12 sps:$4 sm:$0xff]   ;;  %v1183_v36 = vld [vmem:[%s1580_s0 + $0x38] ss:$12 sps:$4 sm:$0xff]   ;;  %v1184_v37 = vld [vmem:[%s1580_s0 + $0x60] ss:$12 sps:$4 sm:$0xff]  }
   0xd   :  { %v1185_v38 = vld [vmem:[%s1580_s0 + $0x50] ss:$12 sps:$4 sm:$0xff]   ;;  %v1188_v40 = vld [vmem:[%s1580_s0 + $0x68] ss:$12 sps:$4 sm:$0xff]   ;;  %v1189_v41 = vld [vmem:[%s1580_s0 + $0x78] ss:$12 sps:$4 sm:$0xff]  }
   0xe   :  { %v1186_v39 = vld [vmem:[%s1580_s0 + $0x7c] ss:$12 sps:$4 sm:$0xff]   ;;  %v1190_v42 = vld [vmem:[%s1580_s0 + $0x80] ss:$12 sps:$4 sm:$0xff]   ;;  %v1193_v44 = vld [vmem:[%s1580_s0 + $0x98] ss:$12 sps:$4 sm:$0xff]  }
   0xf   :  { %1002 = vmatpush3.bf16.msra.mxu0 %v1148_v7  ;;  %1136 = vmatpush3.bf16.msra.mxu1 %v1148_v7  ;;  %v1191_v43 = vld [vmem:[%s1580_s0 + $0x94] ss:$12 sps:$4 sm:$0xff]   ;;  %v1194_v45 = vld [vmem:[%s1580_s0 + $0x90] ss:$12 sps:$4 sm:$0xff]   ;;  %v1196_v47 = vld [vmem:[%s1580_s0 + $0xac] ss:$12 sps:$4 sm:$0xff]  }
  0x10   :  { %1003 = vmatprep.subr.bf16.mxu0 %v1149_v8  ;;  %1129 = vmatprep.subr.bf16.mxu1 %v1149_v8  ;;  %v1195_v46 = vld [vmem:[%s1580_s0 + $0xb0] ss:$12 sps:$4 sm:$0xff]   ;;  %v1198_v48 = vld [vmem:[%s1580_s0 + $0xc8] ss:$12 sps:$4 sm:$0xff]   ;;  %v1200_v50 = vld [vmem:[%s1580_s0 + $0xe0] ss:$12 sps:$4 sm:$0xff]  }
  0x11   :  { %v1199_v49 = vld [vmem:[%s1580_s0 + $0xa8] ss:$12 sps:$4 sm:$0xff]   ;;  %v1201_v51 = vld [vmem:[%s1580_s0 + $0xc4] ss:$12 sps:$4 sm:$0xff]   ;;  %v1204_v53 = vld [vmem:[%s1580_s0 + $0xc0] ss:$12 sps:$4 sm:$0xff]  }
  0x12   :  { %v1203_v52 = vld [vmem:[%s1580_s0 + $0xf8] ss:$12 sps:$4 sm:$0xff]   ;;  %v1205_v54 = vld [vmem:[%s1580_s0 + $0x110] ss:$0 sps:$4 sm:$0x77]  }
  0x13   :  { %1004 = vmatpush3.bf16.msra.mxu0 %v1150_v9  ;;  %1137 = vmatpush3.bf16.msra.mxu1 %v1150_v9 }
  0x14   :  { %1005 = vmatprep.subr.bf16.mxu0 %v1151_v10  ;;  %1130 = vmatprep.subr.bf16.mxu1 %v1151_v10 }
  0x17   :  { %1006 = vmatpush3.bf16.msra.mxu0 %v1152_v13  ;;  %1138 = vmatpush3.bf16.msra.mxu1 %v1152_v13 }
  0x18   :  { %1007 = vmatprep.subr.bf16.mxu0 %v1153_v14  ;;  %1131 = vmatprep.subr.bf16.mxu1 %v1153_v14 }
  0x1b   :  { %1008 = vmatpush3.bf16.msra.mxu0 %v1154_v15  ;;  %1139 = vmatpush3.bf16.msra.mxu1 %v1154_v15 }
  0x1c   :  { %1009 = vmatprep.subr.bf16.mxu0 %v1155_v16  ;;  %1132 = vmatprep.subr.bf16.mxu1 %v1155_v16 }
  0x1f   :  { %1010 = vmatpush3.bf16.msra.mxu0 %v1156_v17  ;;  %1140 = vmatpush3.bf16.msra.mxu1 %v1156_v17 }
  0x20   :  { %1097 = vmatprep.subr.bf16.mxu1 %v1163_v18 }
  0x22   :  { %453 = vmatmul.mubr.bf16.vlgmr.msra.gmra.mxu0 %v1157_v19  ;;  %525 = vmatmul.mubr.bf16.vlgmr.msra.gmra.mxu1 %v1160_v20 }
  0x23   :  { %1098 = vmatpush3.bf16.msra.mxu1 %v1163_v18  ;;  %460 = vmatprep.mubr.bf16.mxu0 %v1164_v21  ;;  %v1425_v18 = vld [vmem:[%s1581_s2] ss:$0 sm:$0xff] }
  0x24   :  { %532 = vmatprep.mubr.bf16.mxu1 %v1166_v22  ;;  %1099 = vmatprep.subr.bf16.mxu1 %v1170_v23  ;;  %v1430_v21 = vld [vmem:[%s1582_s3] ss:$0 sm:$0xff] }
  0x27   :  { %1100 = vmatpush3.bf16.msra.mxu1 %v1170_v23 }
  0x2a   :  { %461 = vmatmul.mubr.bf16.gmra.mxu0 %v1168_v25  ;;  %533 = vmatmul.mubr.bf16.gmra.mxu1 %v1169_v26 }
  0x2b   :  { %468 = vmatprep.mubr.bf16.mxu0 %v1171_v27  ;;  %540 = vmatprep.mubr.bf16.mxu1 %v915_v28 }
  0x32   :  { %469 = vmatmul.mubr.bf16.gmra.mxu0 %v1174_v29  ;;  %541 = vmatmul.mubr.bf16.gmra.mxu1 %v914_v30 }
  0x33   :  { %476 = vmatprep.mubr.bf16.mxu0 %v1176_v31  ;;  %1101 = vmatprep.mubr.msk.bf16.mxu1 %vm383_vm0, %v1178_v32 }
  0x3a   :  { %477 = vmatmul.mubr.bf16.gmra.mxu0 %v1179_v33  ;;  %1102 = vmatmul.mubr.msk.bf16.vlgmr.msra.gmra.mxu1 %vm383_vm0, %v1180_v34 }
  0x3b   :  { %484 = vmatprep.mubr.bf16.mxu0 %v1181_v35  ;;  %1105 = vmatprep.mubr.msk.bf16.mxu1 %vm383_vm0, %v1183_v36 }
  0x42   :  { %485 = vmatmul.mubr.bf16.gmra.mxu0 %v1184_v37  ;;  %1106 = vmatmul.mubr.msk.bf16.gmra.mxu1 %vm383_vm0, %v1185_v38 }
  0x43   :  { %492 = vmatprep.mubr.bf16.mxu0 %v1186_v39  ;;  %1109 = vmatprep.mubr.msk.bf16.mxu1 %vm383_vm0, %v1188_v40 }
  0x4a   :  { %493 = vmatmul.mubr.bf16.gmra.mxu0 %v1189_v41  ;;  %1110 = vmatmul.mubr.msk.bf16.gmra.mxu1 %vm383_vm0, %v1190_v42 }
  0x4b   :  { %500 = vmatprep.mubr.bf16.mxu0 %v1191_v43  ;;  %1113 = vmatprep.mubr.msk.bf16.mxu1 %vm383_vm0, %v1193_v44 }
  0x52   :  { %501 = vmatmul.mubr.bf16.gmra.mxu0 %v1194_v45  ;;  %1114 = vmatmul.mubr.msk.bf16.gmra.mxu1 %vm383_vm0, %v1195_v46 }
  0x53   :  { %508 = vmatprep.mubr.bf16.mxu0 %v1196_v47  ;;  %1117 = vmatprep.mubr.msk.bf16.mxu1 %vm383_vm0, %v1198_v48 }
  0x5a   :  { %509 = vmatmul.mubr.bf16.gmra.mxu0 %v1199_v49  ;;  %1118 = vmatmul.mubr.msk.bf16.gmra.mxu1 %vm383_vm0, %v1200_v50 }
  0x5b   :  { %516 = vmatprep.mubr.bf16.mxu0 %v1201_v51  ;;  %1121 = vmatprep.mubr.msk.bf16.mxu1 %vm383_vm0, %v1203_v52 }
  0x62   :  { %517 = vmatmul.mubr.bf16.gmra.mxu0 %v1204_v53  ;;  %1122 = vmatmul.mubr.msk.bf16.gmra.mxu1 %vm383_vm0, %v1205_v54 }
  0xe2   :  { %v1011_v55 = vpop.f32.mrf.mxu0  ;;  %v1402_v56 = vpop.f32.mrf.mxu1 }
  0xe4   :  { %v1012_v57 = vpop.f32.mrf.mxu0  ;;  %v1404_v58 = vpop.f32.mrf.mxu1 }
  0xe5   :  { %v1013_v19 = vadd.f32 %v1012_v57, %v1011_v55 }
  0xe6   :  { %v1014_v59 = vpop.f32.mrf.mxu0  ;;  %v1406_v60 = vpop.f32.mrf.mxu1 }
  0xe8   :  { %v1015_v61 = vpop.f32.mrf.mxu0  ;;  %v1408_v62 = vpop.f32.mrf.mxu1 }
  0xe9   :  { %v1016_v32 = vadd.f32 %v1015_v61, %v1014_v59 }
  0xea   :  { %v1017_v63 = vpop.f32.mrf.mxu0  ;;  %v1410_v0 = vpop.f32.mrf.mxu1 }
  0xec   :  { %v1018_v1 = vpop.f32.mrf.mxu0  ;;  %v1412_v2 = vpop.f32.mrf.mxu1 }
  0xed   :  { %v1019_v15 = vadd.f32 %v1018_v1, %v1017_v63 }
  0xee   :  { %v1020_v3 = vpop.f32.mrf.mxu0  ;;  %v1414_v4 = vpop.f32.mrf.mxu1 }
  0xf0   :  { %v1021_v5 = vpop.f32.mrf.mxu0  ;;  %v1416_v6 = vpop.f32.mrf.mxu1 }
  0xf1   :  { %v1022_v24 = vadd.f32 %v1021_v5, %v1020_v3 }
  0xf2   :  { %v1023_v7 = vpop.f32.mrf.mxu0  ;;  %v1418_v8 = vpop.f32.mrf.mxu1 }
  0xf4   :  { %v1024_v9 = vpop.f32.mrf.mxu0  ;;  %v1420_v10 = vpop.f32.mrf.mxu1 }
  0xf5   :  { %v1025_v46 = vadd.f32 %v1024_v9, %v1023_v7 }
  0xf6   :  { %v1026_v11 = vpop.f32.mrf.mxu0  ;;  %v1080_v12 = vpop.f32.mrf.mxu1 }
  0xf8   :  { %v1027_v13 = vpop.f32.mrf.mxu0  ;;  %v1081_v14 = vpop.f32.mrf.mxu1 }
  0xf9   :  { %v1028_v61 = vadd.f32 %v1027_v13, %v1026_v11 }
  0xfa   :  { %v1029_v16 = vpop.f32.mrf.mxu0  ;;  %v1103_v17 = vpop.f32.mrf.mxu1 }
  0xfb   :  { %v591_v20 = vadd.f32 %v1103_v17, %v1019_v15 }
  0xfc   :  { %v1030_v22 = vpop.f32.mrf.mxu0  ;;  %v582_v23 = vpop.f32.mrf.mxu1 }
  0xfd   :  { %v685_v25 = vmul.f32 %v1425_v18, %v591_v20  ;;  %v583_v26 = vadd.f32 %v1013_v19, %v582_v23  ;;  %v1031_v36 = vadd.f32 %v1030_v22, %v1029_v16 }
  0xfe   :  { %v1032_v27 = vpop.f32.mrf.mxu0  ;;  %v1104_v28 = vpop.f32.mrf.mxu1 }
  0xff   :  { %v715_v29 = vadd.f32 %v1430_v21, %v685_v25  ;;  %v683_v30 = vmul.f32 %v1425_v18, %v583_v26  ;;  %v594_v31 = vadd.f32 %v1104_v28, %v1022_v24 }
 0x100   :  { %v1033_v33 = vpop.f32.mrf.mxu0  ;;  %v585_v34 = vpop.f32.mrf.mxu1 }
 0x101   :  { %v738_v35 = vmax.f32 %v715_v29, 0.0  ;;  %v713_v37 = vadd.f32 %v1430_v21, %v683_v30  ;;  %v686_v38 = vmul.f32 %v1425_v18, %v594_v31  ;;  %v586_v39 = vadd.f32 %v1016_v32, %v585_v34 }
 0x102   :  { %v1035_v40 = vpop.f32.mrf.mxu0  ;;  %v1107_v41 = vpop.f32.mrf.mxu1  ;;  %v1034_v52 = vadd.f32 %v1033_v33, %v1032_v27 }
 0x103   :  { %v974_v42 = vpack.c.bf16 %v738_v35, %v738_v35  ;;  %v736_v43 = vmax.f32 %v713_v37, 0.0  ;;  %v716_v44 = vadd.f32 %v1430_v21, %v686_v38  ;;  %v607_v45 = vadd.f32 %v1107_v41, %v1031_v36 }
 0x104   :  { %v684_v47 = vmul.f32 %v1425_v18, %v586_v39  ;;  %v1036_v48 = vpop.f32.mrf.mxu0  ;;  %v598_v49 = vpop.f32.mrf.mxu1 }
 0x105   :  { %855 = vst.msk [vmem:[%s1583_s4 + $0x8] sm:$0xf] %vm852_vm1, %v974_v42  ;;  %v972_v50 = vpack.c.bf16 %v736_v43, %v736_v43  ;;  %v739_v51 = vmax.f32 %v716_v44, 0.0  ;;  %v689_v53 = vmul.f32 %v1425_v18, %v607_v45  ;;  %v599_v55 = vadd.f32 %v1025_v46, %v598_v49 }
 0x106   :  { %v714_v54 = vadd.f32 %v1430_v21, %v684_v47  ;;  %v1038_v57 = vpop.f32.mrf.mxu0  ;;  %v1108_v59 = vpop.f32.mrf.mxu1  ;;  %v1037_v22 = vadd.f32 %v1036_v48, %v1035_v40 }
 0x107   :  { %853 = vst.msk [vmem:[%s1583_s4] sm:$0xf] %vm852_vm1, %v972_v50  ;;  %v975_v63 = vpack.c.bf16 %v739_v51, %v739_v51  ;;  %v719_v1 = vadd.f32 %v1430_v21, %v689_v53  ;;  %v610_v3 = vadd.f32 %v1108_v59, %v1034_v52  ;;  %v687_v7 = vmul.f32 %v1425_v18, %v599_v55 }
 0x108   :  { %v737_v5 = vmax.f32 %v714_v54, 0.0  ;;  %v1039_v9 = vpop.f32.mrf.mxu0  ;;  %v601_v12 = vpop.f32.mrf.mxu1 }
 0x109   :  { %856 = vst.msk [vmem:[%s1583_s4 + $0xc] sm:$0xf] %vm852_vm1, %v975_v63  ;;  %v742_v11 = vmax.f32 %v719_v1, 0.0  ;;  %v690_v13 = vmul.f32 %v1425_v18, %v610_v3  ;;  %v602_v14 = vadd.f32 %v1028_v61, %v601_v12  ;;  %v717_v16 = vadd.f32 %v1430_v21, %v687_v7 }
 0x10a   :  { %v973_v15 = vpack.c.bf16 %v737_v5, %v737_v5  ;;  %v1041_v17 = vpop.f32.mrf.mxu0  ;;  %v1111_v19 = vpop.f32.mrf.mxu1  ;;  %v1040_v39 = vadd.f32 %v1039_v9, %v1038_v57 }
 0x10b   :  { %v978_v20 = vpack.c.bf16 %v742_v11, %v742_v11  ;;  %v720_v23 = vadd.f32 %v1430_v21, %v690_v13  ;;  %v688_v24 = vmul.f32 %v1425_v18, %v602_v14  ;;  %v740_v25 = vmax.f32 %v717_v16, 0.0 }
 0x10c   :  { %854 = vst.msk [vmem:[%s1583_s4 + $0x4] sm:$0xf] %vm852_vm1, %v973_v15  ;;  %v1042_v26 = vpop.f32.mrf.mxu0  ;;  %v614_v27 = vpop.f32.mrf.mxu1  ;;  %v1067_v14 = vadd.f32 %v1404_v58, %v1402_v56 }
 0x10d   :  { %859 = vst.msk [vmem:[%s1583_s4 + $0x18] sm:$0xf] %vm852_vm1, %v978_v20  ;;  %v743_v28 = vmax.f32 %v720_v23, 0.0  ;;  %v718_v29 = vadd.f32 %v1430_v21, %v688_v24  ;;  %v1043_v30 = vadd.f32 %v1042_v26, %v1041_v17  ;;  %v615_v31 = vadd.f32 %v1037_v22, %v614_v27 }
 0x10e   :  { %v976_v32 = vpack.c.bf16 %v740_v25, %v740_v25  ;;  %v1044_v33 = vpop.f32.mrf.mxu0  ;;  %v1112_v34 = vpop.f32.mrf.mxu1 }
 0x10f   :  { %v979_v35 = vpack.c.bf16 %v743_v28, %v743_v28  ;;  %v741_v36 = vmax.f32 %v718_v29, 0.0  ;;  %v623_v37 = vadd.f32 %v1111_v19, %v1043_v30  ;;  %v691_v38 = vmul.f32 %v1425_v18, %v615_v31 }
 0x110   :  { %857 = vst.msk [vmem:[%s1583_s4 + $0x10] sm:$0xf] %vm852_vm1, %v976_v32  ;;  %v1045_v40 = vpop.f32.mrf.mxu0  ;;  %v617_v41 = vpop.f32.mrf.mxu1  ;;  %v1070_v31 = vadd.f32 %v1408_v62, %v1406_v60 }
 0x111   :  { %860 = vst.msk [vmem:[%s1583_s4 + $0x1c] sm:$0xf] %vm852_vm1, %v979_v35  ;;  %v977_v42 = vpack.c.bf16 %v741_v36, %v741_v36  ;;  %v693_v43 = vmul.f32 %v1425_v18, %v623_v37  ;;  %v721_v44 = vadd.f32 %v1430_v21, %v691_v38  ;;  %v1046_v45 = vadd.f32 %v1045_v40, %v1044_v33 }
 0x112   :  { %v618_v46 = vadd.f32 %v1040_v39, %v617_v41  ;;  %v1047_v47 = vpop.f32.mrf.mxu0  ;;  %v1115_v48 = vpop.f32.mrf.mxu1 }
 0x113   :  { %858 = vst.msk [vmem:[%s1583_s4 + $0x14] sm:$0xf] %vm852_vm1, %v977_v42  ;;  %v723_v49 = vadd.f32 %v1430_v21, %v693_v43  ;;  %v744_v50 = vmax.f32 %v721_v44, 0.0  ;;  %v626_v51 = vadd.f32 %v1112_v34, %v1046_v45  ;;  %v1073_v43 = vadd.f32 %v1412_v2, %v1410_v0 }
 0x114   :  { %v692_v52 = vmul.f32 %v1425_v18, %v618_v46  ;;  %v1048_v53 = vpop.f32.mrf.mxu0  ;;  %v630_v54 = vpop.f32.mrf.mxu1  ;;  %v1079_v44 = vadd.f32 %v1420_v10, %v1418_v8 }
 0x115   :  { %v746_v55 = vmax.f32 %v723_v49, 0.0  ;;  %v980_v57 = vpack.c.bf16 %v744_v50, %v744_v50  ;;  %v694_v59 = vmul.f32 %v1425_v18, %v626_v51  ;;  %v1049_v61 = vadd.f32 %v1048_v53, %v1047_v47 }
 0x116   :  { %v722_v63 = vadd.f32 %v1430_v21, %v692_v52  ;;  %v1050_v1 = vpop.f32.mrf.mxu0  ;;  %v1116_v3 = vpop.f32.mrf.mxu1 }
 0x117   :  { %v982_v5 = vpack.c.bf16 %v746_v55, %v746_v55  ;;  %861 = vst.msk [vmem:[%s1583_s4 + $0x20] sm:$0xf] %vm852_vm1, %v980_v57  ;;  %v724_v7 = vadd.f32 %v1430_v21, %v694_v59  ;;  %v631_v9 = vadd.f32 %v1049_v61, %v630_v54 }
 0x118   :  { %v745_v12 = vmax.f32 %v722_v63, 0.0  ;;  %v1051_v11 = vpop.f32.mrf.mxu0  ;;  %v633_v13 = vpop.f32.mrf.mxu1 }
 0x119   :  { %863 = vst.msk [vmem:[%s1583_s4 + $0x28] sm:$0xf] %vm852_vm1, %v982_v5  ;;  %v747_v15 = vmax.f32 %v724_v7, 0.0  ;;  %v695_v16 = vmul.f32 %v1425_v18, %v631_v9  ;;  %v1052_v17 = vadd.f32 %v1051_v11, %v1050_v1  ;;  %v1076_v9 = vadd.f32 %v1416_v6, %v1414_v4 }
 0x11a   :  { %v981_v19 = vpack.c.bf16 %v745_v12, %v745_v12  ;;  %v1053_v20 = vpop.f32.mrf.mxu0  ;;  %v1119_v22 = vpop.f32.mrf.mxu1 }
 0x11b   :  { %v983_v23 = vpack.c.bf16 %v747_v15, %v747_v15  ;;  %v725_v24 = vadd.f32 %v1430_v21, %v695_v16  ;;  %v634_v25 = vadd.f32 %v1052_v17, %v633_v13  ;;  %v655_v26 = vadd.f32 %v1119_v22, %v1067_v14 }
 0x11c   :  { %862 = vst.msk [vmem:[%s1583_s4 + $0x24] sm:$0xf] %vm852_vm1, %v981_v19  ;;  %v1054_v56 = vpop.f32.mrf.mxu0  ;;  %v646_v58 = vpop.f32.mrf.mxu1 }
 0x11d   :  { %864 = vst.msk [vmem:[%s1583_s4 + $0x2c] sm:$0xf] %vm852_vm1, %v983_v23  ;;  %v748_v27 = vmax.f32 %v725_v24, 0.0  ;;  %v696_v28 = vmul.f32 %v1425_v18, %v634_v25  ;;  %v701_v29 = vmul.f32 %v1425_v18, %v655_v26  ;;  %v1055_v30 = vadd.f32 %v1054_v56, %v1053_v20 }
 0x11e   :  { %v1056_v32 = vpop.f32.mrf.mxu0  ;;  %v1120_v33 = vpop.f32.mrf.mxu1 }
 0x11f   :  { %v984_v34 = vpack.c.bf16 %v748_v27, %v748_v27  ;;  %v726_v35 = vadd.f32 %v1430_v21, %v696_v28  ;;  %v731_v36 = vadd.f32 %v1430_v21, %v701_v29  ;;  %v639_v37 = vadd.f32 %v1115_v48, %v1055_v30 }
 0x120   :  { %v658_v38 = vadd.f32 %v1120_v33, %v1070_v31  ;;  %v1057_v39 = vpop.f32.mrf.mxu0  ;;  %v649_v40 = vpop.f32.mrf.mxu1 }
 0x121   :  { %865 = vst.msk [vmem:[%s1583_s4 + $0x30] sm:$0xf] %vm852_vm1, %v984_v34  ;;  %v749_v41 = vmax.f32 %v726_v35, 0.0  ;;  %v754_v42 = vmax.f32 %v731_v36, 0.0  ;;  %v697_v60 = vmul.f32 %v1425_v18, %v639_v37  ;;  %v1058_v62 = vadd.f32 %v1057_v39, %v1056_v32 }
 0x122   :  { %v702_v45 = vmul.f32 %v1425_v18, %v658_v38  ;;  %v1059_v46 = vpop.f32.mrf.mxu0  ;;  %v1123_v47 = vpop.f32.mrf.mxu1 }
 0x123   :  { %v985_v48 = vpack.c.bf16 %v749_v41, %v749_v41  ;;  %v990_v49 = vpack.c.bf16 %v754_v42, %v754_v42  ;;  %v727_v50 = vadd.f32 %v1430_v21, %v697_v60  ;;  %v642_v51 = vadd.f32 %v1116_v3, %v1058_v62 }
 0x124   :  { %v732_v52 = vadd.f32 %v1430_v21, %v702_v45  ;;  %v671_v53 = vadd.f32 %v1123_v47, %v1079_v44  ;;  %v1060_v54 = vpop.f32.mrf.mxu0  ;;  %v662_v55 = vpop.f32.mrf.mxu1 }
 0x125   :  { %866 = vst.msk [vmem:[%s1583_s4 + $0x34] sm:$0xf] %vm852_vm1, %v985_v48  ;;  %871 = vst.msk [vmem:[%s1583_s4 + $0x48] sm:$0xf] %vm852_vm1, %v990_v49  ;;  %v750_v0 = vmax.f32 %v727_v50, 0.0  ;;  %v698_v2 = vmul.f32 %v1425_v18, %v642_v51  ;;  %v1061_v8 = vadd.f32 %v1060_v54, %v1059_v46  ;;  %v663_v10 = vadd.f32 %v1073_v43, %v662_v55 }
 0x126   :  { %v755_v57 = vmax.f32 %v732_v52, 0.0  ;;  %v705_v59 = vmul.f32 %v1425_v18, %v671_v53  ;;  %v1062_v61 = vpop.f32.mrf.mxu0  ;;  %v1124_v63 = vpop.f32.mrf.mxu1 }
 0x127   :  { %v986_v1 = vpack.c.bf16 %v750_v0, %v750_v0  ;;  %v728_v3 = vadd.f32 %v1430_v21, %v698_v2  ;;  %v647_v5 = vadd.f32 %v1061_v8, %v646_v58  ;;  %v703_v7 = vmul.f32 %v1425_v18, %v663_v10 }
 0x128   :  { %v991_v12 = vpack.c.bf16 %v755_v57, %v755_v57  ;;  %v735_v11 = vadd.f32 %v1430_v21, %v705_v59  ;;  %v1063_v13 = vpop.f32.mrf.mxu0  ;;  %v665_v14 = vpop.f32.mrf.mxu1 }
 0x129   :  { %867 = vst.msk [vmem:[%s1583_s4 + $0x38] sm:$0xf] %vm852_vm1, %v986_v1  ;;  %v751_v15 = vmax.f32 %v728_v3, 0.0  ;;  %v699_v16 = vmul.f32 %v1425_v18, %v647_v5  ;;  %v733_v17 = vadd.f32 %v1430_v21, %v703_v7  ;;  %v1064_v19 = vadd.f32 %v1063_v13, %v1062_v61 }
 0x12a   :  { %872 = vst.msk [vmem:[%s1583_s4 + $0x4c] sm:$0xf] %vm852_vm1, %v991_v12  ;;  %v758_v4 = vmax.f32 %v735_v11, 0.0  ;;  %v666_v6 = vadd.f32 %v1076_v9, %v665_v14 }
 0x12b   :  { %v987_v20 = vpack.c.bf16 %v751_v15, %v751_v15  ;;  %v729_v22 = vadd.f32 %v1430_v21, %v699_v16  ;;  %v756_v23 = vmax.f32 %v733_v17, 0.0  ;;  %v650_v24 = vadd.f32 %v1064_v19, %v649_v40 }
 0x12c   :  { %v994_v25 = vpack.c.bf16 %v758_v4, %v758_v4  ;;  %v704_v26 = vmul.f32 %v1425_v18, %v666_v6 }
 0x12d   :  { %868 = vst.msk [vmem:[%s1583_s4 + $0x3c] sm:$0xf] %vm852_vm1, %v987_v20  ;;  %v752_v56 = vmax.f32 %v729_v22, 0.0  ;;  %v992_v58 = vpack.c.bf16 %v756_v23, %v756_v23  ;;  %v700_v27 = vmul.f32 %v1425_v18, %v650_v24 }
 0x12e   :  { %876 = vst.msk [vmem:[%s1583_s4 + $0x58] sm:$0x7] %vm875_vm2, %v994_v25  ;;  %v734_v28 = vadd.f32 %v1430_v21, %v704_v26 }
 0x12f   :  { %v988_v29 = vpack.c.bf16 %v752_v56, %v752_v56  ;;  %873 = vst.msk [vmem:[%s1583_s4 + $0x50] sm:$0xf] %vm852_vm1, %v992_v58  ;;  %v730_v30 = vadd.f32 %v1430_v21, %v700_v27 }
 0x130   :  { %v757_v31 = vmax.f32 %v734_v28, 0.0 }
 0x131   :  { %869 = vst.msk [vmem:[%s1583_s4 + $0x40] sm:$0xf] %vm852_vm1, %v988_v29  ;;  %v753_v18 = vmax.f32 %v730_v30, 0.0 }
 0x132   :  { %v993_v32 = vpack.c.bf16 %v757_v31, %v757_v31 }
 0x133   :  { %v989_v33 = vpack.c.bf16 %v753_v18, %v753_v18 }
 0x134   :  { %874 = vst.msk [vmem:[%s1583_s4 + $0x54] sm:$0xf] %vm852_vm1, %v993_v32 }
 0x135   :  { %870 = vst.msk [vmem:[%s1583_s4 + $0x44] sm:$0xf] %vm852_vm1, %v989_v33 }

// kernel: pgccphat_forward.10
= control target key start
LH: loop header
LB: loop body
LE: loop exit
PB: predicated region body
PF: predicated region fallthrough
CT: control target
= control target key end

     0   :  { %v1343_v34 = vmov 0.0   ;;  %vm1344_vm0 = vmmov 0   ;;  %vm523_vm1 = vcmask 523264   ;;  %s1755_s1 = inlined_call_operand.vmem [shape: bf16[576,128], index: 1, kind: input, shape index: {}]   ;;  %s1756_s0 = inlined_call_operand.vmem [shape: bf16[110,576], index: 0, kind: input, shape index: {}]   ;;  %s1757_s2 = inlined_call_operand.vmem [shape: f32[1,128], index: 2, kind: input, shape index: {}]   ;;  %s1758_s3 = inlined_call_operand.vmem [shape: f32[1,128], index: 3, kind: input, shape index: {}]   ;;  %s1759_s4 = inlined_call_operand.vmem [shape: bf16[110,128], index: 4, kind: output, shape index: {}]  }
   0x1   :  { %v1258_v0 = vld [vmem:[%s1755_s1 + $0x78] sm:$0xff]   ;;  %v1262_v4 = vld [vmem:[%s1755_s1 + $0x70] sm:$0xff]   ;;  %v1266_v8 = vld [vmem:[%s1755_s1 + $0x68] sm:$0xff]  }
   0x2   :  { %v1259_v1 = vld [vmem:[%s1755_s1 + $0xf8] sm:$0xff]   ;;  %1085 = vmatprep.subr.bf16.mxu0 %v1258_v0  ;;  %v1263_v5 = vld [vmem:[%s1755_s1 + $0xf0] sm:$0xff]   ;;  %v1267_v9 = vld [vmem:[%s1755_s1 + $0xe8] sm:$0xff]  }
   0x3   :  { %v1260_v2 = vld [vmem:[%s1755_s1 + $0x38] sm:$0xff]   ;;  %1143 = vmatprep.subr.bf16.mxu1 %v1259_v1  ;;  %v1264_v6 = vld [vmem:[%s1755_s1 + $0x30] sm:$0xff]   ;;  %v1268_v10 = vld [vmem:[%s1755_s1 + $0x28] sm:$0xff]  }
   0x4   :  { %v1261_v3 = vld [vmem:[%s1755_s1 + $0xb8] sm:$0xff]   ;;  %1086 = vmatpush3.bf16.msra.mxu0 %v1260_v2  ;;  %v1265_v7 = vld [vmem:[%s1755_s1 + $0xb0] sm:$0xff]   ;;  %v1269_v11 = vld [vmem:[%s1755_s1 + $0xa8] sm:$0xff]  }
   0x5   :  { %1144 = vmatpush3.bf16.msra.mxu1 %v1261_v3  ;;  %1087 = vmatprep.subr.bf16.mxu0 %v1262_v4  ;;  %v1270_v12 = vld [vmem:[%s1755_s1 + $0x60] sm:$0xff]   ;;  %v1274_v16 = vld [vmem:[%s1755_s1 + $0x58] sm:$0xff]   ;;  %v1278_v20 = vld [vmem:[%s1755_s1 + $0x50] sm:$0xff]  }
   0x6   :  { %1145 = vmatprep.subr.bf16.mxu1 %v1263_v5  ;;  %v1271_v13 = vld [vmem:[%s1755_s1 + $0xe0] sm:$0xff]   ;;  %v1275_v17 = vld [vmem:[%s1755_s1 + $0xd8] sm:$0xff]   ;;  %v1279_v21 = vld [vmem:[%s1755_s1 + $0xd0] sm:$0xff]  }
   0x7   :  { %v1272_v14 = vld [vmem:[%s1755_s1 + $0x20] sm:$0xff]   ;;  %v1276_v18 = vld [vmem:[%s1755_s1 + $0x18] sm:$0xff]   ;;  %v1280_v22 = vld [vmem:[%s1755_s1 + $0x10] sm:$0xff]  }
   0x8   :  { %1088 = vmatpush3.bf16.msra.mxu0 %v1264_v6  ;;  %v1273_v15 = vld [vmem:[%s1755_s1 + $0xa0] sm:$0xff]   ;;  %v1277_v19 = vld [vmem:[%s1755_s1 + $0x98] sm:$0xff]   ;;  %v1281_v23 = vld [vmem:[%s1755_s1 + $0x90] sm:$0xff]  }
   0x9   :  { %1146 = vmatpush3.bf16.msra.mxu1 %v1265_v7  ;;  %1089 = vmatprep.subr.bf16.mxu0 %v1266_v8  ;;  %v1282_v24 = vld [vmem:[%s1755_s1 + $0x48] sm:$0xff]   ;;  %v1286_v28 = vld [vmem:[%s1755_s1 + $0x40] sm:$0xff]   ;;  %v1296_v37 = vld [vmem:[%s1755_s1 + $0x118] sm:$0xff]  }
   0xa   :  { %1147 = vmatprep.subr.bf16.mxu1 %v1267_v9  ;;  %v1283_v25 = vld [vmem:[%s1755_s1 + $0xc8] sm:$0xff]   ;;  %v1287_v29 = vld [vmem:[%s1755_s1 + $0xc0] sm:$0xff]   ;;  %v1307_v43 = vld [vmem:[%s1755_s1 + $0x110] sm:$0xff]  }
   0xb   :  { %v1284_v26 = vld [vmem:[%s1755_s1 + $0x8] sm:$0xff]   ;;  %v1288_v30 = vld [vmem:[%s1755_s1] sm:$0xff]   ;;  %v1305_v44 = vld [vmem:[%s1756_s0 + $0x5c] ss:$20 sps:$4 sm:$0xff]  }
   0xc   :  { %1090 = vmatpush3.bf16.msra.mxu0 %v1268_v10  ;;  %v1285_v27 = vld [vmem:[%s1755_s1 + $0x88] sm:$0xff]   ;;  %v1289_v31 = vld [vmem:[%s1755_s1 + $0x80] sm:$0xff]   ;;  %v1310_v48 = vld [vmem:[%s1756_s0 + $0x7c] ss:$20 sps:$4 sm:$0xff]  }
   0xd   :  { %1148 = vmatpush3.bf16.msra.mxu1 %v1269_v11  ;;  %1091 = vmatprep.subr.bf16.mxu0 %v1270_v12  ;;  %v1290_v32 = vld [vmem:[%s1756_s0] ss:$20 sps:$4 sm:$0xff]   ;;  %v1292_v33 = vld [vmem:[%s1756_s0 + $0x4] ss:$20 sps:$4 sm:$0xff]   ;;  %v1293_v35 = vld [vmem:[%s1756_s0 + $0x8] ss:$20 sps:$4 sm:$0xff]  }
   0xe   :  { %1149 = vmatprep.subr.bf16.mxu1 %v1271_v13  ;;  %v1295_v36 = vld [vmem:[%s1756_s0 + $0xc] ss:$20 sps:$4 sm:$0xff]   ;;  %577 = vmatprep.mubr.bf16.mxu0 %v1292_v33  ;;  %v1299_v39 = vld [vmem:[%s1756_s0 + $0x34] ss:$20 sps:$4 sm:$0xff]   ;;  %v1302_v41 = vld [vmem:[%s1756_s0 + $0x30] ss:$20 sps:$4 sm:$0xff]  }
   0xf   :  { %666 = vmatprep.mubr.bf16.mxu1 %v1295_v36  ;;  %v1297_v38 = vld [vmem:[%s1756_s0 + $0x2c] ss:$20 sps:$4 sm:$0xff]   ;;  %v1301_v40 = vld [vmem:[%s1756_s0 + $0x28] ss:$20 sps:$4 sm:$0xff]   ;;  %v1308_v46 = vld [vmem:[%s1756_s0 + $0x50] ss:$20 sps:$4 sm:$0xff]  }
  0x10   :  { %1092 = vmatpush3.bf16.msra.mxu0 %v1272_v14  ;;  %v1303_v42 = vld [vmem:[%s1756_s0 + $0x54] ss:$20 sps:$4 sm:$0xff]   ;;  %v1309_v47 = vld [vmem:[%s1756_s0 + $0x58] ss:$20 sps:$4 sm:$0xff]   ;;  %v1329_v50 = vld [vmem:[%s1755_s1 + $0x100] sm:$0xff]  }
  0x11   :  { %1150 = vmatpush3.bf16.msra.mxu1 %v1273_v15  ;;  %1093 = vmatprep.subr.bf16.mxu0 %v1274_v16  ;;  %v1316_v45 = vld [vmem:[%s1755_s1 + $0x108] sm:$0xff]   ;;  %v1312_v49 = vld [vmem:[%s1756_s0 + $0x84] ss:$20 sps:$4 sm:$0xff]   ;;  %v1315_v52 = vld [vmem:[%s1756_s0 + $0x80] ss:$20 sps:$4 sm:$0xff]  }
  0x12   :  { %1151 = vmatprep.subr.bf16.mxu1 %v1275_v17  ;;  %v1314_v51 = vld [vmem:[%s1756_s0 + $0x78] ss:$20 sps:$4 sm:$0xff]   ;;  %v1321_v55 = vld [vmem:[%s1756_s0 + $0xa0] ss:$20 sps:$4 sm:$0xff]   ;;  %v1322_v56 = vld [vmem:[%s1756_s0 + $0xa8] ss:$20 sps:$4 sm:$0xff]  }
  0x13   :  { %v1317_v53 = vld [vmem:[%s1756_s0 + $0xa4] ss:$20 sps:$4 sm:$0xff]   ;;  %v1319_v54 = vld [vmem:[%s1756_s0 + $0xac] ss:$20 sps:$4 sm:$0xff]   ;;  %v1325_v58 = vld [vmem:[%s1756_s0 + $0xd4] ss:$20 sps:$4 sm:$0xff]  }
  0x14   :  { %1094 = vmatpush3.bf16.msra.mxu0 %v1276_v18  ;;  %v1323_v57 = vld [vmem:[%s1756_s0 + $0xcc] ss:$20 sps:$4 sm:$0xff]   ;;  %v1327_v59 = vld [vmem:[%s1756_s0 + $0xc8] ss:$20 sps:$4 sm:$0xff]   ;;  %v1328_v60 = vld [vmem:[%s1756_s0 + $0xd0] ss:$20 sps:$4 sm:$0xff]  }
  0x15   :  { %1152 = vmatpush3.bf16.msra.mxu1 %v1277_v19  ;;  %1095 = vmatprep.subr.bf16.mxu0 %v1278_v20  ;;  %v1330_v61 = vld [vmem:[%s1756_s0 + $0xf4] ss:$20 sps:$4 sm:$0x7f]   ;;  %v1332_v62 = vld [vmem:[%s1756_s0 + $0xfc] ss:$20 sps:$4 sm:$0x7f]  }
  0x16   :  { %1153 = vmatprep.subr.bf16.mxu1 %v1279_v21  ;;  %v1334_v63 = vld [vmem:[%s1756_s0 + $0xf0] ss:$20 sps:$4 sm:$0x7f]   ;;  %v1335_v0 = vld [vmem:[%s1756_s0 + $0xf8] ss:$20 sps:$4 sm:$0x7f]  }
  0x17   :  { %v1336_v1 = vld [vmem:[%s1756_s0 + $0x10] ss:$20 sps:$4 sm:$0xff]   ;;  %v1338_v3 = vld [vmem:[%s1756_s0 + $0x38] ss:$20 sps:$4 sm:$0xff]   ;;  %v1340_v5 = vld [vmem:[%s1756_s0 + $0x60] ss:$20 sps:$4 sm:$0xff]  }
  0x18   :  { %1096 = vmatpush3.bf16.msra.mxu0 %v1280_v22  ;;  %v1337_v2 = vld [vmem:[%s1756_s0 + $0xb0] ss:$20 sps:$4 sm:$0xff]   ;;  %v1339_v4 = vld [vmem:[%s1756_s0 + $0xd8] ss:$20 sps:$4 sm:$0xff]   ;;  %v1342_v7 = vld [vmem:[%s1756_s0 + $0x88] ss:$20 sps:$4 sm:$0xff]  }
  0x19   :  { %1154 = vmatpush3.bf16.msra.mxu1 %v1281_v23  ;;  %1097 = vmatprep.subr.bf16.mxu0 %v1282_v24  ;;  %v1341_v6 = vld [vmem:[%s1756_s0 + $0x100] ss:$20 sps:$4 sm:$0x7f]  }
  0x1a   :  { %1155 = vmatprep.subr.bf16.mxu1 %v1283_v25 }
  0x1c   :  { %1098 = vmatpush3.bf16.msra.mxu0 %v1284_v26 }
  0x1d   :  { %1156 = vmatpush3.bf16.msra.mxu1 %v1285_v27  ;;  %1099 = vmatprep.subr.bf16.mxu0 %v1286_v28 }
  0x1e   :  { %1157 = vmatprep.subr.bf16.mxu1 %v1287_v29 }
  0x20   :  { %1100 = vmatpush3.bf16.msra.mxu0 %v1288_v30 }
  0x21   :  { %1158 = vmatpush3.bf16.msra.mxu1 %v1289_v31  ;;  %1212 = vmatprep.subr.bf16.mxu0 %v1343_v34 }
  0x22   :  { %1248 = vmatprep.subr.bf16.mxu1 %v1343_v34 }
  0x23   :  { %578 = vmatmul.mubr.bf16.vlgmr.msra.gmra.mxu0 %v1290_v32 }
  0x24   :  { %667 = vmatmul.mubr.bf16.vlgmr.msra.gmra.mxu1 %v1293_v35  ;;  %1213 = vmatpush3.bf16.msra.mxu0 %v1296_v37 }
  0x25   :  { %585 = vmatprep.mubr.bf16.mxu0 %v1297_v38  ;;  %1252 = vmatpush3.bf16.msra.mxu1 %v1296_v37 }
  0x26   :  { %674 = vmatprep.mubr.bf16.mxu1 %v1299_v39  ;;  %1214 = vmatprep.subr.bf16.mxu0 %v1343_v34 }
  0x27   :  { %1249 = vmatprep.subr.bf16.mxu1 %v1343_v34 }
  0x28   :  { %1215 = vmatpush3.bf16.msra.mxu0 %v1307_v43 }
  0x29   :  { %1253 = vmatpush3.bf16.msra.mxu1 %v1307_v43  ;;  %1216 = vmatprep.subr.bf16.mxu0 %v1343_v34 }
  0x2a   :  { %1250 = vmatprep.subr.bf16.mxu1 %v1343_v34 }
  0x2b   :  { %586 = vmatmul.mubr.bf16.gmra.mxu0 %v1301_v40 }
  0x2c   :  { %675 = vmatmul.mubr.bf16.gmra.mxu1 %v1302_v41  ;;  %593 = vmatprep.mubr.bf16.mxu0 %v1303_v42 }
  0x2d   :  { %682 = vmatprep.mubr.bf16.mxu1 %v1305_v44  ;;  %1217 = vmatpush3.bf16.msra.mxu0 %v1316_v45 }
  0x2e   :  { %1254 = vmatpush3.bf16.msra.mxu1 %v1316_v45  ;;  %1218 = vmatprep.subr.bf16.mxu0 %v1343_v34 }
  0x2f   :  { %1251 = vmatprep.subr.bf16.mxu1 %v1343_v34 }
  0x31   :  { %1219 = vmatpush3.bf16.msra.mxu0 %v1329_v50 }
  0x32   :  { %1255 = vmatpush3.bf16.msra.mxu1 %v1329_v50 }
  0x33   :  { %594 = vmatmul.mubr.bf16.gmra.mxu0 %v1308_v46 }
  0x34   :  { %683 = vmatmul.mubr.bf16.gmra.mxu1 %v1309_v47  ;;  %601 = vmatprep.mubr.bf16.mxu0 %v1310_v48 }
  0x35   :  { %690 = vmatprep.mubr.bf16.mxu1 %v1312_v49 }
  0x3b   :  { %602 = vmatmul.mubr.bf16.gmra.mxu0 %v1314_v51 }
  0x3c   :  { %691 = vmatmul.mubr.bf16.gmra.mxu1 %v1315_v52  ;;  %609 = vmatprep.mubr.bf16.mxu0 %v1317_v53 }
  0x3d   :  { %698 = vmatprep.mubr.bf16.mxu1 %v1319_v54 }
  0x43   :  { %610 = vmatmul.mubr.bf16.gmra.mxu0 %v1321_v55 }
  0x44   :  { %699 = vmatmul.mubr.bf16.gmra.mxu1 %v1322_v56  ;;  %617 = vmatprep.mubr.bf16.mxu0 %v1323_v57 }
  0x45   :  { %706 = vmatprep.mubr.bf16.mxu1 %v1325_v58 }
  0x4b   :  { %618 = vmatmul.mubr.bf16.gmra.mxu0 %v1327_v59 }
  0x4c   :  { %707 = vmatmul.mubr.bf16.gmra.mxu1 %v1328_v60  ;;  %625 = vmatprep.mubr.bf16.mxu0 %v1330_v61 }
  0x4d   :  { %714 = vmatprep.mubr.bf16.mxu1 %v1332_v62 }
  0x53   :  { %626 = vmatmul.mubr.bf16.gmra.mxu0 %v1334_v63 }
  0x54   :  { %715 = vmatmul.mubr.bf16.gmra.mxu1 %v1335_v0  ;;  %1220 = vmatprep.mubr.msk.bf16.mxu0 %vm1344_vm0, %v1343_v34 }
  0x55   :  { %1236 = vmatprep.mubr.msk.bf16.mxu1 %vm1344_vm0, %v1343_v34 }
  0x5b   :  { %1221 = vmatmul.mubr.msk.bf16.vlgmr.msra.gmra.mxu0 %vm523_vm1, %v1336_v1 }
  0x5c   :  { %1237 = vmatmul.mubr.msk.bf16.vlgmr.msra.gmra.mxu1 %vm523_vm1, %v1337_v2  ;;  %1224 = vmatprep.mubr.msk.bf16.mxu0 %vm1344_vm0, %v1343_v34 }
  0x5d   :  { %1240 = vmatprep.mubr.msk.bf16.mxu1 %vm1344_vm0, %v1343_v34 }
  0x63   :  { %1225 = vmatmul.mubr.msk.bf16.gmra.mxu0 %vm523_vm1, %v1338_v3 }
  0x64   :  { %1241 = vmatmul.mubr.msk.bf16.gmra.mxu1 %vm523_vm1, %v1339_v4  ;;  %1228 = vmatprep.mubr.msk.bf16.mxu0 %vm1344_vm0, %v1343_v34 }
  0x65   :  { %1244 = vmatprep.mubr.msk.bf16.mxu1 %vm1344_vm0, %v1343_v34 }
  0x6b   :  { %1229 = vmatmul.mubr.msk.bf16.gmra.mxu0 %vm523_vm1, %v1340_v5 }
  0x6c   :  { %1245 = vmatmul.mubr.msk.bf16.gmra.mxu1 %vm523_vm1, %v1341_v6  ;;  %1232 = vmatprep.mubr.msk.bf16.mxu0 %vm1344_vm0, %v1343_v34 }
  0x73   :  { %1233 = vmatmul.mubr.msk.bf16.gmra.mxu0 %vm523_vm1, %v1342_v7 }
  0xe3   :  { %v1101_v8 = vpop.f32.mrf.mxu0 }
  0xe4   :  { %v1159_v9 = vpop.f32.mrf.mxu1 }
  0xe5   :  { %v1102_v10 = vpop.f32.mrf.mxu0 }
  0xe6   :  { %v1160_v11 = vpop.f32.mrf.mxu1  ;;  %v1103_v59 = vadd.f32 %v1102_v10, %v1101_v8  ;;  %v1669_v8 = vld [vmem:[%s1757_s2] ss:$0 sm:$0xff] }
  0xe7   :  { %v1104_v12 = vpop.f32.mrf.mxu0  ;;  %v1161_v60 = vadd.f32 %v1160_v11, %v1159_v9 }
  0xe8   :  { %v1162_v13 = vpop.f32.mrf.mxu1 }
  0xe9   :  { %v1105_v14 = vpop.f32.mrf.mxu0  ;;  %v669_v6 = vadd.f32 %v1161_v60, %v1103_v59 }
  0xea   :  { %v1163_v15 = vpop.f32.mrf.mxu1  ;;  %v1106_v2 = vadd.f32 %v1105_v14, %v1104_v12 }
  0xeb   :  { %v1612_v16 = vpop.f32.mrf.mxu0  ;;  %v1164_v3 = vadd.f32 %v1163_v15, %v1162_v13 }
  0xec   :  { %v1614_v17 = vpop.f32.mrf.mxu1 }
  0xed   :  { %v1108_v18 = vpop.f32.mrf.mxu0  ;;  %v672_v14 = vadd.f32 %v1164_v3, %v1106_v2 }
  0xee   :  { %v1616_v19 = vpop.f32.mrf.mxu1 }
  0xef   :  { %v1618_v20 = vpop.f32.mrf.mxu0  ;;  %v1167_v15 = vadd.f32 %v1616_v19, %v1614_v17 }
  0xf0   :  { %v1620_v21 = vpop.f32.mrf.mxu1 }
  0xf1   :  { %v1622_v22 = vpop.f32.mrf.mxu0 }
  0xf2   :  { %v1624_v23 = vpop.f32.mrf.mxu1 }
  0xf3   :  { %v1626_v24 = vpop.f32.mrf.mxu0  ;;  %v1170_v17 = vadd.f32 %v1624_v23, %v1620_v21 }
  0xf4   :  { %v1628_v25 = vpop.f32.mrf.mxu1 }
  0xf5   :  { %v1630_v26 = vpop.f32.mrf.mxu0 }
  0xf6   :  { %v1632_v27 = vpop.f32.mrf.mxu1  ;;  %v1115_v21 = vadd.f32 %v1630_v26, %v1626_v24 }
  0xf7   :  { %v1634_v28 = vpop.f32.mrf.mxu0 }
  0xf8   :  { %v1636_v29 = vpop.f32.mrf.mxu1 }
  0xf9   :  { %v1638_v30 = vpop.f32.mrf.mxu0 }
  0xfa   :  { %v1640_v31 = vpop.f32.mrf.mxu1 }
  0xfb   :  { %v1642_v32 = vpop.f32.mrf.mxu0 }
  0xfc   :  { %v1644_v33 = vpop.f32.mrf.mxu1 }
  0xfd   :  { %v1646_v34 = vpop.f32.mrf.mxu0 }
  0xfe   :  { %v1648_v35 = vpop.f32.mrf.mxu1 }
  0xff   :  { %v1650_v36 = vpop.f32.mrf.mxu0 }
 0x100   :  { %v1652_v37 = vpop.f32.mrf.mxu1 }
 0x101   :  { %1760 = vst [vmem:[#allocation2_spill] sm:$0xff] %v1652_v37  ;;  %v1654_v38 = vpop.f32.mrf.mxu0 }
 0x102   :  { %v1656_v39 = vpop.f32.mrf.mxu1 }
 0x103   :  { %1761 = vst [vmem:[#allocation3_spill] sm:$0xff] %v1656_v39  ;;  %v1125_v40 = vpop.f32.mrf.mxu0 }
 0x104   :  { %v1183_v41 = vpop.f32.mrf.mxu1 }
 0x105   :  { %v1126_v42 = vpop.f32.mrf.mxu0 }
 0x106   :  { %v1184_v43 = vpop.f32.mrf.mxu1  ;;  %v1127_v62 = vadd.f32 %v1126_v42, %v1125_v40  ;;  %v1109_v40 = vadd.f32 %v1108_v18, %v1612_v16  ;;  %v1112_v18 = vadd.f32 %v1622_v22, %v1618_v20 }
 0x107   :  { %v1128_v44 = vpop.f32.mrf.mxu0  ;;  %v1185_v63 = vadd.f32 %v1184_v43, %v1183_v41 }
 0x108   :  { %v1186_v45 = vpop.f32.mrf.mxu1  ;;  %v677_v60 = vadd.f32 %v1167_v15, %v1109_v40 }
 0x109   :  { %v1129_v46 = vpop.f32.mrf.mxu0  ;;  %v701_v9 = vadd.f32 %v1185_v63, %v1127_v62 }
 0x10a   :  { %v1187_v47 = vpop.f32.mrf.mxu1  ;;  %v1130_v7 = vadd.f32 %v1129_v46, %v1128_v44 }
 0x10b   :  { %v1131_v48 = vpop.f32.mrf.mxu0  ;;  %v1188_v39 = vadd.f32 %v1187_v47, %v1186_v45  ;;  %v1678_v45 = vld [vmem:[%s1758_s3] ss:$0 sm:$0xff] }
 0x10c   :  { %v1189_v49 = vpop.f32.mrf.mxu1 }
 0x10d   :  { %v1132_v50 = vpop.f32.mrf.mxu0  ;;  %v704_v16 = vadd.f32 %v1188_v39, %v1130_v7  ;;  %v680_v7 = vadd.f32 %v1170_v17, %v1112_v18 }
 0x10e   :  { %v1190_v51 = vpop.f32.mrf.mxu1  ;;  %v1133_v41 = vadd.f32 %v1132_v50, %v1131_v48 }
 0x10f   :  { %v1134_v52 = vpop.f32.mrf.mxu0  ;;  %v1191_v42 = vadd.f32 %v1190_v51, %v1189_v49 }
 0x110   :  { %v1192_v53 = vpop.f32.mrf.mxu1 }
 0x111   :  { %v1135_v54 = vpop.f32.mrf.mxu0  ;;  %v709_v62 = vadd.f32 %v1191_v42, %v1133_v41 }
 0x112   :  { %v1193_v55 = vpop.f32.mrf.mxu1  ;;  %v1136_v63 = vadd.f32 %v1135_v54, %v1134_v52 }
 0x113   :  { %v1137_v56 = vpop.f32.mrf.mxu0  ;;  %v1194_v2 = vadd.f32 %v1193_v55, %v1192_v53 }
 0x114   :  { %v1195_v57 = vpop.f32.mrf.mxu1 }
 0x115   :  { %v1138_v58 = vpop.f32.mrf.mxu0  ;;  %v712_v41 = vadd.f32 %v1194_v2, %v1136_v63 }
 0x116   :  { %v1196_v61 = vpop.f32.mrf.mxu1 }
 0x117   :  { %v1658_v0 = vpop.f32.mrf.mxu0  ;;  %v1197_v55 = vadd.f32 %v1196_v61, %v1195_v57 }
 0x118   :  { %v1660_v1 = vpop.f32.mrf.mxu1 }
 0x119   :  { %v1662_v4 = vpop.f32.mrf.mxu0 }
 0x11a   :  { %v1664_v5 = vpop.f32.mrf.mxu1 }
 0x11b   :  { %v757_v37 = vpop.f32.mrf.mxu0 }
 0x11c   :  { %v758_v10 = vadd.f32 %v757_v37, %v669_v6  ;;  %v789_v11 = vpop.f32.mrf.mxu1 }
 0x11d   :  { %v790_v12 = vadd.f32 %v789_v11, %v701_v9  ;;  %v1222_v13 = vpop.f32.mrf.mxu0  ;;  %v1173_v9 = vadd.f32 %v1632_v27, %v1628_v25  ;;  %v1118_v27 = vadd.f32 %v1638_v30, %v1634_v28  ;;  %v1142_v28 = vadd.f32 %v1662_v4, %v1658_v0 }
 0x11e   :  { %v819_v43 = vmul.f32 %v1669_v8, %v758_v10  ;;  %v1238_v44 = vpop.f32.mrf.mxu1  ;;  %v1139_v10 = vadd.f32 %v1138_v58, %v1137_v56  ;;  %v1200_v30 = vadd.f32 %v1664_v5, %v1660_v1  ;;  %v1179_v0 = vadd.f32 %v1648_v35, %v1644_v33 }
 0x11f   :  { %v827_v37 = vmul.f32 %v1669_v8, %v790_v12  ;;  %v760_v46 = vpop.f32.mrf.mxu0  ;;  %v685_v61 = vadd.f32 %v1173_v9, %v1115_v21  ;;  %v1176_v44 = vadd.f32 %v1640_v31, %v1636_v29  ;;  %v1762_v9 = vld [vmem:[#allocation2_spill] sm:$0xff] }
 0x120   :  { %v761_v19 = vadd.f32 %v760_v46, %v672_v14  ;;  %v792_v47 = vpop.f32.mrf.mxu1  ;;  %v840_v50 = vadd.f32 %v1678_v45, %v819_v43  ;;  %v717_v18 = vadd.f32 %v1197_v55, %v1139_v10  ;;  %v1763_v10 = vld [vmem:[#allocation3_spill] sm:$0xff] }
 0x121   :  { %v793_v48 = vadd.f32 %v792_v47, %v704_v16  ;;  %v1223_v49 = vpop.f32.mrf.mxu0  ;;  %v848_v39 = vadd.f32 %v1678_v45, %v827_v37 }
 0x122   :  { %v820_v51 = vmul.f32 %v1669_v8, %v761_v19  ;;  %v1239_v59 = vpop.f32.mrf.mxu1  ;;  %v854_v11 = vmax.f32 %v840_v50, 0.0  ;;  %v1121_v49 = vadd.f32 %v1646_v34, %v1642_v32 }
 0x123   :  { %v828_v20 = vmul.f32 %v1669_v8, %v793_v48  ;;  %v765_v22 = vpop.f32.mrf.mxu0  ;;  %v862_v24 = vmax.f32 %v848_v39, 0.0 }
 0x124   :  { %v841_v23 = vadd.f32 %v1678_v45, %v820_v51  ;;  %v766_v3 = vadd.f32 %v765_v22, %v677_v60  ;;  %v797_v6 = vpop.f32.mrf.mxu1  ;;  %v720_v22 = vadd.f32 %v1200_v30, %v1142_v28 }
 0x125   :  { %v849_v52 = vadd.f32 %v1678_v45, %v828_v20  ;;  %v798_v53 = vadd.f32 %v797_v6, %v709_v62  ;;  %v1226_v54 = vpop.f32.mrf.mxu0  ;;  %v688_v62 = vadd.f32 %v1176_v44, %v1118_v27  ;;  %v693_v6 = vadd.f32 %v1179_v0, %v1121_v49 }
 0x126   :  { %v855_v40 = vmax.f32 %v841_v23, 0.0  ;;  %v821_v12 = vmul.f32 %v1669_v8, %v766_v3  ;;  %v1242_v13 = vpop.f32.mrf.mxu1 }
 0x127   :  { %v863_v26 = vmax.f32 %v849_v52, 0.0  ;;  %v829_v14 = vmul.f32 %v1669_v8, %v798_v53  ;;  %v768_v15 = vpop.f32.mrf.mxu0  ;;  %v1182_v52 = vadd.f32 %v1763_v10, %v1762_v9 }
 0x128   :  { %v1053_v42 = vpack.c.bf16 %v855_v40, %v854_v11  ;;  %v769_v43 = vadd.f32 %v768_v15, %v680_v7  ;;  %v800_v25 = vpop.f32.mrf.mxu1  ;;  %v842_v37 = vadd.f32 %v1678_v45, %v821_v12  ;;  %v1124_v7 = vadd.f32 %v1654_v38, %v1650_v36 }
 0x129   :  { %v1073_v56 = vpack.c.bf16 %v863_v26, %v862_v24  ;;  %v801_v58 = vadd.f32 %v800_v25, %v712_v41  ;;  %v1227_v57 = vpop.f32.mrf.mxu0  ;;  %v850_v29 = vadd.f32 %v1678_v45, %v829_v14 }
 0x12a   :  { %1054 = vst [vmem:[%s1759_s4] sm:$0xff] %v1053_v42   ;;  %v822_v46 = vmul.f32 %v1669_v8, %v769_v43  ;;  %v1243_v16 = vpop.f32.mrf.mxu1  ;;  %v856_v50 = vmax.f32 %v842_v37, 0.0  ;;  %v696_v42 = vadd.f32 %v1182_v52, %v1124_v7 }
 0x12b   :  { %1083 = vst [vmem:[%s1759_s4 + $0x20] sm:$0xff] %v1073_v56   ;;  %v830_v31 = vmul.f32 %v1669_v8, %v801_v58  ;;  %v773_v17 = vpop.f32.mrf.mxu0  ;;  %v864_v63 = vmax.f32 %v850_v29, 0.0 }
 0x12c   :  { %v843_v19 = vadd.f32 %v1678_v45, %v822_v46  ;;  %v774_v47 = vadd.f32 %v773_v17, %v685_v61  ;;  %v805_v48 = vpop.f32.mrf.mxu1 }
 0x12d   :  { %v851_v1 = vadd.f32 %v1678_v45, %v830_v31  ;;  %v806_v4 = vadd.f32 %v805_v48, %v717_v18  ;;  %v1230_v5 = vpop.f32.mrf.mxu0 }
 0x12e   :  { %v857_v51 = vmax.f32 %v843_v19, 0.0  ;;  %v823_v59 = vmul.f32 %v1669_v8, %v774_v47  ;;  %v1246_v60 = vpop.f32.mrf.mxu1 }
 0x12f   :  { %v865_v2 = vmax.f32 %v851_v1, 0.0  ;;  %v831_v39 = vmul.f32 %v1669_v8, %v806_v4  ;;  %v776_v20 = vpop.f32.mrf.mxu0 }
 0x130   :  { %v1058_v32 = vpack.c.bf16 %v857_v51, %v856_v50  ;;  %v777_v34 = vadd.f32 %v776_v20, %v688_v62  ;;  %v808_v21 = vpop.f32.mrf.mxu1  ;;  %v844_v53 = vadd.f32 %v1678_v45, %v823_v59 }
 0x131   :  { %v1078_v33 = vpack.c.bf16 %v865_v2, %v864_v63  ;;  %v852_v35 = vadd.f32 %v1678_v45, %v831_v39  ;;  %v809_v23 = vadd.f32 %v808_v21, %v720_v22  ;;  %v1231_v3 = vpop.f32.mrf.mxu0 }
 0x132   :  { %1080 = vst [vmem:[%s1759_s4 + $0x8] sm:$0xff] %v1058_v32   ;;  %v824_v54 = vmul.f32 %v1669_v8, %v777_v34  ;;  %v1247_v55 = vpop.f32.mrf.mxu1  ;;  %v858_v14 = vmax.f32 %v844_v53, 0.0 }
 0x133   :  { %1084 = vst [vmem:[%s1759_s4 + $0x28] sm:$0xff] %v1078_v33   ;;  %v866_v11 = vmax.f32 %v852_v35, 0.0  ;;  %v832_v40 = vmul.f32 %v1669_v8, %v809_v23  ;;  %v781_v36 = vpop.f32.mrf.mxu0 }
 0x134   :  { %v845_v38 = vadd.f32 %v1678_v45, %v824_v54  ;;  %v782_v12 = vadd.f32 %v781_v36, %v693_v6 }
 0x135   :  { %v1048_v13 = vpack.c.bf16 %v866_v11, %v866_v11  ;;  %v853_v24 = vadd.f32 %v1678_v45, %v832_v40  ;;  %v1234_v26 = vpop.f32.mrf.mxu0 }
 0x136   :  { %v859_v15 = vmax.f32 %v845_v38, 0.0  ;;  %v825_v41 = vmul.f32 %v1669_v8, %v782_v12 }
 0x137   :  { %936 = vst [vmem:[%s1759_s4 + $0x30] sm:$0xf] %v1048_v13  ;;  %v867_v43 = vmax.f32 %v853_v24, 0.0  ;;  %v784_v25 = vpop.f32.mrf.mxu0 }
 0x138   :  { %v1063_v27 = vpack.c.bf16 %v859_v15, %v858_v14  ;;  %v785_v56 = vadd.f32 %v784_v25, %v696_v42  ;;  %v846_v61 = vadd.f32 %v1678_v45, %v825_v41 }
 0x139   :  { %v1049_v58 = vpack.c.bf16 %v867_v43, %v867_v43  ;;  %v1235_v57 = vpop.f32.mrf.mxu0 }
 0x13a   :  { %1081 = vst [vmem:[%s1759_s4 + $0x10] sm:$0xff] %v1063_v27   ;;  %v826_v44 = vmul.f32 %v1669_v8, %v785_v56  ;;  %v860_v46 = vmax.f32 %v846_v61, 0.0 }
 0x13b   :  { %937 = vst [vmem:[%s1759_s4 + $0x34] sm:$0x7] %v1049_v58 }
 0x13c   :  { %v847_v37 = vadd.f32 %v1678_v45, %v826_v44 }
 0x13e   :  { %v861_v16 = vmax.f32 %v847_v37, 0.0 }
 0x140   :  { %v1068_v18 = vpack.c.bf16 %v861_v16, %v860_v46 }
 0x142   :  { %1082 = vst [vmem:[%s1759_s4 + $0x18] sm:$0xff] %v1068_v18  }

// kernel: pgccphat_forward.11
= control target key start
LH: loop header
LB: loop body
LE: loop exit
PB: predicated region body
PF: predicated region fallthrough
CT: control target
= control target key end

     0   :  { %s2714_s15 = smov 0   ;;  %s2716_s16 = smov 0   ;;  %s3284_s0 = inlined_call_operand.vmem [shape: bf16[54,1152], index: 0, kind: input, shape index: {}]   ;;  %s3285_s1 = inlined_call_operand.vmem [shape: bf16[1152,256], index: 1, kind: input, shape index: {}]   ;;  %s3286_s2 = inlined_call_operand.vmem [shape: f32[1,256], index: 2, kind: input, shape index: {}]   ;;  %s3287_s3 = inlined_call_operand.vmem [shape: f32[1,256], index: 3, kind: input, shape index: {}]   ;;  %s3288_s4 = inlined_call_operand.vmem [shape: bf16[54,256], index: 4, kind: output, shape index: {}]  }
   0x1   :  { %s2718_s17 = smov 0  }
   0x2 LB: > { %s2730_s18 = sadd.s32 4294967295, %s2687_s17   ;;  %s2733_s19 = sadd.s32 1, %s2687_s17   ;;  %s2687_s17 = sphi %s2718_s17, %s3292_s17   ;;  %s2683_s16 = sphi %s2716_s16, %s3291_s16   ;;  %s2679_s15 = sphi %s2714_s15, %s3290_s15  }
   0x3   : > { %s39_s20 = ssub.s32 %s2687_s17, %s2733_s19  ;;  %s42_s21 = sadd.s32 1, %s2683_s16 }
   0x4   : > { %p40_p0 = scmp.eq.s32.totalorder %s39_s20, 0  ;;  %p49_p1 = scmp.ne.s32.totalorder %s2683_s16, %s2679_s15 }
   0x5   : > { %p50_p2 = scmp.eq.s32.totalorder %s2687_s17, 0  ;;  %p131_p3 = scmp.eq.s32.totalorder %s2730_s18, 1 }
   0x6   : > { %s2743_s22 = scalar_select %p40_p0, %s2683_s16, %s42_s21  }
   0x7   : > { %p51_p4 = por %p50_p2, %p49_p1  ;;  %p2745_p5 = por %p131_p3, %p49_p1 }
   0x8   : > { %p2159_p6 = scmp.ge.s32.totalorder %s2687_s17, 2 }
   0xa   : > { %156 = sbr.rel (%p2159_p6) target bundleno = 115 (0x73), region = 20 }
   0xf   : > { %159 = sbr.rel (!%p51_p4) target bundleno = 115 (0x73), region = 24  ;;  %s161_s24 = sand.u32 (%p51_p4), 1, %s2683_s16  }
  0x10   : > { %s2160_s25 = sshll.u32 (%p51_p4), %s2687_s17, 2  ;;  %s2518_s26 = smul.u32 (%p51_p4), 576, %s161_s24 }
  0x11   : > { %s2755_s29 = scalar_lea.vmem (%p51_p4), %s3285_s1, %s2160_s25 }
  0x12   : > { %v182_v0 = vld [vmem:[%s2755_s29] sm:$0xf] (%p51_p4)  ;;  %v184_v1 = vld [vmem:[%s2755_s29 + $0x8] sm:$0xf] (%p51_p4)  ;;  %v186_v2 = vld [vmem:[%s2755_s29 + $0x10] sm:$0xf] (%p51_p4) }
  0x13   : > { %v188_v3 = vld [vmem:[%s2755_s29 + $0x18] sm:$0xf] (%p51_p4)  ;;  %v190_v4 = vld [vmem:[%s2755_s29 + $0x20] sm:$0xf] (%p51_p4)  ;;  %s2762_s30 = scalar_lea.vmem (%p51_p4), [#allocation2], %s2518_s26 }
  0x14   : > { %183 = vst [vmem:[%s2762_s30] sm:$0xf] %v182_v0  ;;  %185 = vst [vmem:[%s2762_s30 + $0x4] sm:$0xf] %v184_v1  ;;  %v192_v5 = vld [vmem:[%s2755_s29 + $0x28] sm:$0xf] }
  0x15   : > { %187 = vst [vmem:[%s2762_s30 + $0x8] sm:$0xf] %v186_v2  ;;  %189 = vst [vmem:[%s2762_s30 + $0xc] sm:$0xf] %v188_v3  ;;  %v194_v6 = vld [vmem:[%s2755_s29 + $0x30] sm:$0xf] }
  0x16   : > { %191 = vst [vmem:[%s2762_s30 + $0x10] sm:$0xf] %v190_v4  ;;  %v196_v7 = vld [vmem:[%s2755_s29 + $0x38] sm:$0xf]  ;;  %193 = vst [vmem:[%s2762_s30 + $0x14] sm:$0xf] %v192_v5 }
  0x17   : > { %195 = vst [vmem:[%s2762_s30 + $0x18] sm:$0xf] %v194_v6  ;;  %197 = vst [vmem:[%s2762_s30 + $0x1c] sm:$0xf] %v196_v7  ;;  %v198_v8 = vld [vmem:[%s2755_s29 + $0x40] sm:$0xf] }
  0x18   : > { %v200_v9 = vld [vmem:[%s2755_s29 + $0x48] sm:$0xf]  ;;  %v202_v10 = vld [vmem:[%s2755_s29 + $0x50] sm:$0xf]  ;;  %199 = vst [vmem:[%s2762_s30 + $0x20] sm:$0xf] %v198_v8 }
  0x19   : > { %201 = vst [vmem:[%s2762_s30 + $0x24] sm:$0xf] %v200_v9  ;;  %203 = vst [vmem:[%s2762_s30 + $0x28] sm:$0xf] %v202_v10  ;;  %v204_v11 = vld [vmem:[%s2755_s29 + $0x58] sm:$0xf] }
  0x1a   : > { %v206_v12 = vld [vmem:[%s2755_s29 + $0x60] sm:$0xf]  ;;  %v208_v13 = vld [vmem:[%s2755_s29 + $0x68] sm:$0xf]  ;;  %205 = vst [vmem:[%s2762_s30 + $0x2c] sm:$0xf] %v204_v11 }
  0x1b   : > { %207 = vst [vmem:[%s2762_s30 + $0x30] sm:$0xf] %v206_v12  ;;  %209 = vst [vmem:[%s2762_s30 + $0x34] sm:$0xf] %v208_v13  ;;  %v210_v14 = vld [vmem:[%s2755_s29 + $0x70] sm:$0xf] }
  0x1c   : > { %v212_v15 = vld [vmem:[%s2755_s29 + $0x78] sm:$0xf]  ;;  %v214_v16 = vld [vmem:[%s2755_s29 + $0x80] sm:$0xf]  ;;  %211 = vst [vmem:[%s2762_s30 + $0x38] sm:$0xf] %v210_v14 }
  0x1d   : > { %213 = vst [vmem:[%s2762_s30 + $0x3c] sm:$0xf] %v212_v15  ;;  %215 = vst [vmem:[%s2762_s30 + $0x40] sm:$0xf] %v214_v16  ;;  %v216_v17 = vld [vmem:[%s2755_s29 + $0x88] sm:$0xf] }
  0x1e   : > { %v218_v18 = vld [vmem:[%s2755_s29 + $0x90] sm:$0xf]  ;;  %v220_v19 = vld [vmem:[%s2755_s29 + $0x98] sm:$0xf]  ;;  %217 = vst [vmem:[%s2762_s30 + $0x44] sm:$0xf] %v216_v17 }
  0x1f   : > { %219 = vst [vmem:[%s2762_s30 + $0x48] sm:$0xf] %v218_v18  ;;  %221 = vst [vmem:[%s2762_s30 + $0x4c] sm:$0xf] %v220_v19  ;;  %v222_v20 = vld [vmem:[%s2755_s29 + $0xa0] sm:$0xf] }
  0x20   : > { %v224_v21 = vld [vmem:[%s2755_s29 + $0xa8] sm:$0xf]  ;;  %v226_v22 = vld [vmem:[%s2755_s29 + $0xb0] sm:$0xf]  ;;  %223 = vst [vmem:[%s2762_s30 + $0x50] sm:$0xf] %v222_v20 }
  0x21   : > { %225 = vst [vmem:[%s2762_s30 + $0x54] sm:$0xf] %v224_v21  ;;  %227 = vst [vmem:[%s2762_s30 + $0x58] sm:$0xf] %v226_v22  ;;  %v228_v23 = vld [vmem:[%s2755_s29 + $0xb8] sm:$0xf] }
  0x22   : > { %v230_v24 = vld [vmem:[%s2755_s29 + $0xc0] sm:$0xf]  ;;  %v232_v25 = vld [vmem:[%s2755_s29 + $0xc8] sm:$0xf]  ;;  %229 = vst [vmem:[%s2762_s30 + $0x5c] sm:$0xf] %v228_v23 }
  0x23   : > { %231 = vst [vmem:[%s2762_s30 + $0x60] sm:$0xf] %v230_v24  ;;  %233 = vst [vmem:[%s2762_s30 + $0x64] sm:$0xf] %v232_v25  ;;  %v234_v26 = vld [vmem:[%s2755_s29 + $0xd0] sm:$0xf] }
  0x24   : > { %v236_v27 = vld [vmem:[%s2755_s29 + $0xd8] sm:$0xf]  ;;  %v238_v28 = vld [vmem:[%s2755_s29 + $0xe0] sm:$0xf]  ;;  %235 = vst [vmem:[%s2762_s30 + $0x68] sm:$0xf] %v234_v26 }
  0x25   : > { %237 = vst [vmem:[%s2762_s30 + $0x6c] sm:$0xf] %v236_v27  ;;  %239 = vst [vmem:[%s2762_s30 + $0x70] sm:$0xf] %v238_v28  ;;  %v240_v29 = vld [vmem:[%s2755_s29 + $0xe8] sm:$0xf] }
  0x26   : > { %v242_v30 = vld [vmem:[%s2755_s29 + $0xf0] sm:$0xf]  ;;  %v244_v31 = vld [vmem:[%s2755_s29 + $0xf8] sm:$0xf]  ;;  %241 = vst [vmem:[%s2762_s30 + $0x74] sm:$0xf] %v240_v29 }
  0x27   : > { %243 = vst [vmem:[%s2762_s30 + $0x78] sm:$0xf] %v242_v30  ;;  %245 = vst [vmem:[%s2762_s30 + $0x7c] sm:$0xf] %v244_v31  ;;  %v246_v32 = vld [vmem:[%s2755_s29 + $0x100] sm:$0xf] }
  0x28   : > { %v248_v33 = vld [vmem:[%s2755_s29 + $0x108] sm:$0xf]  ;;  %v250_v34 = vld [vmem:[%s2755_s29 + $0x110] sm:$0xf]  ;;  %247 = vst [vmem:[%s2762_s30 + $0x80] sm:$0xf] %v246_v32 }
  0x29   : > { %249 = vst [vmem:[%s2762_s30 + $0x84] sm:$0xf] %v248_v33  ;;  %251 = vst [vmem:[%s2762_s30 + $0x88] sm:$0xf] %v250_v34  ;;  %v252_v35 = vld [vmem:[%s2755_s29 + $0x118] sm:$0xf] }
  0x2a   : > { %v254_v36 = vld [vmem:[%s2755_s29 + $0x120] sm:$0xf]  ;;  %v256_v37 = vld [vmem:[%s2755_s29 + $0x128] sm:$0xf]  ;;  %253 = vst [vmem:[%s2762_s30 + $0x8c] sm:$0xf] %v252_v35 }
  0x2b   : > { %255 = vst [vmem:[%s2762_s30 + $0x90] sm:$0xf] %v254_v36  ;;  %257 = vst [vmem:[%s2762_s30 + $0x94] sm:$0xf] %v256_v37  ;;  %v258_v38 = vld [vmem:[%s2755_s29 + $0x130] sm:$0xf] }
  0x2c   : > { %v260_v39 = vld [vmem:[%s2755_s29 + $0x138] sm:$0xf]  ;;  %v262_v40 = vld [vmem:[%s2755_s29 + $0x140] sm:$0xf]  ;;  %259 = vst [vmem:[%s2762_s30 + $0x98] sm:$0xf] %v258_v38 }
  0x2d   : > { %261 = vst [vmem:[%s2762_s30 + $0x9c] sm:$0xf] %v260_v39  ;;  %263 = vst [vmem:[%s2762_s30 + $0xa0] sm:$0xf] %v262_v40  ;;  %v264_v41 = vld [vmem:[%s2755_s29 + $0x148] sm:$0xf] }
  0x2e   : > { %v266_v42 = vld [vmem:[%s2755_s29 + $0x150] sm:$0xf]  ;;  %v268_v43 = vld [vmem:[%s2755_s29 + $0x158] sm:$0xf]  ;;  %265 = vst [vmem:[%s2762_s30 + $0xa4] sm:$0xf] %v264_v41 }
  0x2f   : > { %267 = vst [vmem:[%s2762_s30 + $0xa8] sm:$0xf] %v266_v42  ;;  %269 = vst [vmem:[%s2762_s30 + $0xac] sm:$0xf] %v268_v43  ;;  %v270_v44 = vld [vmem:[%s2755_s29 + $0x160] sm:$0xf] }
  0x30   : > { %v272_v45 = vld [vmem:[%s2755_s29 + $0x168] sm:$0xf]  ;;  %v274_v46 = vld [vmem:[%s2755_s29 + $0x170] sm:$0xf]  ;;  %271 = vst [vmem:[%s2762_s30 + $0xb0] sm:$0xf] %v270_v44 }
  0x31   : > { %273 = vst [vmem:[%s2762_s30 + $0xb4] sm:$0xf] %v272_v45  ;;  %275 = vst [vmem:[%s2762_s30 + $0xb8] sm:$0xf] %v274_v46  ;;  %v276_v47 = vld [vmem:[%s2755_s29 + $0x178] sm:$0xf] }
  0x32   : > { %v278_v48 = vld [vmem:[%s2755_s29 + $0x180] sm:$0xf]  ;;  %v280_v49 = vld [vmem:[%s2755_s29 + $0x188] sm:$0xf]  ;;  %277 = vst [vmem:[%s2762_s30 + $0xbc] sm:$0xf] %v276_v47 }
  0x33   : > { %279 = vst [vmem:[%s2762_s30 + $0xc0] sm:$0xf] %v278_v48  ;;  %281 = vst [vmem:[%s2762_s30 + $0xc4] sm:$0xf] %v280_v49  ;;  %v282_v50 = vld [vmem:[%s2755_s29 + $0x190] sm:$0xf] }
  0x34   : > { %v284_v51 = vld [vmem:[%s2755_s29 + $0x198] sm:$0xf]  ;;  %v286_v52 = vld [vmem:[%s2755_s29 + $0x1a0] sm:$0xf]  ;;  %283 = vst [vmem:[%s2762_s30 + $0xc8] sm:$0xf] %v282_v50 }
  0x35   : > { %285 = vst [vmem:[%s2762_s30 + $0xcc] sm:$0xf] %v284_v51  ;;  %287 = vst [vmem:[%s2762_s30 + $0xd0] sm:$0xf] %v286_v52  ;;  %v288_v53 = vld [vmem:[%s2755_s29 + $0x1a8] sm:$0xf] }
  0x36   : > { %v290_v54 = vld [vmem:[%s2755_s29 + $0x1b0] sm:$0xf]  ;;  %v292_v55 = vld [vmem:[%s2755_s29 + $0x1b8] sm:$0xf]  ;;  %289 = vst [vmem:[%s2762_s30 + $0xd4] sm:$0xf] %v288_v53 }
  0x37   : > { %291 = vst [vmem:[%s2762_s30 + $0xd8] sm:$0xf] %v290_v54  ;;  %293 = vst [vmem:[%s2762_s30 + $0xdc] sm:$0xf] %v292_v55  ;;  %v294_v56 = vld [vmem:[%s2755_s29 + $0x1c0] sm:$0xf] }
  0x38   : > { %v296_v57 = vld [vmem:[%s2755_s29 + $0x1c8] sm:$0xf]  ;;  %v298_v58 = vld [vmem:[%s2755_s29 + $0x1d0] sm:$0xf]  ;;  %295 = vst [vmem:[%s2762_s30 + $0xe0] sm:$0xf] %v294_v56 }
  0x39   : > { %297 = vst [vmem:[%s2762_s30 + $0xe4] sm:$0xf] %v296_v57  ;;  %299 = vst [vmem:[%s2762_s30 + $0xe8] sm:$0xf] %v298_v58  ;;  %v300_v59 = vld [vmem:[%s2755_s29 + $0x1d8] sm:$0xf] }
  0x3a   : > { %v302_v60 = vld [vmem:[%s2755_s29 + $0x1e0] sm:$0xf]  ;;  %v304_v61 = vld [vmem:[%s2755_s29 + $0x1e8] sm:$0xf]  ;;  %301 = vst [vmem:[%s2762_s30 + $0xec] sm:$0xf] %v300_v59 }
  0x3b   : > { %303 = vst [vmem:[%s2762_s30 + $0xf0] sm:$0xf] %v302_v60  ;;  %305 = vst [vmem:[%s2762_s30 + $0xf4] sm:$0xf] %v304_v61  ;;  %v306_v62 = vld [vmem:[%s2755_s29 + $0x1f0] sm:$0xf] }
  0x3c   : > { %v308_v63 = vld [vmem:[%s2755_s29 + $0x1f8] sm:$0xf]  ;;  %v310_v0 = vld [vmem:[%s2755_s29 + $0x200] sm:$0xf]  ;;  %307 = vst [vmem:[%s2762_s30 + $0xf8] sm:$0xf] %v306_v62 }
  0x3d   : > { %309 = vst [vmem:[%s2762_s30 + $0xfc] sm:$0xf] %v308_v63  ;;  %311 = vst [vmem:[%s2762_s30 + $0x100] sm:$0xf] %v310_v0  ;;  %v312_v1 = vld [vmem:[%s2755_s29 + $0x208] sm:$0xf] }
  0x3e   : > { %v314_v2 = vld [vmem:[%s2755_s29 + $0x210] sm:$0xf]  ;;  %v316_v3 = vld [vmem:[%s2755_s29 + $0x218] sm:$0xf]  ;;  %313 = vst [vmem:[%s2762_s30 + $0x104] sm:$0xf] %v312_v1 }
  0x3f   : > { %315 = vst [vmem:[%s2762_s30 + $0x108] sm:$0xf] %v314_v2  ;;  %317 = vst [vmem:[%s2762_s30 + $0x10c] sm:$0xf] %v316_v3  ;;  %v318_v4 = vld [vmem:[%s2755_s29 + $0x220] sm:$0xf] }
  0x40   : > { %v320_v5 = vld [vmem:[%s2755_s29 + $0x228] sm:$0xf]  ;;  %v322_v6 = vld [vmem:[%s2755_s29 + $0x230] sm:$0xf]  ;;  %319 = vst [vmem:[%s2762_s30 + $0x110] sm:$0xf] %v318_v4 }
  0x41   : > { %321 = vst [vmem:[%s2762_s30 + $0x114] sm:$0xf] %v320_v5  ;;  %323 = vst [vmem:[%s2762_s30 + $0x118] sm:$0xf] %v322_v6  ;;  %v324_v7 = vld [vmem:[%s2755_s29 + $0x238] sm:$0xf] }
  0x42   : > { %v326_v8 = vld [vmem:[%s2755_s29 + $0x240] sm:$0xf]  ;;  %v328_v9 = vld [vmem:[%s2755_s29 + $0x248] sm:$0xf]  ;;  %325 = vst [vmem:[%s2762_s30 + $0x11c] sm:$0xf] %v324_v7 }
  0x43   : > { %327 = vst [vmem:[%s2762_s30 + $0x120] sm:$0xf] %v326_v8  ;;  %329 = vst [vmem:[%s2762_s30 + $0x124] sm:$0xf] %v328_v9  ;;  %v330_v10 = vld [vmem:[%s2755_s29 + $0x250] sm:$0xf] }
  0x44   : > { %v332_v11 = vld [vmem:[%s2755_s29 + $0x258] sm:$0xf]  ;;  %v334_v12 = vld [vmem:[%s2755_s29 + $0x260] sm:$0xf]  ;;  %331 = vst [vmem:[%s2762_s30 + $0x128] sm:$0xf] %v330_v10 }
  0x45   : > { %333 = vst [vmem:[%s2762_s30 + $0x12c] sm:$0xf] %v332_v11  ;;  %335 = vst [vmem:[%s2762_s30 + $0x130] sm:$0xf] %v334_v12  ;;  %v336_v13 = vld [vmem:[%s2755_s29 + $0x268] sm:$0xf] }
  0x46   : > { %v338_v14 = vld [vmem:[%s2755_s29 + $0x270] sm:$0xf]  ;;  %v340_v15 = vld [vmem:[%s2755_s29 + $0x278] sm:$0xf]  ;;  %337 = vst [vmem:[%s2762_s30 + $0x134] sm:$0xf] %v336_v13 }
  0x47   : > { %339 = vst [vmem:[%s2762_s30 + $0x138] sm:$0xf] %v338_v14  ;;  %341 = vst [vmem:[%s2762_s30 + $0x13c] sm:$0xf] %v340_v15  ;;  %v342_v16 = vld [vmem:[%s2755_s29 + $0x280] sm:$0xf] }
  0x48   : > { %v344_v17 = vld [vmem:[%s2755_s29 + $0x288] sm:$0xf]  ;;  %v346_v18 = vld [vmem:[%s2755_s29 + $0x290] sm:$0xf]  ;;  %343 = vst [vmem:[%s2762_s30 + $0x140] sm:$0xf] %v342_v16 }
  0x49   : > { %345 = vst [vmem:[%s2762_s30 + $0x144] sm:$0xf] %v344_v17  ;;  %347 = vst [vmem:[%s2762_s30 + $0x148] sm:$0xf] %v346_v18  ;;  %v348_v19 = vld [vmem:[%s2755_s29 + $0x298] sm:$0xf] }
  0x4a   : > { %v350_v20 = vld [vmem:[%s2755_s29 + $0x2a0] sm:$0xf]  ;;  %v352_v21 = vld [vmem:[%s2755_s29 + $0x2a8] sm:$0xf]  ;;  %349 = vst [vmem:[%s2762_s30 + $0x14c] sm:$0xf] %v348_v19 }
  0x4b   : > { %351 = vst [vmem:[%s2762_s30 + $0x150] sm:$0xf] %v350_v20  ;;  %353 = vst [vmem:[%s2762_s30 + $0x154] sm:$0xf] %v352_v21  ;;  %v354_v22 = vld [vmem:[%s2755_s29 + $0x2b0] sm:$0xf] }
  0x4c   : > { %v356_v23 = vld [vmem:[%s2755_s29 + $0x2b8] sm:$0xf]  ;;  %v358_v24 = vld [vmem:[%s2755_s29 + $0x2c0] sm:$0xf]  ;;  %355 = vst [vmem:[%s2762_s30 + $0x158] sm:$0xf] %v354_v22 }
  0x4d   : > { %357 = vst [vmem:[%s2762_s30 + $0x15c] sm:$0xf] %v356_v23  ;;  %359 = vst [vmem:[%s2762_s30 + $0x160] sm:$0xf] %v358_v24  ;;  %v360_v25 = vld [vmem:[%s2755_s29 + $0x2c8] sm:$0xf] }
  0x4e   : > { %v362_v26 = vld [vmem:[%s2755_s29 + $0x2d0] sm:$0xf]  ;;  %v364_v27 = vld [vmem:[%s2755_s29 + $0x2d8] sm:$0xf]  ;;  %361 = vst [vmem:[%s2762_s30 + $0x164] sm:$0xf] %v360_v25 }
  0x4f   : > { %363 = vst [vmem:[%s2762_s30 + $0x168] sm:$0xf] %v362_v26  ;;  %365 = vst [vmem:[%s2762_s30 + $0x16c] sm:$0xf] %v364_v27  ;;  %v366_v28 = vld [vmem:[%s2755_s29 + $0x2e0] sm:$0xf] }
  0x50   : > { %v368_v29 = vld [vmem:[%s2755_s29 + $0x2e8] sm:$0xf]  ;;  %v370_v30 = vld [vmem:[%s2755_s29 + $0x2f0] sm:$0xf]  ;;  %367 = vst [vmem:[%s2762_s30 + $0x170] sm:$0xf] %v366_v28 }
  0x51   : > { %369 = vst [vmem:[%s2762_s30 + $0x174] sm:$0xf] %v368_v29  ;;  %371 = vst [vmem:[%s2762_s30 + $0x178] sm:$0xf] %v370_v30  ;;  %v372_v31 = vld [vmem:[%s2755_s29 + $0x2f8] sm:$0xf] }
  0x52   : > { %v374_v32 = vld [vmem:[%s2755_s29 + $0x300] sm:$0xf]  ;;  %v376_v33 = vld [vmem:[%s2755_s29 + $0x308] sm:$0xf]  ;;  %373 = vst [vmem:[%s2762_s30 + $0x17c] sm:$0xf] %v372_v31 }
  0x53   : > { %375 = vst [vmem:[%s2762_s30 + $0x180] sm:$0xf] %v374_v32  ;;  %377 = vst [vmem:[%s2762_s30 + $0x184] sm:$0xf] %v376_v33  ;;  %v378_v34 = vld [vmem:[%s2755_s29 + $0x310] sm:$0xf] }
  0x54   : > { %v380_v35 = vld [vmem:[%s2755_s29 + $0x318] sm:$0xf]  ;;  %v382_v36 = vld [vmem:[%s2755_s29 + $0x320] sm:$0xf]  ;;  %379 = vst [vmem:[%s2762_s30 + $0x188] sm:$0xf] %v378_v34 }
  0x55   : > { %381 = vst [vmem:[%s2762_s30 + $0x18c] sm:$0xf] %v380_v35  ;;  %383 = vst [vmem:[%s2762_s30 + $0x190] sm:$0xf] %v382_v36  ;;  %v384_v37 = vld [vmem:[%s2755_s29 + $0x328] sm:$0xf] }
  0x56   : > { %v386_v38 = vld [vmem:[%s2755_s29 + $0x330] sm:$0xf]  ;;  %v388_v39 = vld [vmem:[%s2755_s29 + $0x338] sm:$0xf]  ;;  %385 = vst [vmem:[%s2762_s30 + $0x194] sm:$0xf] %v384_v37 }
  0x57   : > { %387 = vst [vmem:[%s2762_s30 + $0x198] sm:$0xf] %v386_v38  ;;  %389 = vst [vmem:[%s2762_s30 + $0x19c] sm:$0xf] %v388_v39  ;;  %v390_v40 = vld [vmem:[%s2755_s29 + $0x340] sm:$0xf] }
  0x58   : > { %v392_v41 = vld [vmem:[%s2755_s29 + $0x348] sm:$0xf]  ;;  %v394_v42 = vld [vmem:[%s2755_s29 + $0x350] sm:$0xf]  ;;  %391 = vst [vmem:[%s2762_s30 + $0x1a0] sm:$0xf] %v390_v40 }
  0x59   : > { %393 = vst [vmem:[%s2762_s30 + $0x1a4] sm:$0xf] %v392_v41  ;;  %395 = vst [vmem:[%s2762_s30 + $0x1a8] sm:$0xf] %v394_v42  ;;  %v396_v43 = vld [vmem:[%s2755_s29 + $0x358] sm:$0xf] }
  0x5a   : > { %v398_v44 = vld [vmem:[%s2755_s29 + $0x360] sm:$0xf]  ;;  %v400_v45 = vld [vmem:[%s2755_s29 + $0x368] sm:$0xf]  ;;  %397 = vst [vmem:[%s2762_s30 + $0x1ac] sm:$0xf] %v396_v43 }
  0x5b   : > { %399 = vst [vmem:[%s2762_s30 + $0x1b0] sm:$0xf] %v398_v44  ;;  %401 = vst [vmem:[%s2762_s30 + $0x1b4] sm:$0xf] %v400_v45  ;;  %v402_v46 = vld [vmem:[%s2755_s29 + $0x370] sm:$0xf] }
  0x5c   : > { %v404_v47 = vld [vmem:[%s2755_s29 + $0x378] sm:$0xf]  ;;  %v406_v48 = vld [vmem:[%s2755_s29 + $0x380] sm:$0xf]  ;;  %403 = vst [vmem:[%s2762_s30 + $0x1b8] sm:$0xf] %v402_v46 }
  0x5d   : > { %405 = vst [vmem:[%s2762_s30 + $0x1bc] sm:$0xf] %v404_v47  ;;  %407 = vst [vmem:[%s2762_s30 + $0x1c0] sm:$0xf] %v406_v48  ;;  %v408_v49 = vld [vmem:[%s2755_s29 + $0x388] sm:$0xf] }
  0x5e   : > { %v410_v50 = vld [vmem:[%s2755_s29 + $0x390] sm:$0xf]  ;;  %v412_v51 = vld [vmem:[%s2755_s29 + $0x398] sm:$0xf]  ;;  %409 = vst [vmem:[%s2762_s30 + $0x1c4] sm:$0xf] %v408_v49 }
  0x5f   : > { %411 = vst [vmem:[%s2762_s30 + $0x1c8] sm:$0xf] %v410_v50  ;;  %413 = vst [vmem:[%s2762_s30 + $0x1cc] sm:$0xf] %v412_v51  ;;  %v414_v52 = vld [vmem:[%s2755_s29 + $0x3a0] sm:$0xf] }
  0x60   : > { %v416_v53 = vld [vmem:[%s2755_s29 + $0x3a8] sm:$0xf]  ;;  %v418_v54 = vld [vmem:[%s2755_s29 + $0x3b0] sm:$0xf]  ;;  %415 = vst [vmem:[%s2762_s30 + $0x1d0] sm:$0xf] %v414_v52 }
  0x61   : > { %417 = vst [vmem:[%s2762_s30 + $0x1d4] sm:$0xf] %v416_v53  ;;  %419 = vst [vmem:[%s2762_s30 + $0x1d8] sm:$0xf] %v418_v54  ;;  %v420_v55 = vld [vmem:[%s2755_s29 + $0x3b8] sm:$0xf] }
  0x62   : > { %v422_v56 = vld [vmem:[%s2755_s29 + $0x3c0] sm:$0xf]  ;;  %v424_v57 = vld [vmem:[%s2755_s29 + $0x3c8] sm:$0xf]  ;;  %421 = vst [vmem:[%s2762_s30 + $0x1dc] sm:$0xf] %v420_v55 }
  0x63   : > { %423 = vst [vmem:[%s2762_s30 + $0x1e0] sm:$0xf] %v422_v56  ;;  %425 = vst [vmem:[%s2762_s30 + $0x1e4] sm:$0xf] %v424_v57  ;;  %v426_v58 = vld [vmem:[%s2755_s29 + $0x3d0] sm:$0xf] }
  0x64   : > { %v428_v59 = vld [vmem:[%s2755_s29 + $0x3d8] sm:$0xf]  ;;  %v430_v60 = vld [vmem:[%s2755_s29 + $0x3e0] sm:$0xf]  ;;  %427 = vst [vmem:[%s2762_s30 + $0x1e8] sm:$0xf] %v426_v58 }
  0x65   : > { %429 = vst [vmem:[%s2762_s30 + $0x1ec] sm:$0xf] %v428_v59  ;;  %431 = vst [vmem:[%s2762_s30 + $0x1f0] sm:$0xf] %v430_v60  ;;  %v432_v61 = vld [vmem:[%s2755_s29 + $0x3e8] sm:$0xf] }
  0x66   : > { %v434_v62 = vld [vmem:[%s2755_s29 + $0x3f0] sm:$0xf]  ;;  %v436_v63 = vld [vmem:[%s2755_s29 + $0x3f8] sm:$0xf]  ;;  %433 = vst [vmem:[%s2762_s30 + $0x1f4] sm:$0xf] %v432_v61 }
  0x67   : > { %435 = vst [vmem:[%s2762_s30 + $0x1f8] sm:$0xf] %v434_v62  ;;  %437 = vst [vmem:[%s2762_s30 + $0x1fc] sm:$0xf] %v436_v63  ;;  %v438_v0 = vld [vmem:[%s2755_s29 + $0x400] sm:$0xf] }
  0x68   : > { %v440_v1 = vld [vmem:[%s2755_s29 + $0x408] sm:$0xf]  ;;  %v442_v2 = vld [vmem:[%s2755_s29 + $0x410] sm:$0xf]  ;;  %439 = vst [vmem:[%s2762_s30 + $0x200] sm:$0xf] %v438_v0 }
  0x69   : > { %441 = vst [vmem:[%s2762_s30 + $0x204] sm:$0xf] %v440_v1  ;;  %443 = vst [vmem:[%s2762_s30 + $0x208] sm:$0xf] %v442_v2  ;;  %v444_v3 = vld [vmem:[%s2755_s29 + $0x418] sm:$0xf] }
  0x6a   : > { %v446_v4 = vld [vmem:[%s2755_s29 + $0x420] sm:$0xf]  ;;  %v448_v5 = vld [vmem:[%s2755_s29 + $0x428] sm:$0xf]  ;;  %445 = vst [vmem:[%s2762_s30 + $0x20c] sm:$0xf] %v444_v3 }
  0x6b   : > { %447 = vst [vmem:[%s2762_s30 + $0x210] sm:$0xf] %v446_v4  ;;  %449 = vst [vmem:[%s2762_s30 + $0x214] sm:$0xf] %v448_v5  ;;  %v450_v6 = vld [vmem:[%s2755_s29 + $0x430] sm:$0xf] }
  0x6c   : > { %v452_v7 = vld [vmem:[%s2755_s29 + $0x438] sm:$0xf]  ;;  %v454_v8 = vld [vmem:[%s2755_s29 + $0x440] sm:$0xf]  ;;  %451 = vst [vmem:[%s2762_s30 + $0x218] sm:$0xf] %v450_v6 }
  0x6d   : > { %453 = vst [vmem:[%s2762_s30 + $0x21c] sm:$0xf] %v452_v7  ;;  %455 = vst [vmem:[%s2762_s30 + $0x220] sm:$0xf] %v454_v8  ;;  %v456_v9 = vld [vmem:[%s2755_s29 + $0x448] sm:$0xf] }
  0x6e   : > { %v458_v10 = vld [vmem:[%s2755_s29 + $0x450] sm:$0xf]  ;;  %v460_v11 = vld [vmem:[%s2755_s29 + $0x458] sm:$0xf]  ;;  %457 = vst [vmem:[%s2762_s30 + $0x224] sm:$0xf] %v456_v9 }
  0x6f   : > { %459 = vst [vmem:[%s2762_s30 + $0x228] sm:$0xf] %v458_v10  ;;  %461 = vst [vmem:[%s2762_s30 + $0x22c] sm:$0xf] %v460_v11  ;;  %v462_v12 = vld [vmem:[%s2755_s29 + $0x460] sm:$0xf] }
  0x70   : > { %v464_v13 = vld [vmem:[%s2755_s29 + $0x468] sm:$0xf]  ;;  %v466_v14 = vld [vmem:[%s2755_s29 + $0x470] sm:$0xf]  ;;  %463 = vst [vmem:[%s2762_s30 + $0x230] sm:$0xf] %v462_v12 }
  0x71   : > { %465 = vst [vmem:[%s2762_s30 + $0x234] sm:$0xf] %v464_v13  ;;  %467 = vst [vmem:[%s2762_s30 + $0x238] sm:$0xf] %v466_v14  ;;  %v468_v15 = vld [vmem:[%s2755_s29 + $0x478] sm:$0xf] }
  0x72   : > { %469 = vst [vmem:[%s2762_s30 + $0x23c] sm:$0xf] %v468_v15 }
  0x73 PF: > { %p2161_p7 = scmp.ge.s32.totalorder %s2687_s17, 1  ;;  %p792_p8 = scmp.lt.s32.totalorder %s2687_s17, 3 }
  0x75   : > { %p793_p9 = pnand %p2161_p7, %p792_p8 }
  0x76   : > { %s799_s5 = sand.u32 (!%p793_p9), 1, %s2679_s15   ;;  %p829_p10 = scmp.lt.s32.totalorder (!%p793_p9), %s2730_s18, 1 }
  0x77   : > { %796 = sbr.rel (%p793_p9) target bundleno = 443 (0x1bb), region = 73 }
  0x78   : > { %s2519_s6 = smul.u32 (!%p793_p9), 576, %s799_s5 }
  0x79   : > { %s2520_s30 = smul.u32 (!%p793_p9), 28, %s799_s5 }
  0x7a   : > { %s3058_s11 = scalar_lea.vmem (!%p793_p9), [#allocation2], %s2519_s6 }
  0x7b   : > { %s828_s15 = scalar_lea.vmem (!%p793_p9), [#allocation3], %s2520_s30 }
  0x7c   : > { %v2579_v16 = vld [vmem:[%s3284_s0 + $0x4] ss:$36 sps:$4 sm:$0xff]   ;;  %v2582_v17 = vld [vmem:[%s3284_s0 + $0xc] ss:$36 sps:$4 sm:$0xff]   ;;  %v2545_v18 = vld [vmem:[%s3058_s11 + $0x78] sm:$0xff]   ;;  %s2279_s5 = sshll.u32 (%p2745_p5), %s2730_s18, 2 }
  0x7d   : > { %1649 = vmatprep.mubr.bf16.mxu0 %v2579_v16  ;;  %1713 = vmatprep.mubr.bf16.mxu1 %v2582_v17  ;;  %v2546_v19 = vld [vmem:[%s3058_s11 + $0xf8] sm:$0xff]   ;;  %v2549_v22 = vld [vmem:[%s3058_s11 + $0x70] sm:$0xff]   ;;  %v2553_v26 = vld [vmem:[%s3058_s11 + $0x68] sm:$0xff]   ;;  %s2016_s8 = scalar_lea.vmem (%p2745_p5), %s3288_s4, %s2279_s5 }
  0x7e   : > { %2306 = vmatprep.subr.bf16.mxu0 %v2545_v18  ;;  %v2547_v20 = vld [vmem:[%s3058_s11 + $0x38] sm:$0xff]   ;;  %2346 = vmatprep.subr.bf16.mxu1 %v2546_v19  ;;  %v2550_v23 = vld [vmem:[%s3058_s11 + $0xf0] sm:$0xff]   ;;  %v2554_v27 = vld [vmem:[%s3058_s11 + $0xe8] sm:$0xff]  }
  0x7f   : > { %v2548_v21 = vld [vmem:[%s3058_s11 + $0xb8] sm:$0xff]   ;;  %2307 = vmatpush3.bf16.msra.mxu0 %v2547_v20  ;;  %v2551_v24 = vld [vmem:[%s3058_s11 + $0x30] sm:$0xff]   ;;  %v2555_v28 = vld [vmem:[%s3058_s11 + $0x28] sm:$0xff]  }
  0x80   : > { %2347 = vmatpush3.bf16.msra.mxu1 %v2548_v21  ;;  %2308 = vmatprep.subr.bf16.mxu0 %v2549_v22  ;;  %v2552_v25 = vld [vmem:[%s3058_s11 + $0xb0] sm:$0xff]   ;;  %v2556_v29 = vld [vmem:[%s3058_s11 + $0xa8] sm:$0xff]   ;;  %v2557_v30 = vld [vmem:[%s3058_s11 + $0x60] sm:$0xff]  }
  0x81   : > { %2348 = vmatprep.subr.bf16.mxu1 %v2550_v23  ;;  %v2558_v31 = vld [vmem:[%s3058_s11 + $0xe0] sm:$0xff]   ;;  %v2561_v34 = vld [vmem:[%s3058_s11 + $0x58] sm:$0xff]   ;;  %v2565_v38 = vld [vmem:[%s3058_s11 + $0x50] sm:$0xff]  }
  0x82   : > { %v2559_v32 = vld [vmem:[%s3058_s11 + $0x20] sm:$0xff]   ;;  %v2562_v35 = vld [vmem:[%s3058_s11 + $0xd8] sm:$0xff]   ;;  %v2566_v39 = vld [vmem:[%s3058_s11 + $0xd0] sm:$0xff]  }
  0x83   : > { %2309 = vmatpush3.bf16.msra.mxu0 %v2551_v24  ;;  %v2560_v33 = vld [vmem:[%s3058_s11 + $0xa0] sm:$0xff]   ;;  %v2563_v36 = vld [vmem:[%s3058_s11 + $0x18] sm:$0xff]   ;;  %v2567_v40 = vld [vmem:[%s3058_s11 + $0x10] sm:$0xff]  }
  0x84   : > { %2349 = vmatpush3.bf16.msra.mxu1 %v2552_v25  ;;  %2310 = vmatprep.subr.bf16.mxu0 %v2553_v26  ;;  %v2564_v37 = vld [vmem:[%s3058_s11 + $0x98] sm:$0xff]   ;;  %v2568_v41 = vld [vmem:[%s3058_s11 + $0x90] sm:$0xff]   ;;  %v2569_v42 = vld [vmem:[%s3058_s11 + $0x48] sm:$0xff]  }
  0x85   : > { %2350 = vmatprep.subr.bf16.mxu1 %v2554_v27  ;;  %v2570_v43 = vld [vmem:[%s3058_s11 + $0xc8] sm:$0xff]   ;;  %v2573_v46 = vld [vmem:[%s3058_s11 + $0x40] sm:$0xff]   ;;  %v2583_v53 = vld [vmem:[%s3058_s11 + $0x178] sm:$0xff]  }
  0x86   : > { %v2571_v44 = vld [vmem:[%s3058_s11 + $0x8] sm:$0xff]   ;;  %v2574_v47 = vld [vmem:[%s3058_s11 + $0xc0] sm:$0xff]   ;;  %v2584_v54 = vld [vmem:[%s3058_s11 + $0x1f8] sm:$0xff]  }
  0x87   : > { %2311 = vmatpush3.bf16.msra.mxu0 %v2555_v28  ;;  %v2572_v45 = vld [vmem:[%s3058_s11 + $0x88] sm:$0xff]   ;;  %v2577_v48 = vld [vmem:[%s3284_s0] ss:$36 sps:$4 sm:$0xff]   ;;  %v2585_v55 = vld [vmem:[%s3058_s11 + $0x138] sm:$0xff]  }
  0x88   : > { %2351 = vmatpush3.bf16.msra.mxu1 %v2556_v29  ;;  %2312 = vmatprep.subr.bf16.mxu0 %v2557_v30  ;;  %v2575_v49 = vld [vmem:[%s3058_s11] sm:$0xff]   ;;  %v2580_v50 = vld [vmem:[%s3284_s0 + $0x8] ss:$36 sps:$4 sm:$0xff]   ;;  %v2586_v56 = vld [vmem:[%s3058_s11 + $0x1b8] sm:$0xff]  }
  0x89   : > { %2352 = vmatprep.subr.bf16.mxu1 %v2558_v31  ;;  %v2576_v51 = vld [vmem:[%s3058_s11 + $0x80] sm:$0xff]   ;;  %v2591_v52 = vld [vmem:[%s3284_s0 + $0x4c] ss:$36 sps:$4 sm:$0xff]   ;;  %v2593_v61 = vld [vmem:[%s3284_s0 + $0x54] ss:$36 sps:$4 sm:$0xff]  }
  0x8a   : > { %v2587_v57 = vld [vmem:[%s3058_s11 + $0x170] sm:$0xff]   ;;  %v2595_v62 = vld [vmem:[%s3284_s0 + $0x48] ss:$36 sps:$4 sm:$0xff]   ;;  %v2601_v4 = vld [vmem:[%s3058_s11 + $0x160] sm:$0xff]  }
  0x8b   : > { %2313 = vmatpush3.bf16.msra.mxu0 %v2559_v32  ;;  %v2588_v58 = vld [vmem:[%s3058_s11 + $0x1f0] sm:$0xff]   ;;  %v2597_v0 = vld [vmem:[%s3058_s11 + $0x168] sm:$0xff]   ;;  %v2602_v5 = vld [vmem:[%s3058_s11 + $0x1e0] sm:$0xff]  }
  0x8c   : > { %2353 = vmatpush3.bf16.msra.mxu1 %v2560_v33  ;;  %2314 = vmatprep.subr.bf16.mxu0 %v2561_v34  ;;  %v2589_v59 = vld [vmem:[%s3058_s11 + $0x130] sm:$0xff]   ;;  %v2598_v1 = vld [vmem:[%s3058_s11 + $0x1e8] sm:$0xff]   ;;  %v2603_v6 = vld [vmem:[%s3058_s11 + $0x120] sm:$0xff]  }
  0x8d   : > { %2354 = vmatprep.subr.bf16.mxu1 %v2562_v35  ;;  %v2590_v60 = vld [vmem:[%s3058_s11 + $0x1b0] sm:$0xff]   ;;  %v2599_v2 = vld [vmem:[%s3058_s11 + $0x128] sm:$0xff]   ;;  %v2604_v7 = vld [vmem:[%s3058_s11 + $0x1a0] sm:$0xff]  }
  0x8e   : > { %v2596_v63 = vld [vmem:[%s3284_s0 + $0x50] ss:$36 sps:$4 sm:$0xff]   ;;  %v2600_v3 = vld [vmem:[%s3058_s11 + $0x1a8] sm:$0xff]   ;;  %v2607_v9 = vld [vmem:[%s3284_s0 + $0x9c] ss:$36 sps:$4 sm:$0xff]  }
  0x8f   : > { %2315 = vmatpush3.bf16.msra.mxu0 %v2563_v36  ;;  %v2605_v8 = vld [vmem:[%s3284_s0 + $0x94] ss:$36 sps:$4 sm:$0xff]   ;;  %v867_v21 = vld [vmem:[%s3284_s0 + $0xe0] sm:$0x77]  ;;  %v2623_v26 = vld [vmem:[%s3058_s11 + $0x148] sm:$0xff]  }
  0x90   : > { %2355 = vmatpush3.bf16.msra.mxu1 %v2564_v37  ;;  %2316 = vmatprep.subr.bf16.mxu0 %v2565_v38  ;;  %v2609_v10 = vld [vmem:[%s3284_s0 + $0x90] ss:$36 sps:$4 sm:$0xff]   ;;  %v2610_v11 = vld [vmem:[%s3284_s0 + $0x98] ss:$36 sps:$4 sm:$0xff]   ;;  %v2192_v23 = vcombine.high %v867_v21, %v867_v21  ;;  %v2191_v25 = vcombine.low %v867_v21, %v867_v21  ;;  %v2624_v27 = vld [vmem:[%s3058_s11 + $0x1c8] sm:$0xff]  }
  0x91   : > { %2356 = vmatprep.subr.bf16.mxu1 %v2566_v39  ;;  %v2611_v12 = vld [vmem:[%s3058_s11 + $0x158] sm:$0xff]   ;;  %v2615_v16 = vld [vmem:[%s3058_s11 + $0x150] sm:$0xff]   ;;  %v2625_v28 = vld [vmem:[%s3058_s11 + $0x108] sm:$0xff]  }
  0x92   : > { %v2612_v13 = vld [vmem:[%s3058_s11 + $0x1d8] sm:$0xff]   ;;  %v2616_v17 = vld [vmem:[%s3058_s11 + $0x1d0] sm:$0xff]   ;;  %v2626_v29 = vld [vmem:[%s3058_s11 + $0x188] sm:$0xff]  }
  0x93   : > { %2317 = vmatpush3.bf16.msra.mxu0 %v2567_v40  ;;  %v2613_v14 = vld [vmem:[%s3058_s11 + $0x118] sm:$0xff]   ;;  %v2617_v18 = vld [vmem:[%s3058_s11 + $0x110] sm:$0xff]   ;;  %v2627_v30 = vld [vmem:[%s3058_s11 + $0x140] sm:$0xff]  }
  0x94   : > { %2357 = vmatpush3.bf16.msra.mxu1 %v2568_v41  ;;  %2318 = vmatprep.subr.bf16.mxu0 %v2569_v42  ;;  %v2614_v15 = vld [vmem:[%s3058_s11 + $0x198] sm:$0xff]   ;;  %v2618_v19 = vld [vmem:[%s3058_s11 + $0x190] sm:$0xff]   ;;  %v2628_v31 = vld [vmem:[%s3058_s11 + $0x1c0] sm:$0xff]  }
  0x95   : > { %2358 = vmatprep.subr.bf16.mxu1 %v2570_v43  ;;  %v866_v20 = vld [vmem:[%s3284_s0 + $0xd8] sm:$0x77]  ;;  %v2629_v32 = vld [vmem:[%s3058_s11 + $0x100] sm:$0xff]   ;;  %v2631_v34 = vld [vmem:[%s3284_s0 + $0x10] ss:$36 sps:$4 sm:$0xff]  }
  0x96   : > { %v2190_v22 = vcombine.high %v866_v20, %v866_v20  ;;  %v2189_v24 = vcombine.low %v866_v20, %v866_v20  ;;  %v2630_v33 = vld [vmem:[%s3058_s11 + $0x180] sm:$0xff]   ;;  %v2633_v35 = vld [vmem:[%s3284_s0 + $0x14] ss:$36 sps:$4 sm:$0xff]   ;;  %v2645_v43 = vld [vmem:[%s3058_s11 + $0x228] sm:$0xff]  }
  0x97   : > { %2319 = vmatpush3.bf16.msra.mxu0 %v2571_v44  ;;  %v2634_v36 = vld [vmem:[%s3284_s0 + $0x18] ss:$36 sps:$4 sm:$0xff]   ;;  %v2638_v39 = vld [vmem:[%s3058_s11 + $0x230] sm:$0xff]   ;;  %v2641_v41 = vld [vmem:[%s3284_s0 + $0x64] ss:$36 sps:$4 sm:$0xff]  }
  0x98   : > { %2359 = vmatpush3.bf16.msra.mxu1 %v2572_v45  ;;  %2320 = vmatprep.subr.bf16.mxu0 %v2573_v46  ;;  %v2636_v37 = vld [vmem:[%s3284_s0 + $0x1c] ss:$36 sps:$4 sm:$0xff]   ;;  %v2647_v45 = vld [vmem:[%s3284_s0 + $0xa4] ss:$36 sps:$4 sm:$0xff]   ;;  %v2649_v46 = vld [vmem:[%s3284_s0 + $0xac] ss:$36 sps:$4 sm:$0xff]  }
  0x99   : > { %2360 = vmatprep.subr.bf16.mxu1 %v2574_v47  ;;  %v2637_v38 = vld [vmem:[%s3058_s11 + $0x238] sm:$0xff]   ;;  %v2644_v44 = vld [vmem:[%s3284_s0 + $0x60] ss:$36 sps:$4 sm:$0xff]  }
  0x9a   : > { %v2639_v40 = vld [vmem:[%s3284_s0 + $0x5c] ss:$36 sps:$4 sm:$0xff]  }
  0x9b   : > { %2321 = vmatpush3.bf16.msra.mxu0 %v2575_v49  ;;  %v2643_v42 = vld [vmem:[%s3284_s0 + $0x58] ss:$36 sps:$4 sm:$0xff]   ;;  %v2646_v47 = vld [vmem:[%s3058_s11 + $0x220] sm:$0xff]   ;;  %v868_v49 = vld [vmem:[%s3284_s0 + $0xe8] sm:$0x77] }
  0x9c   : > { %2361 = vmatpush3.bf16.msra.mxu1 %v2576_v51  ;;  %2386 = vmatprep.subr.bf16.mxu0 %v2583_v53  ;;  %v2651_v51 = vld [vmem:[%s3284_s0 + $0xa0] ss:$36 sps:$4 sm:$0xff]   ;;  %v2194_v53 = vcombine.high %v868_v49, %v868_v49 }
  0x9d   : > { %2426 = vmatprep.subr.bf16.mxu1 %v2584_v54 }
  0x9e   : > { %1650 = vmatmul.mubr.bf16.vlgmr.msra.gmra.mxu0 %v2577_v48  ;;  %v2653_v48 = vld [vmem:[%s3058_s11 + $0x218] sm:$0xff]  }
  0x9f   : > { %1714 = vmatmul.mubr.bf16.vlgmr.msra.gmra.mxu1 %v2580_v50  ;;  %2387 = vmatpush3.bf16.msra.mxu0 %v2585_v55  ;;  %v869_v50 = vld [vmem:[%s3284_s0 + $0xf0] sm:$0x77] }
  0xa0   : > { %2427 = vmatpush3.bf16.msra.mxu1 %v2586_v56  ;;  %1657 = vmatprep.mubr.bf16.mxu0 %v2591_v52  ;;  %v2652_v52 = vld [vmem:[%s3284_s0 + $0xa8] ss:$36 sps:$4 sm:$0xff]   ;;  %v2196_v54 = vcombine.high %v869_v50, %v869_v50  ;;  %v2654_v55 = vld [vmem:[%s3058_s11 + $0x210] sm:$0xff]  }
  0xa1   : > { %2388 = vmatprep.subr.bf16.mxu0 %v2587_v57  ;;  %2428 = vmatprep.subr.bf16.mxu1 %v2588_v58  ;;  %v2659_v56 = vld [vmem:[%s3058_s11 + $0x208] sm:$0xff]   ;;  %v2193_v57 = vcombine.low %v868_v49, %v868_v49  ;;  %v2195_v58 = vcombine.low %v869_v50, %v869_v50 }
  0xa2   : > { %1721 = vmatprep.mubr.bf16.mxu1 %v2593_v61  ;;  %v2660_v61 = vld [vmem:[%s3058_s11 + $0x200] sm:$0xff]   ;;  %s3246_s11 = scalar_select %p829_p10, %s2730_s18, 1 }
  0xa3   : > { %2389 = vmatpush3.bf16.msra.mxu0 %v2589_v59  ;;  %v2661_v59 = vld [vmem:[%s3284_s0 + $0x20] ss:$36 sps:$4 sm:$0xff]  }
  0xa4   : > { %2429 = vmatpush3.bf16.msra.mxu1 %v2590_v60  ;;  %2390 = vmatprep.subr.bf16.mxu0 %v2597_v0  ;;  %v2662_v60 = vld [vmem:[%s3284_s0 + $0xb0] ss:$36 sps:$4 sm:$0xff]   ;;  %s831_s26 = scalar_lea.vmem %s3286_s2, %s3246_s11  ;;  %s834_s29 = scalar_lea.vmem %s3287_s3, %s3246_s11 }
  0xa5   : > { %2430 = vmatprep.subr.bf16.mxu1 %v2598_v1 }
  0xa6   : > { %1658 = vmatmul.mubr.bf16.gmra.mxu0 %v2595_v62  ;;  %v2663_v62 = vld [vmem:[%s3284_s0 + $0x68] ss:$36 sps:$4 sm:$0xff]  }
  0xa7   : > { %1722 = vmatmul.mubr.bf16.gmra.mxu1 %v2596_v63  ;;  %2391 = vmatpush3.bf16.msra.mxu0 %v2599_v2  ;;  %v2664_v63 = vld [vmem:[%s3284_s0 + $0xf8] ss:$0 sps:$4 sm:$0x77]  }
  0xa8   : > { %2431 = vmatpush3.bf16.msra.mxu1 %v2600_v3  ;;  %2392 = vmatprep.subr.bf16.mxu0 %v2601_v4 }
  0xa9   : > { %2432 = vmatprep.subr.bf16.mxu1 %v2602_v5  ;;  %1665 = vmatprep.mubr.bf16.mxu0 %v2605_v8 }
  0xaa   : > { %1729 = vmatprep.mubr.bf16.mxu1 %v2607_v9 }
  0xab   : > { %2393 = vmatpush3.bf16.msra.mxu0 %v2603_v6 }
  0xac   : > { %2433 = vmatpush3.bf16.msra.mxu1 %v2604_v7  ;;  %2394 = vmatprep.subr.bf16.mxu0 %v2611_v12 }
  0xad   : > { %2434 = vmatprep.subr.bf16.mxu1 %v2612_v13 }
  0xae   : > { %1666 = vmatmul.mubr.bf16.gmra.mxu0 %v2609_v10 }
  0xaf   : > { %1730 = vmatmul.mubr.bf16.gmra.mxu1 %v2610_v11  ;;  %2395 = vmatpush3.bf16.msra.mxu0 %v2613_v14 }
  0xb0   : > { %2435 = vmatpush3.bf16.msra.mxu1 %v2614_v15  ;;  %2396 = vmatprep.subr.bf16.mxu0 %v2615_v16 }
  0xb1   : > { %2436 = vmatprep.subr.bf16.mxu1 %v2616_v17  ;;  %1673 = vmatprep.mubr.bf16.mxu0 %v2190_v22 }
  0xb2   : > { %1737 = vmatprep.mubr.bf16.mxu1 %v2192_v23 }
  0xb3   : > { %2397 = vmatpush3.bf16.msra.mxu0 %v2617_v18 }
  0xb4   : > { %2437 = vmatpush3.bf16.msra.mxu1 %v2618_v19  ;;  %2398 = vmatprep.subr.bf16.mxu0 %v2623_v26 }
  0xb5   : > { %2438 = vmatprep.subr.bf16.mxu1 %v2624_v27 }
  0xb6   : > { %1674 = vmatmul.mubr.bf16.gmra.mxu0 %v2189_v24 }
  0xb7   : > { %1738 = vmatmul.mubr.bf16.gmra.mxu1 %v2191_v25  ;;  %2399 = vmatpush3.bf16.msra.mxu0 %v2625_v28 }
  0xb8   : > { %2439 = vmatpush3.bf16.msra.mxu1 %v2626_v29  ;;  %2400 = vmatprep.subr.bf16.mxu0 %v2627_v30 }
  0xb9   : > { %2440 = vmatprep.subr.bf16.mxu1 %v2628_v31  ;;  %1777 = vmatprep.mubr.bf16.mxu0 %v2633_v35 }
  0xba   : > { %1841 = vmatprep.mubr.bf16.mxu1 %v2636_v37 }
  0xbb   : > { %2401 = vmatpush3.bf16.msra.mxu0 %v2629_v32 }
  0xbc   : > { %2441 = vmatpush3.bf16.msra.mxu1 %v2630_v33  ;;  %2478 = vmatprep.subr.bf16.mxu0 %v2637_v38 }
  0xbd   : > { %2502 = vmatprep.subr.bf16.mxu1 %v2637_v38 }
  0xbe   : > { %1778 = vmatmul.mubr.bf16.vlgmr.msra.gmra.mxu0 %v2631_v34 }
  0xbf   : > { %1842 = vmatmul.mubr.bf16.vlgmr.msra.gmra.mxu1 %v2634_v36  ;;  %2479 = vmatpush3.bf16.msra.mxu0 %v2637_v38 }
  0xc0   : > { %2510 = vmatpush3.bf16.msra.mxu1 %v2637_v38  ;;  %2480 = vmatprep.subr.bf16.mxu0 %v2638_v39 }
  0xc1   : > { %2503 = vmatprep.subr.bf16.mxu1 %v2638_v39  ;;  %1785 = vmatprep.mubr.bf16.mxu0 %v2639_v40 }
  0xc2   : > { %1849 = vmatprep.mubr.bf16.mxu1 %v2641_v41 }
  0xc3   : > { %2481 = vmatpush3.bf16.msra.mxu0 %v2638_v39 }
  0xc4   : > { %2511 = vmatpush3.bf16.msra.mxu1 %v2638_v39  ;;  %2482 = vmatprep.subr.bf16.mxu0 %v2645_v43 }
  0xc5   : > { %2504 = vmatprep.subr.bf16.mxu1 %v2645_v43 }
  0xc6   : > { %1786 = vmatmul.mubr.bf16.gmra.mxu0 %v2643_v42 }
  0xc7   : > { %1850 = vmatmul.mubr.bf16.gmra.mxu1 %v2644_v44  ;;  %1793 = vmatprep.mubr.bf16.mxu0 %v2647_v45 }
  0xc8   : > { %2483 = vmatpush3.bf16.msra.mxu0 %v2645_v43  ;;  %1857 = vmatprep.mubr.bf16.mxu1 %v2649_v46 }
  0xc9   : > { %2512 = vmatpush3.bf16.msra.mxu1 %v2645_v43  ;;  %2484 = vmatprep.subr.bf16.mxu0 %v2646_v47 }
  0xca   : > { %2505 = vmatprep.subr.bf16.mxu1 %v2646_v47 }
  0xcc   : > { %2485 = vmatpush3.bf16.msra.mxu0 %v2646_v47 }
  0xcd   : > { %2513 = vmatpush3.bf16.msra.mxu1 %v2646_v47  ;;  %2486 = vmatprep.subr.bf16.mxu0 %v2653_v48 }
  0xce   : > { %1794 = vmatmul.mubr.bf16.gmra.mxu0 %v2651_v51  ;;  %2506 = vmatprep.subr.bf16.mxu1 %v2653_v48 }
  0xcf   : > { %1858 = vmatmul.mubr.bf16.gmra.mxu1 %v2652_v52  ;;  %1801 = vmatprep.mubr.bf16.mxu0 %v2194_v53 }
  0xd0   : > { %2487 = vmatpush3.bf16.msra.mxu0 %v2653_v48  ;;  %1865 = vmatprep.mubr.bf16.mxu1 %v2196_v54 }
  0xd1   : > { %2514 = vmatpush3.bf16.msra.mxu1 %v2653_v48  ;;  %2488 = vmatprep.subr.bf16.mxu0 %v2654_v55 }
  0xd2   : > { %2507 = vmatprep.subr.bf16.mxu1 %v2654_v55 }
  0xd4   : > { %2489 = vmatpush3.bf16.msra.mxu0 %v2654_v55 }
  0xd5   : > { %2515 = vmatpush3.bf16.msra.mxu1 %v2654_v55  ;;  %2490 = vmatprep.subr.bf16.mxu0 %v2659_v56 }
  0xd6   : > { %1802 = vmatmul.mubr.bf16.gmra.mxu0 %v2193_v57  ;;  %2508 = vmatprep.subr.bf16.mxu1 %v2659_v56 }
  0xd7   : > { %1866 = vmatmul.mubr.bf16.gmra.mxu1 %v2195_v58  ;;  %2494 = vmatprep.mubr.bf16.mxu0 %v2661_v59 }
  0xd8   : > { %2491 = vmatpush3.bf16.msra.mxu0 %v2659_v56  ;;  %2498 = vmatprep.mubr.bf16.mxu1 %v2662_v60 }
  0xd9   : > { %2516 = vmatpush3.bf16.msra.mxu1 %v2659_v56  ;;  %2492 = vmatprep.subr.bf16.mxu0 %v2660_v61 }
  0xda   : > { %2509 = vmatprep.subr.bf16.mxu1 %v2660_v61 }
  0xdc   : > { %2493 = vmatpush3.bf16.msra.mxu0 %v2660_v61 }
  0xdd   : > { %2517 = vmatpush3.bf16.msra.mxu1 %v2660_v61 }
  0xdf   : > { %2495 = vmatmul.mubr.bf16.vlgmr.msra.gmra.mxu0 %v2663_v62 }
  0xe0   : > { %2499 = vmatmul.mubr.bf16.vlgmr.msra.gmra.mxu1 %v2664_v63 }
 0x15e   : > { %v2322_v0 = vpop.f32.mrf.mxu0 }
 0x15f   : > { %v2362_v1 = vpop.f32.mrf.mxu1 }
 0x160   : > { %v2323_v2 = vpop.f32.mrf.mxu0 }
 0x161   : > { %v2324_v3 = vadd.f32 %v2323_v2, %v2322_v0  ;;  %v2363_v4 = vpop.f32.mrf.mxu1 }
 0x162   : > { %v2364_v5 = vadd.f32 %v2363_v4, %v2362_v1  ;;  %v3222_v6 = vpop.f32.mrf.mxu0 }
 0x163   : > { %v3224_v7 = vpop.f32.mrf.mxu1 }
 0x164   : > { %v3226_v8 = vadd.f32 %v2364_v5, %v2324_v3  ;;  %v3228_v9 = vpop.f32.mrf.mxu0 }
 0x165   : > { %v3230_v10 = vpop.f32.mrf.mxu1 }
 0x166   : > { %v2328_v11 = vpop.f32.mrf.mxu0 }
 0x167   : > { %v2368_v12 = vpop.f32.mrf.mxu1 }
 0x168   : > { %v2329_v13 = vpop.f32.mrf.mxu0 }
 0x169   : > { %v2369_v14 = vpop.f32.mrf.mxu1  ;;  %v2330_v57 = vadd.f32 %v2329_v13, %v2328_v11  ;;  %v2327_v11 = vadd.f32 %v3228_v9, %v3222_v6 }
 0x16a   : > { %v2331_v15 = vpop.f32.mrf.mxu0  ;;  %v2370_v58 = vadd.f32 %v2369_v14, %v2368_v12 }
 0x16b   : > { %v2371_v16 = vpop.f32.mrf.mxu1 }
 0x16c   : > { %v2332_v17 = vpop.f32.mrf.mxu0  ;;  %v1724_v4 = vadd.f32 %v2370_v58, %v2330_v57 }
 0x16d   : > { %v2372_v18 = vpop.f32.mrf.mxu1  ;;  %v2333_v5 = vadd.f32 %v2332_v17, %v2331_v15 }
 0x16e   : > { %v2334_v19 = vpop.f32.mrf.mxu0 }
 0x16f   : > { %v2374_v20 = vpop.f32.mrf.mxu1 }
 0x170   : > { %v2335_v21 = vpop.f32.mrf.mxu0 }
 0x171   : > { %v2375_v22 = vpop.f32.mrf.mxu1  ;;  %v2336_v63 = vadd.f32 %v2335_v21, %v2334_v19  ;;  %v2367_v19 = vadd.f32 %v3230_v10, %v3224_v7 }
 0x172   : > { %v2337_v23 = vpop.f32.mrf.mxu0  ;;  %v2376_v0 = vadd.f32 %v2375_v22, %v2374_v20 }
 0x173   : > { %v2377_v24 = vpop.f32.mrf.mxu1 }
 0x174   : > { %v2338_v25 = vpop.f32.mrf.mxu0  ;;  %v1732_v20 = vadd.f32 %v2376_v0, %v2336_v63 }
 0x175   : > { %v2378_v26 = vpop.f32.mrf.mxu1  ;;  %v2339_v17 = vadd.f32 %v2338_v25, %v2337_v23  ;;  %v1719_v23 = vadd.f32 %v2367_v19, %v2327_v11 }
 0x176   : > { %v2340_v27 = vpop.f32.mrf.mxu0 }
 0x177   : > { %v2380_v28 = vpop.f32.mrf.mxu1 }
 0x178   : > { %v2341_v29 = vpop.f32.mrf.mxu0 }
 0x179   : > { %v2381_v30 = vpop.f32.mrf.mxu1  ;;  %v2342_v60 = vadd.f32 %v2341_v29, %v2340_v27 }
 0x17a   : > { %v2343_v31 = vpop.f32.mrf.mxu0  ;;  %v2382_v61 = vadd.f32 %v2381_v30, %v2380_v28 }
 0x17b   : > { %v2383_v32 = vpop.f32.mrf.mxu1  ;;  %v2373_v31 = vadd.f32 %v2372_v18, %v2371_v16  ;;  %v2379_v18 = vadd.f32 %v2378_v26, %v2377_v24 }
 0x17c   : > { %v2344_v33 = vpop.f32.mrf.mxu0  ;;  %v1740_v12 = vadd.f32 %v2382_v61, %v2342_v60 }
 0x17d   : > { %v2384_v34 = vpop.f32.mrf.mxu1  ;;  %v1727_v30 = vadd.f32 %v2373_v31, %v2333_v5 }
 0x17e   : > { %v2402_v35 = vpop.f32.mrf.mxu0 }
 0x17f   : > { %v3232_v36 = vpop.f32.mrf.mxu1 }
 0x180   : > { %v2403_v37 = vpop.f32.mrf.mxu0 }
 0x181   : > { %v3234_v38 = vpop.f32.mrf.mxu1  ;;  %v2404_v32 = vadd.f32 %v2403_v37, %v2402_v35 }
 0x182   : > { %v2405_v39 = vpop.f32.mrf.mxu0  ;;  %v2444_v24 = vadd.f32 %v3234_v38, %v3232_v36 }
 0x183   : > { %v3236_v40 = vpop.f32.mrf.mxu1  ;;  %v1780_v6 = vadd.f32 %v2404_v32, %v3226_v8 }
 0x184   : > { %v2406_v41 = vpop.f32.mrf.mxu0 }
 0x185   : > { %v3238_v42 = vpop.f32.mrf.mxu1  ;;  %v2407_v9 = vadd.f32 %v2406_v41, %v2405_v39  ;;  %v2270_v39 = vld [vmem:[%s831_s26] ss:$0 sm:$0xff] }
 0x186   : > { %v2408_v43 = vpop.f32.mrf.mxu0  ;;  %v2447_v38 = vadd.f32 %v3238_v42, %v3236_v40 }
 0x187   : > { %v2448_v44 = vpop.f32.mrf.mxu1  ;;  %v1783_v41 = vadd.f32 %v2407_v9, %v1719_v23 }
 0x188   : > { %v2409_v45 = vpop.f32.mrf.mxu0 }
 0x189   : > { %v2449_v46 = vpop.f32.mrf.mxu1  ;;  %v2410_v1 = vadd.f32 %v2409_v45, %v2408_v43  ;;  %v1735_v45 = vadd.f32 %v2379_v18, %v2339_v17 }
 0x18a   : > { %v2411_v47 = vpop.f32.mrf.mxu0  ;;  %v2450_v34 = vadd.f32 %v2449_v46, %v2448_v44 }
 0x18b   : > { %v2451_v48 = vpop.f32.mrf.mxu1  ;;  %v1788_v21 = vadd.f32 %v2410_v1, %v1724_v4 }
 0x18c   : > { %v2412_v49 = vpop.f32.mrf.mxu0 }
 0x18d   : > { %v2452_v50 = vpop.f32.mrf.mxu1  ;;  %v2413_v15 = vadd.f32 %v2412_v49, %v2411_v47  ;;  %v1852_v26 = vadd.f32 %v2450_v34, %v1788_v21 }
 0x18e   : > { %v2414_v51 = vpop.f32.mrf.mxu0  ;;  %v2453_v44 = vadd.f32 %v2452_v50, %v2451_v48 }
 0x18f   : > { %v2454_v52 = vpop.f32.mrf.mxu1  ;;  %v1791_v25 = vadd.f32 %v2413_v15, %v1727_v30 }
 0x190   : > { %v2415_v53 = vpop.f32.mrf.mxu0 }
 0x191   : > { %v2455_v54 = vpop.f32.mrf.mxu1  ;;  %v2416_v13 = vadd.f32 %v2415_v53, %v2414_v51  ;;  %v1844_v51 = vadd.f32 %v2444_v24, %v1780_v6  ;;  %v1855_v60 = vadd.f32 %v2453_v44, %v1791_v25 }
 0x192   : > { %v2417_v55 = vpop.f32.mrf.mxu0  ;;  %v2456_v47 = vadd.f32 %v2455_v54, %v2454_v52  ;;  %v2271_v54 = vld [vmem:[%s834_s29] ss:$0 sm:$0xff] }
 0x193   : > { %v3240_v56 = vpop.f32.mrf.mxu1  ;;  %v1796_v7 = vadd.f32 %v2416_v13, %v1732_v20 }
 0x194   : > { %v2418_v59 = vpop.f32.mrf.mxu0 }
 0x195   : > { %v2458_v62 = vpop.f32.mrf.mxu1  ;;  %v2419_v10 = vadd.f32 %v2418_v59, %v2417_v55  ;;  %v1860_v36 = vadd.f32 %v2456_v47, %v1796_v7 }
 0x196   : > { %v2420_v2 = vpop.f32.mrf.mxu0  ;;  %v2459_v61 = vadd.f32 %v2458_v62, %v3240_v56 }
 0x197   : > { %v2460_v3 = vpop.f32.mrf.mxu1  ;;  %v1799_v53 = vadd.f32 %v2419_v10, %v1735_v45 }
 0x198   : > { %v2421_v33 = vpop.f32.mrf.mxu0 }
 0x199   : > { %v2422_v14 = vadd.f32 %v2421_v33, %v2420_v2  ;;  %v2461_v27 = vpop.f32.mrf.mxu1  ;;  %v1863_v40 = vadd.f32 %v2459_v61, %v1799_v53 }
 0x19a   : > { %v2423_v16 = vpop.f32.mrf.mxu0  ;;  %v2462_v28 = vadd.f32 %v2461_v27, %v2460_v3  ;;  %v1847_v3 = vadd.f32 %v2447_v38, %v1783_v41 }
 0x19b   : > { %v1804_v22 = vadd.f32 %v2422_v14, %v1740_v12  ;;  %v2463_v29 = vpop.f32.mrf.mxu1 }
 0x19c   : > { %v2424_v35 = vpop.f32.mrf.mxu0 }
 0x19d   : > { %v2464_v37 = vpop.f32.mrf.mxu1  ;;  %v1868_v43 = vadd.f32 %v2462_v28, %v1804_v22 }
 0x19f   : > { %v2496_v8 = vpop.f32.mrf.mxu0 }
 0x1a0   : > { %v1916_v46 = vadd.f32 %v2496_v8, %v1852_v26  ;;  %v2500_v49 = vpop.f32.mrf.mxu1 }
 0x1a1   : > { %v1932_v55 = vadd.f32 %v2500_v49, %v1868_v43  ;;  %v1907_v57 = vpop.f32.mrf.mxu0 }
 0x1a2   : > { %v1946_v52 = vmul.f32 %v2270_v39, %v1916_v46  ;;  %v1908_v58 = vadd.f32 %v1907_v57, %v1844_v51  ;;  %v1923_v59 = vpop.f32.mrf.mxu1 }
 0x1a3   : > { %v1950_v63 = vmul.f32 %v2270_v39, %v1932_v55  ;;  %v1924_v48 = vadd.f32 %v1923_v59, %v1860_v36  ;;  %v2497_v50 = vpop.f32.mrf.mxu0 }
 0x1a4   : > { %v1944_v0 = vmul.f32 %v2270_v39, %v1908_v58  ;;  %v1919_v1 = vadd.f32 %v2497_v50, %v1855_v60  ;;  %v2501_v2 = vpop.f32.mrf.mxu1  ;;  %v1960_v42 = vadd.f32 %v2271_v54, %v1946_v52 }
 0x1a5   : > { %v1964_v4 = vadd.f32 %v2271_v54, %v1950_v63  ;;  %v1948_v5 = vmul.f32 %v2270_v39, %v1924_v48  ;;  %v1910_v31 = vpop.f32.mrf.mxu0 }
 0x1a6   : > { %v1947_v32 = vmul.f32 %v2270_v39, %v1919_v1  ;;  %v1911_v33 = vadd.f32 %v1910_v31, %v1847_v3  ;;  %v1926_v11 = vpop.f32.mrf.mxu1  ;;  %v1958_v56 = vadd.f32 %v2271_v54, %v1944_v0  ;;  %v1967_v21 = vmax.f32 %v1960_v42, 0.0 }
 0x1a7   : > { %v1971_v12 = vmax.f32 %v1964_v4, 0.0  ;;  %v1927_v13 = vadd.f32 %v1926_v11, %v1863_v40  ;;  %v1962_v19 = vadd.f32 %v2271_v54, %v1948_v5 }
 0x1a8   : > { %v1961_v62 = vadd.f32 %v2271_v54, %v1947_v32  ;;  %v1945_v14 = vmul.f32 %v2270_v39, %v1911_v33  ;;  %v1965_v18 = vmax.f32 %v1958_v56, 0.0 }
 0x1a9   : > { %v2288_v27 = vpack.c.bf16 %v1971_v12, %v1971_v12  ;;  %v1949_v20 = vmul.f32 %v2270_v39, %v1927_v13  ;;  %v1969_v29 = vmax.f32 %v1962_v19, 0.0 }
 0x1aa   : > { %v1968_v15 = vmax.f32 %v1961_v62, 0.0  ;;  %v1959_v16 = vadd.f32 %v2271_v54, %v1945_v14 }
 0x1ab   : > { %2007 = vst [vmem:[%s828_s15 + $0x18] sm:$0x7] %v2288_v27  ;;  %v1963_v17 = vadd.f32 %v2271_v54, %v1949_v20 }
 0x1ac   : > { %v2297_v22 = vpack.c.bf16 %v1968_v15, %v1967_v21  ;;  %v1966_v28 = vmax.f32 %v1959_v16, 0.0 }
 0x1ad   : > { %v1970_v30 = vmax.f32 %v1963_v17, 0.0  ;;  %2014 = sbr.rel (!%p2745_p5) target bundleno = 443 (0x1bb), region = 81 }
 0x1ae   : > { %2304 = vst [vmem:[%s828_s15 + $0x8] sm:$0xff] %v2297_v22   ;;  %v2292_v6 = vpack.c.bf16 %v1966_v28, %v1965_v18 }
 0x1af   : > { %v2302_v9 = vpack.c.bf16 %v1970_v30, %v1969_v29 }
 0x1b0   : > { %2293 = vst [vmem:[%s828_s15] sm:$0xff] %v2292_v6  }
 0x1b1   : > { %2305 = vst [vmem:[%s828_s15 + $0x10] sm:$0xff] %v2302_v9  }
 0x1b2   : > { %v2045_v23 = vld [vmem:[%s828_s15 + $0x18] sm:$0xf] }
 0x1b3   : > { %2046 = vst [vmem:[%s2016_s8 + $0x30] sm:$0xf] %v2045_v23 }
 0x1b5   : > { %v2037_v7 = vld [vmem:[%s828_s15 + $0x8] sm:$0xf]  ;;  %v2039_v10 = vld [vmem:[%s828_s15 + $0xc] sm:$0xf] }
 0x1b6   : > { %2038 = vst [vmem:[%s2016_s8 + $0x10] sm:$0xf] %v2037_v7  ;;  %2040 = vst [vmem:[%s2016_s8 + $0x18] sm:$0xf] %v2039_v10 }
 0x1b7   : > { %v2033_v34 = vld [vmem:[%s828_s15] sm:$0xf]  ;;  %v2035_v35 = vld [vmem:[%s828_s15 + $0x4] sm:$0xf] }
 0x1b8   : > { %v2041_v37 = vld [vmem:[%s828_s15 + $0x10] sm:$0xf]  ;;  %2034 = vst [vmem:[%s2016_s8] sm:$0xf] %v2033_v34  ;;  %2036 = vst [vmem:[%s2016_s8 + $0x8] sm:$0xf] %v2035_v35 }
 0x1b9   : > { %2042 = vst [vmem:[%s2016_s8 + $0x20] sm:$0xf] %v2041_v37  ;;  %v2043_v43 = vld [vmem:[%s828_s15 + $0x14] sm:$0xf] }
 0x1ba   : > { %2044 = vst [vmem:[%s2016_s8 + $0x28] sm:$0xf] %v2043_v43 }
 0x1bb PF: > { %p11_p11 = scmp.ge.s32.totalorder %s2733_s19, 4   ;;  %s3290_s15 = smov %s2683_s16 }
 0x1bc   : > { %s3291_s16 = smov %s2743_s22  ;;  %s3292_s17 = smov %s2733_s19 }
 0x1bd   :  { %13 = sbr.rel (!%p11_p11) target bundleno = 2 (0x2), region = 159 }

// kernel: pgccphat_forward.12
= control target key start
LH: loop header
LB: loop body
LE: loop exit
PB: predicated region body
PF: predicated region fallthrough
CT: control target
= control target key end

     0   :  { %s3822_s15 = smov 0   ;;  %s3824_s16 = smov 0   ;;  %s4674_s0 = inlined_call_operand.vmem [shape: bf16[14,2304], index: 0, kind: input, shape index: {}]   ;;  %s4675_s1 = inlined_call_operand.vmem [shape: bf16[2304,512], index: 1, kind: input, shape index: {}]   ;;  %s4676_s2 = inlined_call_operand.vmem [shape: f32[1,512], index: 2, kind: input, shape index: {}]   ;;  %s4677_s3 = inlined_call_operand.vmem [shape: f32[1,512], index: 3, kind: input, shape index: {}]   ;;  %s4678_s4 = inlined_call_operand.vmem [shape: bf16[14,512], index: 4, kind: output, shape index: {}]  }
   0x1   :  { %s3826_s17 = smov 0  }
   0x2 LB: > { %s3838_s18 = sadd.s32 4294967295, %s3795_s17   ;;  %s3841_s19 = sadd.s32 1, %s3795_s17   ;;  %s3795_s17 = sphi %s3826_s17, %s4682_s17   ;;  %s3791_s16 = sphi %s3824_s16, %s4681_s16   ;;  %s3787_s15 = sphi %s3822_s15, %s4680_s15  }
   0x3   : > { %s39_s20 = ssub.s32 %s3795_s17, %s3841_s19  ;;  %s42_s21 = sadd.s32 1, %s3791_s16 }
   0x4   : > { %p40_p0 = scmp.eq.s32.totalorder %s39_s20, 0  ;;  %p49_p1 = scmp.ne.s32.totalorder %s3791_s16, %s3787_s15 }
   0x5   : > { %p50_p2 = scmp.eq.s32.totalorder %s3795_s17, 0  ;;  %p131_p3 = scmp.eq.s32.totalorder %s3838_s18, 3 }
   0x6   : > { %s3851_s22 = scalar_select %p40_p0, %s3791_s16, %s42_s21  }
   0x7   : > { %p51_p4 = por %p50_p2, %p49_p1  ;;  %p3853_p5 = por %p131_p3, %p49_p1 }
   0x8   : > { %p3202_p6 = scmp.ge.s32.totalorder %s3795_s17, 4 }
   0xa   : > { %156 = sbr.rel (%p3202_p6) target bundleno = 211 (0xd3), region = 20 }
   0xf   : > { %159 = sbr.rel (!%p51_p4) target bundleno = 211 (0xd3), region = 24  ;;  %s161_s24 = sand.u32 (%p51_p4), 1, %s3791_s16  }
  0x10   : > { %s3203_s25 = sshll.u32 (%p51_p4), %s3795_s17, 2  ;;  %s3576_s26 = smul.u32 (%p51_p4), 1152, %s161_s24 }
  0x11   : > { %s3863_s29 = scalar_lea.vmem (%p51_p4), %s4675_s1, %s3203_s25 }
  0x12   : > { %v182_v0 = vld [vmem:[%s3863_s29] sm:$0xf] (%p51_p4)  ;;  %v184_v1 = vld [vmem:[%s3863_s29 + $0x10] sm:$0xf] (%p51_p4)  ;;  %s3870_s30 = scalar_lea.vmem (%p51_p4), [#allocation2], %s3576_s26 }
  0x13   : > { %v186_v2 = vld [vmem:[%s3863_s29 + $0x20] sm:$0xf] (%p51_p4)  ;;  %v188_v3 = vld [vmem:[%s3863_s29 + $0x30] sm:$0xf] (%p51_p4)  ;;  %183 = vst [vmem:[%s3870_s30] sm:$0xf] (%p51_p4), %v182_v0 }
  0x14   : > { %v190_v4 = vld [vmem:[%s3863_s29 + $0x40] sm:$0xf]  ;;  %185 = vst [vmem:[%s3870_s30 + $0x4] sm:$0xf] %v184_v1  ;;  %187 = vst [vmem:[%s3870_s30 + $0x8] sm:$0xf] %v186_v2 }
  0x15   : > { %189 = vst [vmem:[%s3870_s30 + $0xc] sm:$0xf] %v188_v3  ;;  %191 = vst [vmem:[%s3870_s30 + $0x10] sm:$0xf] %v190_v4  ;;  %v192_v5 = vld [vmem:[%s3863_s29 + $0x50] sm:$0xf] }
  0x16   : > { %v194_v6 = vld [vmem:[%s3863_s29 + $0x60] sm:$0xf]  ;;  %v196_v7 = vld [vmem:[%s3863_s29 + $0x70] sm:$0xf]  ;;  %193 = vst [vmem:[%s3870_s30 + $0x14] sm:$0xf] %v192_v5 }
  0x17   : > { %195 = vst [vmem:[%s3870_s30 + $0x18] sm:$0xf] %v194_v6  ;;  %197 = vst [vmem:[%s3870_s30 + $0x1c] sm:$0xf] %v196_v7  ;;  %v198_v8 = vld [vmem:[%s3863_s29 + $0x80] sm:$0xf] }
  0x18   : > { %v200_v9 = vld [vmem:[%s3863_s29 + $0x90] sm:$0xf]  ;;  %v202_v10 = vld [vmem:[%s3863_s29 + $0xa0] sm:$0xf]  ;;  %199 = vst [vmem:[%s3870_s30 + $0x20] sm:$0xf] %v198_v8 }
  0x19   : > { %201 = vst [vmem:[%s3870_s30 + $0x24] sm:$0xf] %v200_v9  ;;  %203 = vst [vmem:[%s3870_s30 + $0x28] sm:$0xf] %v202_v10  ;;  %v204_v11 = vld [vmem:[%s3863_s29 + $0xb0] sm:$0xf] }
  0x1a   : > { %v206_v12 = vld [vmem:[%s3863_s29 + $0xc0] sm:$0xf]  ;;  %v208_v13 = vld [vmem:[%s3863_s29 + $0xd0] sm:$0xf]  ;;  %205 = vst [vmem:[%s3870_s30 + $0x2c] sm:$0xf] %v204_v11 }
  0x1b   : > { %207 = vst [vmem:[%s3870_s30 + $0x30] sm:$0xf] %v206_v12  ;;  %209 = vst [vmem:[%s3870_s30 + $0x34] sm:$0xf] %v208_v13  ;;  %v210_v14 = vld [vmem:[%s3863_s29 + $0xe0] sm:$0xf] }
  0x1c   : > { %v212_v15 = vld [vmem:[%s3863_s29 + $0xf0] sm:$0xf]  ;;  %v214_v16 = vld [vmem:[%s3863_s29 + $0x100] sm:$0xf]  ;;  %211 = vst [vmem:[%s3870_s30 + $0x38] sm:$0xf] %v210_v14 }
  0x1d   : > { %213 = vst [vmem:[%s3870_s30 + $0x3c] sm:$0xf] %v212_v15  ;;  %215 = vst [vmem:[%s3870_s30 + $0x40] sm:$0xf] %v214_v16  ;;  %v216_v17 = vld [vmem:[%s3863_s29 + $0x110] sm:$0xf] }
  0x1e   : > { %v218_v18 = vld [vmem:[%s3863_s29 + $0x120] sm:$0xf]  ;;  %v220_v19 = vld [vmem:[%s3863_s29 + $0x130] sm:$0xf]  ;;  %217 = vst [vmem:[%s3870_s30 + $0x44] sm:$0xf] %v216_v17 }
  0x1f   : > { %219 = vst [vmem:[%s3870_s30 + $0x48] sm:$0xf] %v218_v18  ;;  %221 = vst [vmem:[%s3870_s30 + $0x4c] sm:$0xf] %v220_v19  ;;  %v222_v20 = vld [vmem:[%s3863_s29 + $0x140] sm:$0xf] }
  0x20   : > { %v224_v21 = vld [vmem:[%s3863_s29 + $0x150] sm:$0xf]  ;;  %v226_v22 = vld [vmem:[%s3863_s29 + $0x160] sm:$0xf]  ;;  %223 = vst [vmem:[%s3870_s30 + $0x50] sm:$0xf] %v222_v20 }
  0x21   : > { %225 = vst [vmem:[%s3870_s30 + $0x54] sm:$0xf] %v224_v21  ;;  %227 = vst [vmem:[%s3870_s30 + $0x58] sm:$0xf] %v226_v22  ;;  %v228_v23 = vld [vmem:[%s3863_s29 + $0x170] sm:$0xf] }
  0x22   : > { %v230_v24 = vld [vmem:[%s3863_s29 + $0x180] sm:$0xf]  ;;  %v232_v25 = vld [vmem:[%s3863_s29 + $0x190] sm:$0xf]  ;;  %229 = vst [vmem:[%s3870_s30 + $0x5c] sm:$0xf] %v228_v23 }
  0x23   : > { %231 = vst [vmem:[%s3870_s30 + $0x60] sm:$0xf] %v230_v24  ;;  %233 = vst [vmem:[%s3870_s30 + $0x64] sm:$0xf] %v232_v25  ;;  %v234_v26 = vld [vmem:[%s3863_s29 + $0x1a0] sm:$0xf] }
  0x24   : > { %v236_v27 = vld [vmem:[%s3863_s29 + $0x1b0] sm:$0xf]  ;;  %v238_v28 = vld [vmem:[%s3863_s29 + $0x1c0] sm:$0xf]  ;;  %235 = vst [vmem:[%s3870_s30 + $0x68] sm:$0xf] %v234_v26 }
  0x25   : > { %237 = vst [vmem:[%s3870_s30 + $0x6c] sm:$0xf] %v236_v27  ;;  %239 = vst [vmem:[%s3870_s30 + $0x70] sm:$0xf] %v238_v28  ;;  %v240_v29 = vld [vmem:[%s3863_s29 + $0x1d0] sm:$0xf] }
  0x26   : > { %v242_v30 = vld [vmem:[%s3863_s29 + $0x1e0] sm:$0xf]  ;;  %v244_v31 = vld [vmem:[%s3863_s29 + $0x1f0] sm:$0xf]  ;;  %241 = vst [vmem:[%s3870_s30 + $0x74] sm:$0xf] %v240_v29 }
  0x27   : > { %243 = vst [vmem:[%s3870_s30 + $0x78] sm:$0xf] %v242_v30  ;;  %245 = vst [vmem:[%s3870_s30 + $0x7c] sm:$0xf] %v244_v31  ;;  %v246_v32 = vld [vmem:[%s3863_s29 + $0x200] sm:$0xf] }
  0x28   : > { %v248_v33 = vld [vmem:[%s3863_s29 + $0x210] sm:$0xf]  ;;  %v250_v34 = vld [vmem:[%s3863_s29 + $0x220] sm:$0xf]  ;;  %247 = vst [vmem:[%s3870_s30 + $0x80] sm:$0xf] %v246_v32 }
  0x29   : > { %249 = vst [vmem:[%s3870_s30 + $0x84] sm:$0xf] %v248_v33  ;;  %251 = vst [vmem:[%s3870_s30 + $0x88] sm:$0xf] %v250_v34  ;;  %v252_v35 = vld [vmem:[%s3863_s29 + $0x230] sm:$0xf] }
  0x2a   : > { %v254_v36 = vld [vmem:[%s3863_s29 + $0x240] sm:$0xf]  ;;  %v256_v37 = vld [vmem:[%s3863_s29 + $0x250] sm:$0xf]  ;;  %253 = vst [vmem:[%s3870_s30 + $0x8c] sm:$0xf] %v252_v35 }
  0x2b   : > { %255 = vst [vmem:[%s3870_s30 + $0x90] sm:$0xf] %v254_v36  ;;  %257 = vst [vmem:[%s3870_s30 + $0x94] sm:$0xf] %v256_v37  ;;  %v258_v38 = vld [vmem:[%s3863_s29 + $0x260] sm:$0xf] }
  0x2c   : > { %v260_v39 = vld [vmem:[%s3863_s29 + $0x270] sm:$0xf]  ;;  %v262_v40 = vld [vmem:[%s3863_s29 + $0x280] sm:$0xf]  ;;  %259 = vst [vmem:[%s3870_s30 + $0x98] sm:$0xf] %v258_v38 }
  0x2d   : > { %261 = vst [vmem:[%s3870_s30 + $0x9c] sm:$0xf] %v260_v39  ;;  %263 = vst [vmem:[%s3870_s30 + $0xa0] sm:$0xf] %v262_v40  ;;  %v264_v41 = vld [vmem:[%s3863_s29 + $0x290] sm:$0xf] }
  0x2e   : > { %v266_v42 = vld [vmem:[%s3863_s29 + $0x2a0] sm:$0xf]  ;;  %v268_v43 = vld [vmem:[%s3863_s29 + $0x2b0] sm:$0xf]  ;;  %265 = vst [vmem:[%s3870_s30 + $0xa4] sm:$0xf] %v264_v41 }
  0x2f   : > { %267 = vst [vmem:[%s3870_s30 + $0xa8] sm:$0xf] %v266_v42  ;;  %269 = vst [vmem:[%s3870_s30 + $0xac] sm:$0xf] %v268_v43  ;;  %v270_v44 = vld [vmem:[%s3863_s29 + $0x2c0] sm:$0xf] }
  0x30   : > { %v272_v45 = vld [vmem:[%s3863_s29 + $0x2d0] sm:$0xf]  ;;  %v274_v46 = vld [vmem:[%s3863_s29 + $0x2e0] sm:$0xf]  ;;  %271 = vst [vmem:[%s3870_s30 + $0xb0] sm:$0xf] %v270_v44 }
  0x31   : > { %273 = vst [vmem:[%s3870_s30 + $0xb4] sm:$0xf] %v272_v45  ;;  %275 = vst [vmem:[%s3870_s30 + $0xb8] sm:$0xf] %v274_v46  ;;  %v276_v47 = vld [vmem:[%s3863_s29 + $0x2f0] sm:$0xf] }
  0x32   : > { %v278_v48 = vld [vmem:[%s3863_s29 + $0x300] sm:$0xf]  ;;  %v280_v49 = vld [vmem:[%s3863_s29 + $0x310] sm:$0xf]  ;;  %277 = vst [vmem:[%s3870_s30 + $0xbc] sm:$0xf] %v276_v47 }
  0x33   : > { %279 = vst [vmem:[%s3870_s30 + $0xc0] sm:$0xf] %v278_v48  ;;  %281 = vst [vmem:[%s3870_s30 + $0xc4] sm:$0xf] %v280_v49  ;;  %v282_v50 = vld [vmem:[%s3863_s29 + $0x320] sm:$0xf] }
  0x34   : > { %v284_v51 = vld [vmem:[%s3863_s29 + $0x330] sm:$0xf]  ;;  %v286_v52 = vld [vmem:[%s3863_s29 + $0x340] sm:$0xf]  ;;  %283 = vst [vmem:[%s3870_s30 + $0xc8] sm:$0xf] %v282_v50 }
  0x35   : > { %285 = vst [vmem:[%s3870_s30 + $0xcc] sm:$0xf] %v284_v51  ;;  %287 = vst [vmem:[%s3870_s30 + $0xd0] sm:$0xf] %v286_v52  ;;  %v288_v53 = vld [vmem:[%s3863_s29 + $0x350] sm:$0xf] }
  0x36   : > { %v290_v54 = vld [vmem:[%s3863_s29 + $0x360] sm:$0xf]  ;;  %v292_v55 = vld [vmem:[%s3863_s29 + $0x370] sm:$0xf]  ;;  %289 = vst [vmem:[%s3870_s30 + $0xd4] sm:$0xf] %v288_v53 }
  0x37   : > { %291 = vst [vmem:[%s3870_s30 + $0xd8] sm:$0xf] %v290_v54  ;;  %293 = vst [vmem:[%s3870_s30 + $0xdc] sm:$0xf] %v292_v55  ;;  %v294_v56 = vld [vmem:[%s3863_s29 + $0x380] sm:$0xf] }
  0x38   : > { %v296_v57 = vld [vmem:[%s3863_s29 + $0x390] sm:$0xf]  ;;  %v298_v58 = vld [vmem:[%s3863_s29 + $0x3a0] sm:$0xf]  ;;  %295 = vst [vmem:[%s3870_s30 + $0xe0] sm:$0xf] %v294_v56 }
  0x39   : > { %297 = vst [vmem:[%s3870_s30 + $0xe4] sm:$0xf] %v296_v57  ;;  %299 = vst [vmem:[%s3870_s30 + $0xe8] sm:$0xf] %v298_v58  ;;  %v300_v59 = vld [vmem:[%s3863_s29 + $0x3b0] sm:$0xf] }
  0x3a   : > { %v302_v60 = vld [vmem:[%s3863_s29 + $0x3c0] sm:$0xf]  ;;  %v304_v61 = vld [vmem:[%s3863_s29 + $0x3d0] sm:$0xf]  ;;  %301 = vst [vmem:[%s3870_s30 + $0xec] sm:$0xf] %v300_v59 }
  0x3b   : > { %303 = vst [vmem:[%s3870_s30 + $0xf0] sm:$0xf] %v302_v60  ;;  %305 = vst [vmem:[%s3870_s30 + $0xf4] sm:$0xf] %v304_v61  ;;  %v306_v62 = vld [vmem:[%s3863_s29 + $0x3e0] sm:$0xf] }
  0x3c   : > { %v308_v63 = vld [vmem:[%s3863_s29 + $0x3f0] sm:$0xf]  ;;  %v310_v0 = vld [vmem:[%s3863_s29 + $0x400] sm:$0xf]  ;;  %307 = vst [vmem:[%s3870_s30 + $0xf8] sm:$0xf] %v306_v62 }
  0x3d   : > { %309 = vst [vmem:[%s3870_s30 + $0xfc] sm:$0xf] %v308_v63  ;;  %311 = vst [vmem:[%s3870_s30 + $0x100] sm:$0xf] %v310_v0  ;;  %v312_v1 = vld [vmem:[%s3863_s29 + $0x410] sm:$0xf] }
  0x3e   : > { %v314_v2 = vld [vmem:[%s3863_s29 + $0x420] sm:$0xf]  ;;  %v316_v3 = vld [vmem:[%s3863_s29 + $0x430] sm:$0xf]  ;;  %313 = vst [vmem:[%s3870_s30 + $0x104] sm:$0xf] %v312_v1 }
  0x3f   : > { %315 = vst [vmem:[%s3870_s30 + $0x108] sm:$0xf] %v314_v2  ;;  %317 = vst [vmem:[%s3870_s30 + $0x10c] sm:$0xf] %v316_v3  ;;  %v318_v4 = vld [vmem:[%s3863_s29 + $0x440] sm:$0xf] }
  0x40   : > { %v320_v5 = vld [vmem:[%s3863_s29 + $0x450] sm:$0xf]  ;;  %v322_v6 = vld [vmem:[%s3863_s29 + $0x460] sm:$0xf]  ;;  %319 = vst [vmem:[%s3870_s30 + $0x110] sm:$0xf] %v318_v4 }
  0x41   : > { %321 = vst [vmem:[%s3870_s30 + $0x114] sm:$0xf] %v320_v5  ;;  %323 = vst [vmem:[%s3870_s30 + $0x118] sm:$0xf] %v322_v6  ;;  %v324_v7 = vld [vmem:[%s3863_s29 + $0x470] sm:$0xf] }
  0x42   : > { %v326_v8 = vld [vmem:[%s3863_s29 + $0x480] sm:$0xf]  ;;  %v328_v9 = vld [vmem:[%s3863_s29 + $0x490] sm:$0xf]  ;;  %325 = vst [vmem:[%s3870_s30 + $0x11c] sm:$0xf] %v324_v7 }
  0x43   : > { %327 = vst [vmem:[%s3870_s30 + $0x120] sm:$0xf] %v326_v8  ;;  %329 = vst [vmem:[%s3870_s30 + $0x124] sm:$0xf] %v328_v9  ;;  %v330_v10 = vld [vmem:[%s3863_s29 + $0x4a0] sm:$0xf] }
  0x44   : > { %v332_v11 = vld [vmem:[%s3863_s29 + $0x4b0] sm:$0xf]  ;;  %v334_v12 = vld [vmem:[%s3863_s29 + $0x4c0] sm:$0xf]  ;;  %331 = vst [vmem:[%s3870_s30 + $0x128] sm:$0xf] %v330_v10 }
  0x45   : > { %333 = vst [vmem:[%s3870_s30 + $0x12c] sm:$0xf] %v332_v11  ;;  %335 = vst [vmem:[%s3870_s30 + $0x130] sm:$0xf] %v334_v12  ;;  %v336_v13 = vld [vmem:[%s3863_s29 + $0x4d0] sm:$0xf] }
  0x46   : > { %v338_v14 = vld [vmem:[%s3863_s29 + $0x4e0] sm:$0xf]  ;;  %v340_v15 = vld [vmem:[%s3863_s29 + $0x4f0] sm:$0xf]  ;;  %337 = vst [vmem:[%s3870_s30 + $0x134] sm:$0xf] %v336_v13 }
  0x47   : > { %339 = vst [vmem:[%s3870_s30 + $0x138] sm:$0xf] %v338_v14  ;;  %341 = vst [vmem:[%s3870_s30 + $0x13c] sm:$0xf] %v340_v15  ;;  %v342_v16 = vld [vmem:[%s3863_s29 + $0x500] sm:$0xf] }
  0x48   : > { %v344_v17 = vld [vmem:[%s3863_s29 + $0x510] sm:$0xf]  ;;  %v346_v18 = vld [vmem:[%s3863_s29 + $0x520] sm:$0xf]  ;;  %343 = vst [vmem:[%s3870_s30 + $0x140] sm:$0xf] %v342_v16 }
  0x49   : > { %345 = vst [vmem:[%s3870_s30 + $0x144] sm:$0xf] %v344_v17  ;;  %347 = vst [vmem:[%s3870_s30 + $0x148] sm:$0xf] %v346_v18  ;;  %v348_v19 = vld [vmem:[%s3863_s29 + $0x530] sm:$0xf] }
  0x4a   : > { %v350_v20 = vld [vmem:[%s3863_s29 + $0x540] sm:$0xf]  ;;  %v352_v21 = vld [vmem:[%s3863_s29 + $0x550] sm:$0xf]  ;;  %349 = vst [vmem:[%s3870_s30 + $0x14c] sm:$0xf] %v348_v19 }
  0x4b   : > { %351 = vst [vmem:[%s3870_s30 + $0x150] sm:$0xf] %v350_v20  ;;  %353 = vst [vmem:[%s3870_s30 + $0x154] sm:$0xf] %v352_v21  ;;  %v354_v22 = vld [vmem:[%s3863_s29 + $0x560] sm:$0xf] }
  0x4c   : > { %v356_v23 = vld [vmem:[%s3863_s29 + $0x570] sm:$0xf]  ;;  %v358_v24 = vld [vmem:[%s3863_s29 + $0x580] sm:$0xf]  ;;  %355 = vst [vmem:[%s3870_s30 + $0x158] sm:$0xf] %v354_v22 }
  0x4d   : > { %357 = vst [vmem:[%s3870_s30 + $0x15c] sm:$0xf] %v356_v23  ;;  %359 = vst [vmem:[%s3870_s30 + $0x160] sm:$0xf] %v358_v24  ;;  %v360_v25 = vld [vmem:[%s3863_s29 + $0x590] sm:$0xf] }
  0x4e   : > { %v362_v26 = vld [vmem:[%s3863_s29 + $0x5a0] sm:$0xf]  ;;  %v364_v27 = vld [vmem:[%s3863_s29 + $0x5b0] sm:$0xf]  ;;  %361 = vst [vmem:[%s3870_s30 + $0x164] sm:$0xf] %v360_v25 }
  0x4f   : > { %363 = vst [vmem:[%s3870_s30 + $0x168] sm:$0xf] %v362_v26  ;;  %365 = vst [vmem:[%s3870_s30 + $0x16c] sm:$0xf] %v364_v27  ;;  %v366_v28 = vld [vmem:[%s3863_s29 + $0x5c0] sm:$0xf] }
  0x50   : > { %v368_v29 = vld [vmem:[%s3863_s29 + $0x5d0] sm:$0xf]  ;;  %v370_v30 = vld [vmem:[%s3863_s29 + $0x5e0] sm:$0xf]  ;;  %367 = vst [vmem:[%s3870_s30 + $0x170] sm:$0xf] %v366_v28 }
  0x51   : > { %369 = vst [vmem:[%s3870_s30 + $0x174] sm:$0xf] %v368_v29  ;;  %371 = vst [vmem:[%s3870_s30 + $0x178] sm:$0xf] %v370_v30  ;;  %v372_v31 = vld [vmem:[%s3863_s29 + $0x5f0] sm:$0xf] }
  0x52   : > { %v374_v32 = vld [vmem:[%s3863_s29 + $0x600] sm:$0xf]  ;;  %v376_v33 = vld [vmem:[%s3863_s29 + $0x610] sm:$0xf]  ;;  %373 = vst [vmem:[%s3870_s30 + $0x17c] sm:$0xf] %v372_v31 }
  0x53   : > { %375 = vst [vmem:[%s3870_s30 + $0x180] sm:$0xf] %v374_v32  ;;  %377 = vst [vmem:[%s3870_s30 + $0x184] sm:$0xf] %v376_v33  ;;  %v378_v34 = vld [vmem:[%s3863_s29 + $0x620] sm:$0xf] }
  0x54   : > { %v380_v35 = vld [vmem:[%s3863_s29 + $0x630] sm:$0xf]  ;;  %v382_v36 = vld [vmem:[%s3863_s29 + $0x640] sm:$0xf]  ;;  %379 = vst [vmem:[%s3870_s30 + $0x188] sm:$0xf] %v378_v34 }
  0x55   : > { %381 = vst [vmem:[%s3870_s30 + $0x18c] sm:$0xf] %v380_v35  ;;  %383 = vst [vmem:[%s3870_s30 + $0x190] sm:$0xf] %v382_v36  ;;  %v384_v37 = vld [vmem:[%s3863_s29 + $0x650] sm:$0xf] }
  0x56   : > { %v386_v38 = vld [vmem:[%s3863_s29 + $0x660] sm:$0xf]  ;;  %v388_v39 = vld [vmem:[%s3863_s29 + $0x670] sm:$0xf]  ;;  %385 = vst [vmem:[%s3870_s30 + $0x194] sm:$0xf] %v384_v37 }
  0x57   : > { %387 = vst [vmem:[%s3870_s30 + $0x198] sm:$0xf] %v386_v38  ;;  %389 = vst [vmem:[%s3870_s30 + $0x19c] sm:$0xf] %v388_v39  ;;  %v390_v40 = vld [vmem:[%s3863_s29 + $0x680] sm:$0xf] }
  0x58   : > { %v392_v41 = vld [vmem:[%s3863_s29 + $0x690] sm:$0xf]  ;;  %v394_v42 = vld [vmem:[%s3863_s29 + $0x6a0] sm:$0xf]  ;;  %391 = vst [vmem:[%s3870_s30 + $0x1a0] sm:$0xf] %v390_v40 }
  0x59   : > { %393 = vst [vmem:[%s3870_s30 + $0x1a4] sm:$0xf] %v392_v41  ;;  %395 = vst [vmem:[%s3870_s30 + $0x1a8] sm:$0xf] %v394_v42  ;;  %v396_v43 = vld [vmem:[%s3863_s29 + $0x6b0] sm:$0xf] }
  0x5a   : > { %v398_v44 = vld [vmem:[%s3863_s29 + $0x6c0] sm:$0xf]  ;;  %v400_v45 = vld [vmem:[%s3863_s29 + $0x6d0] sm:$0xf]  ;;  %397 = vst [vmem:[%s3870_s30 + $0x1ac] sm:$0xf] %v396_v43 }
  0x5b   : > { %399 = vst [vmem:[%s3870_s30 + $0x1b0] sm:$0xf] %v398_v44  ;;  %401 = vst [vmem:[%s3870_s30 + $0x1b4] sm:$0xf] %v400_v45  ;;  %v402_v46 = vld [vmem:[%s3863_s29 + $0x6e0] sm:$0xf] }
  0x5c   : > { %v404_v47 = vld [vmem:[%s3863_s29 + $0x6f0] sm:$0xf]  ;;  %v406_v48 = vld [vmem:[%s3863_s29 + $0x700] sm:$0xf]  ;;  %403 = vst [vmem:[%s3870_s30 + $0x1b8] sm:$0xf] %v402_v46 }
  0x5d   : > { %405 = vst [vmem:[%s3870_s30 + $0x1bc] sm:$0xf] %v404_v47  ;;  %407 = vst [vmem:[%s3870_s30 + $0x1c0] sm:$0xf] %v406_v48  ;;  %v408_v49 = vld [vmem:[%s3863_s29 + $0x710] sm:$0xf] }
  0x5e   : > { %v410_v50 = vld [vmem:[%s3863_s29 + $0x720] sm:$0xf]  ;;  %v412_v51 = vld [vmem:[%s3863_s29 + $0x730] sm:$0xf]  ;;  %409 = vst [vmem:[%s3870_s30 + $0x1c4] sm:$0xf] %v408_v49 }
  0x5f   : > { %411 = vst [vmem:[%s3870_s30 + $0x1c8] sm:$0xf] %v410_v50  ;;  %413 = vst [vmem:[%s3870_s30 + $0x1cc] sm:$0xf] %v412_v51  ;;  %v414_v52 = vld [vmem:[%s3863_s29 + $0x740] sm:$0xf] }
  0x60   : > { %v416_v53 = vld [vmem:[%s3863_s29 + $0x750] sm:$0xf]  ;;  %v418_v54 = vld [vmem:[%s3863_s29 + $0x760] sm:$0xf]  ;;  %415 = vst [vmem:[%s3870_s30 + $0x1d0] sm:$0xf] %v414_v52 }
  0x61   : > { %417 = vst [vmem:[%s3870_s30 + $0x1d4] sm:$0xf] %v416_v53  ;;  %419 = vst [vmem:[%s3870_s30 + $0x1d8] sm:$0xf] %v418_v54  ;;  %v420_v55 = vld [vmem:[%s3863_s29 + $0x770] sm:$0xf] }
  0x62   : > { %v422_v56 = vld [vmem:[%s3863_s29 + $0x780] sm:$0xf]  ;;  %v424_v57 = vld [vmem:[%s3863_s29 + $0x790] sm:$0xf]  ;;  %421 = vst [vmem:[%s3870_s30 + $0x1dc] sm:$0xf] %v420_v55 }
  0x63   : > { %423 = vst [vmem:[%s3870_s30 + $0x1e0] sm:$0xf] %v422_v56  ;;  %425 = vst [vmem:[%s3870_s30 + $0x1e4] sm:$0xf] %v424_v57  ;;  %v426_v58 = vld [vmem:[%s3863_s29 + $0x7a0] sm:$0xf] }
  0x64   : > { %v428_v59 = vld [vmem:[%s3863_s29 + $0x7b0] sm:$0xf]  ;;  %v430_v60 = vld [vmem:[%s3863_s29 + $0x7c0] sm:$0xf]  ;;  %427 = vst [vmem:[%s3870_s30 + $0x1e8] sm:$0xf] %v426_v58 }
  0x65   : > { %429 = vst [vmem:[%s3870_s30 + $0x1ec] sm:$0xf] %v428_v59  ;;  %431 = vst [vmem:[%s3870_s30 + $0x1f0] sm:$0xf] %v430_v60  ;;  %v432_v61 = vld [vmem:[%s3863_s29 + $0x7d0] sm:$0xf] }
  0x66   : > { %v434_v62 = vld [vmem:[%s3863_s29 + $0x7e0] sm:$0xf]  ;;  %v436_v63 = vld [vmem:[%s3863_s29 + $0x7f0] sm:$0xf]  ;;  %433 = vst [vmem:[%s3870_s30 + $0x1f4] sm:$0xf] %v432_v61 }
  0x67   : > { %435 = vst [vmem:[%s3870_s30 + $0x1f8] sm:$0xf] %v434_v62  ;;  %437 = vst [vmem:[%s3870_s30 + $0x1fc] sm:$0xf] %v436_v63  ;;  %v438_v0 = vld [vmem:[%s3863_s29 + $0x800] sm:$0xf] }
  0x68   : > { %v440_v1 = vld [vmem:[%s3863_s29 + $0x810] sm:$0xf]  ;;  %v442_v2 = vld [vmem:[%s3863_s29 + $0x820] sm:$0xf]  ;;  %439 = vst [vmem:[%s3870_s30 + $0x200] sm:$0xf] %v438_v0 }
  0x69   : > { %441 = vst [vmem:[%s3870_s30 + $0x204] sm:$0xf] %v440_v1  ;;  %443 = vst [vmem:[%s3870_s30 + $0x208] sm:$0xf] %v442_v2  ;;  %v444_v3 = vld [vmem:[%s3863_s29 + $0x830] sm:$0xf] }
  0x6a   : > { %v446_v4 = vld [vmem:[%s3863_s29 + $0x840] sm:$0xf]  ;;  %v448_v5 = vld [vmem:[%s3863_s29 + $0x850] sm:$0xf]  ;;  %445 = vst [vmem:[%s3870_s30 + $0x20c] sm:$0xf] %v444_v3 }
  0x6b   : > { %447 = vst [vmem:[%s3870_s30 + $0x210] sm:$0xf] %v446_v4  ;;  %449 = vst [vmem:[%s3870_s30 + $0x214] sm:$0xf] %v448_v5  ;;  %v450_v6 = vld [vmem:[%s3863_s29 + $0x860] sm:$0xf] }
  0x6c   : > { %v452_v7 = vld [vmem:[%s3863_s29 + $0x870] sm:$0xf]  ;;  %v454_v8 = vld [vmem:[%s3863_s29 + $0x880] sm:$0xf]  ;;  %451 = vst [vmem:[%s3870_s30 + $0x218] sm:$0xf] %v450_v6 }
  0x6d   : > { %453 = vst [vmem:[%s3870_s30 + $0x21c] sm:$0xf] %v452_v7  ;;  %455 = vst [vmem:[%s3870_s30 + $0x220] sm:$0xf] %v454_v8  ;;  %v456_v9 = vld [vmem:[%s3863_s29 + $0x890] sm:$0xf] }
  0x6e   : > { %v458_v10 = vld [vmem:[%s3863_s29 + $0x8a0] sm:$0xf]  ;;  %v460_v11 = vld [vmem:[%s3863_s29 + $0x8b0] sm:$0xf]  ;;  %457 = vst [vmem:[%s3870_s30 + $0x224] sm:$0xf] %v456_v9 }
  0x6f   : > { %459 = vst [vmem:[%s3870_s30 + $0x228] sm:$0xf] %v458_v10  ;;  %461 = vst [vmem:[%s3870_s30 + $0x22c] sm:$0xf] %v460_v11  ;;  %v462_v12 = vld [vmem:[%s3863_s29 + $0x8c0] sm:$0xf] }
  0x70   : > { %v464_v13 = vld [vmem:[%s3863_s29 + $0x8d0] sm:$0xf]  ;;  %v466_v14 = vld [vmem:[%s3863_s29 + $0x8e0] sm:$0xf]  ;;  %463 = vst [vmem:[%s3870_s30 + $0x230] sm:$0xf] %v462_v12 }
  0x71   : > { %465 = vst [vmem:[%s3870_s30 + $0x234] sm:$0xf] %v464_v13  ;;  %467 = vst [vmem:[%s3870_s30 + $0x238] sm:$0xf] %v466_v14  ;;  %v468_v15 = vld [vmem:[%s3863_s29 + $0x8f0] sm:$0xf] }
  0x72   : > { %v470_v16 = vld [vmem:[%s3863_s29 + $0x900] sm:$0xf]  ;;  %v472_v17 = vld [vmem:[%s3863_s29 + $0x910] sm:$0xf]  ;;  %469 = vst [vmem:[%s3870_s30 + $0x23c] sm:$0xf] %v468_v15 }
  0x73   : > { %471 = vst [vmem:[%s3870_s30 + $0x240] sm:$0xf] %v470_v16  ;;  %473 = vst [vmem:[%s3870_s30 + $0x244] sm:$0xf] %v472_v17  ;;  %v474_v18 = vld [vmem:[%s3863_s29 + $0x920] sm:$0xf] }
  0x74   : > { %v476_v19 = vld [vmem:[%s3863_s29 + $0x930] sm:$0xf]  ;;  %v478_v20 = vld [vmem:[%s3863_s29 + $0x940] sm:$0xf]  ;;  %475 = vst [vmem:[%s3870_s30 + $0x248] sm:$0xf] %v474_v18 }
  0x75   : > { %477 = vst [vmem:[%s3870_s30 + $0x24c] sm:$0xf] %v476_v19  ;;  %479 = vst [vmem:[%s3870_s30 + $0x250] sm:$0xf] %v478_v20  ;;  %v480_v21 = vld [vmem:[%s3863_s29 + $0x950] sm:$0xf] }
  0x76   : > { %v482_v22 = vld [vmem:[%s3863_s29 + $0x960] sm:$0xf]  ;;  %v484_v23 = vld [vmem:[%s3863_s29 + $0x970] sm:$0xf]  ;;  %481 = vst [vmem:[%s3870_s30 + $0x254] sm:$0xf] %v480_v21 }
  0x77   : > { %483 = vst [vmem:[%s3870_s30 + $0x258] sm:$0xf] %v482_v22  ;;  %485 = vst [vmem:[%s3870_s30 + $0x25c] sm:$0xf] %v484_v23  ;;  %v486_v24 = vld [vmem:[%s3863_s29 + $0x980] sm:$0xf] }
  0x78   : > { %v488_v25 = vld [vmem:[%s3863_s29 + $0x990] sm:$0xf]  ;;  %v490_v26 = vld [vmem:[%s3863_s29 + $0x9a0] sm:$0xf]  ;;  %487 = vst [vmem:[%s3870_s30 + $0x260] sm:$0xf] %v486_v24 }
  0x79   : > { %489 = vst [vmem:[%s3870_s30 + $0x264] sm:$0xf] %v488_v25  ;;  %491 = vst [vmem:[%s3870_s30 + $0x268] sm:$0xf] %v490_v26  ;;  %v492_v27 = vld [vmem:[%s3863_s29 + $0x9b0] sm:$0xf] }
  0x7a   : > { %v494_v28 = vld [vmem:[%s3863_s29 + $0x9c0] sm:$0xf]  ;;  %v496_v29 = vld [vmem:[%s3863_s29 + $0x9d0] sm:$0xf]  ;;  %493 = vst [vmem:[%s3870_s30 + $0x26c] sm:$0xf] %v492_v27 }
  0x7b   : > { %495 = vst [vmem:[%s3870_s30 + $0x270] sm:$0xf] %v494_v28  ;;  %497 = vst [vmem:[%s3870_s30 + $0x274] sm:$0xf] %v496_v29  ;;  %v498_v30 = vld [vmem:[%s3863_s29 + $0x9e0] sm:$0xf] }
  0x7c   : > { %v500_v31 = vld [vmem:[%s3863_s29 + $0x9f0] sm:$0xf]  ;;  %v502_v32 = vld [vmem:[%s3863_s29 + $0xa00] sm:$0xf]  ;;  %499 = vst [vmem:[%s3870_s30 + $0x278] sm:$0xf] %v498_v30 }
  0x7d   : > { %501 = vst [vmem:[%s3870_s30 + $0x27c] sm:$0xf] %v500_v31  ;;  %503 = vst [vmem:[%s3870_s30 + $0x280] sm:$0xf] %v502_v32  ;;  %v504_v33 = vld [vmem:[%s3863_s29 + $0xa10] sm:$0xf] }
  0x7e   : > { %v506_v34 = vld [vmem:[%s3863_s29 + $0xa20] sm:$0xf]  ;;  %v508_v35 = vld [vmem:[%s3863_s29 + $0xa30] sm:$0xf]  ;;  %505 = vst [vmem:[%s3870_s30 + $0x284] sm:$0xf] %v504_v33 }
  0x7f   : > { %507 = vst [vmem:[%s3870_s30 + $0x288] sm:$0xf] %v506_v34  ;;  %509 = vst [vmem:[%s3870_s30 + $0x28c] sm:$0xf] %v508_v35  ;;  %v510_v36 = vld [vmem:[%s3863_s29 + $0xa40] sm:$0xf] }
  0x80   : > { %v512_v37 = vld [vmem:[%s3863_s29 + $0xa50] sm:$0xf]  ;;  %v514_v38 = vld [vmem:[%s3863_s29 + $0xa60] sm:$0xf]  ;;  %511 = vst [vmem:[%s3870_s30 + $0x290] sm:$0xf] %v510_v36 }
  0x81   : > { %513 = vst [vmem:[%s3870_s30 + $0x294] sm:$0xf] %v512_v37  ;;  %515 = vst [vmem:[%s3870_s30 + $0x298] sm:$0xf] %v514_v38  ;;  %v516_v39 = vld [vmem:[%s3863_s29 + $0xa70] sm:$0xf] }
  0x82   : > { %v518_v40 = vld [vmem:[%s3863_s29 + $0xa80] sm:$0xf]  ;;  %v520_v41 = vld [vmem:[%s3863_s29 + $0xa90] sm:$0xf]  ;;  %517 = vst [vmem:[%s3870_s30 + $0x29c] sm:$0xf] %v516_v39 }
  0x83   : > { %519 = vst [vmem:[%s3870_s30 + $0x2a0] sm:$0xf] %v518_v40  ;;  %521 = vst [vmem:[%s3870_s30 + $0x2a4] sm:$0xf] %v520_v41  ;;  %v522_v42 = vld [vmem:[%s3863_s29 + $0xaa0] sm:$0xf] }
  0x84   : > { %v524_v43 = vld [vmem:[%s3863_s29 + $0xab0] sm:$0xf]  ;;  %v526_v44 = vld [vmem:[%s3863_s29 + $0xac0] sm:$0xf]  ;;  %523 = vst [vmem:[%s3870_s30 + $0x2a8] sm:$0xf] %v522_v42 }
  0x85   : > { %525 = vst [vmem:[%s3870_s30 + $0x2ac] sm:$0xf] %v524_v43  ;;  %527 = vst [vmem:[%s3870_s30 + $0x2b0] sm:$0xf] %v526_v44  ;;  %v528_v45 = vld [vmem:[%s3863_s29 + $0xad0] sm:$0xf] }
  0x86   : > { %v530_v46 = vld [vmem:[%s3863_s29 + $0xae0] sm:$0xf]  ;;  %v532_v47 = vld [vmem:[%s3863_s29 + $0xaf0] sm:$0xf]  ;;  %529 = vst [vmem:[%s3870_s30 + $0x2b4] sm:$0xf] %v528_v45 }
  0x87   : > { %531 = vst [vmem:[%s3870_s30 + $0x2b8] sm:$0xf] %v530_v46  ;;  %533 = vst [vmem:[%s3870_s30 + $0x2bc] sm:$0xf] %v532_v47  ;;  %v534_v48 = vld [vmem:[%s3863_s29 + $0xb00] sm:$0xf] }
  0x88   : > { %v536_v49 = vld [vmem:[%s3863_s29 + $0xb10] sm:$0xf]  ;;  %v538_v50 = vld [vmem:[%s3863_s29 + $0xb20] sm:$0xf]  ;;  %535 = vst [vmem:[%s3870_s30 + $0x2c0] sm:$0xf] %v534_v48 }
  0x89   : > { %537 = vst [vmem:[%s3870_s30 + $0x2c4] sm:$0xf] %v536_v49  ;;  %539 = vst [vmem:[%s3870_s30 + $0x2c8] sm:$0xf] %v538_v50  ;;  %v540_v51 = vld [vmem:[%s3863_s29 + $0xb30] sm:$0xf] }
  0x8a   : > { %v542_v52 = vld [vmem:[%s3863_s29 + $0xb40] sm:$0xf]  ;;  %v544_v53 = vld [vmem:[%s3863_s29 + $0xb50] sm:$0xf]  ;;  %541 = vst [vmem:[%s3870_s30 + $0x2cc] sm:$0xf] %v540_v51 }
  0x8b   : > { %543 = vst [vmem:[%s3870_s30 + $0x2d0] sm:$0xf] %v542_v52  ;;  %545 = vst [vmem:[%s3870_s30 + $0x2d4] sm:$0xf] %v544_v53  ;;  %v546_v54 = vld [vmem:[%s3863_s29 + $0xb60] sm:$0xf] }
  0x8c   : > { %v548_v55 = vld [vmem:[%s3863_s29 + $0xb70] sm:$0xf]  ;;  %v550_v56 = vld [vmem:[%s3863_s29 + $0xb80] sm:$0xf]  ;;  %547 = vst [vmem:[%s3870_s30 + $0x2d8] sm:$0xf] %v546_v54 }
  0x8d   : > { %549 = vst [vmem:[%s3870_s30 + $0x2dc] sm:$0xf] %v548_v55  ;;  %551 = vst [vmem:[%s3870_s30 + $0x2e0] sm:$0xf] %v550_v56  ;;  %v552_v57 = vld [vmem:[%s3863_s29 + $0xb90] sm:$0xf] }
  0x8e   : > { %v554_v58 = vld [vmem:[%s3863_s29 + $0xba0] sm:$0xf]  ;;  %v556_v59 = vld [vmem:[%s3863_s29 + $0xbb0] sm:$0xf]  ;;  %553 = vst [vmem:[%s3870_s30 + $0x2e4] sm:$0xf] %v552_v57 }
  0x8f   : > { %555 = vst [vmem:[%s3870_s30 + $0x2e8] sm:$0xf] %v554_v58  ;;  %557 = vst [vmem:[%s3870_s30 + $0x2ec] sm:$0xf] %v556_v59  ;;  %v558_v60 = vld [vmem:[%s3863_s29 + $0xbc0] sm:$0xf] }
  0x90   : > { %v560_v61 = vld [vmem:[%s3863_s29 + $0xbd0] sm:$0xf]  ;;  %v562_v62 = vld [vmem:[%s3863_s29 + $0xbe0] sm:$0xf]  ;;  %559 = vst [vmem:[%s3870_s30 + $0x2f0] sm:$0xf] %v558_v60 }
  0x91   : > { %561 = vst [vmem:[%s3870_s30 + $0x2f4] sm:$0xf] %v560_v61  ;;  %563 = vst [vmem:[%s3870_s30 + $0x2f8] sm:$0xf] %v562_v62  ;;  %v564_v63 = vld [vmem:[%s3863_s29 + $0xbf0] sm:$0xf] }
  0x92   : > { %v566_v0 = vld [vmem:[%s3863_s29 + $0xc00] sm:$0xf]  ;;  %v568_v1 = vld [vmem:[%s3863_s29 + $0xc10] sm:$0xf]  ;;  %565 = vst [vmem:[%s3870_s30 + $0x2fc] sm:$0xf] %v564_v63 }
  0x93   : > { %567 = vst [vmem:[%s3870_s30 + $0x300] sm:$0xf] %v566_v0  ;;  %569 = vst [vmem:[%s3870_s30 + $0x304] sm:$0xf] %v568_v1  ;;  %v570_v2 = vld [vmem:[%s3863_s29 + $0xc20] sm:$0xf] }
  0x94   : > { %v572_v3 = vld [vmem:[%s3863_s29 + $0xc30] sm:$0xf]  ;;  %v574_v4 = vld [vmem:[%s3863_s29 + $0xc40] sm:$0xf]  ;;  %571 = vst [vmem:[%s3870_s30 + $0x308] sm:$0xf] %v570_v2 }
  0x95   : > { %573 = vst [vmem:[%s3870_s30 + $0x30c] sm:$0xf] %v572_v3  ;;  %575 = vst [vmem:[%s3870_s30 + $0x310] sm:$0xf] %v574_v4  ;;  %v576_v5 = vld [vmem:[%s3863_s29 + $0xc50] sm:$0xf] }
  0x96   : > { %v578_v6 = vld [vmem:[%s3863_s29 + $0xc60] sm:$0xf]  ;;  %v580_v7 = vld [vmem:[%s3863_s29 + $0xc70] sm:$0xf]  ;;  %577 = vst [vmem:[%s3870_s30 + $0x314] sm:$0xf] %v576_v5 }
  0x97   : > { %579 = vst [vmem:[%s3870_s30 + $0x318] sm:$0xf] %v578_v6  ;;  %581 = vst [vmem:[%s3870_s30 + $0x31c] sm:$0xf] %v580_v7  ;;  %v582_v8 = vld [vmem:[%s3863_s29 + $0xc80] sm:$0xf] }
  0x98   : > { %v584_v9 = vld [vmem:[%s3863_s29 + $0xc90] sm:$0xf]  ;;  %v586_v10 = vld [vmem:[%s3863_s29 + $0xca0] sm:$0xf]  ;;  %583 = vst [vmem:[%s3870_s30 + $0x320] sm:$0xf] %v582_v8 }
  0x99   : > { %585 = vst [vmem:[%s3870_s30 + $0x324] sm:$0xf] %v584_v9  ;;  %587 = vst [vmem:[%s3870_s30 + $0x328] sm:$0xf] %v586_v10  ;;  %v588_v11 = vld [vmem:[%s3863_s29 + $0xcb0] sm:$0xf] }
  0x9a   : > { %v590_v12 = vld [vmem:[%s3863_s29 + $0xcc0] sm:$0xf]  ;;  %v592_v13 = vld [vmem:[%s3863_s29 + $0xcd0] sm:$0xf]  ;;  %589 = vst [vmem:[%s3870_s30 + $0x32c] sm:$0xf] %v588_v11 }
  0x9b   : > { %591 = vst [vmem:[%s3870_s30 + $0x330] sm:$0xf] %v590_v12  ;;  %593 = vst [vmem:[%s3870_s30 + $0x334] sm:$0xf] %v592_v13  ;;  %v594_v14 = vld [vmem:[%s3863_s29 + $0xce0] sm:$0xf] }
  0x9c   : > { %v596_v15 = vld [vmem:[%s3863_s29 + $0xcf0] sm:$0xf]  ;;  %v598_v16 = vld [vmem:[%s3863_s29 + $0xd00] sm:$0xf]  ;;  %595 = vst [vmem:[%s3870_s30 + $0x338] sm:$0xf] %v594_v14 }
  0x9d   : > { %597 = vst [vmem:[%s3870_s30 + $0x33c] sm:$0xf] %v596_v15  ;;  %599 = vst [vmem:[%s3870_s30 + $0x340] sm:$0xf] %v598_v16  ;;  %v600_v17 = vld [vmem:[%s3863_s29 + $0xd10] sm:$0xf] }
  0x9e   : > { %v602_v18 = vld [vmem:[%s3863_s29 + $0xd20] sm:$0xf]  ;;  %v604_v19 = vld [vmem:[%s3863_s29 + $0xd30] sm:$0xf]  ;;  %601 = vst [vmem:[%s3870_s30 + $0x344] sm:$0xf] %v600_v17 }
  0x9f   : > { %603 = vst [vmem:[%s3870_s30 + $0x348] sm:$0xf] %v602_v18  ;;  %605 = vst [vmem:[%s3870_s30 + $0x34c] sm:$0xf] %v604_v19  ;;  %v606_v20 = vld [vmem:[%s3863_s29 + $0xd40] sm:$0xf] }
  0xa0   : > { %v608_v21 = vld [vmem:[%s3863_s29 + $0xd50] sm:$0xf]  ;;  %v610_v22 = vld [vmem:[%s3863_s29 + $0xd60] sm:$0xf]  ;;  %607 = vst [vmem:[%s3870_s30 + $0x350] sm:$0xf] %v606_v20 }
  0xa1   : > { %609 = vst [vmem:[%s3870_s30 + $0x354] sm:$0xf] %v608_v21  ;;  %611 = vst [vmem:[%s3870_s30 + $0x358] sm:$0xf] %v610_v22  ;;  %v612_v23 = vld [vmem:[%s3863_s29 + $0xd70] sm:$0xf] }
  0xa2   : > { %v614_v24 = vld [vmem:[%s3863_s29 + $0xd80] sm:$0xf]  ;;  %v616_v25 = vld [vmem:[%s3863_s29 + $0xd90] sm:$0xf]  ;;  %613 = vst [vmem:[%s3870_s30 + $0x35c] sm:$0xf] %v612_v23 }
  0xa3   : > { %615 = vst [vmem:[%s3870_s30 + $0x360] sm:$0xf] %v614_v24  ;;  %617 = vst [vmem:[%s3870_s30 + $0x364] sm:$0xf] %v616_v25  ;;  %v618_v26 = vld [vmem:[%s3863_s29 + $0xda0] sm:$0xf] }
  0xa4   : > { %v620_v27 = vld [vmem:[%s3863_s29 + $0xdb0] sm:$0xf]  ;;  %v622_v28 = vld [vmem:[%s3863_s29 + $0xdc0] sm:$0xf]  ;;  %619 = vst [vmem:[%s3870_s30 + $0x368] sm:$0xf] %v618_v26 }
  0xa5   : > { %621 = vst [vmem:[%s3870_s30 + $0x36c] sm:$0xf] %v620_v27  ;;  %623 = vst [vmem:[%s3870_s30 + $0x370] sm:$0xf] %v622_v28  ;;  %v624_v29 = vld [vmem:[%s3863_s29 + $0xdd0] sm:$0xf] }
  0xa6   : > { %v626_v30 = vld [vmem:[%s3863_s29 + $0xde0] sm:$0xf]  ;;  %v628_v31 = vld [vmem:[%s3863_s29 + $0xdf0] sm:$0xf]  ;;  %625 = vst [vmem:[%s3870_s30 + $0x374] sm:$0xf] %v624_v29 }
  0xa7   : > { %627 = vst [vmem:[%s3870_s30 + $0x378] sm:$0xf] %v626_v30  ;;  %629 = vst [vmem:[%s3870_s30 + $0x37c] sm:$0xf] %v628_v31  ;;  %v630_v32 = vld [vmem:[%s3863_s29 + $0xe00] sm:$0xf] }
  0xa8   : > { %v632_v33 = vld [vmem:[%s3863_s29 + $0xe10] sm:$0xf]  ;;  %v634_v34 = vld [vmem:[%s3863_s29 + $0xe20] sm:$0xf]  ;;  %631 = vst [vmem:[%s3870_s30 + $0x380] sm:$0xf] %v630_v32 }
  0xa9   : > { %633 = vst [vmem:[%s3870_s30 + $0x384] sm:$0xf] %v632_v33  ;;  %635 = vst [vmem:[%s3870_s30 + $0x388] sm:$0xf] %v634_v34  ;;  %v636_v35 = vld [vmem:[%s3863_s29 + $0xe30] sm:$0xf] }
  0xaa   : > { %v638_v36 = vld [vmem:[%s3863_s29 + $0xe40] sm:$0xf]  ;;  %v640_v37 = vld [vmem:[%s3863_s29 + $0xe50] sm:$0xf]  ;;  %637 = vst [vmem:[%s3870_s30 + $0x38c] sm:$0xf] %v636_v35 }
  0xab   : > { %639 = vst [vmem:[%s3870_s30 + $0x390] sm:$0xf] %v638_v36  ;;  %641 = vst [vmem:[%s3870_s30 + $0x394] sm:$0xf] %v640_v37  ;;  %v642_v38 = vld [vmem:[%s3863_s29 + $0xe60] sm:$0xf] }
  0xac   : > { %v644_v39 = vld [vmem:[%s3863_s29 + $0xe70] sm:$0xf]  ;;  %v646_v40 = vld [vmem:[%s3863_s29 + $0xe80] sm:$0xf]  ;;  %643 = vst [vmem:[%s3870_s30 + $0x398] sm:$0xf] %v642_v38 }
  0xad   : > { %645 = vst [vmem:[%s3870_s30 + $0x39c] sm:$0xf] %v644_v39  ;;  %647 = vst [vmem:[%s3870_s30 + $0x3a0] sm:$0xf] %v646_v40  ;;  %v648_v41 = vld [vmem:[%s3863_s29 + $0xe90] sm:$0xf] }
  0xae   : > { %v650_v42 = vld [vmem:[%s3863_s29 + $0xea0] sm:$0xf]  ;;  %v652_v43 = vld [vmem:[%s3863_s29 + $0xeb0] sm:$0xf]  ;;  %649 = vst [vmem:[%s3870_s30 + $0x3a4] sm:$0xf] %v648_v41 }
  0xaf   : > { %651 = vst [vmem:[%s3870_s30 + $0x3a8] sm:$0xf] %v650_v42  ;;  %653 = vst [vmem:[%s3870_s30 + $0x3ac] sm:$0xf] %v652_v43  ;;  %v654_v44 = vld [vmem:[%s3863_s29 + $0xec0] sm:$0xf] }
  0xb0   : > { %v656_v45 = vld [vmem:[%s3863_s29 + $0xed0] sm:$0xf]  ;;  %v658_v46 = vld [vmem:[%s3863_s29 + $0xee0] sm:$0xf]  ;;  %655 = vst [vmem:[%s3870_s30 + $0x3b0] sm:$0xf] %v654_v44 }
  0xb1   : > { %657 = vst [vmem:[%s3870_s30 + $0x3b4] sm:$0xf] %v656_v45  ;;  %659 = vst [vmem:[%s3870_s30 + $0x3b8] sm:$0xf] %v658_v46  ;;  %v660_v47 = vld [vmem:[%s3863_s29 + $0xef0] sm:$0xf] }
  0xb2   : > { %v662_v48 = vld [vmem:[%s3863_s29 + $0xf00] sm:$0xf]  ;;  %v664_v49 = vld [vmem:[%s3863_s29 + $0xf10] sm:$0xf]  ;;  %661 = vst [vmem:[%s3870_s30 + $0x3bc] sm:$0xf] %v660_v47 }
  0xb3   : > { %663 = vst [vmem:[%s3870_s30 + $0x3c0] sm:$0xf] %v662_v48  ;;  %665 = vst [vmem:[%s3870_s30 + $0x3c4] sm:$0xf] %v664_v49  ;;  %v666_v50 = vld [vmem:[%s3863_s29 + $0xf20] sm:$0xf] }
  0xb4   : > { %v668_v51 = vld [vmem:[%s3863_s29 + $0xf30] sm:$0xf]  ;;  %v670_v52 = vld [vmem:[%s3863_s29 + $0xf40] sm:$0xf]  ;;  %667 = vst [vmem:[%s3870_s30 + $0x3c8] sm:$0xf] %v666_v50 }
  0xb5   : > { %669 = vst [vmem:[%s3870_s30 + $0x3cc] sm:$0xf] %v668_v51  ;;  %671 = vst [vmem:[%s3870_s30 + $0x3d0] sm:$0xf] %v670_v52  ;;  %v672_v53 = vld [vmem:[%s3863_s29 + $0xf50] sm:$0xf] }
  0xb6   : > { %v674_v54 = vld [vmem:[%s3863_s29 + $0xf60] sm:$0xf]  ;;  %v676_v55 = vld [vmem:[%s3863_s29 + $0xf70] sm:$0xf]  ;;  %673 = vst [vmem:[%s3870_s30 + $0x3d4] sm:$0xf] %v672_v53 }
  0xb7   : > { %675 = vst [vmem:[%s3870_s30 + $0x3d8] sm:$0xf] %v674_v54  ;;  %677 = vst [vmem:[%s3870_s30 + $0x3dc] sm:$0xf] %v676_v55  ;;  %v678_v56 = vld [vmem:[%s3863_s29 + $0xf80] sm:$0xf] }
  0xb8   : > { %v680_v57 = vld [vmem:[%s3863_s29 + $0xf90] sm:$0xf]  ;;  %v682_v58 = vld [vmem:[%s3863_s29 + $0xfa0] sm:$0xf]  ;;  %679 = vst [vmem:[%s3870_s30 + $0x3e0] sm:$0xf] %v678_v56 }
  0xb9   : > { %681 = vst [vmem:[%s3870_s30 + $0x3e4] sm:$0xf] %v680_v57  ;;  %683 = vst [vmem:[%s3870_s30 + $0x3e8] sm:$0xf] %v682_v58  ;;  %v684_v59 = vld [vmem:[%s3863_s29 + $0xfb0] sm:$0xf] }
  0xba   : > { %v686_v60 = vld [vmem:[%s3863_s29 + $0xfc0] sm:$0xf]  ;;  %v688_v61 = vld [vmem:[%s3863_s29 + $0xfd0] sm:$0xf]  ;;  %685 = vst [vmem:[%s3870_s30 + $0x3ec] sm:$0xf] %v684_v59 }
  0xbb   : > { %687 = vst [vmem:[%s3870_s30 + $0x3f0] sm:$0xf] %v686_v60  ;;  %689 = vst [vmem:[%s3870_s30 + $0x3f4] sm:$0xf] %v688_v61  ;;  %v690_v62 = vld [vmem:[%s3863_s29 + $0xfe0] sm:$0xf] }
  0xbc   : > { %v692_v63 = vld [vmem:[%s3863_s29 + $0xff0] sm:$0xf]  ;;  %v694_v0 = vld [vmem:[%s3863_s29 + $0x1000] sm:$0xf]  ;;  %691 = vst [vmem:[%s3870_s30 + $0x3f8] sm:$0xf] %v690_v62 }
  0xbd   : > { %693 = vst [vmem:[%s3870_s30 + $0x3fc] sm:$0xf] %v692_v63  ;;  %695 = vst [vmem:[%s3870_s30 + $0x400] sm:$0xf] %v694_v0  ;;  %v696_v1 = vld [vmem:[%s3863_s29 + $0x1010] sm:$0xf] }
  0xbe   : > { %v698_v2 = vld [vmem:[%s3863_s29 + $0x1020] sm:$0xf]  ;;  %v700_v3 = vld [vmem:[%s3863_s29 + $0x1030] sm:$0xf]  ;;  %697 = vst [vmem:[%s3870_s30 + $0x404] sm:$0xf] %v696_v1 }
  0xbf   : > { %699 = vst [vmem:[%s3870_s30 + $0x408] sm:$0xf] %v698_v2  ;;  %701 = vst [vmem:[%s3870_s30 + $0x40c] sm:$0xf] %v700_v3  ;;  %v702_v4 = vld [vmem:[%s3863_s29 + $0x1040] sm:$0xf] }
  0xc0   : > { %v704_v5 = vld [vmem:[%s3863_s29 + $0x1050] sm:$0xf]  ;;  %v706_v6 = vld [vmem:[%s3863_s29 + $0x1060] sm:$0xf]  ;;  %703 = vst [vmem:[%s3870_s30 + $0x410] sm:$0xf] %v702_v4 }
  0xc1   : > { %705 = vst [vmem:[%s3870_s30 + $0x414] sm:$0xf] %v704_v5  ;;  %707 = vst [vmem:[%s3870_s30 + $0x418] sm:$0xf] %v706_v6  ;;  %v708_v7 = vld [vmem:[%s3863_s29 + $0x1070] sm:$0xf] }
  0xc2   : > { %v710_v8 = vld [vmem:[%s3863_s29 + $0x1080] sm:$0xf]  ;;  %v712_v9 = vld [vmem:[%s3863_s29 + $0x1090] sm:$0xf]  ;;  %709 = vst [vmem:[%s3870_s30 + $0x41c] sm:$0xf] %v708_v7 }
  0xc3   : > { %711 = vst [vmem:[%s3870_s30 + $0x420] sm:$0xf] %v710_v8  ;;  %713 = vst [vmem:[%s3870_s30 + $0x424] sm:$0xf] %v712_v9  ;;  %v714_v10 = vld [vmem:[%s3863_s29 + $0x10a0] sm:$0xf] }
  0xc4   : > { %v716_v11 = vld [vmem:[%s3863_s29 + $0x10b0] sm:$0xf]  ;;  %v718_v12 = vld [vmem:[%s3863_s29 + $0x10c0] sm:$0xf]  ;;  %715 = vst [vmem:[%s3870_s30 + $0x428] sm:$0xf] %v714_v10 }
  0xc5   : > { %717 = vst [vmem:[%s3870_s30 + $0x42c] sm:$0xf] %v716_v11  ;;  %719 = vst [vmem:[%s3870_s30 + $0x430] sm:$0xf] %v718_v12  ;;  %v720_v13 = vld [vmem:[%s3863_s29 + $0x10d0] sm:$0xf] }
  0xc6   : > { %v722_v14 = vld [vmem:[%s3863_s29 + $0x10e0] sm:$0xf]  ;;  %v724_v15 = vld [vmem:[%s3863_s29 + $0x10f0] sm:$0xf]  ;;  %721 = vst [vmem:[%s3870_s30 + $0x434] sm:$0xf] %v720_v13 }
  0xc7   : > { %723 = vst [vmem:[%s3870_s30 + $0x438] sm:$0xf] %v722_v14  ;;  %725 = vst [vmem:[%s3870_s30 + $0x43c] sm:$0xf] %v724_v15  ;;  %v726_v16 = vld [vmem:[%s3863_s29 + $0x1100] sm:$0xf] }
  0xc8   : > { %v728_v17 = vld [vmem:[%s3863_s29 + $0x1110] sm:$0xf]  ;;  %v730_v18 = vld [vmem:[%s3863_s29 + $0x1120] sm:$0xf]  ;;  %727 = vst [vmem:[%s3870_s30 + $0x440] sm:$0xf] %v726_v16 }
  0xc9   : > { %729 = vst [vmem:[%s3870_s30 + $0x444] sm:$0xf] %v728_v17  ;;  %731 = vst [vmem:[%s3870_s30 + $0x448] sm:$0xf] %v730_v18  ;;  %v732_v19 = vld [vmem:[%s3863_s29 + $0x1130] sm:$0xf] }
  0xca   : > { %v734_v20 = vld [vmem:[%s3863_s29 + $0x1140] sm:$0xf]  ;;  %v736_v21 = vld [vmem:[%s3863_s29 + $0x1150] sm:$0xf]  ;;  %733 = vst [vmem:[%s3870_s30 + $0x44c] sm:$0xf] %v732_v19 }
  0xcb   : > { %735 = vst [vmem:[%s3870_s30 + $0x450] sm:$0xf] %v734_v20  ;;  %737 = vst [vmem:[%s3870_s30 + $0x454] sm:$0xf] %v736_v21  ;;  %v738_v22 = vld [vmem:[%s3863_s29 + $0x1160] sm:$0xf] }
  0xcc   : > { %v740_v23 = vld [vmem:[%s3863_s29 + $0x1170] sm:$0xf]  ;;  %v742_v24 = vld [vmem:[%s3863_s29 + $0x1180] sm:$0xf]  ;;  %739 = vst [vmem:[%s3870_s30 + $0x458] sm:$0xf] %v738_v22 }
  0xcd   : > { %741 = vst [vmem:[%s3870_s30 + $0x45c] sm:$0xf] %v740_v23  ;;  %743 = vst [vmem:[%s3870_s30 + $0x460] sm:$0xf] %v742_v24  ;;  %v744_v25 = vld [vmem:[%s3863_s29 + $0x1190] sm:$0xf] }
  0xce   : > { %v746_v26 = vld [vmem:[%s3863_s29 + $0x11a0] sm:$0xf]  ;;  %v748_v27 = vld [vmem:[%s3863_s29 + $0x11b0] sm:$0xf]  ;;  %745 = vst [vmem:[%s3870_s30 + $0x464] sm:$0xf] %v744_v25 }
  0xcf   : > { %747 = vst [vmem:[%s3870_s30 + $0x468] sm:$0xf] %v746_v26  ;;  %749 = vst [vmem:[%s3870_s30 + $0x46c] sm:$0xf] %v748_v27  ;;  %v750_v28 = vld [vmem:[%s3863_s29 + $0x11c0] sm:$0xf] }
  0xd0   : > { %v752_v29 = vld [vmem:[%s3863_s29 + $0x11d0] sm:$0xf]  ;;  %v754_v30 = vld [vmem:[%s3863_s29 + $0x11e0] sm:$0xf]  ;;  %751 = vst [vmem:[%s3870_s30 + $0x470] sm:$0xf] %v750_v28 }
  0xd1   : > { %753 = vst [vmem:[%s3870_s30 + $0x474] sm:$0xf] %v752_v29  ;;  %755 = vst [vmem:[%s3870_s30 + $0x478] sm:$0xf] %v754_v30  ;;  %v756_v31 = vld [vmem:[%s3863_s29 + $0x11f0] sm:$0xf] }
  0xd2   : > { %757 = vst [vmem:[%s3870_s30 + $0x47c] sm:$0xf] %v756_v31 }
  0xd3 PF: > { %p3204_p7 = scmp.ge.s32.totalorder %s3795_s17, 1  ;;  %p1368_p8 = scmp.lt.s32.totalorder %s3795_s17, 5 }
  0xd5   : > { %p1369_p9 = pnand %p3204_p7, %p1368_p8 }
  0xd6   : > { %s1375_s5 = sand.u32 (!%p1369_p9), 1, %s3787_s15   ;;  %p1405_p10 = scmp.lt.s32.totalorder (!%p1369_p9), %s3838_s18, 3 }
  0xd7   : > { %1372 = sbr.rel (%p1369_p9) target bundleno = 602 (0x25a), region = 73  ;;  %s3205_s14 = sshll.u32 (!%p1369_p9), %s1375_s5, 3 }
  0xd8   : > { %s3577_s6 = smul.u32 (!%p1369_p9), 1152, %s1375_s5  ;;  %s1404_s17 = scalar_lea.vmem (!%p1369_p9), [#allocation3], %s3205_s14 }
  0xda   : > { %s4454_s11 = scalar_lea.vmem (!%p1369_p9), [#allocation2], %s3577_s6 }
  0xdc   : > { %v3636_v32 = vld [vmem:[%s4674_s0 + $0x4] ss:$72 sps:$4 sm:$0x7f]   ;;  %v3602_v34 = vld [vmem:[%s4454_s11 + $0x78] sm:$0xff]   ;;  %v3606_v38 = vld [vmem:[%s4454_s11 + $0x70] sm:$0xff]   ;;  %s3373_s20 = sshll.u32 (%p3853_p5), %s3838_s18, 2 }
  0xdd   : > { %v3639_v33 = vld [vmem:[%s4674_s0 + $0xc] ss:$72 sps:$4 sm:$0x7f]   ;;  %2704 = vmatprep.mubr.bf16.mxu0 %v3636_v32  ;;  %v3603_v35 = vld [vmem:[%s4454_s11 + $0xf8] sm:$0xff]   ;;  %3378 = vmatprep.subr.bf16.mxu0 %v3602_v34  ;;  %v3614_v46 = vld [vmem:[%s4454_s11 + $0x60] sm:$0xff]   ;;  %s3079_s21 = scalar_lea.vmem (%p3853_p5), %s4678_s4, %s3373_s20 }
  0xde   : > { %2745 = vmatprep.mubr.bf16.mxu1 %v3639_v33  ;;  %v3604_v36 = vld [vmem:[%s4454_s11 + $0x38] sm:$0xff]   ;;  %3400 = vmatprep.subr.bf16.mxu1 %v3603_v35  ;;  %v3607_v39 = vld [vmem:[%s4454_s11 + $0xf0] sm:$0xff]   ;;  %v3610_v42 = vld [vmem:[%s4454_s11 + $0x68] sm:$0xff]  }
  0xdf   : > { %v3605_v37 = vld [vmem:[%s4454_s11 + $0xb8] sm:$0xff]   ;;  %3379 = vmatpush3.bf16.msra.mxu0 %v3604_v36  ;;  %v3608_v40 = vld [vmem:[%s4454_s11 + $0x30] sm:$0xff]   ;;  %v3611_v43 = vld [vmem:[%s4454_s11 + $0xe8] sm:$0xff]  }
  0xe0   : > { %3401 = vmatpush3.bf16.msra.mxu1 %v3605_v37  ;;  %3380 = vmatprep.subr.bf16.mxu0 %v3606_v38  ;;  %v3609_v41 = vld [vmem:[%s4454_s11 + $0xb0] sm:$0xff]   ;;  %v3612_v44 = vld [vmem:[%s4454_s11 + $0x28] sm:$0xff]   ;;  %v3615_v47 = vld [vmem:[%s4454_s11 + $0xe0] sm:$0xff]  }
  0xe1   : > { %3402 = vmatprep.subr.bf16.mxu1 %v3607_v39  ;;  %v3613_v45 = vld [vmem:[%s4454_s11 + $0xa8] sm:$0xff]   ;;  %v3616_v48 = vld [vmem:[%s4454_s11 + $0x20] sm:$0xff]   ;;  %v3618_v50 = vld [vmem:[%s4454_s11 + $0x58] sm:$0xff]  }
  0xe2   : > { %v3617_v49 = vld [vmem:[%s4454_s11 + $0xa0] sm:$0xff]   ;;  %v3619_v51 = vld [vmem:[%s4454_s11 + $0xd8] sm:$0xff]   ;;  %v3622_v54 = vld [vmem:[%s4454_s11 + $0x50] sm:$0xff]  }
  0xe3   : > { %3381 = vmatpush3.bf16.msra.mxu0 %v3608_v40  ;;  %v3620_v52 = vld [vmem:[%s4454_s11 + $0x18] sm:$0xff]   ;;  %v3623_v55 = vld [vmem:[%s4454_s11 + $0xd0] sm:$0xff]   ;;  %v3626_v58 = vld [vmem:[%s4454_s11 + $0x48] sm:$0xff]  }
  0xe4   : > { %3403 = vmatpush3.bf16.msra.mxu1 %v3609_v41  ;;  %3382 = vmatprep.subr.bf16.mxu0 %v3610_v42  ;;  %v3621_v53 = vld [vmem:[%s4454_s11 + $0x98] sm:$0xff]   ;;  %v3624_v56 = vld [vmem:[%s4454_s11 + $0x10] sm:$0xff]   ;;  %v3627_v59 = vld [vmem:[%s4454_s11 + $0xc8] sm:$0xff]  }
  0xe5   : > { %3404 = vmatprep.subr.bf16.mxu1 %v3611_v43  ;;  %v3625_v57 = vld [vmem:[%s4454_s11 + $0x90] sm:$0xff]   ;;  %v3628_v60 = vld [vmem:[%s4454_s11 + $0x8] sm:$0xff]   ;;  %v3630_v62 = vld [vmem:[%s4454_s11 + $0x40] sm:$0xff]  }
  0xe6   : > { %v3629_v61 = vld [vmem:[%s4454_s11 + $0x88] sm:$0xff]   ;;  %v3631_v63 = vld [vmem:[%s4454_s11 + $0xc0] sm:$0xff]   ;;  %v3640_v4 = vld [vmem:[%s4454_s11 + $0x178] sm:$0xff]  }
  0xe7   : > { %3383 = vmatpush3.bf16.msra.mxu0 %v3612_v44  ;;  %v3634_v0 = vld [vmem:[%s4674_s0] ss:$72 sps:$4 sm:$0x7f]   ;;  %v3641_v5 = vld [vmem:[%s4454_s11 + $0x138] sm:$0xff]   ;;  %v3644_v8 = vld [vmem:[%s4454_s11 + $0x170] sm:$0xff]  }
  0xe8   : > { %3405 = vmatpush3.bf16.msra.mxu1 %v3613_v45  ;;  %3384 = vmatprep.subr.bf16.mxu0 %v3614_v46  ;;  %v3632_v1 = vld [vmem:[%s4454_s11] sm:$0xff]   ;;  %v3637_v2 = vld [vmem:[%s4674_s0 + $0x8] ss:$72 sps:$4 sm:$0x7f]   ;;  %v3642_v6 = vld [vmem:[%s4454_s11 + $0x1f8] sm:$0xff]  }
  0xe9   : > { %3406 = vmatprep.subr.bf16.mxu1 %v3615_v47  ;;  %v3633_v3 = vld [vmem:[%s4454_s11 + $0x80] sm:$0xff]   ;;  %v3643_v7 = vld [vmem:[%s4454_s11 + $0x1b8] sm:$0xff]   ;;  %v3645_v9 = vld [vmem:[%s4454_s11 + $0x130] sm:$0xff]  }
  0xea   : > { %v3646_v10 = vld [vmem:[%s4454_s11 + $0x1f0] sm:$0xff]   ;;  %v3648_v12 = vld [vmem:[%s4454_s11 + $0x168] sm:$0xff]   ;;  %v3652_v16 = vld [vmem:[%s4454_s11 + $0x160] sm:$0xff]  }
  0xeb   : > { %3385 = vmatpush3.bf16.msra.mxu0 %v3616_v48  ;;  %v3647_v11 = vld [vmem:[%s4454_s11 + $0x1b0] sm:$0xff]   ;;  %v3649_v13 = vld [vmem:[%s4454_s11 + $0x128] sm:$0xff]   ;;  %v3653_v17 = vld [vmem:[%s4454_s11 + $0x120] sm:$0xff]  }
  0xec   : > { %3407 = vmatpush3.bf16.msra.mxu1 %v3617_v49  ;;  %3386 = vmatprep.subr.bf16.mxu0 %v3618_v50  ;;  %v3650_v14 = vld [vmem:[%s4454_s11 + $0x1e8] sm:$0xff]   ;;  %v3654_v18 = vld [vmem:[%s4454_s11 + $0x1e0] sm:$0xff]   ;;  %v3656_v20 = vld [vmem:[%s4454_s11 + $0x158] sm:$0xff]  }
  0xed   : > { %3408 = vmatprep.subr.bf16.mxu1 %v3619_v51  ;;  %v3651_v15 = vld [vmem:[%s4454_s11 + $0x1a8] sm:$0xff]   ;;  %v3655_v19 = vld [vmem:[%s4454_s11 + $0x1a0] sm:$0xff]   ;;  %v3657_v21 = vld [vmem:[%s4454_s11 + $0x118] sm:$0xff]  }
  0xee   : > { %v3658_v22 = vld [vmem:[%s4454_s11 + $0x1d8] sm:$0xff]   ;;  %v3660_v24 = vld [vmem:[%s4454_s11 + $0x150] sm:$0xff]   ;;  %v3664_v28 = vld [vmem:[%s4454_s11 + $0x148] sm:$0xff]  }
  0xef   : > { %3387 = vmatpush3.bf16.msra.mxu0 %v3620_v52  ;;  %v3659_v23 = vld [vmem:[%s4454_s11 + $0x198] sm:$0xff]   ;;  %v3661_v25 = vld [vmem:[%s4454_s11 + $0x110] sm:$0xff]   ;;  %v3665_v29 = vld [vmem:[%s4454_s11 + $0x108] sm:$0xff]  }
  0xf0   : > { %3409 = vmatpush3.bf16.msra.mxu1 %v3621_v53  ;;  %3388 = vmatprep.subr.bf16.mxu0 %v3622_v54  ;;  %v3662_v26 = vld [vmem:[%s4454_s11 + $0x1d0] sm:$0xff]   ;;  %v3666_v30 = vld [vmem:[%s4454_s11 + $0x1c8] sm:$0xff]   ;;  %v3668_v32 = vld [vmem:[%s4454_s11 + $0x140] sm:$0xff]  }
  0xf1   : > { %3410 = vmatprep.subr.bf16.mxu1 %v3623_v55  ;;  %v3663_v27 = vld [vmem:[%s4454_s11 + $0x190] sm:$0xff]   ;;  %v3667_v31 = vld [vmem:[%s4454_s11 + $0x188] sm:$0xff]   ;;  %v3669_v33 = vld [vmem:[%s4454_s11 + $0x100] sm:$0xff]  }
  0xf2   : > { %v3670_v34 = vld [vmem:[%s4454_s11 + $0x1c0] sm:$0xff]   ;;  %v3671_v35 = vld [vmem:[%s4674_s0 + $0x10] ss:$72 sps:$4 sm:$0x7f]   ;;  %v3686_v48 = vld [vmem:[%s4454_s11 + $0x268] sm:$0xff]  }
  0xf3   : > { %3389 = vmatpush3.bf16.msra.mxu0 %v3624_v56  ;;  %v3674_v36 = vld [vmem:[%s4454_s11 + $0x180] sm:$0xff]   ;;  %v3673_v37 = vld [vmem:[%s4674_s0 + $0x14] ss:$72 sps:$4 sm:$0x7f]   ;;  %v3687_v49 = vld [vmem:[%s4454_s11 + $0x228] sm:$0xff]  }
  0xf4   : > { %3411 = vmatpush3.bf16.msra.mxu1 %v3625_v57  ;;  %3390 = vmatprep.subr.bf16.mxu0 %v3626_v58  ;;  %v3675_v38 = vld [vmem:[%s4454_s11 + $0x278] sm:$0xff]   ;;  %v3682_v44 = vld [vmem:[%s4454_s11 + $0x270] sm:$0xff]   ;;  %v3688_v50 = vld [vmem:[%s4454_s11 + $0x2e8] sm:$0xff]  }
  0xf5   : > { %3412 = vmatprep.subr.bf16.mxu1 %v3627_v59  ;;  %v3676_v39 = vld [vmem:[%s4674_s0 + $0x18] ss:$72 sps:$4 sm:$0x7f]   ;;  %v3678_v41 = vld [vmem:[%s4674_s0 + $0x1c] ss:$72 sps:$4 sm:$0x7f]  }
  0xf6   : > { %v3679_v40 = vld [vmem:[%s4454_s11 + $0x238] sm:$0xff]   ;;  %v3683_v45 = vld [vmem:[%s4454_s11 + $0x230] sm:$0xff]   ;;  %v3689_v51 = vld [vmem:[%s4454_s11 + $0x2a8] sm:$0xff]  }
  0xf7   : > { %3391 = vmatpush3.bf16.msra.mxu0 %v3628_v60  ;;  %v3680_v42 = vld [vmem:[%s4454_s11 + $0x2f8] sm:$0xff]   ;;  %v3684_v46 = vld [vmem:[%s4454_s11 + $0x2f0] sm:$0xff]   ;;  %v3690_v52 = vld [vmem:[%s4454_s11 + $0x260] sm:$0xff]  }
  0xf8   : > { %3413 = vmatpush3.bf16.msra.mxu1 %v3629_v61  ;;  %3392 = vmatprep.subr.bf16.mxu0 %v3630_v62  ;;  %v3681_v43 = vld [vmem:[%s4454_s11 + $0x2b8] sm:$0xff]   ;;  %v3685_v47 = vld [vmem:[%s4454_s11 + $0x2b0] sm:$0xff]   ;;  %v3691_v53 = vld [vmem:[%s4454_s11 + $0x220] sm:$0xff]  }
  0xf9   : > { %3414 = vmatprep.subr.bf16.mxu1 %v3631_v63  ;;  %v3692_v54 = vld [vmem:[%s4454_s11 + $0x2e0] sm:$0xff]   ;;  %v3694_v56 = vld [vmem:[%s4454_s11 + $0x258] sm:$0xff]   ;;  %v3698_v60 = vld [vmem:[%s4454_s11 + $0x250] sm:$0xff]  }
  0xfa   : > { %v3693_v55 = vld [vmem:[%s4454_s11 + $0x2a0] sm:$0xff]   ;;  %v3695_v57 = vld [vmem:[%s4454_s11 + $0x218] sm:$0xff]   ;;  %v3699_v61 = vld [vmem:[%s4454_s11 + $0x210] sm:$0xff]  }
  0xfb   : > { %3393 = vmatpush3.bf16.msra.mxu0 %v3632_v1  ;;  %v3696_v58 = vld [vmem:[%s4454_s11 + $0x2d8] sm:$0xff]   ;;  %v3700_v62 = vld [vmem:[%s4454_s11 + $0x2d0] sm:$0xff]   ;;  %v3703_v1 = vld [vmem:[%s4454_s11 + $0x208] sm:$0xff]  }
  0xfc   : > { %3415 = vmatpush3.bf16.msra.mxu1 %v3633_v3  ;;  %3422 = vmatprep.subr.bf16.mxu0 %v3640_v4  ;;  %v3697_v59 = vld [vmem:[%s4454_s11 + $0x298] sm:$0xff]   ;;  %v3701_v63 = vld [vmem:[%s4454_s11 + $0x290] sm:$0xff]   ;;  %v3705_v3 = vld [vmem:[%s4454_s11 + $0x288] sm:$0xff]  }
  0xfd   : > { %3444 = vmatprep.subr.bf16.mxu1 %v3642_v6  ;;  %v3706_v4 = vld [vmem:[%s4454_s11 + $0x240] sm:$0xff]  }
  0xfe   : > { %2705 = vmatmul.mubr.bf16.vlgmr.msra.gmra.mxu0 %v3634_v0  ;;  %v3702_v0 = vld [vmem:[%s4454_s11 + $0x248] sm:$0xff]   ;;  %v3708_v6 = vld [vmem:[%s4454_s11 + $0x2c0] sm:$0xff]  }
  0xff   : > { %2746 = vmatmul.mubr.bf16.vlgmr.msra.gmra.mxu1 %v3637_v2  ;;  %3423 = vmatpush3.bf16.msra.mxu0 %v3641_v5  ;;  %v3704_v2 = vld [vmem:[%s4454_s11 + $0x2c8] sm:$0xff]   ;;  %v3707_v5 = vld [vmem:[%s4454_s11 + $0x200] sm:$0xff]  }
 0x100   : > { %3445 = vmatpush3.bf16.msra.mxu1 %v3643_v7  ;;  %3424 = vmatprep.subr.bf16.mxu0 %v3644_v8  ;;  %v3709_v7 = vld [vmem:[%s4674_s0 + $0x20] ss:$72 sps:$4 sm:$0x7f]   ;;  %v3711_v8 = vld [vmem:[%s4674_s0 + $0x24] ss:$72 sps:$4 sm:$0x7f]  }
 0x101   : > { %3446 = vmatprep.subr.bf16.mxu1 %v3646_v10  ;;  %2786 = vmatprep.mubr.bf16.mxu0 %v3673_v37  ;;  %v3713_v10 = vld [vmem:[%s4454_s11 + $0x378] sm:$0xff]   ;;  %v3741_v37 = vld [vmem:[%s4454_s11 + $0x308] sm:$0xff]  }
 0x102   : > { %2827 = vmatprep.mubr.bf16.mxu1 %v3678_v41  ;;  %v3745_v41 = vld [vmem:[%s4454_s11 + $0x300] sm:$0xff]  }
 0x103   : > { %3425 = vmatpush3.bf16.msra.mxu0 %v3645_v9  ;;  %v3712_v9 = vld [vmem:[%s4454_s11 + $0x280] sm:$0xff]  }
 0x104   : > { %3447 = vmatpush3.bf16.msra.mxu1 %v3647_v11  ;;  %3426 = vmatprep.subr.bf16.mxu0 %v3648_v12  ;;  %v3714_v11 = vld [vmem:[%s4674_s0 + $0x28] ss:$72 sps:$4 sm:$0x7f]   ;;  %v3716_v12 = vld [vmem:[%s4674_s0 + $0x2c] ss:$72 sps:$4 sm:$0x7f]  }
 0x105   : > { %3448 = vmatprep.subr.bf16.mxu1 %v3650_v14  ;;  %v3718_v14 = vld [vmem:[%s4454_s11 + $0x3f8] sm:$0xff]  }
 0x107   : > { %3427 = vmatpush3.bf16.msra.mxu0 %v3649_v13  ;;  %v3717_v13 = vld [vmem:[%s4454_s11 + $0x338] sm:$0xff]  }
 0x108   : > { %3449 = vmatpush3.bf16.msra.mxu1 %v3651_v15  ;;  %3428 = vmatprep.subr.bf16.mxu0 %v3652_v16  ;;  %v3719_v15 = vld [vmem:[%s4454_s11 + $0x3b8] sm:$0xff]   ;;  %v3720_v16 = vld [vmem:[%s4454_s11 + $0x370] sm:$0xff]  }
 0x109   : > { %3450 = vmatprep.subr.bf16.mxu1 %v3654_v18  ;;  %v3722_v18 = vld [vmem:[%s4454_s11 + $0x3f0] sm:$0xff]  }
 0x10b   : > { %3429 = vmatpush3.bf16.msra.mxu0 %v3653_v17  ;;  %v3721_v17 = vld [vmem:[%s4454_s11 + $0x330] sm:$0xff]  }
 0x10c   : > { %3451 = vmatpush3.bf16.msra.mxu1 %v3655_v19  ;;  %3430 = vmatprep.subr.bf16.mxu0 %v3656_v20  ;;  %v3723_v19 = vld [vmem:[%s4454_s11 + $0x3b0] sm:$0xff]   ;;  %v3724_v20 = vld [vmem:[%s4454_s11 + $0x368] sm:$0xff]  }
 0x10d   : > { %3452 = vmatprep.subr.bf16.mxu1 %v3658_v22  ;;  %v3726_v22 = vld [vmem:[%s4454_s11 + $0x3e8] sm:$0xff]  }
 0x10f   : > { %3431 = vmatpush3.bf16.msra.mxu0 %v3657_v21  ;;  %v3725_v21 = vld [vmem:[%s4454_s11 + $0x328] sm:$0xff]  }
 0x110   : > { %3453 = vmatpush3.bf16.msra.mxu1 %v3659_v23  ;;  %3432 = vmatprep.subr.bf16.mxu0 %v3660_v24  ;;  %v3727_v23 = vld [vmem:[%s4454_s11 + $0x3a8] sm:$0xff]   ;;  %v3728_v24 = vld [vmem:[%s4454_s11 + $0x360] sm:$0xff]  }
 0x111   : > { %3454 = vmatprep.subr.bf16.mxu1 %v3662_v26  ;;  %v3730_v26 = vld [vmem:[%s4454_s11 + $0x3e0] sm:$0xff]  }
 0x113   : > { %3433 = vmatpush3.bf16.msra.mxu0 %v3661_v25  ;;  %v3729_v25 = vld [vmem:[%s4454_s11 + $0x320] sm:$0xff]  }
 0x114   : > { %3455 = vmatpush3.bf16.msra.mxu1 %v3663_v27  ;;  %3434 = vmatprep.subr.bf16.mxu0 %v3664_v28  ;;  %v3731_v27 = vld [vmem:[%s4454_s11 + $0x3a0] sm:$0xff]   ;;  %v3732_v28 = vld [vmem:[%s4454_s11 + $0x358] sm:$0xff]  }
 0x115   : > { %3456 = vmatprep.subr.bf16.mxu1 %v3666_v30  ;;  %v3734_v30 = vld [vmem:[%s4454_s11 + $0x3d8] sm:$0xff]  }
 0x117   : > { %3435 = vmatpush3.bf16.msra.mxu0 %v3665_v29  ;;  %v3733_v29 = vld [vmem:[%s4454_s11 + $0x318] sm:$0xff]  }
 0x118   : > { %3457 = vmatpush3.bf16.msra.mxu1 %v3667_v31  ;;  %3436 = vmatprep.subr.bf16.mxu0 %v3668_v32  ;;  %v3735_v31 = vld [vmem:[%s4454_s11 + $0x398] sm:$0xff]   ;;  %v3736_v32 = vld [vmem:[%s4454_s11 + $0x350] sm:$0xff]  }
 0x119   : > { %3458 = vmatprep.subr.bf16.mxu1 %v3670_v34  ;;  %v3738_v34 = vld [vmem:[%s4454_s11 + $0x3d0] sm:$0xff]  }
 0x11b   : > { %3437 = vmatpush3.bf16.msra.mxu0 %v3669_v33  ;;  %v3737_v33 = vld [vmem:[%s4454_s11 + $0x310] sm:$0xff]  }
 0x11c   : > { %3459 = vmatpush3.bf16.msra.mxu1 %v3674_v36  ;;  %3466 = vmatprep.subr.bf16.mxu0 %v3675_v38  ;;  %v3740_v36 = vld [vmem:[%s4454_s11 + $0x348] sm:$0xff]  }
 0x11d   : > { %3488 = vmatprep.subr.bf16.mxu1 %v3680_v42  ;;  %v3742_v38 = vld [vmem:[%s4454_s11 + $0x3c8] sm:$0xff]   ;;  %v3746_v42 = vld [vmem:[%s4454_s11 + $0x3c0] sm:$0xff]  }
 0x11e   : > { %2787 = vmatmul.mubr.bf16.vlgmr.msra.gmra.mxu0 %v3671_v35  ;;  %v3739_v35 = vld [vmem:[%s4454_s11 + $0x390] sm:$0xff]  }
 0x11f   : > { %3467 = vmatpush3.bf16.msra.mxu0 %v3679_v40  ;;  %2828 = vmatmul.mubr.bf16.vlgmr.msra.gmra.mxu1 %v3676_v39  ;;  %v3743_v39 = vld [vmem:[%s4454_s11 + $0x388] sm:$0xff]   ;;  %v3744_v40 = vld [vmem:[%s4454_s11 + $0x340] sm:$0xff]  }
 0x120   : > { %3489 = vmatpush3.bf16.msra.mxu1 %v3681_v43  ;;  %3468 = vmatprep.subr.bf16.mxu0 %v3682_v44  ;;  %v3747_v43 = vld [vmem:[%s4674_s0 + $0x30] ss:$72 sps:$4 sm:$0x7f]   ;;  %v3749_v44 = vld [vmem:[%s4674_s0 + $0x34] ss:$72 sps:$4 sm:$0x7f]  }
 0x121   : > { %3490 = vmatprep.subr.bf16.mxu1 %v3684_v46  ;;  %2868 = vmatprep.mubr.bf16.mxu0 %v3711_v8  ;;  %v3751_v46 = vld [vmem:[%s4454_s11 + $0x478] sm:$0xff]  }
 0x122   : > { %2909 = vmatprep.mubr.bf16.mxu1 %v3716_v12 }
 0x123   : > { %3469 = vmatpush3.bf16.msra.mxu0 %v3683_v45  ;;  %v3750_v45 = vld [vmem:[%s4454_s11 + $0x380] sm:$0xff]  }
 0x124   : > { %3491 = vmatpush3.bf16.msra.mxu1 %v3685_v47  ;;  %3470 = vmatprep.subr.bf16.mxu0 %v3686_v48  ;;  %v3752_v47 = vld [vmem:[%s4674_s0 + $0x38] ss:$72 sps:$4 sm:$0x7f]   ;;  %v3754_v48 = vld [vmem:[%s4674_s0 + $0x3c] ss:$72 sps:$4 sm:$0x7f]  }
 0x125   : > { %3492 = vmatprep.subr.bf16.mxu1 %v3688_v50  ;;  %v3756_v50 = vld [vmem:[%s4454_s11 + $0x470] sm:$0xff]  }
 0x127   : > { %3471 = vmatpush3.bf16.msra.mxu0 %v3687_v49  ;;  %v3755_v49 = vld [vmem:[%s4454_s11 + $0x438] sm:$0xff]  }
 0x128   : > { %3493 = vmatpush3.bf16.msra.mxu1 %v3689_v51  ;;  %3472 = vmatprep.subr.bf16.mxu0 %v3690_v52  ;;  %v3757_v51 = vld [vmem:[%s4454_s11 + $0x430] sm:$0xff]   ;;  %v3758_v52 = vld [vmem:[%s4454_s11 + $0x468] sm:$0xff]  }
 0x129   : > { %3494 = vmatprep.subr.bf16.mxu1 %v3692_v54  ;;  %v3760_v54 = vld [vmem:[%s4454_s11 + $0x460] sm:$0xff]  }
 0x12b   : > { %3473 = vmatpush3.bf16.msra.mxu0 %v3691_v53  ;;  %v3759_v53 = vld [vmem:[%s4454_s11 + $0x428] sm:$0xff]  }
 0x12c   : > { %3495 = vmatpush3.bf16.msra.mxu1 %v3693_v55  ;;  %3474 = vmatprep.subr.bf16.mxu0 %v3694_v56  ;;  %v3761_v55 = vld [vmem:[%s4454_s11 + $0x420] sm:$0xff]   ;;  %v3762_v56 = vld [vmem:[%s4454_s11 + $0x458] sm:$0xff]  }
 0x12d   : > { %3496 = vmatprep.subr.bf16.mxu1 %v3696_v58  ;;  %v3764_v58 = vld [vmem:[%s4454_s11 + $0x450] sm:$0xff]  }
 0x12f   : > { %3475 = vmatpush3.bf16.msra.mxu0 %v3695_v57  ;;  %v3763_v57 = vld [vmem:[%s4454_s11 + $0x418] sm:$0xff]  }
 0x130   : > { %3497 = vmatpush3.bf16.msra.mxu1 %v3697_v59  ;;  %3476 = vmatprep.subr.bf16.mxu0 %v3698_v60  ;;  %v3772_v59 = vld [vmem:[%s4674_s0 + $0x44] ss:$72 sps:$4 sm:$0x7f]   ;;  %v3765_v60 = vld [vmem:[%s4454_s11 + $0x410] sm:$0xff]  }
 0x131   : > { %3498 = vmatprep.subr.bf16.mxu1 %v3700_v62  ;;  %v3767_v62 = vld [vmem:[%s4454_s11 + $0x408] sm:$0xff]  }
 0x133   : > { %3477 = vmatpush3.bf16.msra.mxu0 %v3699_v61  ;;  %v3766_v61 = vld [vmem:[%s4454_s11 + $0x448] sm:$0xff]  }
 0x134   : > { %3499 = vmatpush3.bf16.msra.mxu1 %v3701_v63  ;;  %3478 = vmatprep.subr.bf16.mxu0 %v3702_v0  ;;  %v3768_v63 = vld [vmem:[%s4454_s11 + $0x440] sm:$0xff]  }
 0x135   : > { %3500 = vmatprep.subr.bf16.mxu1 %v3704_v2  ;;  %v3769_v0 = vld [vmem:[%s4454_s11 + $0x400] sm:$0xff]   ;;  %s1406_s11 = scalar_select %p1405_p10, %s3838_s18, 3 }
 0x137   : > { %3479 = vmatpush3.bf16.msra.mxu0 %v3703_v1  ;;  %v3770_v1 = vld [vmem:[%s4674_s0 + $0x40] ss:$72 sps:$4 sm:$0x7f]   ;;  %s1407_s9 = scalar_lea.vmem %s4676_s2, %s1406_s11  ;;  %s1410_s13 = scalar_lea.vmem %s4677_s3, %s1406_s11 }
 0x138   : > { %3501 = vmatpush3.bf16.msra.mxu1 %v3705_v3  ;;  %3480 = vmatprep.subr.bf16.mxu0 %v3706_v4 }
 0x139   : > { %3502 = vmatprep.subr.bf16.mxu1 %v3708_v6 }
 0x13b   : > { %3481 = vmatpush3.bf16.msra.mxu0 %v3707_v5 }
 0x13c   : > { %3503 = vmatpush3.bf16.msra.mxu1 %v3712_v9  ;;  %3510 = vmatprep.subr.bf16.mxu0 %v3713_v10 }
 0x13d   : > { %3532 = vmatprep.subr.bf16.mxu1 %v3718_v14 }
 0x13e   : > { %2869 = vmatmul.mubr.bf16.vlgmr.msra.gmra.mxu0 %v3709_v7 }
 0x13f   : > { %3511 = vmatpush3.bf16.msra.mxu0 %v3717_v13  ;;  %2910 = vmatmul.mubr.bf16.vlgmr.msra.gmra.mxu1 %v3714_v11 }
 0x140   : > { %3533 = vmatpush3.bf16.msra.mxu1 %v3719_v15  ;;  %3512 = vmatprep.subr.bf16.mxu0 %v3720_v16 }
 0x141   : > { %3534 = vmatprep.subr.bf16.mxu1 %v3722_v18  ;;  %2950 = vmatprep.mubr.bf16.mxu0 %v3749_v44 }
 0x142   : > { %2991 = vmatprep.mubr.bf16.mxu1 %v3754_v48 }
 0x143   : > { %3513 = vmatpush3.bf16.msra.mxu0 %v3721_v17 }
 0x144   : > { %3535 = vmatpush3.bf16.msra.mxu1 %v3723_v19  ;;  %3514 = vmatprep.subr.bf16.mxu0 %v3724_v20 }
 0x145   : > { %3536 = vmatprep.subr.bf16.mxu1 %v3726_v22 }
 0x147   : > { %3515 = vmatpush3.bf16.msra.mxu0 %v3725_v21 }
 0x148   : > { %3537 = vmatpush3.bf16.msra.mxu1 %v3727_v23  ;;  %3516 = vmatprep.subr.bf16.mxu0 %v3728_v24 }
 0x149   : > { %3538 = vmatprep.subr.bf16.mxu1 %v3730_v26 }
 0x14b   : > { %3517 = vmatpush3.bf16.msra.mxu0 %v3729_v25 }
 0x14c   : > { %3539 = vmatpush3.bf16.msra.mxu1 %v3731_v27  ;;  %3518 = vmatprep.subr.bf16.mxu0 %v3732_v28 }
 0x14d   : > { %3540 = vmatprep.subr.bf16.mxu1 %v3734_v30 }
 0x14f   : > { %3519 = vmatpush3.bf16.msra.mxu0 %v3733_v29 }
 0x150   : > { %3541 = vmatpush3.bf16.msra.mxu1 %v3735_v31  ;;  %3520 = vmatprep.subr.bf16.mxu0 %v3736_v32 }
 0x151   : > { %3542 = vmatprep.subr.bf16.mxu1 %v3738_v34 }
 0x153   : > { %3521 = vmatpush3.bf16.msra.mxu0 %v3737_v33 }
 0x154   : > { %3543 = vmatpush3.bf16.msra.mxu1 %v3739_v35  ;;  %3522 = vmatprep.subr.bf16.mxu0 %v3740_v36 }
 0x155   : > { %3544 = vmatprep.subr.bf16.mxu1 %v3742_v38 }
 0x157   : > { %3523 = vmatpush3.bf16.msra.mxu0 %v3741_v37 }
 0x158   : > { %3545 = vmatpush3.bf16.msra.mxu1 %v3743_v39  ;;  %3524 = vmatprep.subr.bf16.mxu0 %v3744_v40 }
 0x159   : > { %3546 = vmatprep.subr.bf16.mxu1 %v3746_v42 }
 0x15b   : > { %3525 = vmatpush3.bf16.msra.mxu0 %v3745_v41 }
 0x15c   : > { %3547 = vmatpush3.bf16.msra.mxu1 %v3750_v45  ;;  %3554 = vmatprep.subr.bf16.mxu0 %v3751_v46 }
 0x15e   : > { %2951 = vmatmul.mubr.bf16.vlgmr.msra.gmra.mxu0 %v3747_v43 }
 0x15f   : > { %3555 = vmatpush3.bf16.msra.mxu0 %v3755_v49  ;;  %2992 = vmatmul.mubr.bf16.vlgmr.msra.gmra.mxu1 %v3752_v47 }
 0x160   : > { %3556 = vmatprep.subr.bf16.mxu0 %v3756_v50  ;;  %3032 = vmatprep.mubr.bf16.mxu0 %v3772_v59 }
 0x163   : > { %3557 = vmatpush3.bf16.msra.mxu0 %v3757_v51 }
 0x164   : > { %3558 = vmatprep.subr.bf16.mxu0 %v3758_v52 }
 0x167   : > { %3559 = vmatpush3.bf16.msra.mxu0 %v3759_v53 }
 0x168   : > { %3560 = vmatprep.subr.bf16.mxu0 %v3760_v54 }
 0x16b   : > { %3561 = vmatpush3.bf16.msra.mxu0 %v3761_v55 }
 0x16c   : > { %3562 = vmatprep.subr.bf16.mxu0 %v3762_v56 }
 0x16f   : > { %3563 = vmatpush3.bf16.msra.mxu0 %v3763_v57 }
 0x170   : > { %3564 = vmatprep.subr.bf16.mxu0 %v3764_v58 }
 0x173   : > { %3565 = vmatpush3.bf16.msra.mxu0 %v3765_v60 }
 0x174   : > { %3566 = vmatprep.subr.bf16.mxu0 %v3766_v61 }
 0x177   : > { %3567 = vmatpush3.bf16.msra.mxu0 %v3767_v62 }
 0x178   : > { %3568 = vmatprep.subr.bf16.mxu0 %v3768_v63 }
 0x17b   : > { %3569 = vmatpush3.bf16.msra.mxu0 %v3769_v0 }
 0x17e   : > { %3033 = vmatmul.mubr.bf16.vlgmr.msra.gmra.mxu0 %v3770_v1 }
 0x1be   : > { %v3394_v2 = vpop.f32.mrf.mxu0 }
 0x1bf   : > { %v3416_v3 = vpop.f32.mrf.mxu1 }
 0x1c0   : > { %v3395_v4 = vpop.f32.mrf.mxu0 }
 0x1c1   : > { %v3417_v5 = vpop.f32.mrf.mxu1  ;;  %v3396_v23 = vadd.f32 %v3395_v4, %v3394_v2  ;;  %v3368_v2 = vld [vmem:[%s1407_s9] ss:$0 sm:$0xff] }
 0x1c2   : > { %v3397_v6 = vpop.f32.mrf.mxu0  ;;  %v3418_v24 = vadd.f32 %v3417_v5, %v3416_v3  ;;  %v3369_v5 = vld [vmem:[%s1410_s13] ss:$0 sm:$0xff] }
 0x1c3   : > { %v3419_v7 = vpop.f32.mrf.mxu1 }
 0x1c4   : > { %v3398_v8 = vpop.f32.mrf.mxu0  ;;  %v2748_v29 = vadd.f32 %v3418_v24, %v3396_v23 }
 0x1c5   : > { %v3420_v10 = vpop.f32.mrf.mxu1  ;;  %v3399_v30 = vadd.f32 %v3398_v8, %v3397_v6 }
 0x1c6   : > { %v3421_v31 = vadd.f32 %v3420_v10, %v3419_v7 }
 0x1c8   : > { %v2751_v38 = vadd.f32 %v3421_v31, %v3399_v30 }
 0x1de   : > { %v3438_v9 = vpop.f32.mrf.mxu0 }
 0x1df   : > { %v3460_v12 = vpop.f32.mrf.mxu1 }
 0x1e0   : > { %v3439_v11 = vpop.f32.mrf.mxu0 }
 0x1e1   : > { %v3461_v14 = vpop.f32.mrf.mxu1  ;;  %v3440_v27 = vadd.f32 %v3439_v11, %v3438_v9 }
 0x1e2   : > { %v3441_v13 = vpop.f32.mrf.mxu0  ;;  %v3462_v34 = vadd.f32 %v3461_v14, %v3460_v12 }
 0x1e3   : > { %v3463_v16 = vpop.f32.mrf.mxu1  ;;  %v2789_v33 = vadd.f32 %v3440_v27, %v2748_v29 }
 0x1e4   : > { %v3442_v15 = vpop.f32.mrf.mxu0 }
 0x1e5   : > { %v3464_v18 = vpop.f32.mrf.mxu1  ;;  %v3443_v35 = vadd.f32 %v3442_v15, %v3441_v13  ;;  %v2830_v40 = vadd.f32 %v3462_v34, %v2789_v33 }
 0x1e6   : > { %v3465_v42 = vadd.f32 %v3464_v18, %v3463_v16 }
 0x1e7   : > { %v2792_v41 = vadd.f32 %v3443_v35, %v2751_v38 }
 0x1e9   : > { %v2833_v48 = vadd.f32 %v3465_v42, %v2792_v41 }
 0x1fe   : > { %v3482_v17 = vpop.f32.mrf.mxu0 }
 0x1ff   : > { %v3504_v20 = vpop.f32.mrf.mxu1 }
 0x200   : > { %v3483_v19 = vpop.f32.mrf.mxu0 }
 0x201   : > { %v3505_v22 = vpop.f32.mrf.mxu1  ;;  %v3484_v39 = vadd.f32 %v3483_v19, %v3482_v17 }
 0x202   : > { %v3485_v21 = vpop.f32.mrf.mxu0  ;;  %v3506_v46 = vadd.f32 %v3505_v22, %v3504_v20 }
 0x203   : > { %v3507_v26 = vpop.f32.mrf.mxu1  ;;  %v2871_v45 = vadd.f32 %v3484_v39, %v2830_v40 }
 0x204   : > { %v3486_v25 = vpop.f32.mrf.mxu0 }
 0x205   : > { %v3508_v32 = vpop.f32.mrf.mxu1  ;;  %v3487_v47 = vadd.f32 %v3486_v25, %v3485_v21  ;;  %v2912_v52 = vadd.f32 %v3506_v46, %v2871_v45 }
 0x206   : > { %v3509_v54 = vadd.f32 %v3508_v32, %v3507_v26 }
 0x207   : > { %v2874_v53 = vadd.f32 %v3487_v47, %v2833_v48 }
 0x209   : > { %v2915_v60 = vadd.f32 %v3509_v54, %v2874_v53 }
 0x21e   : > { %v3526_v28 = vpop.f32.mrf.mxu0 }
 0x21f   : > { %v3548_v37 = vpop.f32.mrf.mxu1 }
 0x220   : > { %v3527_v36 = vpop.f32.mrf.mxu0 }
 0x221   : > { %v3549_v44 = vpop.f32.mrf.mxu1  ;;  %v3528_v49 = vadd.f32 %v3527_v36, %v3526_v28 }
 0x222   : > { %v3529_v43 = vpop.f32.mrf.mxu0  ;;  %v3550_v56 = vadd.f32 %v3549_v44, %v3548_v37 }
 0x223   : > { %v3551_v51 = vpop.f32.mrf.mxu1  ;;  %v2953_v55 = vadd.f32 %v3528_v49, %v2912_v52 }
 0x224   : > { %v3530_v50 = vpop.f32.mrf.mxu0 }
 0x225   : > { %v3531_v57 = vadd.f32 %v3530_v50, %v3529_v43  ;;  %v3552_v58 = vpop.f32.mrf.mxu1  ;;  %v2994_v62 = vadd.f32 %v3550_v56, %v2953_v55 }
 0x226   : > { %v3553_v0 = vadd.f32 %v3552_v58, %v3551_v51 }
 0x227   : > { %v2956_v63 = vadd.f32 %v3531_v57, %v2915_v60 }
 0x229   : > { %v2997_v7 = vadd.f32 %v3553_v0, %v2956_v63 }
 0x23e   : > { %v3570_v59 = vpop.f32.mrf.mxu0 }
 0x240   : > { %v3571_v61 = vpop.f32.mrf.mxu0 }
 0x241   : > { %v3572_v1 = vadd.f32 %v3571_v61, %v3570_v59 }
 0x242   : > { %v3573_v3 = vpop.f32.mrf.mxu0 }
 0x243   : > { %v3035_v4 = vadd.f32 %v3572_v1, %v2994_v62 }
 0x244   : > { %v3574_v6 = vpop.f32.mrf.mxu0 }
 0x245   : > { %v3048_v8 = vmul.f32 %v3368_v2, %v3035_v4  ;;  %v3575_v9 = vadd.f32 %v3574_v6, %v3573_v3 }
 0x247   : > { %v3057_v10 = vadd.f32 %v3369_v5, %v3048_v8  ;;  %v3038_v11 = vadd.f32 %v3575_v9, %v2997_v7 }
 0x249   : > { %v3059_v12 = vmax.f32 %v3057_v10, 0.0  ;;  %v3049_v13 = vmul.f32 %v3368_v2, %v3038_v11 }
 0x24b   : > { %v3376_v14 = vpack.c.bf16 %v3059_v12, %v3059_v12  ;;  %v3058_v15 = vadd.f32 %v3369_v5, %v3049_v13 }
 0x24d   : > { %3069 = vst [vmem:[%s1404_s17] sm:$0xf] %v3376_v14  ;;  %v3060_v16 = vmax.f32 %v3058_v15, 0.0  ;;  %3077 = sbr.rel (!%p3853_p5) target bundleno = 602 (0x25a), region = 81 }
 0x24f   : > { %v3377_v17 = vpack.c.bf16 %v3060_v16, %v3060_v16 }
 0x251   : > { %3070 = vst [vmem:[%s1404_s17 + $0x4] sm:$0x7] %v3377_v17 }
 0x254   : > { %v3096_v18 = vld [vmem:[%s1404_s17] sm:$0xf] }
 0x255   : > { %3097 = vst [vmem:[%s3079_s21] sm:$0xf] %v3096_v18 }
 0x258   : > { %v3098_v19 = vld [vmem:[%s1404_s17 + $0x4] sm:$0xf] }
 0x259   : > { %3099 = vst [vmem:[%s3079_s21 + $0x10] sm:$0xf] %v3098_v19 }
 0x25a PF: > { %p11_p11 = scmp.ge.s32.totalorder %s3841_s19, 6   ;;  %s4680_s15 = smov %s3791_s16 }
 0x25b   : > { %s4681_s16 = smov %s3851_s22  ;;  %s4682_s17 = smov %s3841_s19 }
 0x25c   :  { %13 = sbr.rel (!%p11_p11) target bundleno = 2 (0x2), region = 159 }

// kernel: pgccphat_forward.13
= control target key start
LH: loop header
LB: loop body
LE: loop exit
PB: predicated region body
PF: predicated region fallthrough
CT: control target
= control target key end

     0   :  { %v10841_v36 = vmov 1966171168   ;;  %v943_v38 = vlaneseq  ;;  %vm8161_vm0 = vcmask 1024   ;;  %s14425_s1 = inlined_call_operand.vmem [shape: bf16[3584,512], index: 1, kind: input, shape index: {}]   ;;  %s14426_s0 = inlined_call_operand.vmem [shape: bf16[2,3584], index: 0, kind: input, shape index: {}]   ;;  %s14427_s4 = inlined_call_operand.vmem [shape: bf16[512,512], index: 4, kind: input, shape index: {}]   ;;  %s14428_s2 = inlined_call_operand.vmem [shape: f32[1,512], index: 2, kind: input, shape index: {}]   ;;  %s14429_s3 = inlined_call_operand.vmem [shape: f32[1,512], index: 3, kind: input, shape index: {}]   ;;  %s14430_s7 = inlined_call_operand.vmem [shape: bf16[512,1], index: 7, kind: input, shape index: {}]   ;;  %s14431_s5 = inlined_call_operand.vmem [shape: f32[1,512], index: 5, kind: input, shape index: {}]   ;;  %s14432_s6 = inlined_call_operand.vmem [shape: f32[1,512], index: 6, kind: input, shape index: {}]   ;;  %s14433_s8 = inlined_call_operand.<no memory space> [shape: f32[1,1], index: 8, kind: input, shape index: {}]   ;;  %s14434_s9 = inlined_call_operand.vmem [shape: f32[2,1], index: 9, kind: output, shape index: {}]  }
   0x1   :  { %v9270_v0 = vld [vmem:[%s14425_s1 + $0xe4] ss:$16 sps:$4 sm:$0xff]   ;;  %v9274_v2 = vld [vmem:[%s14425_s1 + $0xe0] ss:$16 sps:$4 sm:$0xff]   ;;  %v941_v37 = vunpack.c.l.s4 %v10841_v36 }
   0x2   :  { %v9272_v1 = vld [vmem:[%s14425_s1 + $0x2e4] ss:$16 sps:$4 sm:$0xff]   ;;  %5618 = vmatprep.subr.bf16.mxu0 %v9270_v0  ;;  %v9275_v3 = vld [vmem:[%s14425_s1 + $0x2e0] ss:$16 sps:$4 sm:$0xff]   ;;  %v11009_v43 = vshrl.u32 %v943_v38, 7 }
   0x3   :  { %5659 = vmatprep.subr.bf16.mxu1 %v9272_v1  ;;  %v9276_v4 = vld [vmem:[%s14425_s1 + $0xc4] ss:$16 sps:$4 sm:$0xff]   ;;  %5619 = vmatpush1.bf16.msra.mxu0 %v9274_v2  ;;  %v9280_v6 = vld [vmem:[%s14425_s1 + $0xc0] ss:$16 sps:$4 sm:$0xff]   ;;  %v942_v42 = vunpack.c.0.s8 %v941_v37 }
   0x4   :  { %5660 = vmatpush1.bf16.msra.mxu1 %v9275_v3  ;;  %v9278_v5 = vld [vmem:[%s14425_s1 + $0x2c4] ss:$16 sps:$4 sm:$0xff]   ;;  %5620 = vmatprep.subr.bf16.mxu0 %v9276_v4  ;;  %v9281_v7 = vld [vmem:[%s14425_s1 + $0x2c0] ss:$16 sps:$4 sm:$0xff]  }
   0x5   :  { %5661 = vmatprep.subr.bf16.mxu1 %v9278_v5  ;;  %v9282_v8 = vld [vmem:[%s14425_s1 + $0xa4] ss:$16 sps:$4 sm:$0xff]   ;;  %v9286_v10 = vld [vmem:[%s14425_s1 + $0xa0] ss:$16 sps:$4 sm:$0xff]   ;;  %v11027_v49 = vsub.s32 %v942_v42, %v11009_v43 }
   0x6   :  { %v9284_v9 = vld [vmem:[%s14425_s1 + $0x2a4] ss:$16 sps:$4 sm:$0xff]   ;;  %v9287_v11 = vld [vmem:[%s14425_s1 + $0x2a0] ss:$16 sps:$4 sm:$0xff]  }
   0x7   :  { %5621 = vmatpush1.bf16.msra.mxu0 %v9280_v6  ;;  %v9288_v12 = vld [vmem:[%s14425_s1 + $0x84] ss:$16 sps:$4 sm:$0xff]   ;;  %v9292_v14 = vld [vmem:[%s14425_s1 + $0x80] ss:$16 sps:$4 sm:$0xff]  }
   0x8   :  { %5662 = vmatpush1.bf16.msra.mxu1 %v9281_v7  ;;  %5622 = vmatprep.subr.bf16.mxu0 %v9282_v8  ;;  %v9290_v13 = vld [vmem:[%s14425_s1 + $0x284] ss:$16 sps:$4 sm:$0xff]   ;;  %v9293_v15 = vld [vmem:[%s14425_s1 + $0x280] ss:$16 sps:$4 sm:$0xff]  }
   0x9   :  { %5663 = vmatprep.subr.bf16.mxu1 %v9284_v9  ;;  %v9294_v16 = vld [vmem:[%s14425_s1 + $0x64] ss:$16 sps:$4 sm:$0xff]   ;;  %v9298_v18 = vld [vmem:[%s14425_s1 + $0x60] ss:$16 sps:$4 sm:$0xff]  }
   0xa   :  { %v9296_v17 = vld [vmem:[%s14425_s1 + $0x264] ss:$16 sps:$4 sm:$0xff]   ;;  %v9299_v19 = vld [vmem:[%s14425_s1 + $0x260] ss:$16 sps:$4 sm:$0xff]  }
   0xb   :  { %5623 = vmatpush1.bf16.msra.mxu0 %v9286_v10  ;;  %v9300_v20 = vld [vmem:[%s14425_s1 + $0x44] ss:$16 sps:$4 sm:$0xff]   ;;  %v9304_v22 = vld [vmem:[%s14425_s1 + $0x40] ss:$16 sps:$4 sm:$0xff]  }
   0xc   :  { %5664 = vmatpush1.bf16.msra.mxu1 %v9287_v11  ;;  %5624 = vmatprep.subr.bf16.mxu0 %v9288_v12  ;;  %v9302_v21 = vld [vmem:[%s14425_s1 + $0x244] ss:$16 sps:$4 sm:$0xff]   ;;  %v9305_v23 = vld [vmem:[%s14425_s1 + $0x240] ss:$16 sps:$4 sm:$0xff]  }
   0xd   :  { %5665 = vmatprep.subr.bf16.mxu1 %v9290_v13  ;;  %v9306_v24 = vld [vmem:[%s14425_s1 + $0x24] ss:$16 sps:$4 sm:$0xff]   ;;  %v9310_v26 = vld [vmem:[%s14425_s1 + $0x20] ss:$16 sps:$4 sm:$0xff]  }
   0xe   :  { %v9308_v25 = vld [vmem:[%s14425_s1 + $0x224] ss:$16 sps:$4 sm:$0xff]   ;;  %v9311_v27 = vld [vmem:[%s14425_s1 + $0x220] ss:$16 sps:$4 sm:$0xff]  }
   0xf   :  { %5625 = vmatpush1.bf16.msra.mxu0 %v9292_v14  ;;  %v9312_v28 = vld [vmem:[%s14425_s1 + $0x4] ss:$16 sps:$4 sm:$0xff]   ;;  %v9316_v30 = vld [vmem:[%s14425_s1] ss:$16 sps:$4 sm:$0xff]  }
  0x10   :  { %5666 = vmatpush1.bf16.msra.mxu1 %v9293_v15  ;;  %5626 = vmatprep.subr.bf16.mxu0 %v9294_v16  ;;  %v9314_v29 = vld [vmem:[%s14425_s1 + $0x204] ss:$16 sps:$4 sm:$0xff]   ;;  %v9317_v31 = vld [vmem:[%s14425_s1 + $0x200] ss:$16 sps:$4 sm:$0xff]  }
  0x11   :  { %5667 = vmatprep.subr.bf16.mxu1 %v9296_v17  ;;  %v9318_v32 = vld [vmem:[%s14425_s1 + $0x1e4] ss:$16 sps:$4 sm:$0xff]   ;;  %v9322_v34 = vld [vmem:[%s14425_s1 + $0x1e0] ss:$16 sps:$4 sm:$0xff]  }
  0x12   :  { %v9320_v33 = vld [vmem:[%s14425_s1 + $0x3e4] ss:$16 sps:$4 sm:$0xff]   ;;  %v9323_v35 = vld [vmem:[%s14425_s1 + $0x3e0] ss:$16 sps:$4 sm:$0xff]  }
  0x13   :  { %5627 = vmatpush1.bf16.msra.mxu0 %v9298_v18  ;;  %v9324_v39 = vld [vmem:[%s14425_s1 + $0x1c4] ss:$16 sps:$4 sm:$0xff]   ;;  %v9328_v41 = vld [vmem:[%s14425_s1 + $0x1c0] ss:$16 sps:$4 sm:$0xff]  }
  0x14   :  { %5668 = vmatpush1.bf16.msra.mxu1 %v9299_v19  ;;  %5628 = vmatprep.subr.bf16.mxu0 %v9300_v20  ;;  %v9326_v40 = vld [vmem:[%s14425_s1 + $0x3c4] ss:$16 sps:$4 sm:$0xff]   ;;  %v9329_v44 = vld [vmem:[%s14425_s1 + $0x3c0] ss:$16 sps:$4 sm:$0xff]  }
  0x15   :  { %5669 = vmatprep.subr.bf16.mxu1 %v9302_v21  ;;  %v9330_v45 = vld [vmem:[%s14425_s1 + $0x1a4] ss:$16 sps:$4 sm:$0xff]   ;;  %v9334_v47 = vld [vmem:[%s14425_s1 + $0x1a0] ss:$16 sps:$4 sm:$0xff]  }
  0x16   :  { %v9332_v46 = vld [vmem:[%s14425_s1 + $0x3a4] ss:$16 sps:$4 sm:$0xff]   ;;  %v9335_v48 = vld [vmem:[%s14425_s1 + $0x3a0] ss:$16 sps:$4 sm:$0xff]  }
  0x17   :  { %5629 = vmatpush1.bf16.msra.mxu0 %v9304_v22  ;;  %v9336_v50 = vld [vmem:[%s14425_s1 + $0x184] ss:$16 sps:$4 sm:$0xff]   ;;  %v9340_v53 = vld [vmem:[%s14425_s1 + $0x180] ss:$16 sps:$4 sm:$0xff]  }
  0x18   :  { %5670 = vmatpush1.bf16.msra.mxu1 %v9305_v23  ;;  %5630 = vmatprep.subr.bf16.mxu0 %v9306_v24  ;;  %v9338_v51 = vld [vmem:[%s14425_s1 + $0x384] ss:$16 sps:$4 sm:$0xff]   ;;  %v9341_v55 = vld [vmem:[%s14425_s1 + $0x380] ss:$16 sps:$4 sm:$0xff]  }
  0x19   :  { %5671 = vmatprep.subr.bf16.mxu1 %v9308_v25  ;;  %v35_v52 = vld [vmem:[%s14426_s0] sm:$0xff] }
  0x1a   :  { %v946_v54 = vrot.slane %v35_v52, %v11027_v49  ;;  %v9342_v56 = vld [vmem:[%s14425_s1 + $0x164] ss:$16 sps:$4 sm:$0xff]   ;;  %v9346_v59 = vld [vmem:[%s14425_s1 + $0x160] ss:$16 sps:$4 sm:$0xff]   ;;  %v939_v1 = vcombine.high %v35_v52, %v35_v52 }
  0x1b   :  { %5631 = vmatpush1.bf16.msra.mxu0 %v9310_v26  ;;  %v9344_v57 = vld [vmem:[%s14425_s1 + $0x364] ss:$16 sps:$4 sm:$0xff]   ;;  %v9347_v61 = vld [vmem:[%s14425_s1 + $0x360] ss:$16 sps:$4 sm:$0xff]  }
  0x1c   :  { %5672 = vmatpush1.bf16.msra.mxu1 %v9311_v27  ;;  %5632 = vmatprep.subr.bf16.mxu0 %v9312_v28  ;;  %v954_v58 = vcombine.high %v946_v54, %v946_v54  ;;  %v9348_v62 = vld [vmem:[%s14425_s1 + $0x144] ss:$16 sps:$4 sm:$0xff]   ;;  %v9352_v2 = vld [vmem:[%s14425_s1 + $0x140] ss:$16 sps:$4 sm:$0xff]   ;;  %v11085_v6 = vrot.slane %v939_v1, %v11027_v49  ;;  %v11105_v13 = vrot.slane %v946_v54, %v11027_v49 }
  0x1d   :  { %5673 = vmatprep.subr.bf16.mxu1 %v9314_v29  ;;  %v9350_v63 = vld [vmem:[%s14425_s1 + $0x344] ss:$16 sps:$4 sm:$0xff]   ;;  %v9353_v3 = vld [vmem:[%s14425_s1 + $0x340] ss:$16 sps:$4 sm:$0xff]  }
  0x1e   :  { %v11055_v60 = vrot.slane %v954_v58, %v11027_v49  ;;  %v9354_v4 = vld [vmem:[%s14425_s1 + $0x124] ss:$16 sps:$4 sm:$0xff]   ;;  %v9358_v7 = vld [vmem:[%s14425_s1 + $0x120] ss:$16 sps:$4 sm:$0xff]   ;;  %v955_v11 = vcombine.high %v11085_v6, %v11085_v6  ;;  %v11121_v18 = vcombine.high %v11105_v13, %v11105_v13 }
  0x1f   :  { %5633 = vmatpush1.bf16.msra.mxu0 %v9316_v30  ;;  %v9356_v5 = vld [vmem:[%s14425_s1 + $0x324] ss:$16 sps:$4 sm:$0xff]   ;;  %v9359_v8 = vld [vmem:[%s14425_s1 + $0x320] ss:$16 sps:$4 sm:$0xff]  }
  0x20   :  { %5674 = vmatpush1.bf16.msra.mxu1 %v9317_v31  ;;  %5634 = vmatprep.subr.bf16.mxu0 %v9318_v32  ;;  %v11068_v0 = vcombine.high %v11055_v60, %v11055_v60  ;;  %v9360_v9 = vld [vmem:[%s14425_s1 + $0x104] ss:$16 sps:$4 sm:$0xff]   ;;  %v9364_v12 = vld [vmem:[%s14425_s1 + $0x100] ss:$16 sps:$4 sm:$0xff]   ;;  %v11117_v17 = vrot.slane %v955_v11, %v11027_v49 }
  0x21   :  { %5675 = vmatprep.subr.bf16.mxu1 %v9320_v33  ;;  %5650 = vmatprep.mubr.bf16.mxu0 %v11055_v60  ;;  %v9362_v10 = vld [vmem:[%s14425_s1 + $0x304] ss:$16 sps:$4 sm:$0xff]   ;;  %v9365_v14 = vld [vmem:[%s14425_s1 + $0x300] ss:$16 sps:$4 sm:$0xff]  }
  0x22   :  { %5691 = vmatprep.mubr.bf16.mxu1 %v11068_v0  ;;  %v9368_v15 = vld [vmem:[%s14425_s1 + $0x4e4] ss:$16 sps:$4 sm:$0xff]   ;;  %v9366_v19 = vld [vmem:[%s14425_s1 + $0x4e0] ss:$16 sps:$4 sm:$0xff]   ;;  %v11137_v23 = vcombine.high %v11117_v17, %v11117_v17 }
  0x23   :  { %5635 = vmatpush2.bf16.msra.mxu0 %v9322_v34  ;;  %v9371_v16 = vld [vmem:[%s14425_s1 + $0x6e4] ss:$16 sps:$4 sm:$0xff]   ;;  %v9369_v20 = vld [vmem:[%s14425_s1 + $0x6e0] ss:$16 sps:$4 sm:$0xff]  }
  0x24   :  { %5676 = vmatpush2.bf16.msra.mxu1 %v9323_v35  ;;  %5636 = vmatprep.subr.bf16.mxu0 %v9324_v39  ;;  %v9374_v21 = vld [vmem:[%s14425_s1 + $0x4c4] ss:$16 sps:$4 sm:$0xff]   ;;  %v9372_v24 = vld [vmem:[%s14425_s1 + $0x4c0] ss:$16 sps:$4 sm:$0xff]  }
  0x25   :  { %5677 = vmatprep.subr.bf16.mxu1 %v9326_v40  ;;  %v9377_v22 = vld [vmem:[%s14425_s1 + $0x6c4] ss:$16 sps:$4 sm:$0xff]   ;;  %v9375_v25 = vld [vmem:[%s14425_s1 + $0x6c0] ss:$16 sps:$4 sm:$0xff]  }
  0x26   :  { %v9380_v26 = vld [vmem:[%s14425_s1 + $0x4a4] ss:$16 sps:$4 sm:$0xff]   ;;  %v9378_v28 = vld [vmem:[%s14425_s1 + $0x4a0] ss:$16 sps:$4 sm:$0xff]  }
  0x27   :  { %5637 = vmatpush2.bf16.msra.mxu0 %v9328_v41  ;;  %v9383_v27 = vld [vmem:[%s14425_s1 + $0x6a4] ss:$16 sps:$4 sm:$0xff]   ;;  %v9381_v29 = vld [vmem:[%s14425_s1 + $0x6a0] ss:$16 sps:$4 sm:$0xff]  }
  0x28   :  { %5678 = vmatpush2.bf16.msra.mxu1 %v9329_v44  ;;  %5638 = vmatprep.subr.bf16.mxu0 %v9330_v45  ;;  %v9386_v30 = vld [vmem:[%s14425_s1 + $0x484] ss:$16 sps:$4 sm:$0xff]   ;;  %v9384_v32 = vld [vmem:[%s14425_s1 + $0x480] ss:$16 sps:$4 sm:$0xff]  }
  0x29   :  { %5679 = vmatprep.subr.bf16.mxu1 %v9332_v46  ;;  %v9389_v31 = vld [vmem:[%s14425_s1 + $0x684] ss:$16 sps:$4 sm:$0xff]   ;;  %v9387_v33 = vld [vmem:[%s14425_s1 + $0x680] ss:$16 sps:$4 sm:$0xff]  }
  0x2a   :  { %v9392_v34 = vld [vmem:[%s14425_s1 + $0x464] ss:$16 sps:$4 sm:$0xff]   ;;  %v9390_v36 = vld [vmem:[%s14425_s1 + $0x460] ss:$16 sps:$4 sm:$0xff]  }
  0x2b   :  { %5639 = vmatpush2.bf16.msra.mxu0 %v9334_v47  ;;  %v9395_v35 = vld [vmem:[%s14425_s1 + $0x664] ss:$16 sps:$4 sm:$0xff]   ;;  %v9393_v37 = vld [vmem:[%s14425_s1 + $0x660] ss:$16 sps:$4 sm:$0xff]  }
  0x2c   :  { %5680 = vmatpush2.bf16.msra.mxu1 %v9335_v48  ;;  %5640 = vmatprep.subr.bf16.mxu0 %v9336_v50  ;;  %v9398_v38 = vld [vmem:[%s14425_s1 + $0x444] ss:$16 sps:$4 sm:$0xff]   ;;  %v9396_v40 = vld [vmem:[%s14425_s1 + $0x440] ss:$16 sps:$4 sm:$0xff]  }
  0x2d   :  { %5681 = vmatprep.subr.bf16.mxu1 %v9338_v51  ;;  %v9401_v39 = vld [vmem:[%s14425_s1 + $0x644] ss:$16 sps:$4 sm:$0xff]   ;;  %v9399_v41 = vld [vmem:[%s14425_s1 + $0x640] ss:$16 sps:$4 sm:$0xff]  }
  0x2e   :  { %v9404_v42 = vld [vmem:[%s14425_s1 + $0x424] ss:$16 sps:$4 sm:$0xff]   ;;  %v9402_v45 = vld [vmem:[%s14425_s1 + $0x420] ss:$16 sps:$4 sm:$0xff]  }
  0x2f   :  { %5641 = vmatpush2.bf16.msra.mxu0 %v9340_v53  ;;  %v9407_v44 = vld [vmem:[%s14425_s1 + $0x624] ss:$16 sps:$4 sm:$0xff]   ;;  %v9405_v46 = vld [vmem:[%s14425_s1 + $0x620] ss:$16 sps:$4 sm:$0xff]  }
  0x30   :  { %5682 = vmatpush2.bf16.msra.mxu1 %v9341_v55  ;;  %5642 = vmatprep.subr.bf16.mxu0 %v9342_v56  ;;  %v9410_v47 = vld [vmem:[%s14425_s1 + $0x404] ss:$16 sps:$4 sm:$0xff]   ;;  %v9408_v50 = vld [vmem:[%s14425_s1 + $0x400] ss:$16 sps:$4 sm:$0xff]  }
  0x31   :  { %5683 = vmatprep.subr.bf16.mxu1 %v9344_v57  ;;  %v9413_v48 = vld [vmem:[%s14425_s1 + $0x604] ss:$16 sps:$4 sm:$0xff]   ;;  %v9411_v51 = vld [vmem:[%s14425_s1 + $0x600] ss:$16 sps:$4 sm:$0xff]  }
  0x32   :  { %v9416_v52 = vld [vmem:[%s14425_s1 + $0x5e4] ss:$16 sps:$4 sm:$0xff]   ;;  %v9414_v54 = vld [vmem:[%s14425_s1 + $0x5e0] ss:$16 sps:$4 sm:$0xff]  }
  0x33   :  { %5643 = vmatpush2.bf16.msra.mxu0 %v9346_v59  ;;  %v9419_v53 = vld [vmem:[%s14425_s1 + $0x7e4] ss:$16 sps:$4 sm:$0xff]   ;;  %v9417_v55 = vld [vmem:[%s14425_s1 + $0x7e0] ss:$16 sps:$4 sm:$0xff]  }
  0x34   :  { %5684 = vmatpush2.bf16.msra.mxu1 %v9347_v61  ;;  %5644 = vmatprep.subr.bf16.mxu0 %v9348_v62  ;;  %v9422_v56 = vld [vmem:[%s14425_s1 + $0x5c4] ss:$16 sps:$4 sm:$0xff]   ;;  %v9420_v58 = vld [vmem:[%s14425_s1 + $0x5c0] ss:$16 sps:$4 sm:$0xff]  }
  0x35   :  { %5685 = vmatprep.subr.bf16.mxu1 %v9350_v63  ;;  %v9425_v57 = vld [vmem:[%s14425_s1 + $0x7c4] ss:$16 sps:$4 sm:$0xff]   ;;  %v9423_v59 = vld [vmem:[%s14425_s1 + $0x7c0] ss:$16 sps:$4 sm:$0xff]  }
  0x36   :  { %v9428_v61 = vld [vmem:[%s14425_s1 + $0x5a4] ss:$16 sps:$4 sm:$0xff]   ;;  %v9426_v63 = vld [vmem:[%s14425_s1 + $0x5a0] ss:$16 sps:$4 sm:$0xff]  }
  0x37   :  { %5645 = vmatpush2.bf16.msra.mxu0 %v9352_v2  ;;  %v9431_v62 = vld [vmem:[%s14425_s1 + $0x7a4] ss:$16 sps:$4 sm:$0xff]   ;;  %v9429_v1 = vld [vmem:[%s14425_s1 + $0x7a0] ss:$16 sps:$4 sm:$0xff]  }
  0x38   :  { %5686 = vmatpush2.bf16.msra.mxu1 %v9353_v3  ;;  %5646 = vmatprep.subr.bf16.mxu0 %v9354_v4  ;;  %v9434_v2 = vld [vmem:[%s14425_s1 + $0x584] ss:$16 sps:$4 sm:$0xff]   ;;  %v9432_v4 = vld [vmem:[%s14425_s1 + $0x580] ss:$16 sps:$4 sm:$0xff]  }
  0x39   :  { %5687 = vmatprep.subr.bf16.mxu1 %v9356_v5  ;;  %v9437_v3 = vld [vmem:[%s14425_s1 + $0x784] ss:$16 sps:$4 sm:$0xff]   ;;  %v9435_v5 = vld [vmem:[%s14425_s1 + $0x780] ss:$16 sps:$4 sm:$0xff]  }
  0x3a   :  { %v9446_v11 = vld [vmem:[%s14425_s1 + $0x544] ss:$16 sps:$4 sm:$0xff]  }
  0x3b   :  { %5647 = vmatpush2.bf16.msra.mxu0 %v9358_v7  ;;  %v9440_v7 = vld [vmem:[%s14425_s1 + $0x564] ss:$16 sps:$4 sm:$0xff]  }
  0x3c   :  { %5688 = vmatpush2.bf16.msra.mxu1 %v9359_v8  ;;  %5648 = vmatprep.subr.bf16.mxu0 %v9360_v9  ;;  %v9443_v8 = vld [vmem:[%s14425_s1 + $0x764] ss:$16 sps:$4 sm:$0xff]   ;;  %v9438_v9 = vld [vmem:[%s14425_s1 + $0x560] ss:$16 sps:$4 sm:$0xff]  }
  0x3d   :  { %5689 = vmatprep.subr.bf16.mxu1 %v9362_v10  ;;  %v9441_v10 = vld [vmem:[%s14425_s1 + $0x760] ss:$16 sps:$4 sm:$0xff]  }
  0x3f   :  { %5649 = vmatpush2.bf16.msra.mxu0 %v9364_v12  ;;  %v9449_v12 = vld [vmem:[%s14425_s1 + $0x744] ss:$16 sps:$4 sm:$0xff]  }
  0x40   :  { %5690 = vmatpush2.bf16.msra.mxu1 %v9365_v14  ;;  %5700 = vmatprep.subr.bf16.mxu0 %v9368_v15  ;;  %v9444_v14 = vld [vmem:[%s14425_s1 + $0x540] ss:$16 sps:$4 sm:$0xff]  }
  0x41   :  { %5741 = vmatprep.subr.bf16.mxu1 %v9371_v16  ;;  %v9447_v15 = vld [vmem:[%s14425_s1 + $0x740] ss:$16 sps:$4 sm:$0xff]   ;;  %v9452_v16 = vld [vmem:[%s14425_s1 + $0x524] ss:$16 sps:$4 sm:$0xff]  }
  0x42   :  { %5651 = vmatmul.mubr.bf16.vlgmr.msra.gmra.mxu0 %v11105_v13 }
  0x43   :  { %5692 = vmatmul.mubr.bf16.vlgmr.msra.gmra.mxu1 %v11121_v18  ;;  %5701 = vmatpush1.bf16.msra.mxu0 %v9366_v19  ;;  %v9455_v19 = vld [vmem:[%s14425_s1 + $0x724] ss:$16 sps:$4 sm:$0xff]  }
  0x44   :  { %5742 = vmatpush1.bf16.msra.mxu1 %v9369_v20  ;;  %5702 = vmatprep.subr.bf16.mxu0 %v9374_v21  ;;  %v9450_v20 = vld [vmem:[%s14425_s1 + $0x520] ss:$16 sps:$4 sm:$0xff]  }
  0x45   :  { %5743 = vmatprep.subr.bf16.mxu1 %v9377_v22  ;;  %5732 = vmatprep.mubr.bf16.mxu0 %v11117_v17  ;;  %v9453_v21 = vld [vmem:[%s14425_s1 + $0x720] ss:$16 sps:$4 sm:$0xff]   ;;  %v9458_v22 = vld [vmem:[%s14425_s1 + $0x504] ss:$16 sps:$4 sm:$0xff]  }
  0x46   :  { %5773 = vmatprep.mubr.bf16.mxu1 %v11137_v23 }
  0x47   :  { %5703 = vmatpush1.bf16.msra.mxu0 %v9372_v24  ;;  %v9461_v24 = vld [vmem:[%s14425_s1 + $0x704] ss:$16 sps:$4 sm:$0xff]  }
  0x48   :  { %5744 = vmatpush1.bf16.msra.mxu1 %v9375_v25  ;;  %5704 = vmatprep.subr.bf16.mxu0 %v9380_v26  ;;  %v9456_v25 = vld [vmem:[%s14425_s1 + $0x500] ss:$16 sps:$4 sm:$0xff]   ;;  %v11316_v26 = vrot.slane %v11085_v6, %v11027_v49 }
  0x49   :  { %5745 = vmatprep.subr.bf16.mxu1 %v9383_v27  ;;  %v9459_v27 = vld [vmem:[%s14425_s1 + $0x700] ss:$16 sps:$4 sm:$0xff]  }
  0x4a   :  { %v11329_v6 = vcombine.high %v11316_v26, %v11316_v26 }
  0x4b   :  { %5705 = vmatpush1.bf16.msra.mxu0 %v9378_v28  ;;  %v9465_v28 = vld [vmem:[%s14425_s1 + $0x8e4] ss:$16 sps:$4 sm:$0xff]  }
  0x4c   :  { %5746 = vmatpush1.bf16.msra.mxu1 %v9381_v29  ;;  %5706 = vmatprep.subr.bf16.mxu0 %v9386_v30  ;;  %v9468_v29 = vld [vmem:[%s14425_s1 + $0xae4] ss:$16 sps:$4 sm:$0xff]   ;;  %v9463_v30 = vld [vmem:[%s14425_s1 + $0x8e0] ss:$16 sps:$4 sm:$0xff]  }
  0x4d   :  { %5747 = vmatprep.subr.bf16.mxu1 %v9389_v31  ;;  %v9466_v31 = vld [vmem:[%s14425_s1 + $0xae0] ss:$16 sps:$4 sm:$0xff]  }
  0x4f   :  { %5707 = vmatpush1.bf16.msra.mxu0 %v9384_v32  ;;  %v11340_v32 = vld [vmem:[%s14426_s0 + $0x8] sm:$0xff] }
  0x50   :  { %5748 = vmatpush1.bf16.msra.mxu1 %v9387_v33  ;;  %5708 = vmatprep.subr.bf16.mxu0 %v9392_v34  ;;  %v9471_v33 = vld [vmem:[%s14425_s1 + $0x8c4] ss:$16 sps:$4 sm:$0xff]  }
  0x51   :  { %5749 = vmatprep.subr.bf16.mxu1 %v9395_v35  ;;  %v9474_v34 = vld [vmem:[%s14425_s1 + $0xac4] ss:$16 sps:$4 sm:$0xff]   ;;  %v11350_v35 = vrot.slane %v11340_v32, %v11027_v49 }
  0x53   :  { %5709 = vmatpush1.bf16.msra.mxu0 %v9390_v36  ;;  %v1003_v36 = vcombine.high %v11350_v35, %v11350_v35 }
  0x54   :  { %5750 = vmatpush1.bf16.msra.mxu1 %v9393_v37  ;;  %5710 = vmatprep.subr.bf16.mxu0 %v9398_v38  ;;  %v9469_v37 = vld [vmem:[%s14425_s1 + $0x8c0] ss:$16 sps:$4 sm:$0xff]  }
  0x55   :  { %5751 = vmatprep.subr.bf16.mxu1 %v9401_v39  ;;  %v9472_v38 = vld [vmem:[%s14425_s1 + $0xac0] ss:$16 sps:$4 sm:$0xff]   ;;  %v9477_v39 = vld [vmem:[%s14425_s1 + $0x8a4] ss:$16 sps:$4 sm:$0xff]  }
  0x57   :  { %5711 = vmatpush1.bf16.msra.mxu0 %v9396_v40  ;;  %v9480_v40 = vld [vmem:[%s14425_s1 + $0xaa4] ss:$16 sps:$4 sm:$0xff]  }
  0x58   :  { %5752 = vmatpush1.bf16.msra.mxu1 %v9399_v41  ;;  %5712 = vmatprep.subr.bf16.mxu0 %v9404_v42  ;;  %v11369_v41 = vrot.slane %v1003_v36, %v11027_v49  ;;  %v9541_v36 = vld [vmem:[%s14425_s1 + $0x940] ss:$16 sps:$4 sm:$0xff]  }
  0x59   :  { %5753 = vmatprep.subr.bf16.mxu1 %v9407_v44  ;;  %v9475_v44 = vld [vmem:[%s14425_s1 + $0x8a0] ss:$16 sps:$4 sm:$0xff]  }
  0x5a   :  { %v11374_v42 = vcombine.high %v11369_v41, %v11369_v41 }
  0x5b   :  { %5713 = vmatpush1.bf16.msra.mxu0 %v9402_v45  ;;  %v9478_v45 = vld [vmem:[%s14425_s1 + $0xaa0] ss:$16 sps:$4 sm:$0xff]  }
  0x5c   :  { %5754 = vmatpush1.bf16.msra.mxu1 %v9405_v46  ;;  %5714 = vmatprep.subr.bf16.mxu0 %v9410_v47  ;;  %v9483_v46 = vld [vmem:[%s14425_s1 + $0x884] ss:$16 sps:$4 sm:$0xff]  }
  0x5d   :  { %5755 = vmatprep.subr.bf16.mxu1 %v9413_v48  ;;  %v9486_v47 = vld [vmem:[%s14425_s1 + $0xa84] ss:$16 sps:$4 sm:$0xff]   ;;  %v9481_v48 = vld [vmem:[%s14425_s1 + $0x880] ss:$16 sps:$4 sm:$0xff]  }
  0x5f   :  { %5715 = vmatpush1.bf16.msra.mxu0 %v9408_v50  ;;  %v9484_v50 = vld [vmem:[%s14425_s1 + $0xa80] ss:$16 sps:$4 sm:$0xff]  }
  0x60   :  { %5756 = vmatpush1.bf16.msra.mxu1 %v9411_v51  ;;  %5716 = vmatprep.subr.bf16.mxu0 %v9416_v52  ;;  %v9489_v51 = vld [vmem:[%s14425_s1 + $0x864] ss:$16 sps:$4 sm:$0xff]  }
  0x61   :  { %5757 = vmatprep.subr.bf16.mxu1 %v9419_v53  ;;  %v9492_v52 = vld [vmem:[%s14425_s1 + $0xa64] ss:$16 sps:$4 sm:$0xff]   ;;  %v9487_v53 = vld [vmem:[%s14425_s1 + $0x860] ss:$16 sps:$4 sm:$0xff]  }
  0x63   :  { %5717 = vmatpush2.bf16.msra.mxu0 %v9414_v54  ;;  %v9490_v54 = vld [vmem:[%s14425_s1 + $0xa60] ss:$16 sps:$4 sm:$0xff]  }
  0x64   :  { %5758 = vmatpush2.bf16.msra.mxu1 %v9417_v55  ;;  %5718 = vmatprep.subr.bf16.mxu0 %v9422_v56  ;;  %v9495_v55 = vld [vmem:[%s14425_s1 + $0x844] ss:$16 sps:$4 sm:$0xff]  }
  0x65   :  { %5759 = vmatprep.subr.bf16.mxu1 %v9425_v57  ;;  %v9498_v56 = vld [vmem:[%s14425_s1 + $0xa44] ss:$16 sps:$4 sm:$0xff]   ;;  %v9493_v57 = vld [vmem:[%s14425_s1 + $0x840] ss:$16 sps:$4 sm:$0xff]  }
  0x67   :  { %5719 = vmatpush2.bf16.msra.mxu0 %v9420_v58  ;;  %v9496_v58 = vld [vmem:[%s14425_s1 + $0xa40] ss:$16 sps:$4 sm:$0xff]  }
  0x68   :  { %5760 = vmatpush2.bf16.msra.mxu1 %v9423_v59  ;;  %5720 = vmatprep.subr.bf16.mxu0 %v9428_v61  ;;  %v9501_v59 = vld [vmem:[%s14425_s1 + $0x824] ss:$16 sps:$4 sm:$0xff]  }
  0x69   :  { %5761 = vmatprep.subr.bf16.mxu1 %v9431_v62  ;;  %v9504_v61 = vld [vmem:[%s14425_s1 + $0xa24] ss:$16 sps:$4 sm:$0xff]   ;;  %v9499_v62 = vld [vmem:[%s14425_s1 + $0x820] ss:$16 sps:$4 sm:$0xff]  }
  0x6b   :  { %5721 = vmatpush2.bf16.msra.mxu0 %v9426_v63  ;;  %v9502_v63 = vld [vmem:[%s14425_s1 + $0xa20] ss:$16 sps:$4 sm:$0xff]  }
  0x6c   :  { %5762 = vmatpush2.bf16.msra.mxu1 %v9429_v1  ;;  %5722 = vmatprep.subr.bf16.mxu0 %v9434_v2  ;;  %v9507_v1 = vld [vmem:[%s14425_s1 + $0x804] ss:$16 sps:$4 sm:$0xff]  }
  0x6d   :  { %5763 = vmatprep.subr.bf16.mxu1 %v9437_v3  ;;  %v9510_v2 = vld [vmem:[%s14425_s1 + $0xa04] ss:$16 sps:$4 sm:$0xff]   ;;  %v9505_v3 = vld [vmem:[%s14425_s1 + $0x800] ss:$16 sps:$4 sm:$0xff]  }
  0x6f   :  { %5723 = vmatpush2.bf16.msra.mxu0 %v9432_v4  ;;  %v9508_v4 = vld [vmem:[%s14425_s1 + $0xa00] ss:$16 sps:$4 sm:$0xff]  }
  0x70   :  { %5764 = vmatpush2.bf16.msra.mxu1 %v9435_v5  ;;  %5724 = vmatprep.subr.bf16.mxu0 %v9440_v7  ;;  %v9513_v5 = vld [vmem:[%s14425_s1 + $0x9e4] ss:$16 sps:$4 sm:$0xff]  }
  0x71   :  { %5765 = vmatprep.subr.bf16.mxu1 %v9443_v8  ;;  %v9516_v7 = vld [vmem:[%s14425_s1 + $0xbe4] ss:$16 sps:$4 sm:$0xff]   ;;  %v9511_v8 = vld [vmem:[%s14425_s1 + $0x9e0] ss:$16 sps:$4 sm:$0xff]  }
  0x73   :  { %5725 = vmatpush2.bf16.msra.mxu0 %v9438_v9  ;;  %v9514_v9 = vld [vmem:[%s14425_s1 + $0xbe0] ss:$16 sps:$4 sm:$0xff]  }
  0x74   :  { %5766 = vmatpush2.bf16.msra.mxu1 %v9441_v10  ;;  %5726 = vmatprep.subr.bf16.mxu0 %v9446_v11  ;;  %v9519_v10 = vld [vmem:[%s14425_s1 + $0x9c4] ss:$16 sps:$4 sm:$0xff]  }
  0x75   :  { %5767 = vmatprep.subr.bf16.mxu1 %v9449_v12  ;;  %v9522_v11 = vld [vmem:[%s14425_s1 + $0xbc4] ss:$16 sps:$4 sm:$0xff]   ;;  %v9517_v12 = vld [vmem:[%s14425_s1 + $0x9c0] ss:$16 sps:$4 sm:$0xff]  }
  0x77   :  { %5727 = vmatpush2.bf16.msra.mxu0 %v9444_v14  ;;  %v9520_v14 = vld [vmem:[%s14425_s1 + $0xbc0] ss:$16 sps:$4 sm:$0xff]  }
  0x78   :  { %5768 = vmatpush2.bf16.msra.mxu1 %v9447_v15  ;;  %5728 = vmatprep.subr.bf16.mxu0 %v9452_v16  ;;  %v9525_v15 = vld [vmem:[%s14425_s1 + $0x9a4] ss:$16 sps:$4 sm:$0xff]  }
  0x79   :  { %5769 = vmatprep.subr.bf16.mxu1 %v9455_v19  ;;  %v9528_v16 = vld [vmem:[%s14425_s1 + $0xba4] ss:$16 sps:$4 sm:$0xff]   ;;  %v9523_v19 = vld [vmem:[%s14425_s1 + $0x9a0] ss:$16 sps:$4 sm:$0xff]  }
  0x7b   :  { %5729 = vmatpush2.bf16.msra.mxu0 %v9450_v20  ;;  %v9526_v20 = vld [vmem:[%s14425_s1 + $0xba0] ss:$16 sps:$4 sm:$0xff]  }
  0x7c   :  { %5770 = vmatpush2.bf16.msra.mxu1 %v9453_v21  ;;  %5730 = vmatprep.subr.bf16.mxu0 %v9458_v22  ;;  %v9531_v21 = vld [vmem:[%s14425_s1 + $0x984] ss:$16 sps:$4 sm:$0xff]  }
  0x7d   :  { %5771 = vmatprep.subr.bf16.mxu1 %v9461_v24  ;;  %v9534_v22 = vld [vmem:[%s14425_s1 + $0xb84] ss:$16 sps:$4 sm:$0xff]   ;;  %v9529_v24 = vld [vmem:[%s14425_s1 + $0x980] ss:$16 sps:$4 sm:$0xff]  }
  0x7f   :  { %5731 = vmatpush2.bf16.msra.mxu0 %v9456_v25  ;;  %v9532_v25 = vld [vmem:[%s14425_s1 + $0xb80] ss:$16 sps:$4 sm:$0xff]  }
  0x80   :  { %5772 = vmatpush2.bf16.msra.mxu1 %v9459_v27  ;;  %5782 = vmatprep.subr.bf16.mxu0 %v9465_v28  ;;  %v9537_v27 = vld [vmem:[%s14425_s1 + $0x964] ss:$16 sps:$4 sm:$0xff]  }
  0x81   :  { %5823 = vmatprep.subr.bf16.mxu1 %v9468_v29  ;;  %v9540_v28 = vld [vmem:[%s14425_s1 + $0xb64] ss:$16 sps:$4 sm:$0xff]   ;;  %v9535_v29 = vld [vmem:[%s14425_s1 + $0x960] ss:$16 sps:$4 sm:$0xff]  }
  0x82   :  { %5733 = vmatmul.mubr.bf16.vlgmr.msra.gmra.mxu0 %v11316_v26 }
  0x83   :  { %5774 = vmatmul.mubr.bf16.vlgmr.msra.gmra.mxu1 %v11329_v6  ;;  %5783 = vmatpush1.bf16.msra.mxu0 %v9463_v30  ;;  %v9538_v30 = vld [vmem:[%s14425_s1 + $0xb60] ss:$16 sps:$4 sm:$0xff]  }
  0x84   :  { %5824 = vmatpush1.bf16.msra.mxu1 %v9466_v31  ;;  %5784 = vmatprep.subr.bf16.mxu0 %v9471_v33  ;;  %v9543_v31 = vld [vmem:[%s14425_s1 + $0x944] ss:$16 sps:$4 sm:$0xff]  }
  0x85   :  { %5825 = vmatprep.subr.bf16.mxu1 %v9474_v34  ;;  %5814 = vmatprep.mubr.bf16.mxu0 %v11369_v41  ;;  %v9546_v33 = vld [vmem:[%s14425_s1 + $0xb44] ss:$16 sps:$4 sm:$0xff]   ;;  %v988_v34 = vcombine.high %v11340_v32, %v11340_v32 }
  0x86   :  { %5855 = vmatprep.mubr.bf16.mxu1 %v11374_v42  ;;  %v9552_v32 = vld [vmem:[%s14425_s1 + $0xb24] ss:$16 sps:$4 sm:$0xff]  }
  0x87   :  { %5785 = vmatpush1.bf16.msra.mxu0 %v9469_v37  ;;  %v9544_v37 = vld [vmem:[%s14425_s1 + $0xb40] ss:$16 sps:$4 sm:$0xff]  }
  0x88   :  { %5826 = vmatpush1.bf16.msra.mxu1 %v9472_v38  ;;  %5786 = vmatprep.subr.bf16.mxu0 %v9477_v39  ;;  %v9549_v38 = vld [vmem:[%s14425_s1 + $0x924] ss:$16 sps:$4 sm:$0xff]   ;;  %v11524_v39 = vrot.slane %v988_v34, %v11027_v49  ;;  %v9610_v34 = vld [vmem:[%s14425_s1 + $0xfe0] ss:$16 sps:$4 sm:$0xff]  }
  0x89   :  { %5827 = vmatprep.subr.bf16.mxu1 %v9480_v40  ;;  %v9547_v40 = vld [vmem:[%s14425_s1 + $0x920] ss:$16 sps:$4 sm:$0xff]  }
  0x8b   :  { %5787 = vmatpush1.bf16.msra.mxu0 %v9475_v44  ;;  %v9550_v44 = vld [vmem:[%s14425_s1 + $0xb20] ss:$16 sps:$4 sm:$0xff]  }
  0x8c   :  { %5828 = vmatpush1.bf16.msra.mxu1 %v9478_v45  ;;  %5788 = vmatprep.subr.bf16.mxu0 %v9483_v46  ;;  %v9555_v45 = vld [vmem:[%s14425_s1 + $0x904] ss:$16 sps:$4 sm:$0xff]  }
  0x8d   :  { %5829 = vmatprep.subr.bf16.mxu1 %v9486_v47  ;;  %v9558_v46 = vld [vmem:[%s14425_s1 + $0xb04] ss:$16 sps:$4 sm:$0xff]   ;;  %v1004_v47 = vcombine.high %v11524_v39, %v11524_v39 }
  0x8f   :  { %5789 = vmatpush1.bf16.msra.mxu0 %v9481_v48  ;;  %v11542_v48 = vrot.slane %v11350_v35, %v11027_v49  ;;  %v9564_v35 = vld [vmem:[%s14425_s1 + $0xee4] ss:$16 sps:$4 sm:$0xff]  }
  0x90   :  { %5830 = vmatpush1.bf16.msra.mxu1 %v9484_v50  ;;  %5790 = vmatprep.subr.bf16.mxu0 %v9489_v51  ;;  %v9553_v50 = vld [vmem:[%s14425_s1 + $0x900] ss:$16 sps:$4 sm:$0xff]  }
  0x91   :  { %5831 = vmatprep.subr.bf16.mxu1 %v9492_v52  ;;  %v9556_v51 = vld [vmem:[%s14425_s1 + $0xb00] ss:$16 sps:$4 sm:$0xff]   ;;  %v9561_v52 = vld [vmem:[%s14425_s1 + $0xce4] ss:$16 sps:$4 sm:$0xff]  }
  0x93   :  { %5791 = vmatpush1.bf16.msra.mxu0 %v9487_v53  ;;  %v11557_v53 = vrot.slane %v1004_v47, %v11027_v49  ;;  %v9627_v47 = vld [vmem:[%s14425_s1 + $0xd84] ss:$16 sps:$4 sm:$0xff]  }
  0x94   :  { %5832 = vmatpush1.bf16.msra.mxu1 %v9490_v54  ;;  %5792 = vmatprep.subr.bf16.mxu0 %v9495_v55  ;;  %v11561_v54 = vcombine.high %v11542_v48, %v11542_v48  ;;  %v9559_v55 = vld [vmem:[%s14425_s1 + $0xce0] ss:$16 sps:$4 sm:$0xff]  }
  0x95   :  { %5833 = vmatprep.subr.bf16.mxu1 %v9498_v56  ;;  %v9562_v56 = vld [vmem:[%s14425_s1 + $0xee0] ss:$16 sps:$4 sm:$0xff]  }
  0x97   :  { %5793 = vmatpush1.bf16.msra.mxu0 %v9493_v57  ;;  %v9567_v57 = vld [vmem:[%s14425_s1 + $0xcc4] ss:$16 sps:$4 sm:$0xff]  }
  0x98   :  { %5834 = vmatpush1.bf16.msra.mxu1 %v9496_v58  ;;  %5794 = vmatprep.subr.bf16.mxu0 %v9501_v59  ;;  %v9570_v58 = vld [vmem:[%s14425_s1 + $0xec4] ss:$16 sps:$4 sm:$0xff]   ;;  %v11577_v59 = vcombine.high %v11557_v53, %v11557_v53 }
  0x99   :  { %5835 = vmatprep.subr.bf16.mxu1 %v9504_v61  ;;  %v9565_v61 = vld [vmem:[%s14425_s1 + $0xcc0] ss:$16 sps:$4 sm:$0xff]  }
  0x9b   :  { %5795 = vmatpush1.bf16.msra.mxu0 %v9499_v62  ;;  %v9568_v62 = vld [vmem:[%s14425_s1 + $0xec0] ss:$16 sps:$4 sm:$0xff]  }
  0x9c   :  { %5836 = vmatpush1.bf16.msra.mxu1 %v9502_v63  ;;  %5796 = vmatprep.subr.bf16.mxu0 %v9507_v1  ;;  %v9573_v63 = vld [vmem:[%s14425_s1 + $0xca4] ss:$16 sps:$4 sm:$0xff]  }
  0x9d   :  { %5837 = vmatprep.subr.bf16.mxu1 %v9510_v2  ;;  %v9576_v1 = vld [vmem:[%s14425_s1 + $0xea4] ss:$16 sps:$4 sm:$0xff]   ;;  %v9571_v2 = vld [vmem:[%s14425_s1 + $0xca0] ss:$16 sps:$4 sm:$0xff]  }
  0x9f   :  { %5797 = vmatpush1.bf16.msra.mxu0 %v9505_v3  ;;  %v9574_v3 = vld [vmem:[%s14425_s1 + $0xea0] ss:$16 sps:$4 sm:$0xff]  }
  0xa0   :  { %5838 = vmatpush1.bf16.msra.mxu1 %v9508_v4  ;;  %5798 = vmatprep.subr.bf16.mxu0 %v9513_v5  ;;  %v9579_v4 = vld [vmem:[%s14425_s1 + $0xc84] ss:$16 sps:$4 sm:$0xff]  }
  0xa1   :  { %5839 = vmatprep.subr.bf16.mxu1 %v9516_v7  ;;  %v9582_v5 = vld [vmem:[%s14425_s1 + $0xe84] ss:$16 sps:$4 sm:$0xff]   ;;  %v9577_v7 = vld [vmem:[%s14425_s1 + $0xc80] ss:$16 sps:$4 sm:$0xff]  }
  0xa3   :  { %5799 = vmatpush2.bf16.msra.mxu0 %v9511_v8  ;;  %v9580_v8 = vld [vmem:[%s14425_s1 + $0xe80] ss:$16 sps:$4 sm:$0xff]  }
  0xa4   :  { %5840 = vmatpush2.bf16.msra.mxu1 %v9514_v9  ;;  %5800 = vmatprep.subr.bf16.mxu0 %v9519_v10  ;;  %v9585_v9 = vld [vmem:[%s14425_s1 + $0xc64] ss:$16 sps:$4 sm:$0xff]  }
  0xa5   :  { %5841 = vmatprep.subr.bf16.mxu1 %v9522_v11  ;;  %v9588_v10 = vld [vmem:[%s14425_s1 + $0xe64] ss:$16 sps:$4 sm:$0xff]   ;;  %v9583_v11 = vld [vmem:[%s14425_s1 + $0xc60] ss:$16 sps:$4 sm:$0xff]  }
  0xa7   :  { %5801 = vmatpush2.bf16.msra.mxu0 %v9517_v12  ;;  %v9586_v12 = vld [vmem:[%s14425_s1 + $0xe60] ss:$16 sps:$4 sm:$0xff]  }
  0xa8   :  { %5842 = vmatpush2.bf16.msra.mxu1 %v9520_v14  ;;  %5802 = vmatprep.subr.bf16.mxu0 %v9525_v15  ;;  %v9591_v14 = vld [vmem:[%s14425_s1 + $0xc44] ss:$16 sps:$4 sm:$0xff]  }
  0xa9   :  { %5843 = vmatprep.subr.bf16.mxu1 %v9528_v16  ;;  %v9594_v15 = vld [vmem:[%s14425_s1 + $0xe44] ss:$16 sps:$4 sm:$0xff]   ;;  %v9589_v16 = vld [vmem:[%s14425_s1 + $0xc40] ss:$16 sps:$4 sm:$0xff]  }
  0xab   :  { %5803 = vmatpush2.bf16.msra.mxu0 %v9523_v19  ;;  %v9592_v19 = vld [vmem:[%s14425_s1 + $0xe40] ss:$16 sps:$4 sm:$0xff]  }
  0xac   :  { %5844 = vmatpush2.bf16.msra.mxu1 %v9526_v20  ;;  %5804 = vmatprep.subr.bf16.mxu0 %v9531_v21  ;;  %v9597_v20 = vld [vmem:[%s14425_s1 + $0xc24] ss:$16 sps:$4 sm:$0xff]  }
  0xad   :  { %5845 = vmatprep.subr.bf16.mxu1 %v9534_v22  ;;  %v9600_v21 = vld [vmem:[%s14425_s1 + $0xe24] ss:$16 sps:$4 sm:$0xff]   ;;  %v9595_v22 = vld [vmem:[%s14425_s1 + $0xc20] ss:$16 sps:$4 sm:$0xff]  }
  0xaf   :  { %5805 = vmatpush2.bf16.msra.mxu0 %v9529_v24  ;;  %v9598_v24 = vld [vmem:[%s14425_s1 + $0xe20] ss:$16 sps:$4 sm:$0xff]  }
  0xb0   :  { %5846 = vmatpush2.bf16.msra.mxu1 %v9532_v25  ;;  %5806 = vmatprep.subr.bf16.mxu0 %v9537_v27  ;;  %v9603_v25 = vld [vmem:[%s14425_s1 + $0xc04] ss:$16 sps:$4 sm:$0xff]  }
  0xb1   :  { %5847 = vmatprep.subr.bf16.mxu1 %v9540_v28  ;;  %v9606_v27 = vld [vmem:[%s14425_s1 + $0xe04] ss:$16 sps:$4 sm:$0xff]   ;;  %v9601_v28 = vld [vmem:[%s14425_s1 + $0xc00] ss:$16 sps:$4 sm:$0xff]  }
  0xb3   :  { %5807 = vmatpush2.bf16.msra.mxu0 %v9535_v29  ;;  %v9604_v29 = vld [vmem:[%s14425_s1 + $0xe00] ss:$16 sps:$4 sm:$0xff]  }
  0xb4   :  { %5848 = vmatpush2.bf16.msra.mxu1 %v9538_v30  ;;  %5808 = vmatprep.subr.bf16.mxu0 %v9543_v31  ;;  %v9609_v30 = vld [vmem:[%s14425_s1 + $0xde4] ss:$16 sps:$4 sm:$0xff]  }
  0xb5   :  { %5849 = vmatprep.subr.bf16.mxu1 %v9546_v33  ;;  %v9612_v31 = vld [vmem:[%s14425_s1 + $0xfe4] ss:$16 sps:$4 sm:$0xff]   ;;  %v9607_v33 = vld [vmem:[%s14425_s1 + $0xde0] ss:$16 sps:$4 sm:$0xff]  }
  0xb7   :  { %5809 = vmatpush2.bf16.msra.mxu0 %v9541_v36  ;;  %v9615_v36 = vld [vmem:[%s14425_s1 + $0xdc4] ss:$16 sps:$4 sm:$0xff]  }
  0xb8   :  { %5850 = vmatpush2.bf16.msra.mxu1 %v9544_v37  ;;  %5810 = vmatprep.subr.bf16.mxu0 %v9549_v38  ;;  %v9618_v37 = vld [vmem:[%s14425_s1 + $0xfc4] ss:$16 sps:$4 sm:$0xff]   ;;  %v9613_v38 = vld [vmem:[%s14425_s1 + $0xdc0] ss:$16 sps:$4 sm:$0xff]  }
  0xb9   :  { %5851 = vmatprep.subr.bf16.mxu1 %v9552_v32  ;;  %v9616_v32 = vld [vmem:[%s14425_s1 + $0xfc0] ss:$16 sps:$4 sm:$0xff]  }
  0xbb   :  { %5811 = vmatpush2.bf16.msra.mxu0 %v9547_v40  ;;  %v9621_v40 = vld [vmem:[%s14425_s1 + $0xda4] ss:$16 sps:$4 sm:$0xff]  }
  0xbc   :  { %5852 = vmatpush2.bf16.msra.mxu1 %v9550_v44  ;;  %5812 = vmatprep.subr.bf16.mxu0 %v9555_v45  ;;  %v9624_v44 = vld [vmem:[%s14425_s1 + $0xfa4] ss:$16 sps:$4 sm:$0xff]   ;;  %v9619_v45 = vld [vmem:[%s14425_s1 + $0xda0] ss:$16 sps:$4 sm:$0xff]  }
  0xbd   :  { %5853 = vmatprep.subr.bf16.mxu1 %v9558_v46  ;;  %v9622_v46 = vld [vmem:[%s14425_s1 + $0xfa0] ss:$16 sps:$4 sm:$0xff]  }
  0xbf   :  { %5813 = vmatpush2.bf16.msra.mxu0 %v9553_v50  ;;  %v9630_v50 = vld [vmem:[%s14425_s1 + $0xf84] ss:$16 sps:$4 sm:$0xff]  }
  0xc0   :  { %5854 = vmatpush2.bf16.msra.mxu1 %v9556_v51  ;;  %5864 = vmatprep.subr.bf16.mxu0 %v9561_v52  ;;  %v9625_v51 = vld [vmem:[%s14425_s1 + $0xd80] ss:$16 sps:$4 sm:$0xff]  }
  0xc1   :  { %5905 = vmatprep.subr.bf16.mxu1 %v9564_v35  ;;  %v9628_v52 = vld [vmem:[%s14425_s1 + $0xf80] ss:$16 sps:$4 sm:$0xff]   ;;  %v9633_v35 = vld [vmem:[%s14425_s1 + $0xd64] ss:$16 sps:$4 sm:$0xff]  }
  0xc2   :  { %5815 = vmatmul.mubr.bf16.vlgmr.msra.gmra.mxu0 %v11542_v48 }
  0xc3   :  { %5856 = vmatmul.mubr.bf16.vlgmr.msra.gmra.mxu1 %v11561_v54  ;;  %5865 = vmatpush1.bf16.msra.mxu0 %v9559_v55  ;;  %v9636_v55 = vld [vmem:[%s14425_s1 + $0xf64] ss:$16 sps:$4 sm:$0xff]  }
  0xc4   :  { %5906 = vmatpush1.bf16.msra.mxu1 %v9562_v56  ;;  %5866 = vmatprep.subr.bf16.mxu0 %v9567_v57  ;;  %v9631_v56 = vld [vmem:[%s14425_s1 + $0xd60] ss:$16 sps:$4 sm:$0xff]  }
  0xc5   :  { %5907 = vmatprep.subr.bf16.mxu1 %v9570_v58  ;;  %5896 = vmatprep.mubr.bf16.mxu0 %v11557_v53  ;;  %v9634_v57 = vld [vmem:[%s14425_s1 + $0xf60] ss:$16 sps:$4 sm:$0xff]   ;;  %v9639_v58 = vld [vmem:[%s14425_s1 + $0xd44] ss:$16 sps:$4 sm:$0xff]  }
  0xc6   :  { %5937 = vmatprep.mubr.bf16.mxu1 %v11577_v59 }
  0xc7   :  { %5867 = vmatpush1.bf16.msra.mxu0 %v9565_v61  ;;  %v9642_v61 = vld [vmem:[%s14425_s1 + $0xf44] ss:$16 sps:$4 sm:$0xff]  }
  0xc8   :  { %5908 = vmatpush1.bf16.msra.mxu1 %v9568_v62  ;;  %5868 = vmatprep.subr.bf16.mxu0 %v9573_v63  ;;  %v9637_v62 = vld [vmem:[%s14425_s1 + $0xd40] ss:$16 sps:$4 sm:$0xff]  }
  0xc9   :  { %5909 = vmatprep.subr.bf16.mxu1 %v9576_v1  ;;  %v11733_v63 = vld [vmem:[%s14426_s0 + $0x10] sm:$0xff] }
  0xca   :  { %v9640_v1 = vld [vmem:[%s14425_s1 + $0xf40] ss:$16 sps:$4 sm:$0xff]  }
  0xcb   :  { %5869 = vmatpush1.bf16.msra.mxu0 %v9571_v2  ;;  %v9645_v2 = vld [vmem:[%s14425_s1 + $0xd24] ss:$16 sps:$4 sm:$0xff]  }
  0xcc   :  { %5910 = vmatpush1.bf16.msra.mxu1 %v9574_v3  ;;  %5870 = vmatprep.subr.bf16.mxu0 %v9579_v4  ;;  %v9648_v3 = vld [vmem:[%s14425_s1 + $0xf24] ss:$16 sps:$4 sm:$0xff]   ;;  %v11746_v4 = vrot.slane %v11733_v63, %v11027_v49 }
  0xcd   :  { %5911 = vmatprep.subr.bf16.mxu1 %v9582_v5  ;;  %v9643_v5 = vld [vmem:[%s14425_s1 + $0xd20] ss:$16 sps:$4 sm:$0xff]  }
  0xcf   :  { %5871 = vmatpush1.bf16.msra.mxu0 %v9577_v7  ;;  %v9646_v7 = vld [vmem:[%s14425_s1 + $0xf20] ss:$16 sps:$4 sm:$0xff]  }
  0xd0   :  { %5912 = vmatpush1.bf16.msra.mxu1 %v9580_v8  ;;  %5872 = vmatprep.subr.bf16.mxu0 %v9585_v9  ;;  %v9651_v8 = vld [vmem:[%s14425_s1 + $0xd04] ss:$16 sps:$4 sm:$0xff]  }
  0xd1   :  { %5913 = vmatprep.subr.bf16.mxu1 %v9588_v10  ;;  %v9654_v9 = vld [vmem:[%s14425_s1 + $0xf04] ss:$16 sps:$4 sm:$0xff]   ;;  %v1052_v10 = vcombine.high %v11746_v4, %v11746_v4 }
  0xd3   :  { %5873 = vmatpush1.bf16.msra.mxu0 %v9583_v11  ;;  %v9649_v11 = vld [vmem:[%s14425_s1 + $0xd00] ss:$16 sps:$4 sm:$0xff]  }
  0xd4   :  { %5914 = vmatpush1.bf16.msra.mxu1 %v9586_v12  ;;  %5874 = vmatprep.subr.bf16.mxu0 %v9591_v14  ;;  %v11767_v12 = vrot.slane %v11524_v39, %v11027_v49  ;;  %v9652_v14 = vld [vmem:[%s14425_s1 + $0xf00] ss:$16 sps:$4 sm:$0xff]  }
  0xd5   :  { %5915 = vmatprep.subr.bf16.mxu1 %v9594_v15  ;;  %v9658_v15 = vld [vmem:[%s14425_s1 + $0x10e4] ss:$16 sps:$4 sm:$0xff]  }
  0xd6   :  { %v11783_v39 = vcombine.high %v11767_v12, %v11767_v12 }
  0xd7   :  { %5875 = vmatpush1.bf16.msra.mxu0 %v9589_v16  ;;  %v9661_v16 = vld [vmem:[%s14425_s1 + $0x12e4] ss:$16 sps:$4 sm:$0xff]  }
  0xd8   :  { %5916 = vmatpush1.bf16.msra.mxu1 %v9592_v19  ;;  %5876 = vmatprep.subr.bf16.mxu0 %v9597_v20  ;;  %v11779_v19 = vrot.slane %v1052_v10, %v11027_v49  ;;  %v9656_v20 = vld [vmem:[%s14425_s1 + $0x10e0] ss:$16 sps:$4 sm:$0xff]   ;;  %v9703_v10 = vld [vmem:[%s14425_s1 + $0x1204] ss:$16 sps:$4 sm:$0xff]  }
  0xd9   :  { %5917 = vmatprep.subr.bf16.mxu1 %v9600_v21  ;;  %v9659_v21 = vld [vmem:[%s14425_s1 + $0x12e0] ss:$16 sps:$4 sm:$0xff]  }
  0xdb   :  { %5877 = vmatpush1.bf16.msra.mxu0 %v9595_v22  ;;  %v9664_v22 = vld [vmem:[%s14425_s1 + $0x10c4] ss:$16 sps:$4 sm:$0xff]  }
  0xdc   :  { %5918 = vmatpush1.bf16.msra.mxu1 %v9598_v24  ;;  %5878 = vmatprep.subr.bf16.mxu0 %v9603_v25  ;;  %v9667_v24 = vld [vmem:[%s14425_s1 + $0x12c4] ss:$16 sps:$4 sm:$0xff]   ;;  %v11799_v25 = vcombine.high %v11779_v19, %v11779_v19 }
  0xdd   :  { %5919 = vmatprep.subr.bf16.mxu1 %v9606_v27 }
  0xdf   :  { %5879 = vmatpush1.bf16.msra.mxu0 %v9601_v28 }
  0xe0   :  { %5920 = vmatpush1.bf16.msra.mxu1 %v9604_v29  ;;  %5880 = vmatprep.subr.bf16.mxu0 %v9609_v30  ;;  %v9662_v29 = vld [vmem:[%s14425_s1 + $0x10c0] ss:$16 sps:$4 sm:$0xff]  }
  0xe1   :  { %5921 = vmatprep.subr.bf16.mxu1 %v9612_v31  ;;  %v9665_v30 = vld [vmem:[%s14425_s1 + $0x12c0] ss:$16 sps:$4 sm:$0xff]  }
  0xe3   :  { %5881 = vmatpush2.bf16.msra.mxu0 %v9607_v33 }
  0xe4   :  { %5922 = vmatpush2.bf16.msra.mxu1 %v9610_v34  ;;  %5882 = vmatprep.subr.bf16.mxu0 %v9615_v36  ;;  %v9670_v36 = vld [vmem:[%s14425_s1 + $0x10a4] ss:$16 sps:$4 sm:$0xff]  }
  0xe5   :  { %5923 = vmatprep.subr.bf16.mxu1 %v9618_v37  ;;  %v9673_v37 = vld [vmem:[%s14425_s1 + $0x12a4] ss:$16 sps:$4 sm:$0xff]  }
  0xe7   :  { %5883 = vmatpush2.bf16.msra.mxu0 %v9613_v38 }
  0xe8   :  { %5924 = vmatpush2.bf16.msra.mxu1 %v9616_v32  ;;  %5884 = vmatprep.subr.bf16.mxu0 %v9621_v40  ;;  %v9668_v32 = vld [vmem:[%s14425_s1 + $0x10a0] ss:$16 sps:$4 sm:$0xff]  }
  0xe9   :  { %5925 = vmatprep.subr.bf16.mxu1 %v9624_v44  ;;  %v9671_v40 = vld [vmem:[%s14425_s1 + $0x12a0] ss:$16 sps:$4 sm:$0xff]  }
  0xeb   :  { %5885 = vmatpush2.bf16.msra.mxu0 %v9619_v45 }
  0xec   :  { %5926 = vmatpush2.bf16.msra.mxu1 %v9622_v46  ;;  %5886 = vmatprep.subr.bf16.mxu0 %v9627_v47 }
  0xed   :  { %5927 = vmatprep.subr.bf16.mxu1 %v9630_v50  ;;  %v9676_v50 = vld [vmem:[%s14425_s1 + $0x1084] ss:$16 sps:$4 sm:$0xff]  }
  0xef   :  { %5887 = vmatpush2.bf16.msra.mxu0 %v9625_v51  ;;  %v9679_v51 = vld [vmem:[%s14425_s1 + $0x1284] ss:$16 sps:$4 sm:$0xff]  }
  0xf0   :  { %5928 = vmatpush2.bf16.msra.mxu1 %v9628_v52  ;;  %5888 = vmatprep.subr.bf16.mxu0 %v9633_v35  ;;  %v9674_v52 = vld [vmem:[%s14425_s1 + $0x1080] ss:$16 sps:$4 sm:$0xff]  }
  0xf1   :  { %5929 = vmatprep.subr.bf16.mxu1 %v9636_v55  ;;  %v9677_v35 = vld [vmem:[%s14425_s1 + $0x1280] ss:$16 sps:$4 sm:$0xff]   ;;  %v9682_v55 = vld [vmem:[%s14425_s1 + $0x1064] ss:$16 sps:$4 sm:$0xff]  }
  0xf3   :  { %5889 = vmatpush2.bf16.msra.mxu0 %v9631_v56  ;;  %v9685_v56 = vld [vmem:[%s14425_s1 + $0x1264] ss:$16 sps:$4 sm:$0xff]  }
  0xf4   :  { %5930 = vmatpush2.bf16.msra.mxu1 %v9634_v57  ;;  %5890 = vmatprep.subr.bf16.mxu0 %v9639_v58  ;;  %v9680_v57 = vld [vmem:[%s14425_s1 + $0x1060] ss:$16 sps:$4 sm:$0xff]  }
  0xf5   :  { %5931 = vmatprep.subr.bf16.mxu1 %v9642_v61  ;;  %v9683_v58 = vld [vmem:[%s14425_s1 + $0x1260] ss:$16 sps:$4 sm:$0xff]   ;;  %v9688_v61 = vld [vmem:[%s14425_s1 + $0x1044] ss:$16 sps:$4 sm:$0xff]  }
  0xf7   :  { %5891 = vmatpush2.bf16.msra.mxu0 %v9637_v62  ;;  %v9691_v62 = vld [vmem:[%s14425_s1 + $0x1244] ss:$16 sps:$4 sm:$0xff]  }
  0xf8   :  { %5932 = vmatpush2.bf16.msra.mxu1 %v9640_v1  ;;  %5892 = vmatprep.subr.bf16.mxu0 %v9645_v2  ;;  %v9686_v1 = vld [vmem:[%s14425_s1 + $0x1040] ss:$16 sps:$4 sm:$0xff]  }
  0xf9   :  { %5933 = vmatprep.subr.bf16.mxu1 %v9648_v3  ;;  %v9689_v2 = vld [vmem:[%s14425_s1 + $0x1240] ss:$16 sps:$4 sm:$0xff]   ;;  %v9694_v3 = vld [vmem:[%s14425_s1 + $0x1024] ss:$16 sps:$4 sm:$0xff]  }
  0xfb   :  { %5893 = vmatpush2.bf16.msra.mxu0 %v9643_v5  ;;  %v9697_v5 = vld [vmem:[%s14425_s1 + $0x1224] ss:$16 sps:$4 sm:$0xff]  }
  0xfc   :  { %5934 = vmatpush2.bf16.msra.mxu1 %v9646_v7  ;;  %5894 = vmatprep.subr.bf16.mxu0 %v9651_v8  ;;  %v9692_v7 = vld [vmem:[%s14425_s1 + $0x1020] ss:$16 sps:$4 sm:$0xff]  }
  0xfd   :  { %5935 = vmatprep.subr.bf16.mxu1 %v9654_v9  ;;  %v9695_v8 = vld [vmem:[%s14425_s1 + $0x1220] ss:$16 sps:$4 sm:$0xff]   ;;  %v9700_v9 = vld [vmem:[%s14425_s1 + $0x1004] ss:$16 sps:$4 sm:$0xff]  }
  0xff   :  { %5895 = vmatpush2.bf16.msra.mxu0 %v9649_v11  ;;  %v9698_v11 = vld [vmem:[%s14425_s1 + $0x1000] ss:$16 sps:$4 sm:$0xff]  }
 0x100   :  { %5936 = vmatpush2.bf16.msra.mxu1 %v9652_v14  ;;  %5946 = vmatprep.subr.bf16.mxu0 %v9658_v15  ;;  %v9701_v14 = vld [vmem:[%s14425_s1 + $0x1200] ss:$16 sps:$4 sm:$0xff]   ;;  %v9706_v15 = vld [vmem:[%s14425_s1 + $0x11e4] ss:$16 sps:$4 sm:$0xff]  }
 0x101   :  { %5987 = vmatprep.subr.bf16.mxu1 %v9661_v16  ;;  %v9709_v16 = vld [vmem:[%s14425_s1 + $0x13e4] ss:$16 sps:$4 sm:$0xff]  }
 0x102   :  { %v5652_v27 = vpop.f32.mrf.mxu0  ;;  %5897 = vmatmul.mubr.bf16.vlgmr.msra.gmra.mxu0 %v11767_v12 }
 0x103   :  { %v5693_v28 = vpop.f32.mrf.mxu1  ;;  %5938 = vmatmul.mubr.bf16.vlgmr.msra.gmra.mxu1 %v11783_v39  ;;  %5947 = vmatpush1.bf16.msra.mxu0 %v9656_v20  ;;  %v9704_v20 = vld [vmem:[%s14425_s1 + $0x11e0] ss:$16 sps:$4 sm:$0xff]  }
 0x104   :  { %v11809_v31 = vadd.f32 %v5693_v28, %v5652_v27  ;;  %5988 = vmatpush1.bf16.msra.mxu1 %v9659_v21  ;;  %v5654_v33 = vpop.f32.mrf.mxu0  ;;  %5948 = vmatprep.subr.bf16.mxu0 %v9664_v22  ;;  %v9707_v21 = vld [vmem:[%s14425_s1 + $0x13e0] ss:$16 sps:$4 sm:$0xff]   ;;  %v9712_v22 = vld [vmem:[%s14425_s1 + $0x11c4] ss:$16 sps:$4 sm:$0xff]  }
 0x105   :  { %v5695_v34 = vpop.f32.mrf.mxu1  ;;  %5989 = vmatprep.subr.bf16.mxu1 %v9667_v24  ;;  %5978 = vmatprep.mubr.bf16.mxu0 %v11779_v19  ;;  %v9715_v24 = vld [vmem:[%s14425_s1 + $0x13c4] ss:$16 sps:$4 sm:$0xff]   ;;  %v9710_v27 = vld [vmem:[%s14425_s1 + $0x11c0] ss:$16 sps:$4 sm:$0xff]  }
 0x106   :  { %v11817_v38 = vadd.f32 %v5695_v34, %v5654_v33  ;;  %6019 = vmatprep.mubr.bf16.mxu1 %v11799_v25  ;;  %v5656_v44 = vpop.f32.mrf.mxu0  ;;  %v9713_v28 = vld [vmem:[%s14425_s1 + $0x13c0] ss:$16 sps:$4 sm:$0xff]  }
 0x107   :  { %v5697_v45 = vpop.f32.mrf.mxu1  ;;  %5949 = vmatpush1.bf16.msra.mxu0 %v9662_v29  ;;  %v9718_v29 = vld [vmem:[%s14425_s1 + $0x11a4] ss:$16 sps:$4 sm:$0xff]   ;;  %v9716_v33 = vld [vmem:[%s14425_s1 + $0x11a0] ss:$16 sps:$4 sm:$0xff]  }
 0x108   :  { %5990 = vmatpush1.bf16.msra.mxu1 %v9665_v30  ;;  %v5657_v46 = vpop.f32.mrf.mxu0  ;;  %5950 = vmatprep.subr.bf16.mxu0 %v9670_v36  ;;  %v9721_v30 = vld [vmem:[%s14425_s1 + $0x13a4] ss:$16 sps:$4 sm:$0xff]   ;;  %v9719_v34 = vld [vmem:[%s14425_s1 + $0x13a0] ss:$16 sps:$4 sm:$0xff]  }
 0x109   :  { %v5698_v47 = vpop.f32.mrf.mxu1  ;;  %5991 = vmatprep.subr.bf16.mxu1 %v9673_v37  ;;  %v9724_v36 = vld [vmem:[%s14425_s1 + $0x1184] ss:$16 sps:$4 sm:$0xff]   ;;  %v9728_v46 = vld [vmem:[%s14425_s1 + $0x1160] ss:$16 sps:$4 sm:$0xff]  }
 0x10a   :  { %v9727_v37 = vld [vmem:[%s14425_s1 + $0x1384] ss:$16 sps:$4 sm:$0xff]   ;;  %v9731_v47 = vld [vmem:[%s14425_s1 + $0x1360] ss:$16 sps:$4 sm:$0xff]  }
 0x10b   :  { %5951 = vmatpush1.bf16.msra.mxu0 %v9668_v32  ;;  %v9722_v32 = vld [vmem:[%s14425_s1 + $0x1180] ss:$16 sps:$4 sm:$0xff]   ;;  %v9730_v44 = vld [vmem:[%s14425_s1 + $0x1164] ss:$16 sps:$4 sm:$0xff]  }
 0x10c   :  { %5992 = vmatpush1.bf16.msra.mxu1 %v9671_v40  ;;  %5952 = vmatprep.subr.bf16.mxu0 %v9676_v50  ;;  %v9725_v40 = vld [vmem:[%s14425_s1 + $0x1380] ss:$16 sps:$4 sm:$0xff]   ;;  %v9733_v45 = vld [vmem:[%s14425_s1 + $0x1364] ss:$16 sps:$4 sm:$0xff]  }
 0x10d   :  { %5993 = vmatprep.subr.bf16.mxu1 %v9679_v51  ;;  %v9736_v50 = vld [vmem:[%s14425_s1 + $0x1144] ss:$16 sps:$4 sm:$0xff]  }
 0x10e   :  { %v9739_v51 = vld [vmem:[%s14425_s1 + $0x1344] ss:$16 sps:$4 sm:$0xff]  }
 0x10f   :  { %5953 = vmatpush1.bf16.msra.mxu0 %v9674_v52  ;;  %v1037_v52 = vcombine.high %v11733_v63, %v11733_v63  ;;  %v9745_v63 = vld [vmem:[%s14425_s1 + $0x1324] ss:$16 sps:$4 sm:$0xff]  }
 0x110   :  { %5994 = vmatpush1.bf16.msra.mxu1 %v9677_v35  ;;  %5954 = vmatprep.subr.bf16.mxu0 %v9682_v55  ;;  %v9734_v35 = vld [vmem:[%s14425_s1 + $0x1140] ss:$16 sps:$4 sm:$0xff]  }
 0x111   :  { %5995 = vmatprep.subr.bf16.mxu1 %v9685_v56  ;;  %v9737_v55 = vld [vmem:[%s14425_s1 + $0x1340] ss:$16 sps:$4 sm:$0xff]   ;;  %v9742_v56 = vld [vmem:[%s14425_s1 + $0x1124] ss:$16 sps:$4 sm:$0xff]  }
 0x113   :  { %5955 = vmatpush1.bf16.msra.mxu0 %v9680_v57  ;;  %v11968_v57 = vrot.slane %v1037_v52, %v11027_v49  ;;  %v9773_v52 = vld [vmem:[%s14425_s1 + $0x1680] ss:$16 sps:$4 sm:$0xff]  }
 0x114   :  { %5996 = vmatpush1.bf16.msra.mxu1 %v9683_v58  ;;  %5956 = vmatprep.subr.bf16.mxu0 %v9688_v61  ;;  %v9740_v58 = vld [vmem:[%s14425_s1 + $0x1120] ss:$16 sps:$4 sm:$0xff]  }
 0x115   :  { %5997 = vmatprep.subr.bf16.mxu1 %v9691_v62  ;;  %v9743_v61 = vld [vmem:[%s14425_s1 + $0x1320] ss:$16 sps:$4 sm:$0xff]   ;;  %v9748_v62 = vld [vmem:[%s14425_s1 + $0x1104] ss:$16 sps:$4 sm:$0xff]  }
 0x117   :  { %5957 = vmatpush1.bf16.msra.mxu0 %v9686_v1  ;;  %v9751_v1 = vld [vmem:[%s14425_s1 + $0x1304] ss:$16 sps:$4 sm:$0xff]  }
 0x118   :  { %5998 = vmatpush1.bf16.msra.mxu1 %v9689_v2  ;;  %5958 = vmatprep.subr.bf16.mxu0 %v9694_v3  ;;  %v1053_v2 = vcombine.high %v11968_v57, %v11968_v57  ;;  %v11986_v3 = vrot.slane %v11746_v4, %v11027_v49  ;;  %v9757_v4 = vld [vmem:[%s14425_s1 + $0x16e4] ss:$16 sps:$4 sm:$0xff]  }
 0x119   :  { %5999 = vmatprep.subr.bf16.mxu1 %v9697_v5  ;;  %v9746_v5 = vld [vmem:[%s14425_s1 + $0x1100] ss:$16 sps:$4 sm:$0xff]  }
 0x11b   :  { %5959 = vmatpush1.bf16.msra.mxu0 %v9692_v7  ;;  %v9749_v7 = vld [vmem:[%s14425_s1 + $0x1300] ss:$16 sps:$4 sm:$0xff]  }
 0x11c   :  { %6000 = vmatpush1.bf16.msra.mxu1 %v9695_v8  ;;  %5960 = vmatprep.subr.bf16.mxu0 %v9700_v9  ;;  %v9754_v8 = vld [vmem:[%s14425_s1 + $0x14e4] ss:$16 sps:$4 sm:$0xff]   ;;  %v9752_v9 = vld [vmem:[%s14425_s1 + $0x14e0] ss:$16 sps:$4 sm:$0xff]  }
 0x11d   :  { %6001 = vmatprep.subr.bf16.mxu1 %v9703_v10  ;;  %v9755_v10 = vld [vmem:[%s14425_s1 + $0x16e0] ss:$16 sps:$4 sm:$0xff]  }
 0x11f   :  { %5961 = vmatpush1.bf16.msra.mxu0 %v9698_v11  ;;  %v12007_v11 = vrot.slane %v1053_v2, %v11027_v49  ;;  %v9790_v2 = vld [vmem:[%s14425_s1 + $0x1424] ss:$16 sps:$4 sm:$0xff]  }
 0x120   :  { %6002 = vmatpush1.bf16.msra.mxu1 %v9701_v14  ;;  %5962 = vmatprep.subr.bf16.mxu0 %v9706_v15  ;;  %v12011_v14 = vcombine.high %v11986_v3, %v11986_v3  ;;  %v9760_v15 = vld [vmem:[%s14425_s1 + $0x14c4] ss:$16 sps:$4 sm:$0xff]  }
 0x121   :  { %6003 = vmatprep.subr.bf16.mxu1 %v9709_v16  ;;  %v9763_v16 = vld [vmem:[%s14425_s1 + $0x16c4] ss:$16 sps:$4 sm:$0xff]  }
 0x123   :  { %5963 = vmatpush2.bf16.msra.mxu0 %v9704_v20  ;;  %v9758_v20 = vld [vmem:[%s14425_s1 + $0x14c0] ss:$16 sps:$4 sm:$0xff]  }
 0x124   :  { %6004 = vmatpush2.bf16.msra.mxu1 %v9707_v21  ;;  %5964 = vmatprep.subr.bf16.mxu0 %v9712_v22  ;;  %v9761_v21 = vld [vmem:[%s14425_s1 + $0x16c0] ss:$16 sps:$4 sm:$0xff]   ;;  %v12027_v22 = vcombine.high %v12007_v11, %v12007_v11 }
 0x125   :  { %6005 = vmatprep.subr.bf16.mxu1 %v9715_v24 }
 0x127   :  { %5965 = vmatpush2.bf16.msra.mxu0 %v9710_v27 }
 0x128   :  { %6006 = vmatpush2.bf16.msra.mxu1 %v9713_v28  ;;  %5966 = vmatprep.subr.bf16.mxu0 %v9718_v29 }
 0x129   :  { %6007 = vmatprep.subr.bf16.mxu1 %v9721_v30 }
 0x12b   :  { %5967 = vmatpush2.bf16.msra.mxu0 %v9716_v33  ;;  %v9766_v33 = vld [vmem:[%s14425_s1 + $0x14a4] ss:$16 sps:$4 sm:$0xff]  }
 0x12c   :  { %6008 = vmatpush2.bf16.msra.mxu1 %v9719_v34  ;;  %5968 = vmatprep.subr.bf16.mxu0 %v9724_v36  ;;  %v9769_v34 = vld [vmem:[%s14425_s1 + $0x16a4] ss:$16 sps:$4 sm:$0xff]  }
 0x12d   :  { %6009 = vmatprep.subr.bf16.mxu1 %v9727_v37 }
 0x12f   :  { %5969 = vmatpush2.bf16.msra.mxu0 %v9722_v32  ;;  %v9767_v32 = vld [vmem:[%s14425_s1 + $0x16a0] ss:$16 sps:$4 sm:$0xff]  }
 0x130   :  { %6010 = vmatpush2.bf16.msra.mxu1 %v9725_v40  ;;  %5970 = vmatprep.subr.bf16.mxu0 %v9730_v44 }
 0x131   :  { %6011 = vmatprep.subr.bf16.mxu1 %v9733_v45 }
 0x133   :  { %5971 = vmatpush2.bf16.msra.mxu0 %v9728_v46 }
 0x134   :  { %6012 = vmatpush2.bf16.msra.mxu1 %v9731_v47  ;;  %5972 = vmatprep.subr.bf16.mxu0 %v9736_v50  ;;  %v9772_v47 = vld [vmem:[%s14425_s1 + $0x1484] ss:$16 sps:$4 sm:$0xff]  }
 0x135   :  { %6013 = vmatprep.subr.bf16.mxu1 %v9739_v51  ;;  %v9775_v50 = vld [vmem:[%s14425_s1 + $0x1684] ss:$16 sps:$4 sm:$0xff]   ;;  %v9770_v51 = vld [vmem:[%s14425_s1 + $0x1480] ss:$16 sps:$4 sm:$0xff]  }
 0x137   :  { %5973 = vmatpush2.bf16.msra.mxu0 %v9734_v35  ;;  %v9778_v35 = vld [vmem:[%s14425_s1 + $0x1464] ss:$16 sps:$4 sm:$0xff]  }
 0x138   :  { %6014 = vmatpush2.bf16.msra.mxu1 %v9737_v55  ;;  %5974 = vmatprep.subr.bf16.mxu0 %v9742_v56  ;;  %v9781_v55 = vld [vmem:[%s14425_s1 + $0x1664] ss:$16 sps:$4 sm:$0xff]   ;;  %v9776_v56 = vld [vmem:[%s14425_s1 + $0x1460] ss:$16 sps:$4 sm:$0xff]  }
 0x139   :  { %6015 = vmatprep.subr.bf16.mxu1 %v9745_v63  ;;  %v9779_v63 = vld [vmem:[%s14425_s1 + $0x1660] ss:$16 sps:$4 sm:$0xff]  }
 0x13b   :  { %5975 = vmatpush2.bf16.msra.mxu0 %v9740_v58  ;;  %v9784_v58 = vld [vmem:[%s14425_s1 + $0x1444] ss:$16 sps:$4 sm:$0xff]  }
 0x13c   :  { %6016 = vmatpush2.bf16.msra.mxu1 %v9743_v61  ;;  %5976 = vmatprep.subr.bf16.mxu0 %v9748_v62  ;;  %v9787_v61 = vld [vmem:[%s14425_s1 + $0x1644] ss:$16 sps:$4 sm:$0xff]   ;;  %v9782_v62 = vld [vmem:[%s14425_s1 + $0x1440] ss:$16 sps:$4 sm:$0xff]  }
 0x13d   :  { %6017 = vmatprep.subr.bf16.mxu1 %v9751_v1  ;;  %v9785_v1 = vld [vmem:[%s14425_s1 + $0x1640] ss:$16 sps:$4 sm:$0xff]  }
 0x13f   :  { %5977 = vmatpush2.bf16.msra.mxu0 %v9746_v5  ;;  %v9793_v5 = vld [vmem:[%s14425_s1 + $0x1624] ss:$16 sps:$4 sm:$0xff]  }
 0x140   :  { %6018 = vmatpush2.bf16.msra.mxu1 %v9749_v7  ;;  %6028 = vmatprep.subr.bf16.mxu0 %v9754_v8  ;;  %v9788_v7 = vld [vmem:[%s14425_s1 + $0x1420] ss:$16 sps:$4 sm:$0xff]  }
 0x141   :  { %6069 = vmatprep.subr.bf16.mxu1 %v9757_v4  ;;  %v9791_v8 = vld [vmem:[%s14425_s1 + $0x1620] ss:$16 sps:$4 sm:$0xff]   ;;  %v9796_v4 = vld [vmem:[%s14425_s1 + $0x1404] ss:$16 sps:$4 sm:$0xff]  }
 0x142   :  { %v5734_v24 = vpop.f32.mrf.mxu0  ;;  %5979 = vmatmul.mubr.bf16.vlgmr.msra.gmra.mxu0 %v11986_v3 }
 0x143   :  { %v5775_v27 = vpop.f32.mrf.mxu1  ;;  %6020 = vmatmul.mubr.bf16.vlgmr.msra.gmra.mxu1 %v12011_v14  ;;  %v5735_v28 = vadd.f32 %v5734_v24, %v11809_v31  ;;  %6029 = vmatpush1.bf16.msra.mxu0 %v9752_v9  ;;  %v9764_v31 = vld [vmem:[%s14425_s1 + $0x14a0] ss:$16 sps:$4 sm:$0xff]   ;;  %v9799_v9 = vld [vmem:[%s14425_s1 + $0x1604] ss:$16 sps:$4 sm:$0xff]  }
 0x144   :  { %6070 = vmatpush1.bf16.msra.mxu1 %v9755_v10  ;;  %v5736_v29 = vpop.f32.mrf.mxu0  ;;  %6030 = vmatprep.subr.bf16.mxu0 %v9760_v15  ;;  %v9794_v10 = vld [vmem:[%s14425_s1 + $0x1400] ss:$16 sps:$4 sm:$0xff]  }
 0x145   :  { %v5777_v30 = vpop.f32.mrf.mxu1  ;;  %6071 = vmatprep.subr.bf16.mxu1 %v9763_v16  ;;  %v12038_v36 = vadd.f32 %v5775_v27, %v5735_v28  ;;  %v5737_v37 = vadd.f32 %v5736_v29, %v11817_v38  ;;  %6060 = vmatprep.mubr.bf16.mxu0 %v12007_v11  ;;  %v9797_v15 = vld [vmem:[%s14425_s1 + $0x1600] ss:$16 sps:$4 sm:$0xff]   ;;  %v9802_v16 = vld [vmem:[%s14425_s1 + $0x15e4] ss:$16 sps:$4 sm:$0xff]  }
 0x146   :  { %6101 = vmatprep.mubr.bf16.mxu1 %v12027_v22  ;;  %v5738_v40 = vpop.f32.mrf.mxu0  ;;  %v9803_v24 = vld [vmem:[%s14425_s1 + $0x17e0] ss:$16 sps:$4 sm:$0xff]   ;;  %v9808_v27 = vld [vmem:[%s14425_s1 + $0x15c4] ss:$16 sps:$4 sm:$0xff]  }
 0x147   :  { %v5779_v44 = vpop.f32.mrf.mxu1  ;;  %v12049_v45 = vadd.f32 %v5777_v30, %v5737_v37  ;;  %6031 = vmatpush1.bf16.msra.mxu0 %v9758_v20  ;;  %v9805_v20 = vld [vmem:[%s14425_s1 + $0x17e4] ss:$16 sps:$4 sm:$0xff]   ;;  %v9806_v29 = vld [vmem:[%s14425_s1 + $0x15c0] ss:$16 sps:$4 sm:$0xff]  }
 0x148   :  { %6072 = vmatpush1.bf16.msra.mxu1 %v9761_v21  ;;  %v5739_v46 = vpop.f32.mrf.mxu0  ;;  %6032 = vmatprep.subr.bf16.mxu0 %v9766_v33  ;;  %v9800_v21 = vld [vmem:[%s14425_s1 + $0x15e0] ss:$16 sps:$4 sm:$0xff]   ;;  %v9811_v28 = vld [vmem:[%s14425_s1 + $0x17c4] ss:$16 sps:$4 sm:$0xff]  }
 0x149   :  { %v5780_v38 = vpop.f32.mrf.mxu1  ;;  %6073 = vmatprep.subr.bf16.mxu1 %v9769_v34  ;;  %v9809_v30 = vld [vmem:[%s14425_s1 + $0x17c0] ss:$16 sps:$4 sm:$0xff]   ;;  %v9814_v33 = vld [vmem:[%s14425_s1 + $0x15a4] ss:$16 sps:$4 sm:$0xff]  }
 0x14a   :  { %v9817_v34 = vld [vmem:[%s14425_s1 + $0x17a4] ss:$16 sps:$4 sm:$0xff]   ;;  %v9812_v37 = vld [vmem:[%s14425_s1 + $0x15a0] ss:$16 sps:$4 sm:$0xff]  }
 0x14b   :  { %6033 = vmatpush1.bf16.msra.mxu0 %v9764_v31  ;;  %v9815_v31 = vld [vmem:[%s14425_s1 + $0x17a0] ss:$16 sps:$4 sm:$0xff]   ;;  %v9823_v40 = vld [vmem:[%s14425_s1 + $0x1784] ss:$16 sps:$4 sm:$0xff]  }
 0x14c   :  { %6074 = vmatpush1.bf16.msra.mxu1 %v9767_v32  ;;  %6034 = vmatprep.subr.bf16.mxu0 %v9772_v47  ;;  %v9820_v32 = vld [vmem:[%s14425_s1 + $0x1584] ss:$16 sps:$4 sm:$0xff]   ;;  %v9818_v44 = vld [vmem:[%s14425_s1 + $0x1580] ss:$16 sps:$4 sm:$0xff]  }
 0x14d   :  { %6075 = vmatprep.subr.bf16.mxu1 %v9775_v50  ;;  %v9821_v46 = vld [vmem:[%s14425_s1 + $0x1780] ss:$16 sps:$4 sm:$0xff]   ;;  %v9826_v38 = vld [vmem:[%s14425_s1 + $0x1564] ss:$16 sps:$4 sm:$0xff]  }
 0x14e   :  { %v9829_v47 = vld [vmem:[%s14425_s1 + $0x1764] ss:$16 sps:$4 sm:$0xff]   ;;  %v9824_v50 = vld [vmem:[%s14425_s1 + $0x1560] ss:$16 sps:$4 sm:$0xff]  }
 0x14f   :  { %6035 = vmatpush1.bf16.msra.mxu0 %v9770_v51  ;;  %v9827_v51 = vld [vmem:[%s14425_s1 + $0x1760] ss:$16 sps:$4 sm:$0xff]  }
 0x150   :  { %6076 = vmatpush1.bf16.msra.mxu1 %v9773_v52  ;;  %6036 = vmatprep.subr.bf16.mxu0 %v9778_v35  ;;  %v9832_v52 = vld [vmem:[%s14425_s1 + $0x1544] ss:$16 sps:$4 sm:$0xff]  }
 0x151   :  { %6077 = vmatprep.subr.bf16.mxu1 %v9781_v55  ;;  %v9835_v35 = vld [vmem:[%s14425_s1 + $0x1744] ss:$16 sps:$4 sm:$0xff]   ;;  %v9830_v55 = vld [vmem:[%s14425_s1 + $0x1540] ss:$16 sps:$4 sm:$0xff]  }
 0x153   :  { %6037 = vmatpush1.bf16.msra.mxu0 %v9776_v56  ;;  %v9833_v56 = vld [vmem:[%s14425_s1 + $0x1740] ss:$16 sps:$4 sm:$0xff]  }
 0x154   :  { %6078 = vmatpush1.bf16.msra.mxu1 %v9779_v63  ;;  %6038 = vmatprep.subr.bf16.mxu0 %v9784_v58  ;;  %v9838_v63 = vld [vmem:[%s14425_s1 + $0x1524] ss:$16 sps:$4 sm:$0xff]  }
 0x155   :  { %6079 = vmatprep.subr.bf16.mxu1 %v9787_v61  ;;  %v9841_v58 = vld [vmem:[%s14425_s1 + $0x1724] ss:$16 sps:$4 sm:$0xff]   ;;  %v12192_v61 = vld.sshfl [vmem:[%s14426_s0 + $0x18] sm:$0x33 pattern:$0x75316420] }
 0x157   :  { %6039 = vmatpush1.bf16.msra.mxu0 %v9782_v62  ;;  %v9836_v62 = vld [vmem:[%s14425_s1 + $0x1520] ss:$16 sps:$4 sm:$0xff]  }
 0x158   :  { %6080 = vmatpush1.bf16.msra.mxu1 %v9785_v1  ;;  %6040 = vmatprep.subr.bf16.mxu0 %v9790_v2  ;;  %v9839_v1 = vld [vmem:[%s14425_s1 + $0x1720] ss:$16 sps:$4 sm:$0xff]   ;;  %v9844_v2 = vld [vmem:[%s14425_s1 + $0x1504] ss:$16 sps:$4 sm:$0xff]  }
 0x159   :  { %6081 = vmatprep.subr.bf16.mxu1 %v9793_v5  ;;  %v9847_v5 = vld [vmem:[%s14425_s1 + $0x1704] ss:$16 sps:$4 sm:$0xff]  }
 0x15b   :  { %6041 = vmatpush1.bf16.msra.mxu0 %v9788_v7  ;;  %v1093_v7 = vcombine.high %v12192_v61, %v12192_v61 }
 0x15c   :  { %6082 = vmatpush1.bf16.msra.mxu1 %v9791_v8  ;;  %6042 = vmatprep.subr.bf16.mxu0 %v9796_v4  ;;  %v12210_v8 = vrot.slane %v11968_v57, %v11027_v49  ;;  %v9842_v4 = vld [vmem:[%s14425_s1 + $0x1500] ss:$16 sps:$4 sm:$0xff]   ;;  %v9854_v57 = vld [vmem:[%s14425_s1 + $0x1ae4] ss:$16 sps:$4 sm:$0xff]  }
 0x15d   :  { %6083 = vmatprep.subr.bf16.mxu1 %v9799_v9  ;;  %v9845_v9 = vld [vmem:[%s14425_s1 + $0x1700] ss:$16 sps:$4 sm:$0xff]  }
 0x15f   :  { %6043 = vmatpush1.bf16.msra.mxu0 %v9794_v10  ;;  %v9851_v10 = vld [vmem:[%s14425_s1 + $0x18e4] ss:$16 sps:$4 sm:$0xff]  }
 0x160   :  { %6084 = vmatpush1.bf16.msra.mxu1 %v9797_v15  ;;  %6044 = vmatprep.subr.bf16.mxu0 %v9802_v16  ;;  %v9849_v15 = vld [vmem:[%s14425_s1 + $0x18e0] ss:$16 sps:$4 sm:$0xff]  }
 0x161   :  { %6085 = vmatprep.subr.bf16.mxu1 %v9805_v20  ;;  %v9852_v16 = vld [vmem:[%s14425_s1 + $0x1ae0] ss:$16 sps:$4 sm:$0xff]   ;;  %v12231_v20 = vrot.slane %v1093_v7, %v11027_v49  ;;  %v9881_v7 = vld [vmem:[%s14425_s1 + $0x1844] ss:$16 sps:$4 sm:$0xff]  }
 0x163   :  { %6045 = vmatpush2.bf16.msra.mxu0 %v9800_v21  ;;  %v12235_v21 = vcombine.high %v12210_v8, %v12210_v8 }
 0x164   :  { %6086 = vmatpush2.bf16.msra.mxu1 %v9803_v24  ;;  %6046 = vmatprep.subr.bf16.mxu0 %v9808_v27  ;;  %v9857_v24 = vld [vmem:[%s14425_s1 + $0x18c4] ss:$16 sps:$4 sm:$0xff]  }
 0x165   :  { %6087 = vmatprep.subr.bf16.mxu1 %v9811_v28  ;;  %v9860_v27 = vld [vmem:[%s14425_s1 + $0x1ac4] ss:$16 sps:$4 sm:$0xff]   ;;  %v9855_v28 = vld [vmem:[%s14425_s1 + $0x18c0] ss:$16 sps:$4 sm:$0xff]  }
 0x167   :  { %6047 = vmatpush2.bf16.msra.mxu0 %v9806_v29  ;;  %v9858_v29 = vld [vmem:[%s14425_s1 + $0x1ac0] ss:$16 sps:$4 sm:$0xff]  }
 0x168   :  { %6088 = vmatpush2.bf16.msra.mxu1 %v9809_v30  ;;  %6048 = vmatprep.subr.bf16.mxu0 %v9814_v33  ;;  %v12251_v30 = vcombine.high %v12231_v20, %v12231_v20 }
 0x169   :  { %6089 = vmatprep.subr.bf16.mxu1 %v9817_v34 }
 0x16b   :  { %6049 = vmatpush2.bf16.msra.mxu0 %v9812_v37 }
 0x16c   :  { %6090 = vmatpush2.bf16.msra.mxu1 %v9815_v31  ;;  %6050 = vmatprep.subr.bf16.mxu0 %v9820_v32 }
 0x16d   :  { %6091 = vmatprep.subr.bf16.mxu1 %v9823_v40  ;;  %v9863_v40 = vld [vmem:[%s14425_s1 + $0x18a4] ss:$16 sps:$4 sm:$0xff]  }
 0x16f   :  { %6051 = vmatpush2.bf16.msra.mxu0 %v9818_v44  ;;  %v9866_v44 = vld [vmem:[%s14425_s1 + $0x1aa4] ss:$16 sps:$4 sm:$0xff]  }
 0x170   :  { %6092 = vmatpush2.bf16.msra.mxu1 %v9821_v46  ;;  %6052 = vmatprep.subr.bf16.mxu0 %v9826_v38 }
 0x171   :  { %6093 = vmatprep.subr.bf16.mxu1 %v9829_v47  ;;  %v9864_v47 = vld [vmem:[%s14425_s1 + $0x1aa0] ss:$16 sps:$4 sm:$0xff]  }
 0x173   :  { %6053 = vmatpush2.bf16.msra.mxu0 %v9824_v50 }
 0x174   :  { %6094 = vmatpush2.bf16.msra.mxu1 %v9827_v51  ;;  %6054 = vmatprep.subr.bf16.mxu0 %v9832_v52 }
 0x175   :  { %6095 = vmatprep.subr.bf16.mxu1 %v9835_v35 }
 0x177   :  { %6055 = vmatpush2.bf16.msra.mxu0 %v9830_v55  ;;  %v9869_v55 = vld [vmem:[%s14425_s1 + $0x1884] ss:$16 sps:$4 sm:$0xff]  }
 0x178   :  { %6096 = vmatpush2.bf16.msra.mxu1 %v9833_v56  ;;  %6056 = vmatprep.subr.bf16.mxu0 %v9838_v63  ;;  %v9872_v56 = vld [vmem:[%s14425_s1 + $0x1a84] ss:$16 sps:$4 sm:$0xff]   ;;  %v9867_v63 = vld [vmem:[%s14425_s1 + $0x1880] ss:$16 sps:$4 sm:$0xff]  }
 0x179   :  { %6097 = vmatprep.subr.bf16.mxu1 %v9841_v58  ;;  %v9870_v58 = vld [vmem:[%s14425_s1 + $0x1a80] ss:$16 sps:$4 sm:$0xff]  }
 0x17b   :  { %6057 = vmatpush2.bf16.msra.mxu0 %v9836_v62  ;;  %v9875_v62 = vld [vmem:[%s14425_s1 + $0x1864] ss:$16 sps:$4 sm:$0xff]  }
 0x17c   :  { %6098 = vmatpush2.bf16.msra.mxu1 %v9839_v1  ;;  %6058 = vmatprep.subr.bf16.mxu0 %v9844_v2  ;;  %v9878_v1 = vld [vmem:[%s14425_s1 + $0x1a64] ss:$16 sps:$4 sm:$0xff]   ;;  %v9873_v2 = vld [vmem:[%s14425_s1 + $0x1860] ss:$16 sps:$4 sm:$0xff]  }
 0x17d   :  { %6099 = vmatprep.subr.bf16.mxu1 %v9847_v5  ;;  %v9876_v5 = vld [vmem:[%s14425_s1 + $0x1a60] ss:$16 sps:$4 sm:$0xff]  }
 0x17f   :  { %6059 = vmatpush2.bf16.msra.mxu0 %v9842_v4  ;;  %v9884_v4 = vld [vmem:[%s14425_s1 + $0x1a44] ss:$16 sps:$4 sm:$0xff]  }
 0x180   :  { %6100 = vmatpush2.bf16.msra.mxu1 %v9845_v9  ;;  %6110 = vmatprep.subr.bf16.mxu0 %v9851_v10  ;;  %v9879_v9 = vld [vmem:[%s14425_s1 + $0x1840] ss:$16 sps:$4 sm:$0xff]  }
 0x181   :  { %6151 = vmatprep.subr.bf16.mxu1 %v9854_v57  ;;  %v9882_v10 = vld [vmem:[%s14425_s1 + $0x1a40] ss:$16 sps:$4 sm:$0xff]   ;;  %v9887_v57 = vld [vmem:[%s14425_s1 + $0x1824] ss:$16 sps:$4 sm:$0xff]  }
 0x182   :  { %v5816_v33 = vpop.f32.mrf.mxu0  ;;  %6061 = vmatmul.mubr.bf16.vlgmr.msra.gmra.mxu0 %v12210_v8 }
 0x183   :  { %v5857_v34 = vpop.f32.mrf.mxu1  ;;  %6102 = vmatmul.mubr.bf16.vlgmr.msra.gmra.mxu1 %v12235_v21  ;;  %v5817_v37 = vadd.f32 %v5816_v33, %v12038_v36  ;;  %6111 = vmatpush1.bf16.msra.mxu0 %v9849_v15  ;;  %v9861_v36 = vld [vmem:[%s14425_s1 + $0x18a0] ss:$16 sps:$4 sm:$0xff]   ;;  %v9890_v15 = vld [vmem:[%s14425_s1 + $0x1a24] ss:$16 sps:$4 sm:$0xff]  }
 0x184   :  { %6152 = vmatpush1.bf16.msra.mxu1 %v9852_v16  ;;  %v5818_v31 = vpop.f32.mrf.mxu0  ;;  %6112 = vmatprep.subr.bf16.mxu0 %v9857_v24  ;;  %v9885_v16 = vld [vmem:[%s14425_s1 + $0x1820] ss:$16 sps:$4 sm:$0xff]  }
 0x185   :  { %v5859_v32 = vpop.f32.mrf.mxu1  ;;  %6153 = vmatprep.subr.bf16.mxu1 %v9860_v27  ;;  %v12262_v46 = vadd.f32 %v5857_v34, %v5817_v37  ;;  %v5819_v38 = vadd.f32 %v5818_v31, %v12049_v45  ;;  %6142 = vmatprep.mubr.bf16.mxu0 %v12231_v20  ;;  %v9888_v24 = vld [vmem:[%s14425_s1 + $0x1a20] ss:$16 sps:$4 sm:$0xff]   ;;  %v9893_v27 = vld [vmem:[%s14425_s1 + $0x1804] ss:$16 sps:$4 sm:$0xff]  }
 0x186   :  { %6183 = vmatprep.mubr.bf16.mxu1 %v12251_v30  ;;  %v5820_v50 = vpop.f32.mrf.mxu0  ;;  %v9894_v33 = vld [vmem:[%s14425_s1 + $0x1a00] ss:$16 sps:$4 sm:$0xff]   ;;  %v9899_v34 = vld [vmem:[%s14425_s1 + $0x19e4] ss:$16 sps:$4 sm:$0xff]  }
 0x187   :  { %v5861_v51 = vpop.f32.mrf.mxu1  ;;  %v12273_v52 = vadd.f32 %v5859_v32, %v5819_v38  ;;  %6113 = vmatpush1.bf16.msra.mxu0 %v9855_v28  ;;  %v9896_v28 = vld [vmem:[%s14425_s1 + $0x1a04] ss:$16 sps:$4 sm:$0xff]   ;;  %v9897_v31 = vld [vmem:[%s14425_s1 + $0x19e0] ss:$16 sps:$4 sm:$0xff]  }
 0x188   :  { %6154 = vmatpush1.bf16.msra.mxu1 %v9858_v29  ;;  %v5821_v35 = vpop.f32.mrf.mxu0  ;;  %6114 = vmatprep.subr.bf16.mxu0 %v9863_v40  ;;  %v9891_v29 = vld [vmem:[%s14425_s1 + $0x1800] ss:$16 sps:$4 sm:$0xff]   ;;  %v9902_v37 = vld [vmem:[%s14425_s1 + $0x1be4] ss:$16 sps:$4 sm:$0xff]  }
 0x189   :  { %v5862_v45 = vpop.f32.mrf.mxu1  ;;  %6155 = vmatprep.subr.bf16.mxu1 %v9866_v44  ;;  %v9900_v32 = vld [vmem:[%s14425_s1 + $0x1be0] ss:$16 sps:$4 sm:$0xff]   ;;  %v9905_v40 = vld [vmem:[%s14425_s1 + $0x19c4] ss:$16 sps:$4 sm:$0xff]  }
 0x18a   :  { %v9908_v44 = vld [vmem:[%s14425_s1 + $0x1bc4] ss:$16 sps:$4 sm:$0xff]   ;;  %v9903_v38 = vld [vmem:[%s14425_s1 + $0x19c0] ss:$16 sps:$4 sm:$0xff]  }
 0x18b   :  { %6115 = vmatpush1.bf16.msra.mxu0 %v9861_v36  ;;  %v9906_v36 = vld [vmem:[%s14425_s1 + $0x1bc0] ss:$16 sps:$4 sm:$0xff]   ;;  %v9914_v50 = vld [vmem:[%s14425_s1 + $0x1ba4] ss:$16 sps:$4 sm:$0xff]  }
 0x18c   :  { %6156 = vmatpush1.bf16.msra.mxu1 %v9864_v47  ;;  %6116 = vmatprep.subr.bf16.mxu0 %v9869_v55  ;;  %v9911_v47 = vld [vmem:[%s14425_s1 + $0x19a4] ss:$16 sps:$4 sm:$0xff]   ;;  %v9909_v51 = vld [vmem:[%s14425_s1 + $0x19a0] ss:$16 sps:$4 sm:$0xff]  }
 0x18d   :  { %6157 = vmatprep.subr.bf16.mxu1 %v9872_v56  ;;  %v9912_v35 = vld [vmem:[%s14425_s1 + $0x1ba0] ss:$16 sps:$4 sm:$0xff]   ;;  %v9917_v45 = vld [vmem:[%s14425_s1 + $0x1984] ss:$16 sps:$4 sm:$0xff]  }
 0x18e   :  { %v9920_v55 = vld [vmem:[%s14425_s1 + $0x1b84] ss:$16 sps:$4 sm:$0xff]   ;;  %v9915_v56 = vld [vmem:[%s14425_s1 + $0x1980] ss:$16 sps:$4 sm:$0xff]  }
 0x18f   :  { %6117 = vmatpush1.bf16.msra.mxu0 %v9867_v63  ;;  %v9918_v63 = vld [vmem:[%s14425_s1 + $0x1b80] ss:$16 sps:$4 sm:$0xff]  }
 0x190   :  { %6158 = vmatpush1.bf16.msra.mxu1 %v9870_v58  ;;  %6118 = vmatprep.subr.bf16.mxu0 %v9875_v62  ;;  %v9923_v58 = vld [vmem:[%s14425_s1 + $0x1964] ss:$16 sps:$4 sm:$0xff]  }
 0x191   :  { %6159 = vmatprep.subr.bf16.mxu1 %v9878_v1  ;;  %v9926_v62 = vld [vmem:[%s14425_s1 + $0x1b64] ss:$16 sps:$4 sm:$0xff]   ;;  %v9921_v1 = vld [vmem:[%s14425_s1 + $0x1960] ss:$16 sps:$4 sm:$0xff]  }
 0x193   :  { %6119 = vmatpush1.bf16.msra.mxu0 %v9873_v2  ;;  %v9924_v2 = vld [vmem:[%s14425_s1 + $0x1b60] ss:$16 sps:$4 sm:$0xff]  }
 0x194   :  { %6160 = vmatpush1.bf16.msra.mxu1 %v9876_v5  ;;  %6120 = vmatprep.subr.bf16.mxu0 %v9881_v7  ;;  %v9929_v5 = vld [vmem:[%s14425_s1 + $0x1944] ss:$16 sps:$4 sm:$0xff]  }
 0x195   :  { %6161 = vmatprep.subr.bf16.mxu1 %v9884_v4  ;;  %v9932_v7 = vld [vmem:[%s14425_s1 + $0x1b44] ss:$16 sps:$4 sm:$0xff]   ;;  %v9927_v4 = vld [vmem:[%s14425_s1 + $0x1940] ss:$16 sps:$4 sm:$0xff]  }
 0x197   :  { %6121 = vmatpush1.bf16.msra.mxu0 %v9879_v9  ;;  %v9930_v9 = vld [vmem:[%s14425_s1 + $0x1b40] ss:$16 sps:$4 sm:$0xff]  }
 0x198   :  { %6162 = vmatpush1.bf16.msra.mxu1 %v9882_v10  ;;  %6122 = vmatprep.subr.bf16.mxu0 %v9887_v57  ;;  %v9935_v10 = vld [vmem:[%s14425_s1 + $0x1924] ss:$16 sps:$4 sm:$0xff]  }
 0x199   :  { %6163 = vmatprep.subr.bf16.mxu1 %v9890_v15  ;;  %v9938_v57 = vld [vmem:[%s14425_s1 + $0x1b24] ss:$16 sps:$4 sm:$0xff]   ;;  %v9933_v15 = vld [vmem:[%s14425_s1 + $0x1920] ss:$16 sps:$4 sm:$0xff]  }
 0x19b   :  { %6123 = vmatpush1.bf16.msra.mxu0 %v9885_v16  ;;  %v9936_v16 = vld [vmem:[%s14425_s1 + $0x1b20] ss:$16 sps:$4 sm:$0xff]  }
 0x19c   :  { %6164 = vmatpush1.bf16.msra.mxu1 %v9888_v24  ;;  %6124 = vmatprep.subr.bf16.mxu0 %v9893_v27  ;;  %v9941_v24 = vld [vmem:[%s14425_s1 + $0x1904] ss:$16 sps:$4 sm:$0xff]  }
 0x19d   :  { %6165 = vmatprep.subr.bf16.mxu1 %v9896_v28  ;;  %v9944_v27 = vld [vmem:[%s14425_s1 + $0x1b04] ss:$16 sps:$4 sm:$0xff]   ;;  %v12427_v28 = vrot.slane %v12192_v61, %v11027_v49  ;;  %v9950_v49 = vld [vmem:[%s14425_s1 + $0x2ec] ss:$16 sps:$4 sm:$0xff]   ;;  %v9945_v61 = vld [vmem:[%s14425_s1 + $0xe8] ss:$16 sps:$4 sm:$0xff]  }
 0x19f   :  { %6125 = vmatpush1.bf16.msra.mxu0 %v9891_v29  ;;  %v9939_v29 = vld [vmem:[%s14425_s1 + $0x1900] ss:$16 sps:$4 sm:$0xff]  }
 0x1a0   :  { %6166 = vmatpush1.bf16.msra.mxu1 %v9894_v33  ;;  %6126 = vmatprep.subr.bf16.mxu0 %v9899_v34  ;;  %v9942_v33 = vld [vmem:[%s14425_s1 + $0x1b00] ss:$16 sps:$4 sm:$0xff]   ;;  %v9947_v34 = vld [vmem:[%s14425_s1 + $0xec] ss:$16 sps:$4 sm:$0xff]  }
 0x1a1   :  { %6167 = vmatprep.subr.bf16.mxu1 %v9902_v37  ;;  %v9948_v37 = vld [vmem:[%s14425_s1 + $0x2e8] ss:$16 sps:$4 sm:$0xff]  }
 0x1a3   :  { %6127 = vmatpush2.bf16.msra.mxu0 %v9897_v31  ;;  %v12449_v31 = vcombine.high %v12427_v28, %v12427_v28 }
 0x1a4   :  { %6168 = vmatpush2.bf16.msra.mxu1 %v9900_v32  ;;  %6128 = vmatprep.subr.bf16.mxu0 %v9905_v40  ;;  %v9953_v32 = vld [vmem:[%s14425_s1 + $0xcc] ss:$16 sps:$4 sm:$0xff]  }
 0x1a5   :  { %6169 = vmatprep.subr.bf16.mxu1 %v9908_v44  ;;  %v9956_v40 = vld [vmem:[%s14425_s1 + $0x2cc] ss:$16 sps:$4 sm:$0xff]   ;;  %v9951_v44 = vld [vmem:[%s14425_s1 + $0xc8] ss:$16 sps:$4 sm:$0xff]  }
 0x1a7   :  { %6129 = vmatpush2.bf16.msra.mxu0 %v9903_v38  ;;  %v9954_v38 = vld [vmem:[%s14425_s1 + $0x2c8] ss:$16 sps:$4 sm:$0xff]  }
 0x1a8   :  { %6170 = vmatpush2.bf16.msra.mxu1 %v9906_v36  ;;  %6130 = vmatprep.subr.bf16.mxu0 %v9911_v47 }
 0x1a9   :  { %6171 = vmatprep.subr.bf16.mxu1 %v9914_v50 }
 0x1ab   :  { %6131 = vmatpush2.bf16.msra.mxu0 %v9909_v51 }
 0x1ac   :  { %6172 = vmatpush2.bf16.msra.mxu1 %v9912_v35  ;;  %6132 = vmatprep.subr.bf16.mxu0 %v9917_v45  ;;  %v9959_v45 = vld [vmem:[%s14425_s1 + $0xac] ss:$16 sps:$4 sm:$0xff]  }
 0x1ad   :  { %6173 = vmatprep.subr.bf16.mxu1 %v9920_v55  ;;  %v9962_v55 = vld [vmem:[%s14425_s1 + $0x2ac] ss:$16 sps:$4 sm:$0xff]  }
 0x1af   :  { %6133 = vmatpush2.bf16.msra.mxu0 %v9915_v56 }
 0x1b0   :  { %6174 = vmatpush2.bf16.msra.mxu1 %v9918_v63  ;;  %6134 = vmatprep.subr.bf16.mxu0 %v9923_v58  ;;  %v9960_v58 = vld [vmem:[%s14425_s1 + $0x2a8] ss:$16 sps:$4 sm:$0xff]  }
 0x1b1   :  { %6175 = vmatprep.subr.bf16.mxu1 %v9926_v62 }
 0x1b3   :  { %6135 = vmatpush2.bf16.msra.mxu0 %v9921_v1 }
 0x1b4   :  { %6176 = vmatpush2.bf16.msra.mxu1 %v9924_v2  ;;  %6136 = vmatprep.subr.bf16.mxu0 %v9929_v5 }
 0x1b5   :  { %6177 = vmatprep.subr.bf16.mxu1 %v9932_v7  ;;  %v9965_v7 = vld [vmem:[%s14425_s1 + $0x8c] ss:$16 sps:$4 sm:$0xff]  }
 0x1b7   :  { %6137 = vmatpush2.bf16.msra.mxu0 %v9927_v4  ;;  %v9966_v4 = vld [vmem:[%s14425_s1 + $0x288] ss:$16 sps:$4 sm:$0xff]  }
 0x1b8   :  { %6178 = vmatpush2.bf16.msra.mxu1 %v9930_v9  ;;  %6138 = vmatprep.subr.bf16.mxu0 %v9935_v10  ;;  %v9971_v9 = vld [vmem:[%s14425_s1 + $0x6c] ss:$16 sps:$4 sm:$0xff]  }
 0x1b9   :  { %6179 = vmatprep.subr.bf16.mxu1 %v9938_v57  ;;  %v9974_v10 = vld [vmem:[%s14425_s1 + $0x26c] ss:$16 sps:$4 sm:$0xff]   ;;  %v9969_v57 = vld [vmem:[%s14425_s1 + $0x68] ss:$16 sps:$4 sm:$0xff]  }
 0x1bb   :  { %6139 = vmatpush2.bf16.msra.mxu0 %v9933_v15  ;;  %v9972_v15 = vld [vmem:[%s14425_s1 + $0x268] ss:$16 sps:$4 sm:$0xff]  }
 0x1bc   :  { %6180 = vmatpush2.bf16.msra.mxu1 %v9936_v16  ;;  %6140 = vmatprep.subr.bf16.mxu0 %v9941_v24  ;;  %v9977_v16 = vld [vmem:[%s14425_s1 + $0x4c] ss:$16 sps:$4 sm:$0xff]  }
 0x1bd   :  { %6181 = vmatprep.subr.bf16.mxu1 %v9944_v27  ;;  %v9980_v24 = vld [vmem:[%s14425_s1 + $0x24c] ss:$16 sps:$4 sm:$0xff]   ;;  %v9975_v27 = vld [vmem:[%s14425_s1 + $0x48] ss:$16 sps:$4 sm:$0xff]  }
 0x1bf   :  { %6141 = vmatpush2.bf16.msra.mxu0 %v9939_v29  ;;  %v9978_v29 = vld [vmem:[%s14425_s1 + $0x248] ss:$16 sps:$4 sm:$0xff]  }
 0x1c0   :  { %6182 = vmatpush2.bf16.msra.mxu1 %v9942_v33  ;;  %6192 = vmatprep.subr.bf16.mxu0 %v9947_v34  ;;  %v9983_v33 = vld [vmem:[%s14425_s1 + $0x2c] ss:$16 sps:$4 sm:$0xff]  }
 0x1c1   :  { %6233 = vmatprep.subr.bf16.mxu1 %v9950_v49  ;;  %v9986_v34 = vld [vmem:[%s14425_s1 + $0x22c] ss:$16 sps:$4 sm:$0xff]   ;;  %v9981_v49 = vld [vmem:[%s14425_s1 + $0x28] ss:$16 sps:$4 sm:$0xff]  }
 0x1c2   :  { %v5898_v36 = vpop.f32.mrf.mxu0  ;;  %6143 = vmatmul.mubr.bf16.vlgmr.msra.gmra.mxu0 %v12427_v28 }
 0x1c3   :  { %v5939_v47 = vpop.f32.mrf.mxu1  ;;  %6184 = vmatmul.mubr.bf16.vlgmr.msra.gmra.mxu1 %v12449_v31  ;;  %v5899_v50 = vadd.f32 %v5898_v36, %v12262_v46  ;;  %6193 = vmatpush1.bf16.msra.mxu0 %v9945_v61  ;;  %v9957_v46 = vld [vmem:[%s14425_s1 + $0xa8] ss:$16 sps:$4 sm:$0xff]   ;;  %v9998_v36 = vld [vmem:[%s14425_s1 + $0x3ec] ss:$16 sps:$4 sm:$0xff]  }
 0x1c4   :  { %6234 = vmatpush1.bf16.msra.mxu1 %v9948_v37  ;;  %v5900_v51 = vpop.f32.mrf.mxu0  ;;  %6194 = vmatprep.subr.bf16.mxu0 %v9953_v32  ;;  %v9984_v61 = vld [vmem:[%s14425_s1 + $0x228] ss:$16 sps:$4 sm:$0xff]   ;;  %v9989_v37 = vld [vmem:[%s14425_s1 + $0xc] ss:$16 sps:$4 sm:$0xff]  }
 0x1c5   :  { %v5941_v35 = vpop.f32.mrf.mxu1  ;;  %6235 = vmatprep.subr.bf16.mxu1 %v9956_v40  ;;  %v12472_v56 = vadd.f32 %v5939_v47, %v5899_v50  ;;  %v5901_v63 = vadd.f32 %v5900_v51, %v12273_v52  ;;  %6224 = vmatprep.mubr.bf16.mxu0 %v11055_v60  ;;  %v9968_v60 = vld [vmem:[%s14425_s1 + $0x28c] ss:$16 sps:$4 sm:$0xff]   ;;  %v9987_v40 = vld [vmem:[%s14425_s1 + $0x8] ss:$16 sps:$4 sm:$0xff]  }
 0x1c6   :  { %6265 = vmatprep.mubr.bf16.mxu1 %v11068_v0  ;;  %v5902_v62 = vpop.f32.mrf.mxu0  ;;  %v9963_v0 = vld [vmem:[%s14425_s1 + $0x88] ss:$16 sps:$4 sm:$0xff]   ;;  %v9992_v32 = vld [vmem:[%s14425_s1 + $0x20c] ss:$16 sps:$4 sm:$0xff]  }
 0x1c7   :  { %v5943_v1 = vpop.f32.mrf.mxu1  ;;  %v12483_v2 = vadd.f32 %v5941_v35, %v5901_v63  ;;  %6195 = vmatpush1.bf16.msra.mxu0 %v9951_v44  ;;  %v9990_v44 = vld [vmem:[%s14425_s1 + $0x208] ss:$16 sps:$4 sm:$0xff]   ;;  %v10001_v51 = vld [vmem:[%s14425_s1 + $0x1cc] ss:$16 sps:$4 sm:$0xff]  }
 0x1c8   :  { %6236 = vmatpush1.bf16.msra.mxu1 %v9954_v38  ;;  %v5903_v5 = vpop.f32.mrf.mxu0  ;;  %6196 = vmatprep.subr.bf16.mxu0 %v9959_v45  ;;  %v9995_v38 = vld [vmem:[%s14425_s1 + $0x1ec] ss:$16 sps:$4 sm:$0xff]   ;;  %v9993_v47 = vld [vmem:[%s14425_s1 + $0x1e8] ss:$16 sps:$4 sm:$0xff]  }
 0x1c9   :  { %v5944_v52 = vpop.f32.mrf.mxu1  ;;  %6237 = vmatprep.subr.bf16.mxu1 %v9962_v55  ;;  %v9996_v50 = vld [vmem:[%s14425_s1 + $0x3e8] ss:$16 sps:$4 sm:$0xff]   ;;  %v10004_v35 = vld [vmem:[%s14425_s1 + $0x3cc] ss:$16 sps:$4 sm:$0xff]  }
 0x1ca   :  { %v9999_v45 = vld [vmem:[%s14425_s1 + $0x1c8] ss:$16 sps:$4 sm:$0xff]   ;;  %v10007_v63 = vld [vmem:[%s14425_s1 + $0x1ac] ss:$16 sps:$4 sm:$0xff]  }
 0x1cb   :  { %6197 = vmatpush1.bf16.msra.mxu0 %v9957_v46  ;;  %v10002_v55 = vld [vmem:[%s14425_s1 + $0x3c8] ss:$16 sps:$4 sm:$0xff]   ;;  %v10010_v46 = vld [vmem:[%s14425_s1 + $0x3ac] ss:$16 sps:$4 sm:$0xff]  }
 0x1cc   :  { %6238 = vmatpush1.bf16.msra.mxu1 %v9960_v58  ;;  %6198 = vmatprep.subr.bf16.mxu0 %v9965_v7  ;;  %v10005_v58 = vld [vmem:[%s14425_s1 + $0x1a8] ss:$16 sps:$4 sm:$0xff]   ;;  %v10013_v1 = vld [vmem:[%s14425_s1 + $0x18c] ss:$16 sps:$4 sm:$0xff]  }
 0x1cd   :  { %6239 = vmatprep.subr.bf16.mxu1 %v9968_v60  ;;  %v10008_v62 = vld [vmem:[%s14425_s1 + $0x3a8] ss:$16 sps:$4 sm:$0xff]   ;;  %v10016_v5 = vld [vmem:[%s14425_s1 + $0x38c] ss:$16 sps:$4 sm:$0xff]  }
 0x1ce   :  { %v10011_v52 = vld [vmem:[%s14425_s1 + $0x188] ss:$16 sps:$4 sm:$0xff]   ;;  %v10019_v60 = vld [vmem:[%s14425_s1 + $0x16c] ss:$16 sps:$4 sm:$0xff]  }
 0x1cf   :  { %6199 = vmatpush1.bf16.msra.mxu0 %v9963_v0  ;;  %v10014_v7 = vld [vmem:[%s14425_s1 + $0x388] ss:$16 sps:$4 sm:$0xff]   ;;  %v10022_v0 = vld [vmem:[%s14425_s1 + $0x36c] ss:$16 sps:$4 sm:$0xff]  }
 0x1d0   :  { %6240 = vmatpush1.bf16.msra.mxu1 %v9966_v4  ;;  %6200 = vmatprep.subr.bf16.mxu0 %v9971_v9  ;;  %v10017_v4 = vld [vmem:[%s14425_s1 + $0x168] ss:$16 sps:$4 sm:$0xff]  }
 0x1d1   :  { %6241 = vmatprep.subr.bf16.mxu1 %v9974_v10  ;;  %v10020_v9 = vld [vmem:[%s14425_s1 + $0x368] ss:$16 sps:$4 sm:$0xff]   ;;  %v10025_v10 = vld [vmem:[%s14425_s1 + $0x14c] ss:$16 sps:$4 sm:$0xff]  }
 0x1d3   :  { %6201 = vmatpush1.bf16.msra.mxu0 %v9969_v57  ;;  %v10028_v57 = vld [vmem:[%s14425_s1 + $0x34c] ss:$16 sps:$4 sm:$0xff]  }
 0x1d4   :  { %6242 = vmatpush1.bf16.msra.mxu1 %v9972_v15  ;;  %6202 = vmatprep.subr.bf16.mxu0 %v9977_v16  ;;  %v10023_v15 = vld [vmem:[%s14425_s1 + $0x148] ss:$16 sps:$4 sm:$0xff]  }
 0x1d5   :  { %6243 = vmatprep.subr.bf16.mxu1 %v9980_v24  ;;  %v10026_v16 = vld [vmem:[%s14425_s1 + $0x348] ss:$16 sps:$4 sm:$0xff]   ;;  %v10031_v24 = vld [vmem:[%s14425_s1 + $0x12c] ss:$16 sps:$4 sm:$0xff]  }
 0x1d7   :  { %6203 = vmatpush1.bf16.msra.mxu0 %v9975_v27  ;;  %v10034_v27 = vld [vmem:[%s14425_s1 + $0x32c] ss:$16 sps:$4 sm:$0xff]  }
 0x1d8   :  { %6244 = vmatpush1.bf16.msra.mxu1 %v9978_v29  ;;  %6204 = vmatprep.subr.bf16.mxu0 %v9983_v33  ;;  %v10029_v29 = vld [vmem:[%s14425_s1 + $0x128] ss:$16 sps:$4 sm:$0xff]  }
 0x1d9   :  { %6245 = vmatprep.subr.bf16.mxu1 %v9986_v34  ;;  %v10032_v33 = vld [vmem:[%s14425_s1 + $0x328] ss:$16 sps:$4 sm:$0xff]   ;;  %v10037_v34 = vld [vmem:[%s14425_s1 + $0x10c] ss:$16 sps:$4 sm:$0xff]  }
 0x1db   :  { %6205 = vmatpush1.bf16.msra.mxu0 %v9981_v49  ;;  %v10040_v49 = vld [vmem:[%s14425_s1 + $0x30c] ss:$16 sps:$4 sm:$0xff]  }
 0x1dc   :  { %6246 = vmatpush1.bf16.msra.mxu1 %v9984_v61  ;;  %6206 = vmatprep.subr.bf16.mxu0 %v9989_v37  ;;  %v10035_v61 = vld [vmem:[%s14425_s1 + $0x108] ss:$16 sps:$4 sm:$0xff]  }
 0x1dd   :  { %6247 = vmatprep.subr.bf16.mxu1 %v9992_v32  ;;  %v10038_v37 = vld [vmem:[%s14425_s1 + $0x308] ss:$16 sps:$4 sm:$0xff]   ;;  %v10043_v32 = vld [vmem:[%s14425_s1 + $0x4ec] ss:$16 sps:$4 sm:$0xff]  }
 0x1df   :  { %6207 = vmatpush1.bf16.msra.mxu0 %v9987_v40  ;;  %v10046_v40 = vld [vmem:[%s14425_s1 + $0x6ec] ss:$16 sps:$4 sm:$0xff]  }
 0x1e0   :  { %6248 = vmatpush1.bf16.msra.mxu1 %v9990_v44  ;;  %6208 = vmatprep.subr.bf16.mxu0 %v9995_v38  ;;  %v10041_v44 = vld [vmem:[%s14425_s1 + $0x4e8] ss:$16 sps:$4 sm:$0xff]  }
 0x1e1   :  { %6249 = vmatprep.subr.bf16.mxu1 %v9998_v36  ;;  %v10044_v38 = vld [vmem:[%s14425_s1 + $0x6e8] ss:$16 sps:$4 sm:$0xff]   ;;  %v10049_v36 = vld [vmem:[%s14425_s1 + $0x4cc] ss:$16 sps:$4 sm:$0xff]  }
 0x1e3   :  { %6209 = vmatpush2.bf16.msra.mxu0 %v9993_v47  ;;  %v10052_v47 = vld [vmem:[%s14425_s1 + $0x6cc] ss:$16 sps:$4 sm:$0xff]  }
 0x1e4   :  { %6250 = vmatpush2.bf16.msra.mxu1 %v9996_v50  ;;  %6210 = vmatprep.subr.bf16.mxu0 %v10001_v51 }
 0x1e5   :  { %6251 = vmatprep.subr.bf16.mxu1 %v10004_v35 }
 0x1e7   :  { %6211 = vmatpush2.bf16.msra.mxu0 %v9999_v45  ;;  %v10047_v45 = vld [vmem:[%s14425_s1 + $0x4c8] ss:$16 sps:$4 sm:$0xff]  }
 0x1e8   :  { %6252 = vmatpush2.bf16.msra.mxu1 %v10002_v55  ;;  %6212 = vmatprep.subr.bf16.mxu0 %v10007_v63  ;;  %v10050_v55 = vld [vmem:[%s14425_s1 + $0x6c8] ss:$16 sps:$4 sm:$0xff]  }
 0x1e9   :  { %6253 = vmatprep.subr.bf16.mxu1 %v10010_v46 }
 0x1eb   :  { %6213 = vmatpush2.bf16.msra.mxu0 %v10005_v58 }
 0x1ec   :  { %6254 = vmatpush2.bf16.msra.mxu1 %v10008_v62  ;;  %6214 = vmatprep.subr.bf16.mxu0 %v10013_v1 }
 0x1ed   :  { %6255 = vmatprep.subr.bf16.mxu1 %v10016_v5 }
 0x1ef   :  { %6215 = vmatpush2.bf16.msra.mxu0 %v10011_v52  ;;  %v10053_v52 = vld [vmem:[%s14425_s1 + $0x4a8] ss:$16 sps:$4 sm:$0xff]  }
 0x1f0   :  { %6256 = vmatpush2.bf16.msra.mxu1 %v10014_v7  ;;  %6216 = vmatprep.subr.bf16.mxu0 %v10019_v60  ;;  %v10056_v7 = vld [vmem:[%s14425_s1 + $0x6a8] ss:$16 sps:$4 sm:$0xff]  }
 0x1f1   :  { %6257 = vmatprep.subr.bf16.mxu1 %v10022_v0  ;;  %v10059_v0 = vld [vmem:[%s14425_s1 + $0x488] ss:$16 sps:$4 sm:$0xff]  }
 0x1f3   :  { %6217 = vmatpush2.bf16.msra.mxu0 %v10017_v4  ;;  %v10062_v4 = vld [vmem:[%s14425_s1 + $0x688] ss:$16 sps:$4 sm:$0xff]  }
 0x1f4   :  { %6258 = vmatpush2.bf16.msra.mxu1 %v10020_v9  ;;  %6218 = vmatprep.subr.bf16.mxu0 %v10025_v10  ;;  %v10067_v9 = vld [vmem:[%s14425_s1 + $0x46c] ss:$16 sps:$4 sm:$0xff]  }
 0x1f5   :  { %6259 = vmatprep.subr.bf16.mxu1 %v10028_v57  ;;  %v10070_v10 = vld [vmem:[%s14425_s1 + $0x66c] ss:$16 sps:$4 sm:$0xff]   ;;  %v10065_v57 = vld [vmem:[%s14425_s1 + $0x468] ss:$16 sps:$4 sm:$0xff]  }
 0x1f7   :  { %6219 = vmatpush2.bf16.msra.mxu0 %v10023_v15  ;;  %v10068_v15 = vld [vmem:[%s14425_s1 + $0x668] ss:$16 sps:$4 sm:$0xff]  }
 0x1f8   :  { %6260 = vmatpush2.bf16.msra.mxu1 %v10026_v16  ;;  %6220 = vmatprep.subr.bf16.mxu0 %v10031_v24  ;;  %v10073_v16 = vld [vmem:[%s14425_s1 + $0x44c] ss:$16 sps:$4 sm:$0xff]  }
 0x1f9   :  { %6261 = vmatprep.subr.bf16.mxu1 %v10034_v27  ;;  %v10076_v24 = vld [vmem:[%s14425_s1 + $0x64c] ss:$16 sps:$4 sm:$0xff]   ;;  %v10071_v27 = vld [vmem:[%s14425_s1 + $0x448] ss:$16 sps:$4 sm:$0xff]  }
 0x1fb   :  { %6221 = vmatpush2.bf16.msra.mxu0 %v10029_v29  ;;  %v10074_v29 = vld [vmem:[%s14425_s1 + $0x648] ss:$16 sps:$4 sm:$0xff]  }
 0x1fc   :  { %6262 = vmatpush2.bf16.msra.mxu1 %v10032_v33  ;;  %6222 = vmatprep.subr.bf16.mxu0 %v10037_v34  ;;  %v10079_v33 = vld [vmem:[%s14425_s1 + $0x42c] ss:$16 sps:$4 sm:$0xff]  }
 0x1fd   :  { %6263 = vmatprep.subr.bf16.mxu1 %v10040_v49  ;;  %v10082_v34 = vld [vmem:[%s14425_s1 + $0x62c] ss:$16 sps:$4 sm:$0xff]   ;;  %v10077_v49 = vld [vmem:[%s14425_s1 + $0x428] ss:$16 sps:$4 sm:$0xff]  }
 0x1ff   :  { %6223 = vmatpush2.bf16.msra.mxu0 %v10035_v61  ;;  %v10080_v61 = vld [vmem:[%s14425_s1 + $0x628] ss:$16 sps:$4 sm:$0xff]  }
 0x200   :  { %6264 = vmatpush2.bf16.msra.mxu1 %v10038_v37  ;;  %6274 = vmatprep.subr.bf16.mxu0 %v10043_v32  ;;  %v10085_v37 = vld [vmem:[%s14425_s1 + $0x40c] ss:$16 sps:$4 sm:$0xff]  }
 0x201   :  { %6315 = vmatprep.subr.bf16.mxu1 %v10046_v40  ;;  %v10088_v32 = vld [vmem:[%s14425_s1 + $0x60c] ss:$16 sps:$4 sm:$0xff]   ;;  %v10083_v40 = vld [vmem:[%s14425_s1 + $0x408] ss:$16 sps:$4 sm:$0xff]  }
 0x202   :  { %v5980_v50 = vpop.f32.mrf.mxu0  ;;  %6225 = vmatmul.mubr.bf16.vlgmr.msra.gmra.mxu0 %v11105_v13  ;;  %v10055_v13 = vld [vmem:[%s14425_s1 + $0x4ac] ss:$16 sps:$4 sm:$0xff]  }
 0x203   :  { %v6021_v51 = vpop.f32.mrf.mxu1  ;;  %6266 = vmatmul.mubr.bf16.vlgmr.msra.gmra.mxu1 %v11121_v18  ;;  %v5981_v35 = vadd.f32 %v5980_v50, %v12472_v56  ;;  %6275 = vmatpush1.bf16.msra.mxu0 %v10041_v44  ;;  %v10058_v18 = vld [vmem:[%s14425_s1 + $0x6ac] ss:$16 sps:$4 sm:$0xff]   ;;  %v10086_v44 = vld [vmem:[%s14425_s1 + $0x608] ss:$16 sps:$4 sm:$0xff]  }
 0x204   :  { %6316 = vmatpush1.bf16.msra.mxu1 %v10044_v38  ;;  %v5982_v63 = vpop.f32.mrf.mxu0  ;;  %6276 = vmatprep.subr.bf16.mxu0 %v10049_v36  ;;  %v10091_v38 = vld [vmem:[%s14425_s1 + $0x5ec] ss:$16 sps:$4 sm:$0xff]   ;;  %v10092_v50 = vld [vmem:[%s14425_s1 + $0x7e8] ss:$16 sps:$4 sm:$0xff]  }
 0x205   :  { %v6023_v46 = vpop.f32.mrf.mxu1  ;;  %6317 = vmatprep.subr.bf16.mxu1 %v10052_v47  ;;  %v12674_v56 = vadd.f32 %v6021_v51, %v5981_v35  ;;  %v5983_v58 = vadd.f32 %v5982_v63, %v12483_v2  ;;  %6306 = vmatprep.mubr.bf16.mxu0 %v11117_v17  ;;  %v10061_v17 = vld [vmem:[%s14425_s1 + $0x48c] ss:$16 sps:$4 sm:$0xff]   ;;  %v10089_v47 = vld [vmem:[%s14425_s1 + $0x5e8] ss:$16 sps:$4 sm:$0xff]  }
 0x206   :  { %6347 = vmatprep.mubr.bf16.mxu1 %v11137_v23  ;;  %v5984_v62 = vpop.f32.mrf.mxu0  ;;  %v10064_v23 = vld [vmem:[%s14425_s1 + $0x68c] ss:$16 sps:$4 sm:$0xff]  }
 0x207   :  { %v6025_v1 = vpop.f32.mrf.mxu1  ;;  %v12679_v5 = vadd.f32 %v6023_v46, %v5983_v58  ;;  %6277 = vmatpush1.bf16.msra.mxu0 %v10047_v45  ;;  %v10094_v36 = vld [vmem:[%s14425_s1 + $0x7ec] ss:$16 sps:$4 sm:$0xff]   ;;  %v10095_v45 = vld [vmem:[%s14425_s1 + $0x5c8] ss:$16 sps:$4 sm:$0xff]  }
 0x208   :  { %6318 = vmatpush1.bf16.msra.mxu1 %v10050_v55  ;;  %v5985_v60 = vpop.f32.mrf.mxu0  ;;  %6278 = vmatprep.subr.bf16.mxu0 %v10055_v13  ;;  %v10097_v51 = vld [vmem:[%s14425_s1 + $0x5cc] ss:$16 sps:$4 sm:$0xff]   ;;  %v10098_v55 = vld [vmem:[%s14425_s1 + $0x7c8] ss:$16 sps:$4 sm:$0xff]  }
 0x209   :  { %v6026_v2 = vpop.f32.mrf.mxu1  ;;  %6319 = vmatprep.subr.bf16.mxu1 %v10058_v18  ;;  %v10100_v35 = vld [vmem:[%s14425_s1 + $0x7cc] ss:$16 sps:$4 sm:$0xff]   ;;  %v10101_v13 = vld [vmem:[%s14425_s1 + $0x5a8] ss:$16 sps:$4 sm:$0xff]  }
 0x20a   :  { %v10103_v63 = vld [vmem:[%s14425_s1 + $0x5ac] ss:$16 sps:$4 sm:$0xff]   ;;  %v10104_v18 = vld [vmem:[%s14425_s1 + $0x7a8] ss:$16 sps:$4 sm:$0xff]  }
 0x20b   :  { %6279 = vmatpush1.bf16.msra.mxu0 %v10053_v52  ;;  %v10106_v46 = vld [vmem:[%s14425_s1 + $0x7ac] ss:$16 sps:$4 sm:$0xff]   ;;  %v10107_v1 = vld [vmem:[%s14425_s1 + $0x588] ss:$16 sps:$4 sm:$0xff]  }
 0x20c   :  { %6320 = vmatpush1.bf16.msra.mxu1 %v10056_v7  ;;  %6280 = vmatprep.subr.bf16.mxu0 %v10061_v17  ;;  %v10109_v58 = vld [vmem:[%s14425_s1 + $0x58c] ss:$16 sps:$4 sm:$0xff]   ;;  %v10110_v52 = vld [vmem:[%s14425_s1 + $0x788] ss:$16 sps:$4 sm:$0xff]  }
 0x20d   :  { %6321 = vmatprep.subr.bf16.mxu1 %v10064_v23  ;;  %v10112_v62 = vld [vmem:[%s14425_s1 + $0x78c] ss:$16 sps:$4 sm:$0xff]   ;;  %v10113_v2 = vld [vmem:[%s14425_s1 + $0x568] ss:$16 sps:$4 sm:$0xff]  }
 0x20e   :  { %v10115_v7 = vld [vmem:[%s14425_s1 + $0x56c] ss:$16 sps:$4 sm:$0xff]   ;;  %v10116_v17 = vld [vmem:[%s14425_s1 + $0x768] ss:$16 sps:$4 sm:$0xff]  }
 0x20f   :  { %6281 = vmatpush1.bf16.msra.mxu0 %v10059_v0  ;;  %v10118_v60 = vld [vmem:[%s14425_s1 + $0x76c] ss:$16 sps:$4 sm:$0xff]  }
 0x210   :  { %6322 = vmatpush1.bf16.msra.mxu1 %v10062_v4  ;;  %6282 = vmatprep.subr.bf16.mxu0 %v10067_v9  ;;  %v10121_v23 = vld [vmem:[%s14425_s1 + $0x54c] ss:$16 sps:$4 sm:$0xff]   ;;  %v10119_v4 = vld [vmem:[%s14425_s1 + $0x548] ss:$16 sps:$4 sm:$0xff]  }
 0x211   :  { %6323 = vmatprep.subr.bf16.mxu1 %v10070_v10  ;;  %v10124_v0 = vld [vmem:[%s14425_s1 + $0x74c] ss:$16 sps:$4 sm:$0xff]   ;;  %v10122_v9 = vld [vmem:[%s14425_s1 + $0x748] ss:$16 sps:$4 sm:$0xff]  }
 0x212   :  { %v10127_v10 = vld [vmem:[%s14425_s1 + $0x52c] ss:$16 sps:$4 sm:$0xff]  }
 0x213   :  { %6283 = vmatpush1.bf16.msra.mxu0 %v10065_v57  ;;  %v10130_v57 = vld [vmem:[%s14425_s1 + $0x72c] ss:$16 sps:$4 sm:$0xff]  }
 0x214   :  { %6324 = vmatpush1.bf16.msra.mxu1 %v10068_v15  ;;  %6284 = vmatprep.subr.bf16.mxu0 %v10073_v16  ;;  %v10125_v15 = vld [vmem:[%s14425_s1 + $0x528] ss:$16 sps:$4 sm:$0xff]  }
 0x215   :  { %6325 = vmatprep.subr.bf16.mxu1 %v10076_v24  ;;  %v10128_v16 = vld [vmem:[%s14425_s1 + $0x728] ss:$16 sps:$4 sm:$0xff]   ;;  %v10133_v24 = vld [vmem:[%s14425_s1 + $0x50c] ss:$16 sps:$4 sm:$0xff]  }
 0x217   :  { %6285 = vmatpush1.bf16.msra.mxu0 %v10071_v27  ;;  %v10136_v27 = vld [vmem:[%s14425_s1 + $0x70c] ss:$16 sps:$4 sm:$0xff]  }
 0x218   :  { %6326 = vmatpush1.bf16.msra.mxu1 %v10074_v29  ;;  %6286 = vmatprep.subr.bf16.mxu0 %v10079_v33  ;;  %v10131_v29 = vld [vmem:[%s14425_s1 + $0x508] ss:$16 sps:$4 sm:$0xff]  }
 0x219   :  { %6327 = vmatprep.subr.bf16.mxu1 %v10082_v34  ;;  %v10134_v33 = vld [vmem:[%s14425_s1 + $0x708] ss:$16 sps:$4 sm:$0xff]   ;;  %v10139_v34 = vld [vmem:[%s14425_s1 + $0x8ec] ss:$16 sps:$4 sm:$0xff]  }
 0x21b   :  { %6287 = vmatpush1.bf16.msra.mxu0 %v10077_v49  ;;  %v10142_v49 = vld [vmem:[%s14425_s1 + $0xaec] ss:$16 sps:$4 sm:$0xff]  }
 0x21c   :  { %6328 = vmatpush1.bf16.msra.mxu1 %v10080_v61  ;;  %6288 = vmatprep.subr.bf16.mxu0 %v10085_v37  ;;  %v10137_v61 = vld [vmem:[%s14425_s1 + $0x8e8] ss:$16 sps:$4 sm:$0xff]  }
 0x21d   :  { %6329 = vmatprep.subr.bf16.mxu1 %v10088_v32  ;;  %v10140_v37 = vld [vmem:[%s14425_s1 + $0xae8] ss:$16 sps:$4 sm:$0xff]   ;;  %v10145_v32 = vld [vmem:[%s14425_s1 + $0x8cc] ss:$16 sps:$4 sm:$0xff]  }
 0x21f   :  { %6289 = vmatpush1.bf16.msra.mxu0 %v10083_v40  ;;  %v10148_v40 = vld [vmem:[%s14425_s1 + $0xacc] ss:$16 sps:$4 sm:$0xff]  }
 0x220   :  { %6330 = vmatpush1.bf16.msra.mxu1 %v10086_v44  ;;  %6290 = vmatprep.subr.bf16.mxu0 %v10091_v38 }
 0x221   :  { %6331 = vmatprep.subr.bf16.mxu1 %v10094_v36 }
 0x223   :  { %6291 = vmatpush2.bf16.msra.mxu0 %v10089_v47  ;;  %v10143_v47 = vld [vmem:[%s14425_s1 + $0x8c8] ss:$16 sps:$4 sm:$0xff]  }
 0x224   :  { %6332 = vmatpush2.bf16.msra.mxu1 %v10092_v50  ;;  %6292 = vmatprep.subr.bf16.mxu0 %v10097_v51  ;;  %v10146_v50 = vld [vmem:[%s14425_s1 + $0xac8] ss:$16 sps:$4 sm:$0xff]  }
 0x225   :  { %6333 = vmatprep.subr.bf16.mxu1 %v10100_v35 }
 0x227   :  { %6293 = vmatpush2.bf16.msra.mxu0 %v10095_v45 }
 0x228   :  { %6334 = vmatpush2.bf16.msra.mxu1 %v10098_v55  ;;  %6294 = vmatprep.subr.bf16.mxu0 %v10103_v63 }
 0x229   :  { %6335 = vmatprep.subr.bf16.mxu1 %v10106_v46 }
 0x22b   :  { %6295 = vmatpush2.bf16.msra.mxu0 %v10101_v13  ;;  %v10149_v13 = vld [vmem:[%s14425_s1 + $0x8a8] ss:$16 sps:$4 sm:$0xff]  }
 0x22c   :  { %6336 = vmatpush2.bf16.msra.mxu1 %v10104_v18  ;;  %6296 = vmatprep.subr.bf16.mxu0 %v10109_v58  ;;  %v10152_v18 = vld [vmem:[%s14425_s1 + $0xaa8] ss:$16 sps:$4 sm:$0xff]  }
 0x22d   :  { %6337 = vmatprep.subr.bf16.mxu1 %v10112_v62  ;;  %v10155_v62 = vld [vmem:[%s14425_s1 + $0x888] ss:$16 sps:$4 sm:$0xff]  }
 0x22f   :  { %6297 = vmatpush2.bf16.msra.mxu0 %v10107_v1  ;;  %v10158_v1 = vld [vmem:[%s14425_s1 + $0xa88] ss:$16 sps:$4 sm:$0xff]  }
 0x230   :  { %6338 = vmatpush2.bf16.msra.mxu1 %v10110_v52  ;;  %6298 = vmatprep.subr.bf16.mxu0 %v10115_v7  ;;  %v10163_v52 = vld [vmem:[%s14425_s1 + $0x86c] ss:$16 sps:$4 sm:$0xff]  }
 0x231   :  { %6339 = vmatprep.subr.bf16.mxu1 %v10118_v60  ;;  %v10166_v7 = vld [vmem:[%s14425_s1 + $0xa6c] ss:$16 sps:$4 sm:$0xff]   ;;  %v10161_v60 = vld [vmem:[%s14425_s1 + $0x868] ss:$16 sps:$4 sm:$0xff]  }
 0x233   :  { %6299 = vmatpush2.bf16.msra.mxu0 %v10113_v2  ;;  %v10164_v2 = vld [vmem:[%s14425_s1 + $0xa68] ss:$16 sps:$4 sm:$0xff]  }
 0x234   :  { %6340 = vmatpush2.bf16.msra.mxu1 %v10116_v17  ;;  %6300 = vmatprep.subr.bf16.mxu0 %v10121_v23  ;;  %v10169_v17 = vld [vmem:[%s14425_s1 + $0x84c] ss:$16 sps:$4 sm:$0xff]  }
 0x235   :  { %6341 = vmatprep.subr.bf16.mxu1 %v10124_v0  ;;  %v10172_v23 = vld [vmem:[%s14425_s1 + $0xa4c] ss:$16 sps:$4 sm:$0xff]   ;;  %v10167_v0 = vld [vmem:[%s14425_s1 + $0x848] ss:$16 sps:$4 sm:$0xff]  }
 0x237   :  { %6301 = vmatpush2.bf16.msra.mxu0 %v10119_v4  ;;  %v10170_v4 = vld [vmem:[%s14425_s1 + $0xa48] ss:$16 sps:$4 sm:$0xff]  }
 0x238   :  { %6342 = vmatpush2.bf16.msra.mxu1 %v10122_v9  ;;  %6302 = vmatprep.subr.bf16.mxu0 %v10127_v10  ;;  %v10175_v9 = vld [vmem:[%s14425_s1 + $0x82c] ss:$16 sps:$4 sm:$0xff]  }
 0x239   :  { %6343 = vmatprep.subr.bf16.mxu1 %v10130_v57  ;;  %v10178_v10 = vld [vmem:[%s14425_s1 + $0xa2c] ss:$16 sps:$4 sm:$0xff]   ;;  %v10173_v57 = vld [vmem:[%s14425_s1 + $0x828] ss:$16 sps:$4 sm:$0xff]  }
 0x23b   :  { %6303 = vmatpush2.bf16.msra.mxu0 %v10125_v15  ;;  %v10176_v15 = vld [vmem:[%s14425_s1 + $0xa28] ss:$16 sps:$4 sm:$0xff]  }
 0x23c   :  { %6344 = vmatpush2.bf16.msra.mxu1 %v10128_v16  ;;  %6304 = vmatprep.subr.bf16.mxu0 %v10133_v24  ;;  %v10181_v16 = vld [vmem:[%s14425_s1 + $0x80c] ss:$16 sps:$4 sm:$0xff]  }
 0x23d   :  { %6345 = vmatprep.subr.bf16.mxu1 %v10136_v27  ;;  %v10184_v24 = vld [vmem:[%s14425_s1 + $0xa0c] ss:$16 sps:$4 sm:$0xff]   ;;  %v10179_v27 = vld [vmem:[%s14425_s1 + $0x808] ss:$16 sps:$4 sm:$0xff]  }
 0x23f   :  { %6305 = vmatpush2.bf16.msra.mxu0 %v10131_v29  ;;  %v10182_v29 = vld [vmem:[%s14425_s1 + $0xa08] ss:$16 sps:$4 sm:$0xff]  }
 0x240   :  { %6346 = vmatpush2.bf16.msra.mxu1 %v10134_v33  ;;  %6356 = vmatprep.subr.bf16.mxu0 %v10139_v34  ;;  %v10187_v33 = vld [vmem:[%s14425_s1 + $0x9ec] ss:$16 sps:$4 sm:$0xff]  }
 0x241   :  { %6397 = vmatprep.subr.bf16.mxu1 %v10142_v49  ;;  %v10190_v34 = vld [vmem:[%s14425_s1 + $0xbec] ss:$16 sps:$4 sm:$0xff]   ;;  %v10185_v49 = vld [vmem:[%s14425_s1 + $0x9e8] ss:$16 sps:$4 sm:$0xff]  }
 0x242   :  { %v6062_v44 = vpop.f32.mrf.mxu0  ;;  %6307 = vmatmul.mubr.bf16.vlgmr.msra.gmra.mxu0 %v11316_v26  ;;  %v10151_v26 = vld [vmem:[%s14425_s1 + $0x8ac] ss:$16 sps:$4 sm:$0xff]  }
 0x243   :  { %v6103_v38 = vpop.f32.mrf.mxu1  ;;  %6348 = vmatmul.mubr.bf16.vlgmr.msra.gmra.mxu1 %v11329_v6  ;;  %v6063_v36 = vadd.f32 %v6062_v44, %v12674_v56  ;;  %6357 = vmatpush1.bf16.msra.mxu0 %v10137_v61  ;;  %v10154_v6 = vld [vmem:[%s14425_s1 + $0xaac] ss:$16 sps:$4 sm:$0xff]   ;;  %v10188_v61 = vld [vmem:[%s14425_s1 + $0xbe8] ss:$16 sps:$4 sm:$0xff]  }
 0x244   :  { %6398 = vmatpush1.bf16.msra.mxu1 %v10140_v37  ;;  %v6064_v51 = vpop.f32.mrf.mxu0  ;;  %6358 = vmatprep.subr.bf16.mxu0 %v10145_v32  ;;  %v10193_v37 = vld [vmem:[%s14425_s1 + $0x9cc] ss:$16 sps:$4 sm:$0xff]   ;;  %v10194_v44 = vld [vmem:[%s14425_s1 + $0xbc8] ss:$16 sps:$4 sm:$0xff]  }
 0x245   :  { %v6105_v35 = vpop.f32.mrf.mxu1  ;;  %6399 = vmatprep.subr.bf16.mxu1 %v10148_v40  ;;  %v12876_v56 = vadd.f32 %v6103_v38, %v6063_v36  ;;  %v6065_v45 = vadd.f32 %v6064_v51, %v12679_v5  ;;  %6388 = vmatprep.mubr.bf16.mxu0 %v11369_v41  ;;  %v10157_v41 = vld [vmem:[%s14425_s1 + $0x88c] ss:$16 sps:$4 sm:$0xff]   ;;  %v10191_v40 = vld [vmem:[%s14425_s1 + $0x9c8] ss:$16 sps:$4 sm:$0xff]  }
 0x246   :  { %6429 = vmatprep.mubr.bf16.mxu1 %v11374_v42  ;;  %v6066_v55 = vpop.f32.mrf.mxu0  ;;  %v10160_v42 = vld [vmem:[%s14425_s1 + $0xa8c] ss:$16 sps:$4 sm:$0xff]  }
 0x247   :  { %v6107_v63 = vpop.f32.mrf.mxu1  ;;  %v12881_v46 = vadd.f32 %v6105_v35, %v6065_v45  ;;  %6359 = vmatpush1.bf16.msra.mxu0 %v10143_v47  ;;  %v10196_v32 = vld [vmem:[%s14425_s1 + $0xbcc] ss:$16 sps:$4 sm:$0xff]   ;;  %v10197_v47 = vld [vmem:[%s14425_s1 + $0x9a8] ss:$16 sps:$4 sm:$0xff]  }
 0x248   :  { %6400 = vmatpush1.bf16.msra.mxu1 %v10146_v50  ;;  %v6067_v58 = vpop.f32.mrf.mxu0  ;;  %6360 = vmatprep.subr.bf16.mxu0 %v10151_v26  ;;  %v10199_v38 = vld [vmem:[%s14425_s1 + $0x9ac] ss:$16 sps:$4 sm:$0xff]   ;;  %v10200_v50 = vld [vmem:[%s14425_s1 + $0xba8] ss:$16 sps:$4 sm:$0xff]  }
 0x249   :  { %v6108_v5 = vpop.f32.mrf.mxu1  ;;  %6401 = vmatprep.subr.bf16.mxu1 %v10154_v6  ;;  %v10202_v36 = vld [vmem:[%s14425_s1 + $0xbac] ss:$16 sps:$4 sm:$0xff]   ;;  %v10203_v26 = vld [vmem:[%s14425_s1 + $0x988] ss:$16 sps:$4 sm:$0xff]  }
 0x24a   :  { %v10205_v51 = vld [vmem:[%s14425_s1 + $0x98c] ss:$16 sps:$4 sm:$0xff]   ;;  %v10206_v6 = vld [vmem:[%s14425_s1 + $0xb88] ss:$16 sps:$4 sm:$0xff]  }
 0x24b   :  { %6361 = vmatpush1.bf16.msra.mxu0 %v10149_v13  ;;  %v10208_v35 = vld [vmem:[%s14425_s1 + $0xb8c] ss:$16 sps:$4 sm:$0xff]   ;;  %v10209_v63 = vld [vmem:[%s14425_s1 + $0x968] ss:$16 sps:$4 sm:$0xff]  }
 0x24c   :  { %6402 = vmatpush1.bf16.msra.mxu1 %v10152_v18  ;;  %6362 = vmatprep.subr.bf16.mxu0 %v10157_v41  ;;  %v10211_v45 = vld [vmem:[%s14425_s1 + $0x96c] ss:$16 sps:$4 sm:$0xff]   ;;  %v10212_v13 = vld [vmem:[%s14425_s1 + $0xb68] ss:$16 sps:$4 sm:$0xff]  }
 0x24d   :  { %6403 = vmatprep.subr.bf16.mxu1 %v10160_v42  ;;  %v10214_v55 = vld [vmem:[%s14425_s1 + $0xb6c] ss:$16 sps:$4 sm:$0xff]   ;;  %v10215_v5 = vld [vmem:[%s14425_s1 + $0x948] ss:$16 sps:$4 sm:$0xff]  }
 0x24e   :  { %v10217_v18 = vld [vmem:[%s14425_s1 + $0x94c] ss:$16 sps:$4 sm:$0xff]   ;;  %v10218_v41 = vld [vmem:[%s14425_s1 + $0xb48] ss:$16 sps:$4 sm:$0xff]  }
 0x24f   :  { %6363 = vmatpush1.bf16.msra.mxu0 %v10155_v62  ;;  %v10220_v58 = vld [vmem:[%s14425_s1 + $0xb4c] ss:$16 sps:$4 sm:$0xff]  }
 0x250   :  { %6404 = vmatpush1.bf16.msra.mxu1 %v10158_v1  ;;  %6364 = vmatprep.subr.bf16.mxu0 %v10163_v52  ;;  %v10223_v42 = vld [vmem:[%s14425_s1 + $0x92c] ss:$16 sps:$4 sm:$0xff]   ;;  %v10221_v1 = vld [vmem:[%s14425_s1 + $0x928] ss:$16 sps:$4 sm:$0xff]  }
 0x251   :  { %6405 = vmatprep.subr.bf16.mxu1 %v10166_v7  ;;  %v10226_v62 = vld [vmem:[%s14425_s1 + $0xb2c] ss:$16 sps:$4 sm:$0xff]   ;;  %v10224_v52 = vld [vmem:[%s14425_s1 + $0xb28] ss:$16 sps:$4 sm:$0xff]  }
 0x252   :  { %v10229_v7 = vld [vmem:[%s14425_s1 + $0x90c] ss:$16 sps:$4 sm:$0xff]  }
 0x253   :  { %6365 = vmatpush1.bf16.msra.mxu0 %v10161_v60  ;;  %v10232_v60 = vld [vmem:[%s14425_s1 + $0xb0c] ss:$16 sps:$4 sm:$0xff]  }
 0x254   :  { %6406 = vmatpush1.bf16.msra.mxu1 %v10164_v2  ;;  %6366 = vmatprep.subr.bf16.mxu0 %v10169_v17  ;;  %v10227_v2 = vld [vmem:[%s14425_s1 + $0x908] ss:$16 sps:$4 sm:$0xff]  }
 0x255   :  { %6407 = vmatprep.subr.bf16.mxu1 %v10172_v23  ;;  %v10230_v17 = vld [vmem:[%s14425_s1 + $0xb08] ss:$16 sps:$4 sm:$0xff]   ;;  %v10235_v23 = vld [vmem:[%s14425_s1 + $0xcec] ss:$16 sps:$4 sm:$0xff]  }
 0x257   :  { %6367 = vmatpush1.bf16.msra.mxu0 %v10167_v0  ;;  %v10238_v0 = vld [vmem:[%s14425_s1 + $0xeec] ss:$16 sps:$4 sm:$0xff]  }
 0x258   :  { %6408 = vmatpush1.bf16.msra.mxu1 %v10170_v4  ;;  %6368 = vmatprep.subr.bf16.mxu0 %v10175_v9  ;;  %v10233_v4 = vld [vmem:[%s14425_s1 + $0xce8] ss:$16 sps:$4 sm:$0xff]  }
 0x259   :  { %6409 = vmatprep.subr.bf16.mxu1 %v10178_v10  ;;  %v10236_v9 = vld [vmem:[%s14425_s1 + $0xee8] ss:$16 sps:$4 sm:$0xff]   ;;  %v10241_v10 = vld [vmem:[%s14425_s1 + $0xccc] ss:$16 sps:$4 sm:$0xff]  }
 0x25b   :  { %6369 = vmatpush1.bf16.msra.mxu0 %v10173_v57  ;;  %v10244_v57 = vld [vmem:[%s14425_s1 + $0xecc] ss:$16 sps:$4 sm:$0xff]  }
 0x25c   :  { %6410 = vmatpush1.bf16.msra.mxu1 %v10176_v15  ;;  %6370 = vmatprep.subr.bf16.mxu0 %v10181_v16 }
 0x25d   :  { %6411 = vmatprep.subr.bf16.mxu1 %v10184_v24 }
 0x25f   :  { %6371 = vmatpush1.bf16.msra.mxu0 %v10179_v27  ;;  %v10239_v27 = vld [vmem:[%s14425_s1 + $0xcc8] ss:$16 sps:$4 sm:$0xff]  }
 0x260   :  { %6412 = vmatpush1.bf16.msra.mxu1 %v10182_v29  ;;  %6372 = vmatprep.subr.bf16.mxu0 %v10187_v33  ;;  %v10242_v29 = vld [vmem:[%s14425_s1 + $0xec8] ss:$16 sps:$4 sm:$0xff]  }
 0x261   :  { %6413 = vmatprep.subr.bf16.mxu1 %v10190_v34 }
 0x263   :  { %6373 = vmatpush2.bf16.msra.mxu0 %v10185_v49 }
 0x264   :  { %6414 = vmatpush2.bf16.msra.mxu1 %v10188_v61  ;;  %6374 = vmatprep.subr.bf16.mxu0 %v10193_v37 }
 0x265   :  { %6415 = vmatprep.subr.bf16.mxu1 %v10196_v32 }
 0x267   :  { %6375 = vmatpush2.bf16.msra.mxu0 %v10191_v40  ;;  %v10245_v40 = vld [vmem:[%s14425_s1 + $0xca8] ss:$16 sps:$4 sm:$0xff]  }
 0x268   :  { %6416 = vmatpush2.bf16.msra.mxu1 %v10194_v44  ;;  %6376 = vmatprep.subr.bf16.mxu0 %v10199_v38  ;;  %v10248_v44 = vld [vmem:[%s14425_s1 + $0xea8] ss:$16 sps:$4 sm:$0xff]  }
 0x269   :  { %6417 = vmatprep.subr.bf16.mxu1 %v10202_v36  ;;  %v10251_v36 = vld [vmem:[%s14425_s1 + $0xc88] ss:$16 sps:$4 sm:$0xff]  }
 0x26b   :  { %6377 = vmatpush2.bf16.msra.mxu0 %v10197_v47  ;;  %v10254_v47 = vld [vmem:[%s14425_s1 + $0xe88] ss:$16 sps:$4 sm:$0xff]  }
 0x26c   :  { %6418 = vmatpush2.bf16.msra.mxu1 %v10200_v50  ;;  %6378 = vmatprep.subr.bf16.mxu0 %v10205_v51  ;;  %v10259_v50 = vld [vmem:[%s14425_s1 + $0xc6c] ss:$16 sps:$4 sm:$0xff]  }
 0x26d   :  { %6419 = vmatprep.subr.bf16.mxu1 %v10208_v35  ;;  %v10262_v51 = vld [vmem:[%s14425_s1 + $0xe6c] ss:$16 sps:$4 sm:$0xff]   ;;  %v10257_v35 = vld [vmem:[%s14425_s1 + $0xc68] ss:$16 sps:$4 sm:$0xff]  }
 0x26f   :  { %6379 = vmatpush2.bf16.msra.mxu0 %v10203_v26  ;;  %v10260_v26 = vld [vmem:[%s14425_s1 + $0xe68] ss:$16 sps:$4 sm:$0xff]  }
 0x270   :  { %6420 = vmatpush2.bf16.msra.mxu1 %v10206_v6  ;;  %6380 = vmatprep.subr.bf16.mxu0 %v10211_v45  ;;  %v10265_v6 = vld [vmem:[%s14425_s1 + $0xc4c] ss:$16 sps:$4 sm:$0xff]  }
 0x271   :  { %6421 = vmatprep.subr.bf16.mxu1 %v10214_v55  ;;  %v10268_v45 = vld [vmem:[%s14425_s1 + $0xe4c] ss:$16 sps:$4 sm:$0xff]   ;;  %v10263_v55 = vld [vmem:[%s14425_s1 + $0xc48] ss:$16 sps:$4 sm:$0xff]  }
 0x273   :  { %6381 = vmatpush2.bf16.msra.mxu0 %v10209_v63  ;;  %v10266_v63 = vld [vmem:[%s14425_s1 + $0xe48] ss:$16 sps:$4 sm:$0xff]  }
 0x274   :  { %6422 = vmatpush2.bf16.msra.mxu1 %v10212_v13  ;;  %6382 = vmatprep.subr.bf16.mxu0 %v10217_v18  ;;  %v10271_v13 = vld [vmem:[%s14425_s1 + $0xc2c] ss:$16 sps:$4 sm:$0xff]  }
 0x275   :  { %6423 = vmatprep.subr.bf16.mxu1 %v10220_v58  ;;  %v10274_v18 = vld [vmem:[%s14425_s1 + $0xe2c] ss:$16 sps:$4 sm:$0xff]   ;;  %v10269_v58 = vld [vmem:[%s14425_s1 + $0xc28] ss:$16 sps:$4 sm:$0xff]  }
 0x277   :  { %6383 = vmatpush2.bf16.msra.mxu0 %v10215_v5  ;;  %v10272_v5 = vld [vmem:[%s14425_s1 + $0xe28] ss:$16 sps:$4 sm:$0xff]  }
 0x278   :  { %6424 = vmatpush2.bf16.msra.mxu1 %v10218_v41  ;;  %6384 = vmatprep.subr.bf16.mxu0 %v10223_v42  ;;  %v10277_v41 = vld [vmem:[%s14425_s1 + $0xc0c] ss:$16 sps:$4 sm:$0xff]  }
 0x279   :  { %6425 = vmatprep.subr.bf16.mxu1 %v10226_v62  ;;  %v10280_v42 = vld [vmem:[%s14425_s1 + $0xe0c] ss:$16 sps:$4 sm:$0xff]   ;;  %v10275_v62 = vld [vmem:[%s14425_s1 + $0xc08] ss:$16 sps:$4 sm:$0xff]  }
 0x27b   :  { %6385 = vmatpush2.bf16.msra.mxu0 %v10221_v1  ;;  %v10278_v1 = vld [vmem:[%s14425_s1 + $0xe08] ss:$16 sps:$4 sm:$0xff]  }
 0x27c   :  { %6426 = vmatpush2.bf16.msra.mxu1 %v10224_v52  ;;  %6386 = vmatprep.subr.bf16.mxu0 %v10229_v7  ;;  %v10283_v52 = vld [vmem:[%s14425_s1 + $0xdec] ss:$16 sps:$4 sm:$0xff]  }
 0x27d   :  { %6427 = vmatprep.subr.bf16.mxu1 %v10232_v60  ;;  %v10286_v7 = vld [vmem:[%s14425_s1 + $0xfec] ss:$16 sps:$4 sm:$0xff]   ;;  %v10281_v60 = vld [vmem:[%s14425_s1 + $0xde8] ss:$16 sps:$4 sm:$0xff]  }
 0x27f   :  { %6387 = vmatpush2.bf16.msra.mxu0 %v10227_v2  ;;  %v10284_v2 = vld [vmem:[%s14425_s1 + $0xfe8] ss:$16 sps:$4 sm:$0xff]  }
 0x280   :  { %6428 = vmatpush2.bf16.msra.mxu1 %v10230_v17  ;;  %6438 = vmatprep.subr.bf16.mxu0 %v10235_v23  ;;  %v10289_v17 = vld [vmem:[%s14425_s1 + $0xdcc] ss:$16 sps:$4 sm:$0xff]  }
 0x281   :  { %6479 = vmatprep.subr.bf16.mxu1 %v10238_v0  ;;  %v10292_v23 = vld [vmem:[%s14425_s1 + $0xfcc] ss:$16 sps:$4 sm:$0xff]   ;;  %v10287_v0 = vld [vmem:[%s14425_s1 + $0xdc8] ss:$16 sps:$4 sm:$0xff]  }
 0x282   :  { %v6144_v15 = vpop.f32.mrf.mxu0  ;;  %6389 = vmatmul.mubr.bf16.vlgmr.msra.gmra.mxu0 %v11542_v48  ;;  %v10247_v48 = vld [vmem:[%s14425_s1 + $0xcac] ss:$16 sps:$4 sm:$0xff]  }
 0x283   :  { %v6185_v16 = vpop.f32.mrf.mxu1  ;;  %6430 = vmatmul.mubr.bf16.vlgmr.msra.gmra.mxu1 %v11561_v54  ;;  %v6145_v24 = vadd.f32 %v6144_v15, %v12876_v56  ;;  %6439 = vmatpush1.bf16.msra.mxu0 %v10233_v4  ;;  %v10250_v54 = vld [vmem:[%s14425_s1 + $0xeac] ss:$16 sps:$4 sm:$0xff]   ;;  %v10290_v4 = vld [vmem:[%s14425_s1 + $0xfc8] ss:$16 sps:$4 sm:$0xff]  }
 0x284   :  { %6480 = vmatpush1.bf16.msra.mxu1 %v10236_v9  ;;  %v6146_v33 = vpop.f32.mrf.mxu0  ;;  %6440 = vmatprep.subr.bf16.mxu0 %v10241_v10  ;;  %v10295_v9 = vld [vmem:[%s14425_s1 + $0xdac] ss:$16 sps:$4 sm:$0xff]   ;;  %v10296_v15 = vld [vmem:[%s14425_s1 + $0xfa8] ss:$16 sps:$4 sm:$0xff]  }
 0x285   :  { %v6187_v34 = vpop.f32.mrf.mxu1  ;;  %6481 = vmatprep.subr.bf16.mxu1 %v10244_v57  ;;  %v13078_v56 = vadd.f32 %v6185_v16, %v6145_v24  ;;  %v6147_v49 = vadd.f32 %v6146_v33, %v12881_v46  ;;  %6470 = vmatprep.mubr.bf16.mxu0 %v11557_v53  ;;  %v10253_v53 = vld [vmem:[%s14425_s1 + $0xc8c] ss:$16 sps:$4 sm:$0xff]   ;;  %v10293_v57 = vld [vmem:[%s14425_s1 + $0xda8] ss:$16 sps:$4 sm:$0xff]  }
 0x286   :  { %6511 = vmatprep.mubr.bf16.mxu1 %v11577_v59  ;;  %v6148_v61 = vpop.f32.mrf.mxu0  ;;  %v10256_v59 = vld [vmem:[%s14425_s1 + $0xe8c] ss:$16 sps:$4 sm:$0xff]  }
 0x287   :  { %v6189_v37 = vpop.f32.mrf.mxu1  ;;  %v13083_v32 = vadd.f32 %v6187_v34, %v6147_v49  ;;  %6441 = vmatpush1.bf16.msra.mxu0 %v10239_v27  ;;  %v10298_v10 = vld [vmem:[%s14425_s1 + $0xfac] ss:$16 sps:$4 sm:$0xff]   ;;  %v10299_v27 = vld [vmem:[%s14425_s1 + $0xd88] ss:$16 sps:$4 sm:$0xff]  }
 0x288   :  { %6482 = vmatpush1.bf16.msra.mxu1 %v10242_v29  ;;  %v6149_v38 = vpop.f32.mrf.mxu0  ;;  %6442 = vmatprep.subr.bf16.mxu0 %v10247_v48  ;;  %v10301_v16 = vld [vmem:[%s14425_s1 + $0xd8c] ss:$16 sps:$4 sm:$0xff]   ;;  %v10302_v29 = vld [vmem:[%s14425_s1 + $0xf88] ss:$16 sps:$4 sm:$0xff]  }
 0x289   :  { %v6190_v46 = vpop.f32.mrf.mxu1  ;;  %6483 = vmatprep.subr.bf16.mxu1 %v10250_v54  ;;  %v10304_v24 = vld [vmem:[%s14425_s1 + $0xf8c] ss:$16 sps:$4 sm:$0xff]   ;;  %v10305_v48 = vld [vmem:[%s14425_s1 + $0xd68] ss:$16 sps:$4 sm:$0xff]  }
 0x28a   :  { %v10307_v33 = vld [vmem:[%s14425_s1 + $0xd6c] ss:$16 sps:$4 sm:$0xff]   ;;  %v10308_v54 = vld [vmem:[%s14425_s1 + $0xf68] ss:$16 sps:$4 sm:$0xff]  }
 0x28b   :  { %6443 = vmatpush1.bf16.msra.mxu0 %v10245_v40  ;;  %v10310_v34 = vld [vmem:[%s14425_s1 + $0xf6c] ss:$16 sps:$4 sm:$0xff]   ;;  %v10311_v37 = vld [vmem:[%s14425_s1 + $0xd48] ss:$16 sps:$4 sm:$0xff]  }
 0x28c   :  { %6484 = vmatpush1.bf16.msra.mxu1 %v10248_v44  ;;  %6444 = vmatprep.subr.bf16.mxu0 %v10253_v53  ;;  %v10313_v49 = vld [vmem:[%s14425_s1 + $0xd4c] ss:$16 sps:$4 sm:$0xff]   ;;  %v10314_v40 = vld [vmem:[%s14425_s1 + $0xf48] ss:$16 sps:$4 sm:$0xff]  }
 0x28d   :  { %6485 = vmatprep.subr.bf16.mxu1 %v10256_v59  ;;  %v10316_v61 = vld [vmem:[%s14425_s1 + $0xf4c] ss:$16 sps:$4 sm:$0xff]   ;;  %v10317_v46 = vld [vmem:[%s14425_s1 + $0xd28] ss:$16 sps:$4 sm:$0xff]  }
 0x28e   :  { %v10319_v44 = vld [vmem:[%s14425_s1 + $0xd2c] ss:$16 sps:$4 sm:$0xff]   ;;  %v10320_v53 = vld [vmem:[%s14425_s1 + $0xf28] ss:$16 sps:$4 sm:$0xff]  }
 0x28f   :  { %6445 = vmatpush1.bf16.msra.mxu0 %v10251_v36  ;;  %v10322_v38 = vld [vmem:[%s14425_s1 + $0xf2c] ss:$16 sps:$4 sm:$0xff]  }
 0x290   :  { %6486 = vmatpush1.bf16.msra.mxu1 %v10254_v47  ;;  %6446 = vmatprep.subr.bf16.mxu0 %v10259_v50  ;;  %v10325_v59 = vld [vmem:[%s14425_s1 + $0xd0c] ss:$16 sps:$4 sm:$0xff]   ;;  %v10323_v47 = vld [vmem:[%s14425_s1 + $0xd08] ss:$16 sps:$4 sm:$0xff]  }
 0x291   :  { %6487 = vmatprep.subr.bf16.mxu1 %v10262_v51  ;;  %v10328_v36 = vld [vmem:[%s14425_s1 + $0xf0c] ss:$16 sps:$4 sm:$0xff]   ;;  %v10326_v50 = vld [vmem:[%s14425_s1 + $0xf08] ss:$16 sps:$4 sm:$0xff]  }
 0x292   :  { %v10331_v51 = vld [vmem:[%s14425_s1 + $0x10ec] ss:$16 sps:$4 sm:$0xff]  }
 0x293   :  { %6447 = vmatpush1.bf16.msra.mxu0 %v10257_v35  ;;  %v10334_v35 = vld [vmem:[%s14425_s1 + $0x12ec] ss:$16 sps:$4 sm:$0xff]  }
 0x294   :  { %6488 = vmatpush1.bf16.msra.mxu1 %v10260_v26  ;;  %6448 = vmatprep.subr.bf16.mxu0 %v10265_v6  ;;  %v10329_v26 = vld [vmem:[%s14425_s1 + $0x10e8] ss:$16 sps:$4 sm:$0xff]  }
 0x295   :  { %6489 = vmatprep.subr.bf16.mxu1 %v10268_v45  ;;  %v10332_v6 = vld [vmem:[%s14425_s1 + $0x12e8] ss:$16 sps:$4 sm:$0xff]   ;;  %v10337_v45 = vld [vmem:[%s14425_s1 + $0x10cc] ss:$16 sps:$4 sm:$0xff]  }
 0x297   :  { %6449 = vmatpush1.bf16.msra.mxu0 %v10263_v55  ;;  %v10340_v55 = vld [vmem:[%s14425_s1 + $0x12cc] ss:$16 sps:$4 sm:$0xff]  }
 0x298   :  { %6490 = vmatpush1.bf16.msra.mxu1 %v10266_v63  ;;  %6450 = vmatprep.subr.bf16.mxu0 %v10271_v13 }
 0x299   :  { %6491 = vmatprep.subr.bf16.mxu1 %v10274_v18 }
 0x29b   :  { %6451 = vmatpush1.bf16.msra.mxu0 %v10269_v58  ;;  %v10335_v58 = vld [vmem:[%s14425_s1 + $0x10c8] ss:$16 sps:$4 sm:$0xff]  }
 0x29c   :  { %6492 = vmatpush1.bf16.msra.mxu1 %v10272_v5  ;;  %6452 = vmatprep.subr.bf16.mxu0 %v10277_v41  ;;  %v10338_v5 = vld [vmem:[%s14425_s1 + $0x12c8] ss:$16 sps:$4 sm:$0xff]  }
 0x29d   :  { %6493 = vmatprep.subr.bf16.mxu1 %v10280_v42 }
 0x29f   :  { %6453 = vmatpush1.bf16.msra.mxu0 %v10275_v62 }
 0x2a0   :  { %6494 = vmatpush1.bf16.msra.mxu1 %v10278_v1  ;;  %6454 = vmatprep.subr.bf16.mxu0 %v10283_v52 }
 0x2a1   :  { %6495 = vmatprep.subr.bf16.mxu1 %v10286_v7  ;;  %v10341_v7 = vld [vmem:[%s14425_s1 + $0x10a8] ss:$16 sps:$4 sm:$0xff]  }
 0x2a3   :  { %6455 = vmatpush2.bf16.msra.mxu0 %v10281_v60  ;;  %v10344_v60 = vld [vmem:[%s14425_s1 + $0x12a8] ss:$16 sps:$4 sm:$0xff]  }
 0x2a4   :  { %6496 = vmatpush2.bf16.msra.mxu1 %v10284_v2  ;;  %6456 = vmatprep.subr.bf16.mxu0 %v10289_v17 }
 0x2a5   :  { %6497 = vmatprep.subr.bf16.mxu1 %v10292_v23  ;;  %v10347_v23 = vld [vmem:[%s14425_s1 + $0x1088] ss:$16 sps:$4 sm:$0xff]  }
 0x2a7   :  { %6457 = vmatpush2.bf16.msra.mxu0 %v10287_v0  ;;  %v10350_v0 = vld [vmem:[%s14425_s1 + $0x1288] ss:$16 sps:$4 sm:$0xff]  }
 0x2a8   :  { %6498 = vmatpush2.bf16.msra.mxu1 %v10290_v4  ;;  %6458 = vmatprep.subr.bf16.mxu0 %v10295_v9  ;;  %v10355_v4 = vld [vmem:[%s14425_s1 + $0x106c] ss:$16 sps:$4 sm:$0xff]  }
 0x2a9   :  { %6499 = vmatprep.subr.bf16.mxu1 %v10298_v10  ;;  %v10358_v9 = vld [vmem:[%s14425_s1 + $0x126c] ss:$16 sps:$4 sm:$0xff]   ;;  %v10353_v10 = vld [vmem:[%s14425_s1 + $0x1068] ss:$16 sps:$4 sm:$0xff]  }
 0x2ab   :  { %6459 = vmatpush2.bf16.msra.mxu0 %v10293_v57  ;;  %v10356_v57 = vld [vmem:[%s14425_s1 + $0x1268] ss:$16 sps:$4 sm:$0xff]  }
 0x2ac   :  { %6500 = vmatpush2.bf16.msra.mxu1 %v10296_v15  ;;  %6460 = vmatprep.subr.bf16.mxu0 %v10301_v16  ;;  %v10361_v15 = vld [vmem:[%s14425_s1 + $0x104c] ss:$16 sps:$4 sm:$0xff]  }
 0x2ad   :  { %6501 = vmatprep.subr.bf16.mxu1 %v10304_v24  ;;  %v10364_v16 = vld [vmem:[%s14425_s1 + $0x124c] ss:$16 sps:$4 sm:$0xff]   ;;  %v10359_v24 = vld [vmem:[%s14425_s1 + $0x1048] ss:$16 sps:$4 sm:$0xff]  }
 0x2af   :  { %6461 = vmatpush2.bf16.msra.mxu0 %v10299_v27  ;;  %v10362_v27 = vld [vmem:[%s14425_s1 + $0x1248] ss:$16 sps:$4 sm:$0xff]  }
 0x2b0   :  { %6502 = vmatpush2.bf16.msra.mxu1 %v10302_v29  ;;  %6462 = vmatprep.subr.bf16.mxu0 %v10307_v33  ;;  %v10367_v29 = vld [vmem:[%s14425_s1 + $0x102c] ss:$16 sps:$4 sm:$0xff]  }
 0x2b1   :  { %6503 = vmatprep.subr.bf16.mxu1 %v10310_v34  ;;  %v10370_v33 = vld [vmem:[%s14425_s1 + $0x122c] ss:$16 sps:$4 sm:$0xff]   ;;  %v10365_v34 = vld [vmem:[%s14425_s1 + $0x1028] ss:$16 sps:$4 sm:$0xff]  }
 0x2b3   :  { %6463 = vmatpush2.bf16.msra.mxu0 %v10305_v48  ;;  %v10368_v48 = vld [vmem:[%s14425_s1 + $0x1228] ss:$16 sps:$4 sm:$0xff]  }
 0x2b4   :  { %6504 = vmatpush2.bf16.msra.mxu1 %v10308_v54  ;;  %6464 = vmatprep.subr.bf16.mxu0 %v10313_v49  ;;  %v10373_v54 = vld [vmem:[%s14425_s1 + $0x100c] ss:$16 sps:$4 sm:$0xff]  }
 0x2b5   :  { %6505 = vmatprep.subr.bf16.mxu1 %v10316_v61  ;;  %v10376_v49 = vld [vmem:[%s14425_s1 + $0x120c] ss:$16 sps:$4 sm:$0xff]   ;;  %v10371_v61 = vld [vmem:[%s14425_s1 + $0x1008] ss:$16 sps:$4 sm:$0xff]  }
 0x2b7   :  { %6465 = vmatpush2.bf16.msra.mxu0 %v10311_v37  ;;  %v10374_v37 = vld [vmem:[%s14425_s1 + $0x1208] ss:$16 sps:$4 sm:$0xff]  }
 0x2b8   :  { %6506 = vmatpush2.bf16.msra.mxu1 %v10314_v40  ;;  %6466 = vmatprep.subr.bf16.mxu0 %v10319_v44  ;;  %v10379_v40 = vld [vmem:[%s14425_s1 + $0x11ec] ss:$16 sps:$4 sm:$0xff]  }
 0x2b9   :  { %6507 = vmatprep.subr.bf16.mxu1 %v10322_v38  ;;  %v10382_v44 = vld [vmem:[%s14425_s1 + $0x13ec] ss:$16 sps:$4 sm:$0xff]   ;;  %v10377_v38 = vld [vmem:[%s14425_s1 + $0x11e8] ss:$16 sps:$4 sm:$0xff]  }
 0x2bb   :  { %6467 = vmatpush2.bf16.msra.mxu0 %v10317_v46  ;;  %v10380_v46 = vld [vmem:[%s14425_s1 + $0x13e8] ss:$16 sps:$4 sm:$0xff]  }
 0x2bc   :  { %6508 = vmatpush2.bf16.msra.mxu1 %v10320_v53  ;;  %6468 = vmatprep.subr.bf16.mxu0 %v10325_v59  ;;  %v10385_v53 = vld [vmem:[%s14425_s1 + $0x11cc] ss:$16 sps:$4 sm:$0xff]  }
 0x2bd   :  { %6509 = vmatprep.subr.bf16.mxu1 %v10328_v36  ;;  %v10388_v59 = vld [vmem:[%s14425_s1 + $0x13cc] ss:$16 sps:$4 sm:$0xff]   ;;  %v10383_v36 = vld [vmem:[%s14425_s1 + $0x11c8] ss:$16 sps:$4 sm:$0xff]  }
 0x2bf   :  { %6469 = vmatpush2.bf16.msra.mxu0 %v10323_v47  ;;  %v10386_v47 = vld [vmem:[%s14425_s1 + $0x13c8] ss:$16 sps:$4 sm:$0xff]  }
 0x2c0   :  { %6510 = vmatpush2.bf16.msra.mxu1 %v10326_v50  ;;  %6520 = vmatprep.subr.bf16.mxu0 %v10331_v51  ;;  %v10391_v50 = vld [vmem:[%s14425_s1 + $0x11ac] ss:$16 sps:$4 sm:$0xff]  }
 0x2c1   :  { %6561 = vmatprep.subr.bf16.mxu1 %v10334_v35  ;;  %v10394_v51 = vld [vmem:[%s14425_s1 + $0x13ac] ss:$16 sps:$4 sm:$0xff]   ;;  %v10389_v35 = vld [vmem:[%s14425_s1 + $0x11a8] ss:$16 sps:$4 sm:$0xff]  }
 0x2c2   :  { %v6226_v63 = vpop.f32.mrf.mxu0  ;;  %6471 = vmatmul.mubr.bf16.vlgmr.msra.gmra.mxu0 %v11767_v12  ;;  %v10343_v12 = vld [vmem:[%s14425_s1 + $0x10ac] ss:$16 sps:$4 sm:$0xff]  }
 0x2c3   :  { %v6267_v13 = vpop.f32.mrf.mxu1  ;;  %6512 = vmatmul.mubr.bf16.vlgmr.msra.gmra.mxu1 %v11783_v39  ;;  %6521 = vmatpush1.bf16.msra.mxu0 %v10329_v26  ;;  %v10346_v39 = vld [vmem:[%s14425_s1 + $0x12ac] ss:$16 sps:$4 sm:$0xff]   ;;  %v10392_v26 = vld [vmem:[%s14425_s1 + $0x13a8] ss:$16 sps:$4 sm:$0xff]  }
 0x2c4   :  { %v13267_v18 = vadd.f32 %v6267_v13, %v6226_v63  ;;  %6562 = vmatpush1.bf16.msra.mxu1 %v10332_v6  ;;  %v6228_v41 = vpop.f32.mrf.mxu0  ;;  %6522 = vmatprep.subr.bf16.mxu0 %v10337_v45  ;;  %v10397_v6 = vld [vmem:[%s14425_s1 + $0x118c] ss:$16 sps:$4 sm:$0xff]   ;;  %v10398_v63 = vld [vmem:[%s14425_s1 + $0x1388] ss:$16 sps:$4 sm:$0xff]  }
 0x2c5   :  { %v6269_v42 = vpop.f32.mrf.mxu1  ;;  %6563 = vmatprep.subr.bf16.mxu1 %v10340_v55  ;;  %6552 = vmatprep.mubr.bf16.mxu0 %v11779_v19  ;;  %v10349_v19 = vld [vmem:[%s14425_s1 + $0x108c] ss:$16 sps:$4 sm:$0xff]   ;;  %v10395_v55 = vld [vmem:[%s14425_s1 + $0x1188] ss:$16 sps:$4 sm:$0xff]  }
 0x2c6   :  { %v13281_v62 = vadd.f32 %v6269_v42, %v6228_v41  ;;  %6593 = vmatprep.mubr.bf16.mxu1 %v11799_v25  ;;  %v6230_v1 = vpop.f32.mrf.mxu0  ;;  %v10352_v25 = vld [vmem:[%s14425_s1 + $0x128c] ss:$16 sps:$4 sm:$0xff]   ;;  %v10404_v41 = vld [vmem:[%s14425_s1 + $0x1368] ss:$16 sps:$4 sm:$0xff]  }
 0x2c7   :  { %v6271_v52 = vpop.f32.mrf.mxu1  ;;  %6523 = vmatpush1.bf16.msra.mxu0 %v10335_v58  ;;  %v10400_v45 = vld [vmem:[%s14425_s1 + $0x138c] ss:$16 sps:$4 sm:$0xff]   ;;  %v10410_v1 = vld [vmem:[%s14425_s1 + $0x1348] ss:$16 sps:$4 sm:$0xff]  }
 0x2c8   :  { %6564 = vmatpush1.bf16.msra.mxu1 %v10338_v5  ;;  %v6231_v2 = vpop.f32.mrf.mxu0  ;;  %6524 = vmatprep.subr.bf16.mxu0 %v10343_v12  ;;  %v10403_v13 = vld [vmem:[%s14425_s1 + $0x116c] ss:$16 sps:$4 sm:$0xff]   ;;  %v10401_v5 = vld [vmem:[%s14425_s1 + $0x1168] ss:$16 sps:$4 sm:$0xff]  }
 0x2c9   :  { %v6272_v17 = vpop.f32.mrf.mxu1  ;;  %6565 = vmatprep.subr.bf16.mxu1 %v10346_v39  ;;  %v10406_v58 = vld [vmem:[%s14425_s1 + $0x136c] ss:$16 sps:$4 sm:$0xff]   ;;  %v10407_v39 = vld [vmem:[%s14425_s1 + $0x1148] ss:$16 sps:$4 sm:$0xff]  }
 0x2ca   :  { %v10409_v42 = vld [vmem:[%s14425_s1 + $0x114c] ss:$16 sps:$4 sm:$0xff]   ;;  %v10416_v2 = vld [vmem:[%s14425_s1 + $0x1328] ss:$16 sps:$4 sm:$0xff]  }
 0x2cb   :  { %6525 = vmatpush1.bf16.msra.mxu0 %v10341_v7  ;;  %v10412_v12 = vld [vmem:[%s14425_s1 + $0x134c] ss:$16 sps:$4 sm:$0xff]  }
 0x2cc   :  { %6566 = vmatpush1.bf16.msra.mxu1 %v10344_v60  ;;  %6526 = vmatprep.subr.bf16.mxu0 %v10349_v19  ;;  %v10415_v52 = vld [vmem:[%s14425_s1 + $0x112c] ss:$16 sps:$4 sm:$0xff]   ;;  %v10413_v60 = vld [vmem:[%s14425_s1 + $0x1128] ss:$16 sps:$4 sm:$0xff]  }
 0x2cd   :  { %6567 = vmatprep.subr.bf16.mxu1 %v10352_v25  ;;  %v10418_v7 = vld [vmem:[%s14425_s1 + $0x132c] ss:$16 sps:$4 sm:$0xff]   ;;  %v10419_v25 = vld [vmem:[%s14425_s1 + $0x1108] ss:$16 sps:$4 sm:$0xff]  }
 0x2ce   :  { %v10421_v17 = vld [vmem:[%s14425_s1 + $0x110c] ss:$16 sps:$4 sm:$0xff]  }
 0x2cf   :  { %6527 = vmatpush1.bf16.msra.mxu0 %v10347_v23  ;;  %v10424_v19 = vld [vmem:[%s14425_s1 + $0x130c] ss:$16 sps:$4 sm:$0xff]   ;;  %v10422_v23 = vld [vmem:[%s14425_s1 + $0x1308] ss:$16 sps:$4 sm:$0xff]  }
 0x2d0   :  { %6568 = vmatpush1.bf16.msra.mxu1 %v10350_v0  ;;  %6528 = vmatprep.subr.bf16.mxu0 %v10355_v4  ;;  %v10427_v0 = vld [vmem:[%s14425_s1 + $0x14ec] ss:$16 sps:$4 sm:$0xff]  }
 0x2d1   :  { %6569 = vmatprep.subr.bf16.mxu1 %v10358_v9  ;;  %v10430_v4 = vld [vmem:[%s14425_s1 + $0x16ec] ss:$16 sps:$4 sm:$0xff]   ;;  %v10425_v9 = vld [vmem:[%s14425_s1 + $0x14e8] ss:$16 sps:$4 sm:$0xff]  }
 0x2d3   :  { %6529 = vmatpush1.bf16.msra.mxu0 %v10353_v10  ;;  %v10428_v10 = vld [vmem:[%s14425_s1 + $0x16e8] ss:$16 sps:$4 sm:$0xff]  }
 0x2d4   :  { %6570 = vmatpush1.bf16.msra.mxu1 %v10356_v57  ;;  %6530 = vmatprep.subr.bf16.mxu0 %v10361_v15  ;;  %v10433_v57 = vld [vmem:[%s14425_s1 + $0x14cc] ss:$16 sps:$4 sm:$0xff]  }
 0x2d5   :  { %6571 = vmatprep.subr.bf16.mxu1 %v10364_v16  ;;  %v10436_v15 = vld [vmem:[%s14425_s1 + $0x16cc] ss:$16 sps:$4 sm:$0xff]   ;;  %v10431_v16 = vld [vmem:[%s14425_s1 + $0x14c8] ss:$16 sps:$4 sm:$0xff]  }
 0x2d7   :  { %6531 = vmatpush1.bf16.msra.mxu0 %v10359_v24  ;;  %v10434_v24 = vld [vmem:[%s14425_s1 + $0x16c8] ss:$16 sps:$4 sm:$0xff]  }
 0x2d8   :  { %6572 = vmatpush1.bf16.msra.mxu1 %v10362_v27  ;;  %6532 = vmatprep.subr.bf16.mxu0 %v10367_v29 }
 0x2d9   :  { %6573 = vmatprep.subr.bf16.mxu1 %v10370_v33  ;;  %v10439_v33 = vld [vmem:[%s14425_s1 + $0x14ac] ss:$16 sps:$4 sm:$0xff]  }
 0x2db   :  { %6533 = vmatpush1.bf16.msra.mxu0 %v10365_v34 }
 0x2dc   :  { %6574 = vmatpush1.bf16.msra.mxu1 %v10368_v48  ;;  %6534 = vmatprep.subr.bf16.mxu0 %v10373_v54 }
 0x2dd   :  { %6575 = vmatprep.subr.bf16.mxu1 %v10376_v49  ;;  %v10442_v49 = vld [vmem:[%s14425_s1 + $0x16ac] ss:$16 sps:$4 sm:$0xff]  }
 0x2df   :  { %6535 = vmatpush1.bf16.msra.mxu0 %v10371_v61 }
 0x2e0   :  { %6576 = vmatpush1.bf16.msra.mxu1 %v10374_v37  ;;  %6536 = vmatprep.subr.bf16.mxu0 %v10379_v40 }
 0x2e1   :  { %6577 = vmatprep.subr.bf16.mxu1 %v10382_v44 }
 0x2e3   :  { %6537 = vmatpush2.bf16.msra.mxu0 %v10377_v38 }
 0x2e4   :  { %6578 = vmatpush2.bf16.msra.mxu1 %v10380_v46  ;;  %6538 = vmatprep.subr.bf16.mxu0 %v10385_v53  ;;  %v10445_v46 = vld [vmem:[%s14425_s1 + $0x148c] ss:$16 sps:$4 sm:$0xff]   ;;  %v10446_v53 = vld [vmem:[%s14425_s1 + $0x1688] ss:$16 sps:$4 sm:$0xff]  }
 0x2e5   :  { %6579 = vmatprep.subr.bf16.mxu1 %v10388_v59  ;;  %v10451_v59 = vld [vmem:[%s14425_s1 + $0x146c] ss:$16 sps:$4 sm:$0xff]  }
 0x2e7   :  { %6539 = vmatpush2.bf16.msra.mxu0 %v10383_v36  ;;  %v10454_v36 = vld [vmem:[%s14425_s1 + $0x166c] ss:$16 sps:$4 sm:$0xff]  }
 0x2e8   :  { %6580 = vmatpush2.bf16.msra.mxu1 %v10386_v47  ;;  %6540 = vmatprep.subr.bf16.mxu0 %v10391_v50  ;;  %v10449_v47 = vld [vmem:[%s14425_s1 + $0x1468] ss:$16 sps:$4 sm:$0xff]  }
 0x2e9   :  { %6581 = vmatprep.subr.bf16.mxu1 %v10394_v51  ;;  %v10452_v50 = vld [vmem:[%s14425_s1 + $0x1668] ss:$16 sps:$4 sm:$0xff]   ;;  %v10457_v51 = vld [vmem:[%s14425_s1 + $0x144c] ss:$16 sps:$4 sm:$0xff]  }
 0x2eb   :  { %6541 = vmatpush2.bf16.msra.mxu0 %v10389_v35  ;;  %v10460_v35 = vld [vmem:[%s14425_s1 + $0x164c] ss:$16 sps:$4 sm:$0xff]  }
 0x2ec   :  { %6582 = vmatpush2.bf16.msra.mxu1 %v10392_v26  ;;  %6542 = vmatprep.subr.bf16.mxu0 %v10397_v6  ;;  %v10455_v26 = vld [vmem:[%s14425_s1 + $0x1448] ss:$16 sps:$4 sm:$0xff]  }
 0x2ed   :  { %6583 = vmatprep.subr.bf16.mxu1 %v10400_v45  ;;  %v10458_v6 = vld [vmem:[%s14425_s1 + $0x1648] ss:$16 sps:$4 sm:$0xff]   ;;  %v10463_v45 = vld [vmem:[%s14425_s1 + $0x142c] ss:$16 sps:$4 sm:$0xff]  }
 0x2ef   :  { %6543 = vmatpush2.bf16.msra.mxu0 %v10395_v55  ;;  %v10466_v55 = vld [vmem:[%s14425_s1 + $0x162c] ss:$16 sps:$4 sm:$0xff]  }
 0x2f0   :  { %6584 = vmatpush2.bf16.msra.mxu1 %v10398_v63  ;;  %6544 = vmatprep.subr.bf16.mxu0 %v10403_v13  ;;  %v10461_v63 = vld [vmem:[%s14425_s1 + $0x1428] ss:$16 sps:$4 sm:$0xff]  }
 0x2f1   :  { %6585 = vmatprep.subr.bf16.mxu1 %v10406_v58  ;;  %v10464_v13 = vld [vmem:[%s14425_s1 + $0x1628] ss:$16 sps:$4 sm:$0xff]   ;;  %v10469_v58 = vld [vmem:[%s14425_s1 + $0x140c] ss:$16 sps:$4 sm:$0xff]  }
 0x2f3   :  { %6545 = vmatpush2.bf16.msra.mxu0 %v10401_v5  ;;  %v10472_v5 = vld [vmem:[%s14425_s1 + $0x160c] ss:$16 sps:$4 sm:$0xff]  }
 0x2f4   :  { %6586 = vmatpush2.bf16.msra.mxu1 %v10404_v41  ;;  %6546 = vmatprep.subr.bf16.mxu0 %v10409_v42  ;;  %v10467_v41 = vld [vmem:[%s14425_s1 + $0x1408] ss:$16 sps:$4 sm:$0xff]  }
 0x2f5   :  { %6587 = vmatprep.subr.bf16.mxu1 %v10412_v12  ;;  %v10470_v42 = vld [vmem:[%s14425_s1 + $0x1608] ss:$16 sps:$4 sm:$0xff]   ;;  %v10475_v12 = vld [vmem:[%s14425_s1 + $0x15ec] ss:$16 sps:$4 sm:$0xff]  }
 0x2f7   :  { %6547 = vmatpush2.bf16.msra.mxu0 %v10407_v39  ;;  %v10478_v39 = vld [vmem:[%s14425_s1 + $0x17ec] ss:$16 sps:$4 sm:$0xff]  }
 0x2f8   :  { %6588 = vmatpush2.bf16.msra.mxu1 %v10410_v1  ;;  %6548 = vmatprep.subr.bf16.mxu0 %v10415_v52  ;;  %v10473_v1 = vld [vmem:[%s14425_s1 + $0x15e8] ss:$16 sps:$4 sm:$0xff]  }
 0x2f9   :  { %6589 = vmatprep.subr.bf16.mxu1 %v10418_v7  ;;  %v10476_v52 = vld [vmem:[%s14425_s1 + $0x17e8] ss:$16 sps:$4 sm:$0xff]   ;;  %v10481_v7 = vld [vmem:[%s14425_s1 + $0x15cc] ss:$16 sps:$4 sm:$0xff]  }
 0x2fb   :  { %6549 = vmatpush2.bf16.msra.mxu0 %v10413_v60  ;;  %v10484_v60 = vld [vmem:[%s14425_s1 + $0x17cc] ss:$16 sps:$4 sm:$0xff]  }
 0x2fc   :  { %6590 = vmatpush2.bf16.msra.mxu1 %v10416_v2  ;;  %6550 = vmatprep.subr.bf16.mxu0 %v10421_v17  ;;  %v10479_v2 = vld [vmem:[%s14425_s1 + $0x15c8] ss:$16 sps:$4 sm:$0xff]  }
 0x2fd   :  { %6591 = vmatprep.subr.bf16.mxu1 %v10424_v19  ;;  %v10482_v17 = vld [vmem:[%s14425_s1 + $0x17c8] ss:$16 sps:$4 sm:$0xff]   ;;  %v10487_v19 = vld [vmem:[%s14425_s1 + $0x15ac] ss:$16 sps:$4 sm:$0xff]  }
 0x2ff   :  { %6551 = vmatpush2.bf16.msra.mxu0 %v10419_v25  ;;  %v10490_v25 = vld [vmem:[%s14425_s1 + $0x17ac] ss:$16 sps:$4 sm:$0xff]  }
 0x300   :  { %6592 = vmatpush2.bf16.msra.mxu1 %v10422_v23  ;;  %6602 = vmatprep.subr.bf16.mxu0 %v10427_v0  ;;  %v10485_v23 = vld [vmem:[%s14425_s1 + $0x15a8] ss:$16 sps:$4 sm:$0xff]  }
 0x301   :  { %6643 = vmatprep.subr.bf16.mxu1 %v10430_v4  ;;  %v10488_v0 = vld [vmem:[%s14425_s1 + $0x17a8] ss:$16 sps:$4 sm:$0xff]   ;;  %v10493_v4 = vld [vmem:[%s14425_s1 + $0x158c] ss:$16 sps:$4 sm:$0xff]  }
 0x302   :  { %v6308_v27 = vpop.f32.mrf.mxu0  ;;  %6553 = vmatmul.mubr.bf16.vlgmr.msra.gmra.mxu0 %v11986_v3 }
 0x303   :  { %v6349_v29 = vpop.f32.mrf.mxu1  ;;  %6594 = vmatmul.mubr.bf16.vlgmr.msra.gmra.mxu1 %v12011_v14  ;;  %v6309_v34 = vadd.f32 %v6308_v27, %v13267_v18  ;;  %6603 = vmatpush1.bf16.msra.mxu0 %v10425_v9  ;;  %v10437_v14 = vld [vmem:[%s14425_s1 + $0x14a8] ss:$16 sps:$4 sm:$0xff]   ;;  %v10496_v9 = vld [vmem:[%s14425_s1 + $0x178c] ss:$16 sps:$4 sm:$0xff]  }
 0x304   :  { %6644 = vmatpush1.bf16.msra.mxu1 %v10428_v10  ;;  %v6310_v48 = vpop.f32.mrf.mxu0  ;;  %6604 = vmatprep.subr.bf16.mxu0 %v10433_v57  ;;  %v10440_v18 = vld [vmem:[%s14425_s1 + $0x16a8] ss:$16 sps:$4 sm:$0xff]  }
 0x305   :  { %v6351_v54 = vpop.f32.mrf.mxu1  ;;  %6645 = vmatprep.subr.bf16.mxu1 %v10436_v15  ;;  %v13480_v61 = vadd.f32 %v6349_v29, %v6309_v34  ;;  %v6311_v3 = vadd.f32 %v6310_v48, %v13281_v62  ;;  %6634 = vmatprep.mubr.bf16.mxu0 %v12007_v11  ;;  %v10448_v11 = vld [vmem:[%s14425_s1 + $0x168c] ss:$16 sps:$4 sm:$0xff]   ;;  %v10491_v10 = vld [vmem:[%s14425_s1 + $0x1588] ss:$16 sps:$4 sm:$0xff]  }
 0x306   :  { %6675 = vmatprep.mubr.bf16.mxu1 %v12027_v22  ;;  %v6312_v37 = vpop.f32.mrf.mxu0  ;;  %v10443_v22 = vld [vmem:[%s14425_s1 + $0x1488] ss:$16 sps:$4 sm:$0xff]   ;;  %v10499_v15 = vld [vmem:[%s14425_s1 + $0x156c] ss:$16 sps:$4 sm:$0xff]  }
 0x307   :  { %v6353_v40 = vpop.f32.mrf.mxu1  ;;  %v13491_v44 = vadd.f32 %v6351_v54, %v6311_v3  ;;  %6605 = vmatpush1.bf16.msra.mxu0 %v10431_v16  ;;  %v10494_v57 = vld [vmem:[%s14425_s1 + $0x1788] ss:$16 sps:$4 sm:$0xff]   ;;  %v10502_v16 = vld [vmem:[%s14425_s1 + $0x176c] ss:$16 sps:$4 sm:$0xff]  }
 0x308   :  { %6646 = vmatpush1.bf16.msra.mxu1 %v10434_v24  ;;  %v6313_v38 = vpop.f32.mrf.mxu0  ;;  %6606 = vmatprep.subr.bf16.mxu0 %v10439_v33  ;;  %v10497_v24 = vld [vmem:[%s14425_s1 + $0x1568] ss:$16 sps:$4 sm:$0xff]   ;;  %v10505_v29 = vld [vmem:[%s14425_s1 + $0x154c] ss:$16 sps:$4 sm:$0xff]  }
 0x309   :  { %v6354_v62 = vpop.f32.mrf.mxu1  ;;  %6647 = vmatprep.subr.bf16.mxu1 %v10442_v49  ;;  %v10500_v27 = vld [vmem:[%s14425_s1 + $0x1768] ss:$16 sps:$4 sm:$0xff]   ;;  %v10508_v33 = vld [vmem:[%s14425_s1 + $0x174c] ss:$16 sps:$4 sm:$0xff]  }
 0x30a   :  { %v10503_v34 = vld [vmem:[%s14425_s1 + $0x1548] ss:$16 sps:$4 sm:$0xff]   ;;  %v10511_v54 = vld [vmem:[%s14425_s1 + $0x152c] ss:$16 sps:$4 sm:$0xff]  }
 0x30b   :  { %6607 = vmatpush1.bf16.msra.mxu0 %v10437_v14  ;;  %v10506_v48 = vld [vmem:[%s14425_s1 + $0x1748] ss:$16 sps:$4 sm:$0xff]   ;;  %v10514_v49 = vld [vmem:[%s14425_s1 + $0x172c] ss:$16 sps:$4 sm:$0xff]  }
 0x30c   :  { %6648 = vmatpush1.bf16.msra.mxu1 %v10440_v18  ;;  %6608 = vmatprep.subr.bf16.mxu0 %v10445_v46  ;;  %v10509_v3 = vld [vmem:[%s14425_s1 + $0x1528] ss:$16 sps:$4 sm:$0xff]   ;;  %v10517_v18 = vld [vmem:[%s14425_s1 + $0x150c] ss:$16 sps:$4 sm:$0xff]  }
 0x30d   :  { %6649 = vmatprep.subr.bf16.mxu1 %v10448_v11  ;;  %v10512_v14 = vld [vmem:[%s14425_s1 + $0x1728] ss:$16 sps:$4 sm:$0xff]   ;;  %v10520_v37 = vld [vmem:[%s14425_s1 + $0x170c] ss:$16 sps:$4 sm:$0xff]  }
 0x30e   :  { %v10515_v40 = vld [vmem:[%s14425_s1 + $0x1508] ss:$16 sps:$4 sm:$0xff]   ;;  %v10523_v62 = vld [vmem:[%s14425_s1 + $0x18ec] ss:$16 sps:$4 sm:$0xff]  }
 0x30f   :  { %6609 = vmatpush1.bf16.msra.mxu0 %v10443_v22  ;;  %v10518_v38 = vld [vmem:[%s14425_s1 + $0x1708] ss:$16 sps:$4 sm:$0xff]   ;;  %v10526_v46 = vld [vmem:[%s14425_s1 + $0x1aec] ss:$16 sps:$4 sm:$0xff]  }
 0x310   :  { %6650 = vmatpush1.bf16.msra.mxu1 %v10446_v53  ;;  %6610 = vmatprep.subr.bf16.mxu0 %v10451_v59  ;;  %v10521_v11 = vld [vmem:[%s14425_s1 + $0x18e8] ss:$16 sps:$4 sm:$0xff]   ;;  %v10529_v53 = vld [vmem:[%s14425_s1 + $0x18cc] ss:$16 sps:$4 sm:$0xff]  }
 0x311   :  { %6651 = vmatprep.subr.bf16.mxu1 %v10454_v36  ;;  %v10524_v22 = vld [vmem:[%s14425_s1 + $0x1ae8] ss:$16 sps:$4 sm:$0xff]   ;;  %v10532_v59 = vld [vmem:[%s14425_s1 + $0x1acc] ss:$16 sps:$4 sm:$0xff]  }
 0x313   :  { %6611 = vmatpush1.bf16.msra.mxu0 %v10449_v47 }
 0x314   :  { %6652 = vmatpush1.bf16.msra.mxu1 %v10452_v50  ;;  %6612 = vmatprep.subr.bf16.mxu0 %v10457_v51  ;;  %v10527_v51 = vld [vmem:[%s14425_s1 + $0x18c8] ss:$16 sps:$4 sm:$0xff]  }
 0x315   :  { %6653 = vmatprep.subr.bf16.mxu1 %v10460_v35  ;;  %v10530_v35 = vld [vmem:[%s14425_s1 + $0x1ac8] ss:$16 sps:$4 sm:$0xff]  }
 0x317   :  { %6613 = vmatpush1.bf16.msra.mxu0 %v10455_v26 }
 0x318   :  { %6654 = vmatpush1.bf16.msra.mxu1 %v10458_v6  ;;  %6614 = vmatprep.subr.bf16.mxu0 %v10463_v45 }
 0x319   :  { %6655 = vmatprep.subr.bf16.mxu1 %v10466_v55 }
 0x31b   :  { %6615 = vmatpush1.bf16.msra.mxu0 %v10461_v63 }
 0x31c   :  { %6656 = vmatpush1.bf16.msra.mxu1 %v10464_v13  ;;  %6616 = vmatprep.subr.bf16.mxu0 %v10469_v58  ;;  %v10533_v58 = vld [vmem:[%s14425_s1 + $0x18a8] ss:$16 sps:$4 sm:$0xff]  }
 0x31d   :  { %6657 = vmatprep.subr.bf16.mxu1 %v10472_v5  ;;  %v10536_v5 = vld [vmem:[%s14425_s1 + $0x1aa8] ss:$16 sps:$4 sm:$0xff]  }
 0x31f   :  { %6617 = vmatpush1.bf16.msra.mxu0 %v10467_v41 }
 0x320   :  { %6658 = vmatpush1.bf16.msra.mxu1 %v10470_v42  ;;  %6618 = vmatprep.subr.bf16.mxu0 %v10475_v12  ;;  %v10539_v42 = vld [vmem:[%s14425_s1 + $0x1888] ss:$16 sps:$4 sm:$0xff]  }
 0x321   :  { %6659 = vmatprep.subr.bf16.mxu1 %v10478_v39  ;;  %v10542_v12 = vld [vmem:[%s14425_s1 + $0x1a88] ss:$16 sps:$4 sm:$0xff]   ;;  %v10547_v39 = vld [vmem:[%s14425_s1 + $0x186c] ss:$16 sps:$4 sm:$0xff]  }
 0x323   :  { %6619 = vmatpush2.bf16.msra.mxu0 %v10473_v1  ;;  %v10550_v1 = vld [vmem:[%s14425_s1 + $0x1a6c] ss:$16 sps:$4 sm:$0xff]  }
 0x324   :  { %6660 = vmatpush2.bf16.msra.mxu1 %v10476_v52  ;;  %6620 = vmatprep.subr.bf16.mxu0 %v10481_v7  ;;  %v10545_v52 = vld [vmem:[%s14425_s1 + $0x1868] ss:$16 sps:$4 sm:$0xff]  }
 0x325   :  { %6661 = vmatprep.subr.bf16.mxu1 %v10484_v60  ;;  %v10548_v7 = vld [vmem:[%s14425_s1 + $0x1a68] ss:$16 sps:$4 sm:$0xff]   ;;  %v10553_v60 = vld [vmem:[%s14425_s1 + $0x184c] ss:$16 sps:$4 sm:$0xff]  }
 0x327   :  { %6621 = vmatpush2.bf16.msra.mxu0 %v10479_v2  ;;  %v10556_v2 = vld [vmem:[%s14425_s1 + $0x1a4c] ss:$16 sps:$4 sm:$0xff]  }
 0x328   :  { %6662 = vmatpush2.bf16.msra.mxu1 %v10482_v17  ;;  %6622 = vmatprep.subr.bf16.mxu0 %v10487_v19  ;;  %v10551_v17 = vld [vmem:[%s14425_s1 + $0x1848] ss:$16 sps:$4 sm:$0xff]  }
 0x329   :  { %6663 = vmatprep.subr.bf16.mxu1 %v10490_v25  ;;  %v10554_v19 = vld [vmem:[%s14425_s1 + $0x1a48] ss:$16 sps:$4 sm:$0xff]   ;;  %v10559_v25 = vld [vmem:[%s14425_s1 + $0x182c] ss:$16 sps:$4 sm:$0xff]  }
 0x32b   :  { %6623 = vmatpush2.bf16.msra.mxu0 %v10485_v23  ;;  %v10562_v23 = vld [vmem:[%s14425_s1 + $0x1a2c] ss:$16 sps:$4 sm:$0xff]  }
 0x32c   :  { %6664 = vmatpush2.bf16.msra.mxu1 %v10488_v0  ;;  %6624 = vmatprep.subr.bf16.mxu0 %v10493_v4  ;;  %v10557_v0 = vld [vmem:[%s14425_s1 + $0x1828] ss:$16 sps:$4 sm:$0xff]  }
 0x32d   :  { %6665 = vmatprep.subr.bf16.mxu1 %v10496_v9  ;;  %v10560_v4 = vld [vmem:[%s14425_s1 + $0x1a28] ss:$16 sps:$4 sm:$0xff]   ;;  %v10565_v9 = vld [vmem:[%s14425_s1 + $0x180c] ss:$16 sps:$4 sm:$0xff]  }
 0x32f   :  { %6625 = vmatpush2.bf16.msra.mxu0 %v10491_v10  ;;  %v10568_v10 = vld [vmem:[%s14425_s1 + $0x1a0c] ss:$16 sps:$4 sm:$0xff]  }
 0x330   :  { %6666 = vmatpush2.bf16.msra.mxu1 %v10494_v57  ;;  %6626 = vmatprep.subr.bf16.mxu0 %v10499_v15  ;;  %v10563_v57 = vld [vmem:[%s14425_s1 + $0x1808] ss:$16 sps:$4 sm:$0xff]  }
 0x331   :  { %6667 = vmatprep.subr.bf16.mxu1 %v10502_v16  ;;  %v10566_v15 = vld [vmem:[%s14425_s1 + $0x1a08] ss:$16 sps:$4 sm:$0xff]   ;;  %v10571_v16 = vld [vmem:[%s14425_s1 + $0x19ec] ss:$16 sps:$4 sm:$0xff]  }
 0x333   :  { %6627 = vmatpush2.bf16.msra.mxu0 %v10497_v24  ;;  %v10574_v24 = vld [vmem:[%s14425_s1 + $0x1bec] ss:$16 sps:$4 sm:$0xff]  }
 0x334   :  { %6668 = vmatpush2.bf16.msra.mxu1 %v10500_v27  ;;  %6628 = vmatprep.subr.bf16.mxu0 %v10505_v29  ;;  %v10569_v27 = vld [vmem:[%s14425_s1 + $0x19e8] ss:$16 sps:$4 sm:$0xff]  }
 0x335   :  { %6669 = vmatprep.subr.bf16.mxu1 %v10508_v33  ;;  %v10572_v29 = vld [vmem:[%s14425_s1 + $0x1be8] ss:$16 sps:$4 sm:$0xff]   ;;  %v10577_v33 = vld [vmem:[%s14425_s1 + $0x19cc] ss:$16 sps:$4 sm:$0xff]  }
 0x337   :  { %6629 = vmatpush2.bf16.msra.mxu0 %v10503_v34  ;;  %v10580_v34 = vld [vmem:[%s14425_s1 + $0x1bcc] ss:$16 sps:$4 sm:$0xff]  }
 0x338   :  { %6670 = vmatpush2.bf16.msra.mxu1 %v10506_v48  ;;  %6630 = vmatprep.subr.bf16.mxu0 %v10511_v54  ;;  %v10575_v48 = vld [vmem:[%s14425_s1 + $0x19c8] ss:$16 sps:$4 sm:$0xff]  }
 0x339   :  { %6671 = vmatprep.subr.bf16.mxu1 %v10514_v49  ;;  %v10578_v54 = vld [vmem:[%s14425_s1 + $0x1bc8] ss:$16 sps:$4 sm:$0xff]   ;;  %v10583_v49 = vld [vmem:[%s14425_s1 + $0x19ac] ss:$16 sps:$4 sm:$0xff]  }
 0x33b   :  { %6631 = vmatpush2.bf16.msra.mxu0 %v10509_v3  ;;  %v10586_v3 = vld [vmem:[%s14425_s1 + $0x1bac] ss:$16 sps:$4 sm:$0xff]  }
 0x33c   :  { %6672 = vmatpush2.bf16.msra.mxu1 %v10512_v14  ;;  %6632 = vmatprep.subr.bf16.mxu0 %v10517_v18  ;;  %v10581_v14 = vld [vmem:[%s14425_s1 + $0x19a8] ss:$16 sps:$4 sm:$0xff]  }
 0x33d   :  { %6673 = vmatprep.subr.bf16.mxu1 %v10520_v37  ;;  %v10584_v18 = vld [vmem:[%s14425_s1 + $0x1ba8] ss:$16 sps:$4 sm:$0xff]   ;;  %v10589_v37 = vld [vmem:[%s14425_s1 + $0x198c] ss:$16 sps:$4 sm:$0xff]  }
 0x33f   :  { %6633 = vmatpush2.bf16.msra.mxu0 %v10515_v40  ;;  %v10592_v40 = vld [vmem:[%s14425_s1 + $0x1b8c] ss:$16 sps:$4 sm:$0xff]  }
 0x340   :  { %6674 = vmatpush2.bf16.msra.mxu1 %v10518_v38  ;;  %6684 = vmatprep.subr.bf16.mxu0 %v10523_v62  ;;  %v10587_v38 = vld [vmem:[%s14425_s1 + $0x1988] ss:$16 sps:$4 sm:$0xff]  }
 0x341   :  { %6725 = vmatprep.subr.bf16.mxu1 %v10526_v46  ;;  %v10590_v62 = vld [vmem:[%s14425_s1 + $0x1b88] ss:$16 sps:$4 sm:$0xff]   ;;  %v10595_v46 = vld [vmem:[%s14425_s1 + $0x196c] ss:$16 sps:$4 sm:$0xff]  }
 0x342   :  { %v6390_v36 = vpop.f32.mrf.mxu0  ;;  %6635 = vmatmul.mubr.bf16.vlgmr.msra.gmra.mxu0 %v12210_v8  ;;  %v10535_v8 = vld [vmem:[%s14425_s1 + $0x18ac] ss:$16 sps:$4 sm:$0xff]  }
 0x343   :  { %v6431_v47 = vpop.f32.mrf.mxu1  ;;  %6676 = vmatmul.mubr.bf16.vlgmr.msra.gmra.mxu1 %v12235_v21  ;;  %v6391_v50 = vadd.f32 %v6390_v36, %v13480_v61  ;;  %6685 = vmatpush1.bf16.msra.mxu0 %v10521_v11  ;;  %v10538_v21 = vld [vmem:[%s14425_s1 + $0x1aac] ss:$16 sps:$4 sm:$0xff]   ;;  %v13821_v36 = vld [vmem:[%s14428_s2] sm:$0xf] }
 0x344   :  { %6726 = vmatpush1.bf16.msra.mxu1 %v10524_v22  ;;  %v6392_v26 = vpop.f32.mrf.mxu0  ;;  %6686 = vmatprep.subr.bf16.mxu0 %v10529_v53  ;;  %v10598_v11 = vld [vmem:[%s14425_s1 + $0x1b6c] ss:$16 sps:$4 sm:$0xff]   ;;  %v13810_v22 = vsub.s32 1, %v11009_v43  ;;  %v10593_v53 = vld [vmem:[%s14425_s1 + $0x1968] ss:$16 sps:$4 sm:$0xff]  }
 0x345   :  { %v6433_v6 = vpop.f32.mrf.mxu1  ;;  %6727 = vmatprep.subr.bf16.mxu1 %v10532_v59  ;;  %v13682_v61 = vadd.f32 %v6431_v47, %v6391_v50  ;;  %v6393_v45 = vadd.f32 %v6392_v26, %v13491_v44  ;;  %6716 = vmatprep.mubr.bf16.mxu0 %v12231_v20  ;;  %v10541_v20 = vld [vmem:[%s14425_s1 + $0x188c] ss:$16 sps:$4 sm:$0xff]   ;;  %v10596_v59 = vld [vmem:[%s14425_s1 + $0x1b68] ss:$16 sps:$4 sm:$0xff]  }
 0x346   :  { %6757 = vmatprep.mubr.bf16.mxu1 %v12251_v30  ;;  %v6394_v55 = vpop.f32.mrf.mxu0  ;;  %v10544_v30 = vld [vmem:[%s14425_s1 + $0x1a8c] ss:$16 sps:$4 sm:$0xff]   ;;  %v10602_v26 = vld [vmem:[%s14425_s1 + $0x1b48] ss:$16 sps:$4 sm:$0xff]  }
 0x347   :  { %v6435_v63 = vpop.f32.mrf.mxu1  ;;  %v13687_v13 = vadd.f32 %v6433_v6, %v6393_v45  ;;  %6687 = vmatpush1.bf16.msra.mxu0 %v10527_v51  ;;  %v10601_v47 = vld [vmem:[%s14425_s1 + $0x194c] ss:$16 sps:$4 sm:$0xff]   ;;  %v6775_v51 = vrot.slane %v13821_v36, %v13810_v22  ;;  %v13840_v6 = vld [vmem:[%s14429_s3] sm:$0xf] }
 0x348   :  { %6728 = vmatpush1.bf16.msra.mxu1 %v10530_v35  ;;  %v6395_v41 = vpop.f32.mrf.mxu0  ;;  %6688 = vmatprep.subr.bf16.mxu0 %v10535_v8  ;;  %v10604_v50 = vld [vmem:[%s14425_s1 + $0x1b4c] ss:$16 sps:$4 sm:$0xff]   ;;  %v10599_v35 = vld [vmem:[%s14425_s1 + $0x1948] ss:$16 sps:$4 sm:$0xff]   ;;  %v6801_v55 = vrot.slane %v13840_v6, %v13810_v22 }
 0x349   :  { %v6436_v44 = vpop.f32.mrf.mxu1  ;;  %6729 = vmatprep.subr.bf16.mxu1 %v10538_v21  ;;  %v10607_v8 = vld [vmem:[%s14425_s1 + $0x192c] ss:$16 sps:$4 sm:$0xff]   ;;  %v6789_v45 = vmul.f32 %v6775_v51, %v13083_v32  ;;  %v10605_v63 = vld [vmem:[%s14425_s1 + $0x1928] ss:$16 sps:$4 sm:$0xff]   ;;  %v10731_v51 = vld [vmem:[%s14427_s4 + $0x220] ss:$16 sps:$4 sm:$0xff]  }
 0x34a   :  { %v10610_v21 = vld [vmem:[%s14425_s1 + $0x1b2c] ss:$16 sps:$4 sm:$0xff]   ;;  %v10611_v44 = vld [vmem:[%s14425_s1 + $0x1908] ss:$16 sps:$4 sm:$0xff]  }
 0x34b   :  { %6689 = vmatpush1.bf16.msra.mxu0 %v10533_v58  ;;  %v10608_v58 = vld [vmem:[%s14425_s1 + $0x1b28] ss:$16 sps:$4 sm:$0xff]   ;;  %v10616_v32 = vld [vmem:[%s14425_s1 + $0x1b0c] ss:$16 sps:$4 sm:$0xff]   ;;  %v6815_v41 = vadd.f32 %v6801_v55, %v6789_v45  ;;  %v10649_v45 = vld [vmem:[%s14427_s4 + $0x1a4] ss:$16 sps:$4 sm:$0xff]  }
 0x34c   :  { %6730 = vmatpush1.bf16.msra.mxu1 %v10536_v5  ;;  %6690 = vmatprep.subr.bf16.mxu0 %v10541_v20  ;;  %v10613_v5 = vld [vmem:[%s14425_s1 + $0x190c] ss:$16 sps:$4 sm:$0xff]   ;;  %v10614_v20 = vld [vmem:[%s14425_s1 + $0x1b08] ss:$16 sps:$4 sm:$0xff]   ;;  %v10739_v55 = vld [vmem:[%s14427_s4 + $0x3e4] ss:$16 sps:$4 sm:$0xff]  }
 0x34d   :  { %6731 = vmatprep.subr.bf16.mxu1 %v10544_v30  ;;  %v10619_v30 = vld [vmem:[%s14427_s4 + $0xe4] ss:$16 sps:$4 sm:$0xff]  }
 0x34f   :  { %6691 = vmatpush1.bf16.msra.mxu0 %v10539_v42  ;;  %v6819_v42 = vmax.f32 %v6815_v41, 0.0  ;;  %v10650_v41 = vld [vmem:[%s14427_s4 + $0x180] ss:$16 sps:$4 sm:$0xff]  }
 0x350   :  { %6732 = vmatpush1.bf16.msra.mxu1 %v10542_v12  ;;  %6692 = vmatprep.subr.bf16.mxu0 %v10547_v39  ;;  %v10617_v12 = vld [vmem:[%s14427_s4 + $0xe0] ss:$16 sps:$4 sm:$0xff]   ;;  %v10622_v39 = vld [vmem:[%s14427_s4 + $0xc4] ss:$16 sps:$4 sm:$0xff]  }
 0x351   :  { %6733 = vmatprep.subr.bf16.mxu1 %v10550_v1  ;;  %v13878_v1 = vpack.c.bf16 %v6819_v42, %v6819_v42  ;;  %v10745_v42 = vld [vmem:[%s14427_s4 + $0x3a4] ss:$16 sps:$4 sm:$0xff]  }
 0x353   :  { %6693 = vmatpush1.bf16.msra.mxu0 %v10545_v52 }
 0x354   :  { %6734 = vmatpush1.bf16.msra.mxu1 %v10548_v7  ;;  %6694 = vmatprep.subr.bf16.mxu0 %v10553_v60 }
 0x355   :  { %6735 = vmatprep.subr.bf16.mxu1 %v10556_v2  ;;  %v10620_v2 = vld [vmem:[%s14427_s4 + $0xc0] ss:$16 sps:$4 sm:$0xff]  }
 0x357   :  { %6695 = vmatpush1.bf16.msra.mxu0 %v10551_v17 }
 0x358   :  { %6736 = vmatpush1.bf16.msra.mxu1 %v10554_v19  ;;  %6696 = vmatprep.subr.bf16.mxu0 %v10559_v25  ;;  %v10625_v25 = vld [vmem:[%s14427_s4 + $0xa4] ss:$16 sps:$4 sm:$0xff]  }
 0x359   :  { %6737 = vmatprep.subr.bf16.mxu1 %v10562_v23 }
 0x35b   :  { %6697 = vmatpush1.bf16.msra.mxu0 %v10557_v0 }
 0x35c   :  { %6738 = vmatpush1.bf16.msra.mxu1 %v10560_v4  ;;  %6698 = vmatprep.subr.bf16.mxu0 %v10565_v9  ;;  %v10623_v4 = vld [vmem:[%s14427_s4 + $0xa0] ss:$16 sps:$4 sm:$0xff]  }
 0x35d   :  { %6739 = vmatprep.subr.bf16.mxu1 %v10568_v10 }
 0x35f   :  { %6699 = vmatpush1.bf16.msra.mxu0 %v10563_v57  ;;  %v10628_v57 = vld [vmem:[%s14427_s4 + $0x84] ss:$16 sps:$4 sm:$0xff]  }
 0x360   :  { %6740 = vmatpush1.bf16.msra.mxu1 %v10566_v15  ;;  %6700 = vmatprep.subr.bf16.mxu0 %v10571_v16  ;;  %v10715_v15 = vld [vmem:[%s14427_s4 + $0x2e4] ss:$16 sps:$4 sm:$0xff]  }
 0x361   :  { %6741 = vmatprep.subr.bf16.mxu1 %v10574_v24  ;;  %v10718_v16 = vld [vmem:[%s14427_s4 + $0x2c4] ss:$16 sps:$4 sm:$0xff]   ;;  %v10626_v24 = vld [vmem:[%s14427_s4 + $0x80] ss:$16 sps:$4 sm:$0xff]  }
 0x363   :  { %6701 = vmatpush2.bf16.msra.mxu0 %v10569_v27  ;;  %v10716_v27 = vld [vmem:[%s14427_s4 + $0x2c0] ss:$16 sps:$4 sm:$0xff]  }
 0x364   :  { %6742 = vmatpush2.bf16.msra.mxu1 %v10572_v29  ;;  %6702 = vmatprep.subr.bf16.mxu0 %v10577_v33  ;;  %v10631_v29 = vld [vmem:[%s14427_s4 + $0x64] ss:$16 sps:$4 sm:$0xff]  }
 0x365   :  { %6743 = vmatprep.subr.bf16.mxu1 %v10580_v34  ;;  %v10721_v33 = vld [vmem:[%s14427_s4 + $0x2a4] ss:$16 sps:$4 sm:$0xff]   ;;  %v10629_v34 = vld [vmem:[%s14427_s4 + $0x60] ss:$16 sps:$4 sm:$0xff]  }
 0x367   :  { %6703 = vmatpush2.bf16.msra.mxu0 %v10575_v48  ;;  %v10719_v48 = vld [vmem:[%s14427_s4 + $0x2a0] ss:$16 sps:$4 sm:$0xff]  }
 0x368   :  { %6744 = vmatpush2.bf16.msra.mxu1 %v10578_v54  ;;  %6704 = vmatprep.subr.bf16.mxu0 %v10583_v49  ;;  %v10634_v54 = vld [vmem:[%s14427_s4 + $0x44] ss:$16 sps:$4 sm:$0xff]  }
 0x369   :  { %6745 = vmatprep.subr.bf16.mxu1 %v10586_v3  ;;  %v10724_v49 = vld [vmem:[%s14427_s4 + $0x284] ss:$16 sps:$4 sm:$0xff]   ;;  %v10632_v3 = vld [vmem:[%s14427_s4 + $0x40] ss:$16 sps:$4 sm:$0xff]  }
 0x36b   :  { %6705 = vmatpush2.bf16.msra.mxu0 %v10581_v14  ;;  %v10722_v14 = vld [vmem:[%s14427_s4 + $0x280] ss:$16 sps:$4 sm:$0xff]  }
 0x36c   :  { %6746 = vmatpush2.bf16.msra.mxu1 %v10584_v18  ;;  %6706 = vmatprep.subr.bf16.mxu0 %v10589_v37  ;;  %v10637_v18 = vld [vmem:[%s14427_s4 + $0x24] ss:$16 sps:$4 sm:$0xff]  }
 0x36d   :  { %6747 = vmatprep.subr.bf16.mxu1 %v10592_v40  ;;  %v10727_v37 = vld [vmem:[%s14427_s4 + $0x264] ss:$16 sps:$4 sm:$0xff]   ;;  %v10635_v40 = vld [vmem:[%s14427_s4 + $0x20] ss:$16 sps:$4 sm:$0xff]  }
 0x36f   :  { %6707 = vmatpush2.bf16.msra.mxu0 %v10587_v38  ;;  %v10725_v38 = vld [vmem:[%s14427_s4 + $0x260] ss:$16 sps:$4 sm:$0xff]  }
 0x370   :  { %6748 = vmatpush2.bf16.msra.mxu1 %v10590_v62  ;;  %6708 = vmatprep.subr.bf16.mxu0 %v10595_v46  ;;  %v10640_v62 = vld [vmem:[%s14427_s4 + $0x4] ss:$16 sps:$4 sm:$0xff]  }
 0x371   :  { %6749 = vmatprep.subr.bf16.mxu1 %v10598_v11  ;;  %v10730_v46 = vld [vmem:[%s14427_s4 + $0x244] ss:$16 sps:$4 sm:$0xff]   ;;  %v10638_v11 = vld [vmem:[%s14427_s4] ss:$16 sps:$4 sm:$0xff]  }
 0x373   :  { %6709 = vmatpush2.bf16.msra.mxu0 %v10593_v53  ;;  %v10728_v53 = vld [vmem:[%s14427_s4 + $0x240] ss:$16 sps:$4 sm:$0xff]  }
 0x374   :  { %6750 = vmatpush2.bf16.msra.mxu1 %v10596_v59  ;;  %6710 = vmatprep.subr.bf16.mxu0 %v10601_v47  ;;  %v10643_v59 = vld [vmem:[%s14427_s4 + $0x1e4] ss:$16 sps:$4 sm:$0xff]  }
 0x375   :  { %6751 = vmatprep.subr.bf16.mxu1 %v10604_v50  ;;  %v10733_v47 = vld [vmem:[%s14427_s4 + $0x224] ss:$16 sps:$4 sm:$0xff]   ;;  %v10641_v50 = vld [vmem:[%s14427_s4 + $0x1e0] ss:$16 sps:$4 sm:$0xff]  }
 0x377   :  { %6711 = vmatpush2.bf16.msra.mxu0 %v10599_v35  ;;  %v10646_v35 = vld [vmem:[%s14427_s4 + $0x1c4] ss:$16 sps:$4 sm:$0xff]  }
 0x378   :  { %6752 = vmatpush2.bf16.msra.mxu1 %v10602_v26  ;;  %6712 = vmatprep.subr.bf16.mxu0 %v10607_v8  ;;  %v10736_v26 = vld [vmem:[%s14427_s4 + $0x204] ss:$16 sps:$4 sm:$0xff]   ;;  %v10644_v8 = vld [vmem:[%s14427_s4 + $0x1c0] ss:$16 sps:$4 sm:$0xff]  }
 0x379   :  { %6753 = vmatprep.subr.bf16.mxu1 %v10610_v21  ;;  %v10734_v21 = vld [vmem:[%s14427_s4 + $0x200] ss:$16 sps:$4 sm:$0xff]  }
 0x37b   :  { %6713 = vmatpush2.bf16.msra.mxu0 %v10605_v63  ;;  %v10647_v63 = vld [vmem:[%s14427_s4 + $0x1a0] ss:$16 sps:$4 sm:$0xff]  }
 0x37c   :  { %6754 = vmatpush2.bf16.msra.mxu1 %v10608_v58  ;;  %6714 = vmatprep.subr.bf16.mxu0 %v10613_v5  ;;  %v10737_v58 = vld [vmem:[%s14427_s4 + $0x3e0] ss:$16 sps:$4 sm:$0xff]   ;;  %v10652_v5 = vld [vmem:[%s14427_s4 + $0x184] ss:$16 sps:$4 sm:$0xff]  }
 0x37d   :  { %6755 = vmatprep.subr.bf16.mxu1 %v10616_v32  ;;  %v10742_v32 = vld [vmem:[%s14427_s4 + $0x3c4] ss:$16 sps:$4 sm:$0xff]  }
 0x37f   :  { %6715 = vmatpush2.bf16.msra.mxu0 %v10611_v44  ;;  %v10740_v44 = vld [vmem:[%s14427_s4 + $0x3c0] ss:$16 sps:$4 sm:$0xff]  }
 0x380   :  { %6756 = vmatpush2.bf16.msra.mxu1 %v10614_v20  ;;  %7594 = vmatprep.subr.bf16.mxu0 %v10619_v30  ;;  %v14013_v20 = vsub.s32 0, %v11009_v43  ;;  %v10655_v30 = vld [vmem:[%s14427_s4 + $0x164] ss:$16 sps:$4 sm:$0xff]  }
 0x381   :  { %7635 = vmatprep.subr.bf16.mxu1 %v10715_v15  ;;  %v10665_v15 = vld [vmem:[%s14427_s4 + $0xe8] ss:$16 sps:$4 sm:$0xff]  }
 0x382   :  { %v6472_v52 = vpop.f32.mrf.mxu0  ;;  %6717 = vmatmul.mubr.bf16.vlgmr.msra.gmra.mxu0 %v12427_v28 }
 0x383   :  { %v6513_v7 = vpop.f32.mrf.mxu1  ;;  %6758 = vmatmul.mubr.bf16.vlgmr.msra.gmra.mxu1 %v12449_v31  ;;  %v6473_v60 = vadd.f32 %v6472_v52, %v13682_v61  ;;  %7595 = vmatpush1.bf16.msra.mxu0 %v10617_v12  ;;  %v10653_v12 = vld [vmem:[%s14427_s4 + $0x160] ss:$16 sps:$4 sm:$0xff]   ;;  %v6771_v52 = vrot.slane %v13821_v36, %v14013_v20 }
 0x384   :  { %7626 = vmatprep.mubr.bf16.mxu0 %v13878_v1  ;;  %v6474_v17 = vpop.f32.mrf.mxu0  ;;  %7596 = vmatprep.subr.bf16.mxu0 %v10622_v39  ;;  %v10743_v39 = vld [vmem:[%s14427_s4 + $0x3a0] ss:$16 sps:$4 sm:$0xff]  }
 0x385   :  { %v6515_v19 = vpop.f32.mrf.mxu1  ;;  %v13890_v23 = vadd.f32 %v6513_v7, %v6473_v60  ;;  %v6475_v28 = vadd.f32 %v6474_v17, %v13687_v13  ;;  %v10713_v13 = vld [vmem:[%s14427_s4 + $0x2e0] ss:$16 sps:$4 sm:$0xff]   ;;  %v10658_v7 = vld [vmem:[%s14427_s4 + $0x144] ss:$16 sps:$4 sm:$0xff]  }
 0x386   :  { %v6476_v31 = vpop.f32.mrf.mxu0  ;;  %7636 = vmatpush1.bf16.msra.mxu1 %v10713_v13  ;;  %v10748_v60 = vld [vmem:[%s14427_s4 + $0x384] ss:$16 sps:$4 sm:$0xff]   ;;  %v10746_v17 = vld [vmem:[%s14427_s4 + $0x380] ss:$16 sps:$4 sm:$0xff]   ;;  %v10667_v13 = vld [vmem:[%s14427_s4 + $0xec] ss:$16 sps:$4 sm:$0xff]  }
 0x387   :  { %v6517_v61 = vpop.f32.mrf.mxu1  ;;  %v13893_v0 = vadd.f32 %v6515_v19, %v6475_v28  ;;  %7597 = vmatpush1.bf16.msra.mxu0 %v10620_v2  ;;  %7637 = vmatprep.subr.bf16.mxu1 %v10718_v16  ;;  %v10656_v2 = vld [vmem:[%s14427_s4 + $0x140] ss:$16 sps:$4 sm:$0xff]   ;;  %v6788_v19 = vmul.f32 %v6771_v52, %v13078_v56  ;;  %v10661_v28 = vld [vmem:[%s14427_s4 + $0x124] ss:$16 sps:$4 sm:$0xff]   ;;  %v10703_v52 = vld [vmem:[%s14427_s4 + $0x16c] ss:$16 sps:$4 sm:$0xff]  }
 0x388   :  { %v6477_v9 = vpop.f32.mrf.mxu0  ;;  %7598 = vmatprep.subr.bf16.mxu0 %v10625_v25  ;;  %v6797_v25 = vrot.slane %v13840_v6, %v14013_v20  ;;  %v10751_v31 = vld [vmem:[%s14427_s4 + $0x364] ss:$16 sps:$4 sm:$0xff]   ;;  %v10659_v61 = vld [vmem:[%s14427_s4 + $0x120] ss:$16 sps:$4 sm:$0xff]  }
 0x389   :  { %v6518_v10 = vpop.f32.mrf.mxu1  ;;  %v10749_v56 = vld [vmem:[%s14427_s4 + $0x360] ss:$16 sps:$4 sm:$0xff]   ;;  %v10664_v9 = vld [vmem:[%s14427_s4 + $0x104] ss:$16 sps:$4 sm:$0xff]  }
 0x38a   :  { %7638 = vmatpush1.bf16.msra.mxu1 %v10716_v27  ;;  %v10662_v10 = vld [vmem:[%s14427_s4 + $0x100] ss:$16 sps:$4 sm:$0xff]  }
 0x38b   :  { %7599 = vmatpush1.bf16.msra.mxu0 %v10623_v4  ;;  %7639 = vmatprep.subr.bf16.mxu1 %v10721_v33  ;;  %v6814_v4 = vadd.f32 %v6797_v25, %v6788_v19  ;;  %v10707_v19 = vld [vmem:[%s14427_s4 + $0x128] ss:$16 sps:$4 sm:$0xff]   ;;  %v10712_v25 = vld [vmem:[%s14427_s4 + $0x10c] ss:$16 sps:$4 sm:$0xff]  }
 0x38c   :  { %7600 = vmatprep.subr.bf16.mxu0 %v10628_v57 }
 0x38d   :  { %v6818_v57 = vmax.f32 %v6814_v4, 0.0 }
 0x38e   :  { %7640 = vmatpush1.bf16.msra.mxu1 %v10719_v48  ;;  %v10754_v48 = vld [vmem:[%s14427_s4 + $0x344] ss:$16 sps:$4 sm:$0xff]  }
 0x38f   :  { %7601 = vmatpush1.bf16.msra.mxu0 %v10626_v24  ;;  %7641 = vmatprep.subr.bf16.mxu1 %v10724_v49  ;;  %v14068_v16 = vpack.c.bf16 %v6818_v57, %v6818_v57  ;;  %v10670_v24 = vld [vmem:[%s14427_s4 + $0xcc] ss:$16 sps:$4 sm:$0xff]  }
 0x390   :  { %7602 = vmatprep.subr.bf16.mxu0 %v10631_v29 }
 0x392   :  { %7642 = vmatpush1.bf16.msra.mxu1 %v10722_v14 }
 0x393   :  { %7603 = vmatpush1.bf16.msra.mxu0 %v10629_v34  ;;  %7643 = vmatprep.subr.bf16.mxu1 %v10727_v37  ;;  %v10668_v34 = vld [vmem:[%s14427_s4 + $0xc8] ss:$16 sps:$4 sm:$0xff]  }
 0x394   :  { %7604 = vmatprep.subr.bf16.mxu0 %v10634_v54 }
 0x396   :  { %7644 = vmatpush1.bf16.msra.mxu1 %v10725_v38  ;;  %v10671_v38 = vld [vmem:[%s14427_s4 + $0xa8] ss:$16 sps:$4 sm:$0xff]  }
 0x397   :  { %7605 = vmatpush1.bf16.msra.mxu0 %v10632_v3  ;;  %7645 = vmatprep.subr.bf16.mxu1 %v10730_v46  ;;  %v10673_v3 = vld [vmem:[%s14427_s4 + $0xac] ss:$16 sps:$4 sm:$0xff]  }
 0x398   :  { %7606 = vmatprep.subr.bf16.mxu0 %v10637_v18 }
 0x39a   :  { %7646 = vmatpush1.bf16.msra.mxu1 %v10728_v53  ;;  %v10755_v53 = vld [vmem:[%s14427_s4 + $0x320] ss:$16 sps:$4 sm:$0xff]  }
 0x39b   :  { %7607 = vmatpush1.bf16.msra.mxu0 %v10635_v40  ;;  %7647 = vmatprep.subr.bf16.mxu1 %v10733_v47  ;;  %v10760_v47 = vld [vmem:[%s14427_s4 + $0x304] ss:$16 sps:$4 sm:$0xff]  }
 0x39c   :  { %7608 = vmatprep.subr.bf16.mxu0 %v10640_v62  ;;  %v10757_v62 = vld [vmem:[%s14427_s4 + $0x324] ss:$16 sps:$4 sm:$0xff]  }
 0x39e   :  { %7648 = vmatpush1.bf16.msra.mxu1 %v10731_v51  ;;  %v10758_v51 = vld [vmem:[%s14427_s4 + $0x300] ss:$16 sps:$4 sm:$0xff]  }
 0x39f   :  { %7609 = vmatpush1.bf16.msra.mxu0 %v10638_v11  ;;  %7649 = vmatprep.subr.bf16.mxu1 %v10736_v26  ;;  %v10763_v26 = vld [vmem:[%s14427_s4 + $0x2ec] ss:$16 sps:$4 sm:$0xff]  }
 0x3a0   :  { %7610 = vmatprep.subr.bf16.mxu0 %v10643_v59  ;;  %v10674_v59 = vld [vmem:[%s14427_s4 + $0x88] ss:$16 sps:$4 sm:$0xff]  }
 0x3a2   :  { %7650 = vmatpush1.bf16.msra.mxu1 %v10734_v21  ;;  %v10680_v21 = vld [vmem:[%s14427_s4 + $0x48] ss:$16 sps:$4 sm:$0xff]  }
 0x3a3   :  { %7611 = vmatpush2.bf16.msra.mxu0 %v10641_v50  ;;  %7651 = vmatprep.subr.bf16.mxu1 %v10739_v55  ;;  %v10679_v50 = vld [vmem:[%s14427_s4 + $0x6c] ss:$16 sps:$4 sm:$0xff]   ;;  %v10683_v55 = vld [vmem:[%s14427_s4 + $0x28] ss:$16 sps:$4 sm:$0xff]  }
 0x3a4   :  { %7612 = vmatprep.subr.bf16.mxu0 %v10646_v35  ;;  %v10677_v35 = vld [vmem:[%s14427_s4 + $0x68] ss:$16 sps:$4 sm:$0xff]  }
 0x3a6   :  { %7652 = vmatpush2.bf16.msra.mxu1 %v10737_v58  ;;  %v10686_v58 = vld [vmem:[%s14427_s4 + $0x8] ss:$16 sps:$4 sm:$0xff]  }
 0x3a7   :  { %7613 = vmatpush2.bf16.msra.mxu0 %v10644_v8  ;;  %7653 = vmatprep.subr.bf16.mxu1 %v10742_v32  ;;  %v10682_v8 = vld [vmem:[%s14427_s4 + $0x4c] ss:$16 sps:$4 sm:$0xff]   ;;  %v10689_v32 = vld [vmem:[%s14427_s4 + $0x1e8] ss:$16 sps:$4 sm:$0xff]  }
 0x3a8   :  { %7614 = vmatprep.subr.bf16.mxu0 %v10649_v45  ;;  %v10685_v45 = vld [vmem:[%s14427_s4 + $0x2c] ss:$16 sps:$4 sm:$0xff]  }
 0x3aa   :  { %7654 = vmatpush2.bf16.msra.mxu1 %v10740_v44  ;;  %v10692_v44 = vld [vmem:[%s14427_s4 + $0x1c8] ss:$16 sps:$4 sm:$0xff]  }
 0x3ab   :  { %7615 = vmatpush2.bf16.msra.mxu0 %v10647_v63  ;;  %7655 = vmatprep.subr.bf16.mxu1 %v10745_v42  ;;  %v10688_v63 = vld [vmem:[%s14427_s4 + $0xc] ss:$16 sps:$4 sm:$0xff]   ;;  %v10695_v42 = vld [vmem:[%s14427_s4 + $0x1a8] ss:$16 sps:$4 sm:$0xff]  }
 0x3ac   :  { %7616 = vmatprep.subr.bf16.mxu0 %v10652_v5  ;;  %v10691_v5 = vld [vmem:[%s14427_s4 + $0x1ec] ss:$16 sps:$4 sm:$0xff]  }
 0x3ae   :  { %7656 = vmatpush2.bf16.msra.mxu1 %v10743_v39  ;;  %v10698_v39 = vld [vmem:[%s14427_s4 + $0x188] ss:$16 sps:$4 sm:$0xff]  }
 0x3af   :  { %7617 = vmatpush2.bf16.msra.mxu0 %v10650_v41  ;;  %7657 = vmatprep.subr.bf16.mxu1 %v10748_v60  ;;  %v10694_v41 = vld [vmem:[%s14427_s4 + $0x1cc] ss:$16 sps:$4 sm:$0xff]  }
 0x3b0   :  { %7618 = vmatprep.subr.bf16.mxu0 %v10655_v30  ;;  %v10697_v30 = vld [vmem:[%s14427_s4 + $0x1ac] ss:$16 sps:$4 sm:$0xff]  }
 0x3b1   :  { %v10706_v60 = vld [vmem:[%s14427_s4 + $0x14c] ss:$16 sps:$4 sm:$0xff]  }
 0x3b2   :  { %7658 = vmatpush2.bf16.msra.mxu1 %v10746_v17  ;;  %v10709_v17 = vld [vmem:[%s14427_s4 + $0x12c] ss:$16 sps:$4 sm:$0xff]  }
 0x3b3   :  { %7619 = vmatpush2.bf16.msra.mxu0 %v10653_v12  ;;  %7659 = vmatprep.subr.bf16.mxu1 %v10751_v31  ;;  %v10700_v12 = vld [vmem:[%s14427_s4 + $0x18c] ss:$16 sps:$4 sm:$0xff]  }
 0x3b4   :  { %7620 = vmatprep.subr.bf16.mxu0 %v10658_v7  ;;  %v10701_v7 = vld [vmem:[%s14427_s4 + $0x168] ss:$16 sps:$4 sm:$0xff]  }
 0x3b6   :  { %7660 = vmatpush2.bf16.msra.mxu1 %v10749_v56 }
 0x3b7   :  { %7621 = vmatpush2.bf16.msra.mxu0 %v10656_v2  ;;  %7661 = vmatprep.subr.bf16.mxu1 %v10754_v48  ;;  %v10704_v2 = vld [vmem:[%s14427_s4 + $0x148] ss:$16 sps:$4 sm:$0xff]  }
 0x3b8   :  { %7622 = vmatprep.subr.bf16.mxu0 %v10661_v28  ;;  %v10710_v28 = vld [vmem:[%s14427_s4 + $0x108] ss:$16 sps:$4 sm:$0xff]  }
 0x3bb   :  { %7623 = vmatpush2.bf16.msra.mxu0 %v10659_v61 }
 0x3bc   :  { %7624 = vmatprep.subr.bf16.mxu0 %v10664_v9 }
 0x3bf   :  { %7625 = vmatpush2.bf16.msra.mxu0 %v10662_v10 }
 0x3c0   :  { %7676 = vmatprep.subr.bf16.mxu0 %v10667_v13 }
 0x3c2   :  { %v6554_v27 = vpop.f32.mrf.mxu0  ;;  %7627 = vmatmul.mubr.bf16.vlgmr.msra.gmra.mxu0 %v14068_v16 }
 0x3c3   :  { %v6595_v29 = vpop.f32.mrf.mxu1  ;;  %v6555_v33 = vadd.f32 %v6554_v27, %v13890_v23  ;;  %7677 = vmatpush1.bf16.msra.mxu0 %v10665_v15  ;;  %7708 = vmatprep.mubr.bf16.mxu0 %v13878_v1  ;;  %v10752_v23 = vld [vmem:[%s14427_s4 + $0x340] ss:$16 sps:$4 sm:$0xff]  }
 0x3c4   :  { %v6556_v54 = vpop.f32.mrf.mxu0  ;;  %7678 = vmatprep.subr.bf16.mxu0 %v10670_v24  ;;  %7662 = vmatpush2.bf16.msra.mxu1 %v10752_v23 }
 0x3c5   :  { %v6597_v49 = vpop.f32.mrf.mxu1  ;;  %v14088_v1 = vadd.f32 %v6595_v29, %v6555_v33  ;;  %v6557_v14 = vadd.f32 %v6556_v54, %v13893_v0  ;;  %v10676_v0 = vld [vmem:[%s14427_s4 + $0x8c] ss:$16 sps:$4 sm:$0xff]   ;;  %7663 = vmatprep.subr.bf16.mxu1 %v10757_v62  ;;  %v14193_v29 = vsub.s32 2, %v11009_v43  ;;  %v14196_v33 = vsub.s32 3, %v11009_v43 }
 0x3c6   :  { %v6558_v18 = vpop.f32.mrf.mxu0 }
 0x3c7   :  { %v6599_v37 = vpop.f32.mrf.mxu1  ;;  %v14091_v40 = vadd.f32 %v6597_v49, %v6557_v14  ;;  %7679 = vmatpush1.bf16.msra.mxu0 %v10668_v34  ;;  %v6779_v49 = vrot.slane %v13821_v36, %v14193_v29  ;;  %v6805_v14 = vrot.slane %v13840_v6, %v14193_v29 }
 0x3c8   :  { %v6559_v46 = vpop.f32.mrf.mxu0  ;;  %7680 = vmatprep.subr.bf16.mxu0 %v10673_v3  ;;  %7664 = vmatpush2.bf16.msra.mxu1 %v10755_v53  ;;  %v6783_v37 = vrot.slane %v13821_v36, %v14196_v33 }
 0x3c9   :  { %v6600_v11 = vpop.f32.mrf.mxu1  ;;  %7665 = vmatprep.subr.bf16.mxu1 %v10760_v47  ;;  %v6809_v46 = vrot.slane %v13840_v6, %v14196_v33  ;;  %v10809_v47 = vld [vmem:[%s14430_s7 + $0x78] sm:$0xff]   ;;  %v10812_v6 = vld [vmem:[%s14430_s7 + $0x30] sm:$0xff]  }
 0x3cb   :  { %7681 = vmatpush1.bf16.msra.mxu0 %v10671_v38 }
 0x3cc   :  { %7682 = vmatprep.subr.bf16.mxu0 %v10676_v0  ;;  %7666 = vmatpush2.bf16.msra.mxu1 %v10758_v51  ;;  %v10811_v51 = vld [vmem:[%s14430_s7 + $0x70] sm:$0xff]  }
 0x3cd   :  { %7717 = vmatprep.subr.bf16.mxu1 %v10763_v26 }
 0x3cf   :  { %7683 = vmatpush1.bf16.msra.mxu0 %v10674_v59 }
 0x3d0   :  { %7684 = vmatprep.subr.bf16.mxu0 %v10679_v50  ;;  %v10810_v50 = vld [vmem:[%s14430_s7 + $0x38] sm:$0xff]  }
 0x3d3   :  { %7685 = vmatpush1.bf16.msra.mxu0 %v10677_v35 }
 0x3d4   :  { %7686 = vmatprep.subr.bf16.mxu0 %v10682_v8  ;;  %v10813_v8 = vld [vmem:[%s14430_s7 + $0x68] sm:$0xff]  }
 0x3d7   :  { %7687 = vmatpush1.bf16.msra.mxu0 %v10680_v21  ;;  %v10761_v21 = vld [vmem:[%s14427_s4 + $0x2e8] ss:$16 sps:$4 sm:$0xff]  }
 0x3d8   :  { %7688 = vmatprep.subr.bf16.mxu0 %v10685_v45 }
 0x3db   :  { %7689 = vmatpush1.bf16.msra.mxu0 %v10683_v55  ;;  %v10766_v55 = vld [vmem:[%s14427_s4 + $0x2cc] ss:$16 sps:$4 sm:$0xff]  }
 0x3dc   :  { %7690 = vmatprep.subr.bf16.mxu0 %v10688_v63 }
 0x3df   :  { %7691 = vmatpush1.bf16.msra.mxu0 %v10686_v58  ;;  %v10814_v58 = vld [vmem:[%s14430_s7 + $0x28] sm:$0xff]  }
 0x3e0   :  { %7692 = vmatprep.subr.bf16.mxu0 %v10691_v5  ;;  %v10764_v5 = vld [vmem:[%s14427_s4 + $0x2c8] ss:$16 sps:$4 sm:$0xff]  }
 0x3e3   :  { %7693 = vmatpush2.bf16.msra.mxu0 %v10689_v32  ;;  %v10815_v32 = vld [vmem:[%s14430_s7 + $0x60] sm:$0xff]  }
 0x3e4   :  { %7694 = vmatprep.subr.bf16.mxu0 %v10694_v41  ;;  %v10769_v41 = vld [vmem:[%s14427_s4 + $0x2ac] ss:$16 sps:$4 sm:$0xff]  }
 0x3e7   :  { %7695 = vmatpush2.bf16.msra.mxu0 %v10692_v44  ;;  %v10816_v44 = vld [vmem:[%s14430_s7 + $0x20] sm:$0xff]  }
 0x3e8   :  { %7696 = vmatprep.subr.bf16.mxu0 %v10697_v30  ;;  %v10817_v30 = vld [vmem:[%s14430_s7 + $0x58] sm:$0xff]  }
 0x3eb   :  { %7697 = vmatpush2.bf16.msra.mxu0 %v10695_v42  ;;  %v10767_v42 = vld [vmem:[%s14427_s4 + $0x2a8] ss:$16 sps:$4 sm:$0xff]  }
 0x3ec   :  { %7698 = vmatprep.subr.bf16.mxu0 %v10700_v12  ;;  %v10772_v12 = vld [vmem:[%s14427_s4 + $0x28c] ss:$16 sps:$4 sm:$0xff]  }
 0x3ef   :  { %7699 = vmatpush2.bf16.msra.mxu0 %v10698_v39  ;;  %v10818_v39 = vld [vmem:[%s14430_s7 + $0x18] sm:$0xff]  }
 0x3f0   :  { %7700 = vmatprep.subr.bf16.mxu0 %v10703_v52  ;;  %v10770_v52 = vld [vmem:[%s14427_s4 + $0x288] ss:$16 sps:$4 sm:$0xff]  }
 0x3f3   :  { %7701 = vmatpush2.bf16.msra.mxu0 %v10701_v7  ;;  %v10775_v7 = vld [vmem:[%s14427_s4 + $0x26c] ss:$16 sps:$4 sm:$0xff]  }
 0x3f4   :  { %7702 = vmatprep.subr.bf16.mxu0 %v10706_v60  ;;  %v10773_v60 = vld [vmem:[%s14427_s4 + $0x268] ss:$16 sps:$4 sm:$0xff]  }
 0x3f7   :  { %7703 = vmatpush2.bf16.msra.mxu0 %v10704_v2  ;;  %v10778_v2 = vld [vmem:[%s14427_s4 + $0x24c] ss:$16 sps:$4 sm:$0xff]  }
 0x3f8   :  { %7704 = vmatprep.subr.bf16.mxu0 %v10709_v17  ;;  %v10776_v17 = vld [vmem:[%s14427_s4 + $0x248] ss:$16 sps:$4 sm:$0xff]  }
 0x3fb   :  { %7705 = vmatpush2.bf16.msra.mxu0 %v10707_v19  ;;  %v10781_v19 = vld [vmem:[%s14427_s4 + $0x22c] ss:$16 sps:$4 sm:$0xff]  }
 0x3fc   :  { %7706 = vmatprep.subr.bf16.mxu0 %v10712_v25  ;;  %v10779_v25 = vld [vmem:[%s14427_s4 + $0x228] ss:$16 sps:$4 sm:$0xff]  }
 0x3ff   :  { %7707 = vmatpush2.bf16.msra.mxu0 %v10710_v28  ;;  %v10784_v28 = vld [vmem:[%s14427_s4 + $0x20c] ss:$16 sps:$4 sm:$0xff]  }
 0x400   :  { %9225 = vmatprep.subr.bf16.mxu0 %v10809_v47  ;;  %v10829_v47 = vld [vmem:[%s14430_s7 + $0xe8] sm:$0xff]  }
 0x402   :  { %v6636_v31 = vpop.f32.mrf.mxu0  ;;  %7709 = vmatmul.mubr.bf16.vlgmr.msra.gmra.mxu0 %v14068_v16 }
 0x403   :  { %v6677_v61 = vpop.f32.mrf.mxu1  ;;  %v6637_v56 = vadd.f32 %v6636_v31, %v14088_v1  ;;  %9226 = vmatpush3.bf16.msra.mxu0 %v10810_v50  ;;  %v10782_v31 = vld [vmem:[%s14427_s4 + $0x208] ss:$16 sps:$4 sm:$0xff]  }
 0x404   :  { %v6638_v4 = vpop.f32.mrf.mxu0  ;;  %9227 = vmatprep.subr.bf16.mxu0 %v10811_v51  ;;  %v10830_v50 = vld [vmem:[%s14430_s7 + $0xa8] sm:$0xff]   ;;  %v10832_v51 = vld [vmem:[%s14430_s7 + $0xa0] sm:$0xff]  }
 0x405   :  { %v6679_v9 = vpop.f32.mrf.mxu1  ;;  %v6678_v10 = vadd.f32 %v6677_v61, %v6637_v56  ;;  %v6639_v27 = vadd.f32 %v6638_v4, %v14091_v40  ;;  %v10787_v61 = vld [vmem:[%s14427_s4 + $0x3ec] ss:$16 sps:$4 sm:$0xff]   ;;  %v10785_v56 = vld [vmem:[%s14427_s4 + $0x3e8] ss:$16 sps:$4 sm:$0xff]  }
 0x406   :  { %v6640_v57 = vpop.f32.mrf.mxu0  ;;  %v10790_v4 = vld [vmem:[%s14427_s4 + $0x3cc] ss:$16 sps:$4 sm:$0xff]  }
 0x407   :  { %v6681_v13 = vpop.f32.mrf.mxu1  ;;  %v6680_v16 = vadd.f32 %v6679_v9, %v6639_v27  ;;  %9228 = vmatpush3.bf16.msra.mxu0 %v10812_v6  ;;  %v10788_v9 = vld [vmem:[%s14427_s4 + $0x3c8] ss:$16 sps:$4 sm:$0xff]  }
 0x408   :  { %v6641_v15 = vpop.f32.mrf.mxu0  ;;  %9229 = vmatprep.subr.bf16.mxu0 %v10813_v8  ;;  %v10791_v57 = vld [vmem:[%s14427_s4 + $0x3a8] ss:$16 sps:$4 sm:$0xff]   ;;  %v10796_v13 = vld [vmem:[%s14427_s4 + $0x38c] ss:$16 sps:$4 sm:$0xff]  }
 0x409   :  { %v6682_v24 = vpop.f32.mrf.mxu1  ;;  %v10794_v15 = vld [vmem:[%s14427_s4 + $0x388] ss:$16 sps:$4 sm:$0xff]  }
 0x40a   :  { %v10799_v24 = vld [vmem:[%s14427_s4 + $0x36c] ss:$16 sps:$4 sm:$0xff]   ;;  %v10797_v27 = vld [vmem:[%s14427_s4 + $0x368] ss:$16 sps:$4 sm:$0xff]  }
 0x40b   :  { %9230 = vmatpush3.bf16.msra.mxu0 %v10814_v58  ;;  %v10834_v6 = vld [vmem:[%s14430_s7 + $0x98] sm:$0xff]   ;;  %v10837_v58 = vld [vmem:[%s14430_s7 + $0xc8] sm:$0xff]  }
 0x40c   :  { %9231 = vmatprep.subr.bf16.mxu0 %v10815_v32  ;;  %v10839_v32 = vld [vmem:[%s14430_s7 + $0xc0] sm:$0xff]  }
 0x40f   :  { %9232 = vmatpush3.bf16.msra.mxu0 %v10816_v44  ;;  %v7758_v44 = vld [vmem:[%s14431_s5] sm:$0xf] }
 0x410   :  { %9233 = vmatprep.subr.bf16.mxu0 %v10817_v30  ;;  %v7784_v30 = vld [vmem:[%s14432_s6] sm:$0xf] }
 0x413   :  { %9234 = vmatpush3.bf16.msra.mxu0 %v10818_v39 }
 0x442   :  { %v6718_v34 = vpop.f32.mrf.mxu0 }
 0x443   :  { %v6759_v48 = vpop.f32.mrf.mxu1  ;;  %v6719_v54 = vadd.f32 %v6718_v34, %v6678_v10  ;;  %v10793_v10 = vld [vmem:[%s14427_s4 + $0x3ac] ss:$16 sps:$4 sm:$0xff]  }
 0x444   :  { %v6720_v3 = vpop.f32.mrf.mxu0  ;;  %v10802_v34 = vld [vmem:[%s14427_s4 + $0x34c] ss:$16 sps:$4 sm:$0xff]  }
 0x445   :  { %v6761_v23 = vpop.f32.mrf.mxu1  ;;  %v6760_v1 = vadd.f32 %v6759_v48, %v6719_v54  ;;  %v6721_v18 = vadd.f32 %v6720_v3, %v6680_v16  ;;  %v10800_v16 = vld [vmem:[%s14427_s4 + $0x348] ss:$16 sps:$4 sm:$0xff]  }
 0x446   :  { %v6722_v40 = vpop.f32.mrf.mxu0 }
 0x447   :  { %v6763_v43 = vpop.f32.mrf.mxu1  ;;  %v6790_v38 = vmul.f32 %v6779_v49, %v6760_v1  ;;  %v6762_v62 = vadd.f32 %v6761_v23, %v6721_v18  ;;  %v10805_v49 = vld [vmem:[%s14427_s4 + $0x32c] ss:$16 sps:$4 sm:$0xff]   ;;  %v10803_v23 = vld [vmem:[%s14427_s4 + $0x328] ss:$16 sps:$4 sm:$0xff]   ;;  %v10820_v40 = vld [vmem:[%s14430_s7 + $0x10] sm:$0xff]  }
 0x448   :  { %v6723_v11 = vpop.f32.mrf.mxu0  ;;  %v10806_v18 = vld [vmem:[%s14427_s4 + $0x308] ss:$16 sps:$4 sm:$0xff]  }
 0x449   :  { %v6764_v0 = vpop.f32.mrf.mxu1  ;;  %v6816_v53 = vadd.f32 %v6805_v14, %v6790_v38  ;;  %v6791_v59 = vmul.f32 %v6783_v37, %v6762_v62  ;;  %v10808_v14 = vld [vmem:[%s14427_s4 + $0x30c] ss:$16 sps:$4 sm:$0xff]   ;;  %v10819_v37 = vld [vmem:[%s14430_s7 + $0x50] sm:$0xff]   ;;  %v10823_v62 = vld [vmem:[%s14430_s7 + $0x40] sm:$0xff]  }
 0x44a   :  { %9235 = vmatprep.subr.bf16.mxu0 %v10819_v37  ;;  %v10821_v43 = vld [vmem:[%s14430_s7 + $0x48] sm:$0xff]   ;;  %v10825_v11 = vld [vmem:[%s14430_s7 + $0xf8] sm:$0xff]  }
 0x44b   :  { %v6817_v36 = vadd.f32 %v6809_v46, %v6791_v59  ;;  %v6820_v35 = vmax.f32 %v6816_v53, 0.0  ;;  %9236 = vmatpush3.bf16.msra.mxu0 %v10820_v40  ;;  %v10822_v38 = vld [vmem:[%s14430_s7 + $0x8] sm:$0xff]   ;;  %v10824_v46 = vld [vmem:[%s14430_s7] sm:$0xff]   ;;  %v10826_v0 = vld [vmem:[%s14430_s7 + $0xb8] sm:$0xff]   ;;  %v14_v40 = vstv %s14433_s8 }
 0x44c   :  { %9237 = vmatprep.subr.bf16.mxu0 %v10821_v43  ;;  %v10827_v53 = vld [vmem:[%s14430_s7 + $0xf0] sm:$0xff]   ;;  %15 = vst [vmem:[#allocation2] sm:$0x1] %v14_v40 }
 0x44d   :  { %v6821_v26 = vmax.f32 %v6817_v36, 0.0  ;;  %v14227_v63 = vpack.c.bf16 %v6820_v35, %v6820_v35  ;;  %v10828_v59 = vld [vmem:[%s14430_s7 + $0xb0] sm:$0xff]   ;;  %v10831_v36 = vld [vmem:[%s14430_s7 + $0xe0] sm:$0xff]   ;;  %v10833_v35 = vld [vmem:[%s14430_s7 + $0xd8] sm:$0xff]  }
 0x44f   :  { %v6825_v45 = vpack.c.bf16 %v6821_v26, %v6821_v26  ;;  %9238 = vmatpush3.bf16.msra.mxu0 %v10822_v38 }
 0x450   :  { %9239 = vmatprep.subr.bf16.mxu0 %v10823_v62 }
 0x451   :  { %7667 = vmatprep.mubr.bf16.mxu1 %v6825_v45 }
 0x452   :  { %7668 = vmatmul.mubr.bf16.vlgmr.msra.gmra.mxu1 %v14227_v63 }
 0x453   :  { %7718 = vmatpush1.bf16.msra.mxu1 %v10761_v21  ;;  %7749 = vmatprep.mubr.bf16.mxu1 %v6825_v45 }
 0x454   :  { %7719 = vmatprep.subr.bf16.mxu1 %v10766_v55  ;;  %9240 = vmatpush3.bf16.msra.mxu0 %v10824_v46  ;;  %v10835_v55 = vld [vmem:[%s14430_s7 + $0xd0] sm:$0xff]  }
 0x457   :  { %7720 = vmatpush1.bf16.msra.mxu1 %v10764_v5  ;;  %v10838_v5 = vld [vmem:[%s14430_s7 + $0x88] sm:$0xff]  }
 0x458   :  { %7721 = vmatprep.subr.bf16.mxu1 %v10769_v41  ;;  %v10840_v41 = vld [vmem:[%s14430_s7 + $0x80] sm:$0xff]  }
 0x45b   :  { %7722 = vmatpush1.bf16.msra.mxu1 %v10767_v42  ;;  %v7763_v42 = vrot.slane %v7758_v44, %v14013_v20 }
 0x45c   :  { %7723 = vmatprep.subr.bf16.mxu1 %v10772_v12 }
 0x45f   :  { %7724 = vmatpush1.bf16.msra.mxu1 %v10770_v52  ;;  %v7789_v52 = vrot.slane %v7784_v30, %v14013_v20  ;;  %v7771_v20 = vrot.slane %v7758_v44, %v14193_v29 }
 0x460   :  { %7725 = vmatprep.subr.bf16.mxu1 %v10775_v7  ;;  %v7767_v7 = vrot.slane %v7758_v44, %v13810_v22 }
 0x463   :  { %7726 = vmatpush1.bf16.msra.mxu1 %v10773_v60 }
 0x464   :  { %7727 = vmatprep.subr.bf16.mxu1 %v10778_v2 }
 0x467   :  { %7728 = vmatpush1.bf16.msra.mxu1 %v10776_v17 }
 0x468   :  { %7729 = vmatprep.subr.bf16.mxu1 %v10781_v19  ;;  %v7793_v19 = vrot.slane %v7784_v30, %v13810_v22 }
 0x46b   :  { %7730 = vmatpush1.bf16.msra.mxu1 %v10779_v25 }
 0x46c   :  { %7731 = vmatprep.subr.bf16.mxu1 %v10784_v28 }
 0x46f   :  { %7732 = vmatpush1.bf16.msra.mxu1 %v10782_v31 }
 0x470   :  { %7733 = vmatprep.subr.bf16.mxu1 %v10787_v61 }
 0x473   :  { %7734 = vmatpush2.bf16.msra.mxu1 %v10785_v56 }
 0x474   :  { %7735 = vmatprep.subr.bf16.mxu1 %v10790_v4 }
 0x477   :  { %7736 = vmatpush2.bf16.msra.mxu1 %v10788_v9 }
 0x478   :  { %7737 = vmatprep.subr.bf16.mxu1 %v10793_v10 }
 0x47b   :  { %7738 = vmatpush2.bf16.msra.mxu1 %v10791_v57 }
 0x47c   :  { %7739 = vmatprep.subr.bf16.mxu1 %v10796_v13 }
 0x47f   :  { %7740 = vmatpush2.bf16.msra.mxu1 %v10794_v15 }
 0x480   :  { %7741 = vmatprep.subr.bf16.mxu1 %v10799_v24  ;;  %v7797_v24 = vrot.slane %v7784_v30, %v14193_v29 }
 0x482   :  { %v14317_v48 = vpop.f32.mrf.mxu0 }
 0x483   :  { %7742 = vmatpush2.bf16.msra.mxu1 %v10797_v27  ;;  %v7775_v27 = vrot.slane %v7758_v44, %v14196_v33 }
 0x484   :  { %v14322_v54 = vpop.f32.mrf.mxu0  ;;  %7743 = vmatprep.subr.bf16.mxu1 %v10802_v34 }
 0x486   :  { %v7632_v3 = vpop.f32.mrf.mxu0 }
 0x487   :  { %7744 = vmatpush2.bf16.msra.mxu1 %v10800_v16  ;;  %v7801_v16 = vrot.slane %v7784_v30, %v14196_v33 }
 0x488   :  { %v7633_v1 = vpop.f32.mrf.mxu0  ;;  %7745 = vmatprep.subr.bf16.mxu1 %v10805_v49 }
 0x48b   :  { %7746 = vmatpush2.bf16.msra.mxu1 %v10803_v23 }
 0x48c   :  { %7747 = vmatprep.subr.bf16.mxu1 %v10808_v14 }
 0x48f   :  { %7748 = vmatpush2.bf16.msra.mxu1 %v10806_v18 }
 0x490   :  { %9247 = vmatprep.subr.bf16.mxu1 %v10825_v11  ;;  %v9192_v11 = vld [vmem:[#allocation2] ss:$0 sm:$0xff] }
 0x492   :  { %7750 = vmatmul.mubr.bf16.vlgmr.msra.gmra.mxu1 %v14227_v63  ;;  %v10836_v63 = vld [vmem:[%s14430_s7 + $0x90] sm:$0xff]  }
 0x493   :  { %9248 = vmatpush3.bf16.msra.mxu1 %v10826_v0 }
 0x494   :  { %9249 = vmatprep.subr.bf16.mxu1 %v10827_v53 }
 0x497   :  { %9250 = vmatpush3.bf16.msra.mxu1 %v10828_v59 }
 0x498   :  { %9251 = vmatprep.subr.bf16.mxu1 %v10829_v47 }
 0x49b   :  { %9252 = vmatpush3.bf16.msra.mxu1 %v10830_v50 }
 0x49c   :  { %9253 = vmatprep.subr.bf16.mxu1 %v10831_v36 }
 0x49f   :  { %9254 = vmatpush3.bf16.msra.mxu1 %v10832_v51 }
 0x4a0   :  { %9255 = vmatprep.subr.bf16.mxu1 %v10833_v35 }
 0x4a3   :  { %9256 = vmatpush3.bf16.msra.mxu1 %v10834_v6 }
 0x4a4   :  { %9257 = vmatprep.subr.bf16.mxu1 %v10835_v55 }
 0x4a7   :  { %9258 = vmatpush3.bf16.msra.mxu1 %v10836_v63 }
 0x4a8   :  { %9259 = vmatprep.subr.bf16.mxu1 %v10837_v58 }
 0x4ab   :  { %9260 = vmatpush3.bf16.msra.mxu1 %v10838_v5 }
 0x4ac   :  { %9261 = vmatprep.subr.bf16.mxu1 %v10839_v32 }
 0x4af   :  { %9262 = vmatpush3.bf16.msra.mxu1 %v10840_v41 }
 0x4c2   :  { %v7710_v26 = vpop.f32.mrf.mxu0 }
 0x4c4   :  { %v7712_v8 = vpop.f32.mrf.mxu0 }
 0x4c6   :  { %v7714_v21 = vpop.f32.mrf.mxu0 }
 0x4c8   :  { %v7715_v45 = vpop.f32.mrf.mxu0 }
 0x512   :  { %v7669_v12 = vpop.f32.mrf.mxu1 }
 0x513   :  { %v7670_v39 = vadd.f32 %v7669_v12, %v14317_v48 }
 0x514   :  { %v7671_v60 = vpop.f32.mrf.mxu1 }
 0x515   :  { %v7780_v2 = vmul.f32 %v7763_v42, %v7670_v39  ;;  %v7672_v17 = vadd.f32 %v7671_v60, %v14322_v54 }
 0x516   :  { %v7673_v25 = vpop.f32.mrf.mxu1 }
 0x517   :  { %v7806_v28 = vadd.f32 %v7789_v52, %v7780_v2  ;;  %v7781_v31 = vmul.f32 %v7767_v7, %v7672_v17 }
 0x518   :  { %v7674_v61 = vpop.f32.mrf.mxu1 }
 0x519   :  { %v7807_v56 = vadd.f32 %v7793_v19, %v7781_v31  ;;  %v7810_v4 = vmax.f32 %v7806_v28, 0.0 }
 0x51b   :  { %v7811_v9 = vmax.f32 %v7807_v56, 0.0  ;;  %v7814_v57 = vpack.c.bf16 %v7810_v4, %v7810_v4 }
 0x51d   :  { %v7815_v10 = vpack.c.bf16 %v7811_v9, %v7811_v9 }
 0x51f   :  { %8113 = vmatprep.mubr.bf16.mxu0 %v7815_v10 }
 0x520   :  { %8114 = vmatmul.mubr.bf16.vlgmr.msra.gmra.mxu0 %v7814_v57 }
 0x552   :  { %v7751_v13 = vpop.f32.mrf.mxu1 }
 0x553   :  { %v7752_v15 = vadd.f32 %v7751_v13, %v7710_v26 }
 0x554   :  { %v7753_v22 = vpop.f32.mrf.mxu1 }
 0x555   :  { %v7782_v34 = vmul.f32 %v7771_v20, %v7752_v15  ;;  %v7754_v48 = vadd.f32 %v7753_v22, %v7712_v8 }
 0x556   :  { %v7755_v54 = vpop.f32.mrf.mxu1 }
 0x557   :  { %v7808_v49 = vadd.f32 %v7797_v24, %v7782_v34  ;;  %v7783_v3 = vmul.f32 %v7775_v27, %v7754_v48 }
 0x558   :  { %v7756_v23 = vpop.f32.mrf.mxu1 }
 0x559   :  { %v7809_v1 = vadd.f32 %v7801_v16, %v7783_v3  ;;  %v7812_v14 = vmax.f32 %v7808_v49, 0.0 }
 0x55b   :  { %v7813_v18 = vmax.f32 %v7809_v1, 0.0  ;;  %v7816_v29 = vpack.c.bf16 %v7812_v14, %v7812_v14 }
 0x55d   :  { %v7817_v37 = vpack.c.bf16 %v7813_v18, %v7813_v18 }
 0x55f   :  { %8153 = vmatprep.mubr.bf16.mxu1 %v7817_v37 }
 0x560   :  { %8154 = vmatmul.mubr.bf16.vlgmr.msra.gmra.mxu1 %v7816_v29 }
 0x5e0   :  { %v9241_v43 = vpop.f32.mrf.mxu0 }
 0x5e2   :  { %v9242_v38 = vpop.f32.mrf.mxu0 }
 0x5e3   :  { %v9243_v46 = vadd.f32 %v9242_v38, %v9241_v43 }
 0x5e4   :  { %v9244_v62 = vpop.f32.mrf.mxu0 }
 0x5e5   :  { %v8116_v59 = vadd.f32 %v9243_v46, %v9192_v11 }
 0x5e6   :  { %v9245_v33 = vpop.f32.mrf.mxu0 }
 0x620   :  { %v9263_v0 = vpop.f32.mrf.mxu1 }
 0x622   :  { %v9264_v53 = vpop.f32.mrf.mxu1 }
 0x623   :  { %v9265_v47 = vadd.f32 %v9264_v53, %v9263_v0 }
 0x624   :  { %v9266_v50 = vpop.f32.mrf.mxu1 }
 0x625   :  { %v8156_v36 = vadd.f32 %v9265_v47, %v8116_v59 }
 0x626   :  { %v9267_v51 = vpop.f32.mrf.mxu1 }
 0x627   :  { %8162 = vst.msk [vmem:[%s14434_s9] sm:$0x3] %vm8161_vm0, %v8156_v36 }

</bundles_post_ra>
